<compile_context>
chip_gen: v5e
topology: v5e:2x2
jax: 0.10.0
libtpu: 0.0.40
codegen_flags: <defaults>
</compile_context>

<pallas_src>
from functools import partial

import jax
import jax.numpy as jnp
from jax.experimental import pallas as pl
from jax.experimental.pallas import tpu as pltpu


# ---------------------------------------------------------------------------
# in-kernel helpers (traced inside the Pallas kernel)
# ---------------------------------------------------------------------------
def _silu(v):
    return v * jax.nn.sigmoid(v)


def _group_norm(h, gamma, beta, gavg_ref, cpg, N, eps):
    """GroupNorm on channels-major data.

    h     : [C, N] f32   (N = flattened spatial of ONE image)
    gamma : [C, 1], beta : [C, 1]
    gavg_ref : group-averaging matrix ref (only used when cpg > 1)
    """
    s1 = jnp.sum(h, axis=1, keepdims=True)           # [C, 1]
    s2 = jnp.sum(h * h, axis=1, keepdims=True)       # [C, 1]
    if cpg == 1:
        # each channel is its own group -> group mean == channel mean
        mean = s1 * (1.0 / N)
        meansq = s2 * (1.0 / N)
    else:
        stats = jnp.dot(gavg_ref[...], jnp.concatenate([s1, s2], axis=1),
                        preferred_element_type=jnp.float32)   # [C, 2]
        mean = stats[:, 0:1]
        meansq = stats[:, 1:2]
    var = jnp.maximum(meansq - mean * mean, 0.0)      # clamp for stability
    inv = jax.lax.rsqrt(var + eps)
    return (h - mean) * inv * gamma + beta


def _fill_tap_slab(slab_ref, h, mask_ref, b, C, N, W):
    """Write the 9 rolled+masked tap views of h into the bf16 im2col slab.

    slab_ref : [9*C, bb*N] bf16 scratch
    h        : [C, N] f32 (normalized + activated input of this conv,
               one batch element)
    mask_ref : [9, 1, N] f32 validity masks (precomputed in the wrapper)
    """
    for dy in (-1, 0, 1):
        for dx in (-1, 0, 1):
            t = (dy + 1) * 3 + (dx + 1)
            s = dy * W + dx                  # flat offset of the source pixel
            if s == 0:
                v = h
            else:
                # v[:, n] = h[:, n + s], out-of-image lanes zeroed by the mask
                v = pltpu.roll(h, (-s) % N, axis=1) * mask_ref[t]
            slab_ref[t * C:(t + 1) * C, b * N:(b + 1) * N] = v.astype(jnp.bfloat16)


# ---------------------------------------------------------------------------
# Pallas kernel: `bb` batch elements per grid step, one matmul per conv
# ---------------------------------------------------------------------------
def resblock_kernel(x_ref, emb_ref, mask_ref,
                    gn1w_ref, gn1b_ref, w1_ref, b1_ref,
                    wemb_ref, bemb_ref,
                    gn2w_ref, gn2b_ref, w2_ref, b2_ref,
                    gavg1_ref, gavg2_ref,
                    out_ref, slab_ref,
                    *, H, W, bb, C, Cout, cpg, eps):
    """
    x_ref    : [bb, C, N]      flattened-spatial inputs of this block
    emb_ref  : [bb, 1, E]      timestep embeddings of this block
    mask_ref : [9, 1, N]       per-tap validity masks (0/1, f32)
    gn*_ref  : [C, 1]          GroupNorm affine params
    w1_ref   : [Cout, 9*C]     in_layers conv taps (bf16),  b1_ref: [Cout, 1]
    wemb_ref : [Cout, E]       emb_layers linear,           bemb_ref: [Cout, 1]
    w2_ref   : [Cout, 9*Cout]  out_layers conv taps (bf16), b2_ref: [Cout, 1]
    gavg*    : group-averaging matrices (only used when cpg > 1)
    out_ref  : [bb, Cout, N]
    slab_ref : [9*C, bb*N] bf16 im2col scratch (reused by both convs, C==Cout)
    """
    N = H * W

    # ---- in_layers: GroupNorm -> SiLU -> im2col slab (per batch element) ----
    for b in range(bb):
        hb = _group_norm(x_ref[b], gn1w_ref[...], gn1b_ref[...],
                         gavg1_ref, cpg, N, eps)
        hb = _silu(hb)
        _fill_tap_slab(slab_ref, hb, mask_ref, b, C, N, W)

    # conv1: single bf16 matmul [Cout, 9C] x [9C, bb*N], f32 accumulation
    h1 = jnp.dot(w1_ref[...], slab_ref[...],
                 preferred_element_type=jnp.float32) + b1_ref[...]

    # ---- + emb, out_layers: GroupNorm -> SiLU -> Dropout(identity) -> slab ----
    for b in range(bb):
        e = _silu(emb_ref[b])                                     # [1, E]
        emb_out = jnp.sum(wemb_ref[...] * e, axis=1, keepdims=True) + bemb_ref[...]
        hb = h1[:, b * N:(b + 1) * N] + emb_out                   # [Cout, N]
        hb = _group_norm(hb, gn2w_ref[...], gn2b_ref[...],
                         gavg2_ref, cpg, N, eps)
        hb = _silu(hb)
        _fill_tap_slab(slab_ref, hb, mask_ref, b, Cout, N, W)

    # conv2: single bf16 matmul
    h2 = jnp.dot(w2_ref[...], slab_ref[...],
                 preferred_element_type=jnp.float32) + b2_ref[...]

    # ---- identity skip connection (out_channels == channels) ----
    # Re-read x from the ref here (short live ranges, no 8+ vregs pinned).
    for b in range(bb):
        out_ref[b] = (x_ref[b] + h2[:, b * N:(b + 1) * N]).astype(out_ref.dtype)


# ---------------------------------------------------------------------------
# wrapper
# ---------------------------------------------------------------------------
def resblock_forward(x, emb, params, *, num_groups=32, eps=1e-5, batch_block=None):
    """x: [B, C, H, W], emb: [B, E]. Returns [B, Cout, H, W]."""
    B, C, H, W = x.shape
    N = H * W
    E = emb.shape[1]
    Cout = params["conv1_w"].shape[0]
    assert Cout == C, "only the identity skip-connection path is implemented"
    assert C % num_groups == 0
    cpg = C // num_groups

    if batch_block is None:
        # Keep >= 2 grid steps when possible so both v7x TensorCores get work
        # (batch axis is "parallel"); on single-TC chips (v5e/v6e) pass
        # batch_block=B to fold the entire batch into one wide-lane step.
        batch_block = B // 2 if (B % 2 == 0 and B > 1) else 1
    bb = batch_block
    assert B % bb == 0
    grid = (B // bb,)

    f32, bf16 = jnp.float32, jnp.bfloat16
    x_flat = x.reshape(B, C, N).astype(f32)                  # [B, C, N]
    emb3 = emb.reshape(B, 1, E).astype(f32)                  # [B, 1, E]

    def col(v):                                              # [K] -> [K, 1]
        return v.reshape(-1, 1).astype(f32)

    def conv_w2d(w):                                         # [O,I,3,3] -> [O, 9*I]
        O, I = w.shape[0], w.shape[1]
        # column index = t*I + i with t = (ky)*3 + kx, matching the slab layout
        return jnp.transpose(w, (0, 2, 3, 1)).reshape(O, 9 * I).astype(bf16)

    def group_avg(ch):
        idx = jnp.arange(ch)
        same = (idx[:, None] // cpg) == (idx[None, :] // cpg)
        return same.astype(f32) / float(cpg * N)

    # per-tap validity masks (constants of H, W only)
    pos = jnp.arange(N)
    yy, xx = pos // W, pos % W
    masks = []
    for dy in (-1, 0, 1):
        for dx in (-1, 0, 1):
            valid = ((yy + dy >= 0) & (yy + dy < H) &
                     (xx + dx >= 0) & (xx + dx < W))
            masks.append(valid.astype(f32))
    mask_arr = jnp.stack(masks).reshape(9, 1, N)

    w1, b1 = conv_w2d(params["conv1_w"]), col(params["conv1_b"])
    w2, b2 = conv_w2d(params["conv2_w"]), col(params["conv2_b"])
    gn1w, gn1b = col(params["gn1_w"]), col(params["gn1_b"])
    gn2w, gn2b = col(params["gn2_w"]), col(params["gn2_b"])
    wemb, bemb = params["emb_w"].astype(f32), col(params["emb_b"])
    gavg1, gavg2 = group_avg(C), group_avg(Cout)

    kernel = partial(resblock_kernel, H=H, W=W, bb=bb, C=C, Cout=Cout,
                     cpg=cpg, eps=eps)

    full2 = lambda g: (0, 0)
    full3 = lambda g: (0, 0, 0)
    batched = lambda g: (g, 0, 0)

    flops = int(B * (2 * Cout * 9 * C * N + 2 * Cout * 9 * Cout * N
                     + 2 * Cout * E + 12 * (C + Cout) * N))
    transcendentals = int(B * (C * N + Cout * N + E))
    bytes_accessed = int(4 * B * (2 * C * N + Cout * N + E)
                         + 2 * 9 * Cout * (C + Cout) + 4 * Cout * E
                         + 4 * (C * C + Cout * Cout + 4 * C + 5 * Cout)
                         + 4 * 9 * N)

    out = pl.pallas_call(
        kernel,
        out_shape=jax.ShapeDtypeStruct((B, Cout, N), f32),
        grid=grid,
        in_specs=[
            pl.BlockSpec((bb, C, N), batched),               # x
            pl.BlockSpec((bb, 1, E), batched),               # emb
            pl.BlockSpec((9, 1, N), full3),                  # tap masks
            pl.BlockSpec((C, 1), full2),                     # gn1 weight
            pl.BlockSpec((C, 1), full2),                     # gn1 bias
            pl.BlockSpec((Cout, 9 * C), full2),              # conv1 taps (bf16)
            pl.BlockSpec((Cout, 1), full2),                  # conv1 bias
            pl.BlockSpec((Cout, E), full2),                  # emb linear weight
            pl.BlockSpec((Cout, 1), full2),                  # emb linear bias
            pl.BlockSpec((Cout, 1), full2),                  # gn2 weight
            pl.BlockSpec((Cout, 1), full2),                  # gn2 bias
            pl.BlockSpec((Cout, 9 * Cout), full2),           # conv2 taps (bf16)
            pl.BlockSpec((Cout, 1), full2),                  # conv2 bias
            pl.BlockSpec((C, C), full2),                     # group-avg (in GN)
            pl.BlockSpec((Cout, Cout), full2),               # group-avg (out GN)
        ],
        out_specs=pl.BlockSpec((bb, Cout, N), batched),
        scratch_shapes=[pltpu.VMEM((9 * C, bb * N), bf16)],  # shared im2col slab
        compiler_params=pltpu.CompilerParams(
            dimension_semantics=("parallel",)),
        cost_estimate=pl.CostEstimate(
            flops=flops, transcendentals=transcendentals,
            bytes_accessed=bytes_accessed),
    )(x_flat, emb3, mask_arr, gn1w, gn1b, w1, b1, wemb, bemb,
      gn2w, gn2b, w2, b2, gavg1, gavg2)

    return out.reshape(B, Cout, H, W)


# ---------------------------------------------------------------------------
# pure-JAX reference reproducing the PyTorch forward
# ---------------------------------------------------------------------------
def reference_resblock(x, emb, p, *, num_groups=32, eps=1e-5):
    hp = jax.lax.Precision.HIGHEST

    def gn(h, w, b):
        B, C, H, W = h.shape
        G = num_groups
        hg = h.reshape(B, G, C // G, H, W)
        m = hg.mean(axis=(2, 3, 4), keepdims=True)
        v = hg.var(axis=(2, 3, 4), keepdims=True)
        hg = (hg - m) / jnp.sqrt(v + eps)
        return (hg.reshape(B, C, H, W) * w[None, :, None, None]
                + b[None, :, None, None])

    def silu(v):
        return v * jax.nn.sigmoid(v)

    def conv(h, w, b):
        o = jax.lax.conv_general_dilated(
            h, w, (1, 1), ((1, 1), (1, 1)),
            dimension_numbers=("NCHW", "OIHW", "NCHW"), precision=hp)
        return o + b[None, :, None, None]

    h = conv(silu(gn(x, p["gn1_w"], p["gn1_b"])), p["conv1_w"], p["conv1_b"])
    e = jnp.einsum("be,oe->bo", silu(emb), p["emb_w"], precision=hp) + p["emb_b"][None, :]
    h = h + e[:, :, None, None]
    h = conv(silu(gn(h, p["gn2_w"], p["gn2_b"])), p["conv2_w"], p["conv2_b"])
    return x + h                      # identity skip connection


if __name__ == "__main__":
    # Small config consistent with ResBlock: channels=32 (normalization() uses
    # 32 groups), emb_channels=64, out_channels=channels -> identity skip.
    # B=4 so the default batch folding gives 2 images per grid step x 2 steps.
    B, C, H, W = 4, 32, 16, 16
    E = 64
    Cout = C

    key = jax.random.PRNGKey(0)
    ks = jax.random.split(key, 12)

    x = jax.random.normal(ks[0], (B, C, H, W), dtype=jnp.float32)
    emb = jax.random.normal(ks[1], (B, E), dtype=jnp.float32)

    params = {
        "gn1_w": 1.0 + 0.1 * jax.random.normal(ks[2], (C,), dtype=jnp.float32),
        "gn1_b": 0.1 * jax.random.normal(ks[3], (C,), dtype=jnp.float32),
        "conv1_w": 0.05 * jax.random.normal(ks[4], (Cout, C, 3, 3), dtype=jnp.float32),
        "conv1_b": 0.01 * jax.random.normal(ks[5], (Cout,), dtype=jnp.float32),
        "emb_w": 0.05 * jax.random.normal(ks[6], (Cout, E), dtype=jnp.float32),
        "emb_b": 0.01 * jax.random.normal(ks[7], (Cout,), dtype=jnp.float32),
        "gn2_w": 1.0 + 0.1 * jax.random.normal(ks[8], (Cout,), dtype=jnp.float32),
        "gn2_b": 0.1 * jax.random.normal(ks[9], (Cout,), dtype=jnp.float32),
        # zero_module() zeroes this conv at init; random weights stand in for a
        # trained checkpoint so the test actually exercises the path.
        "conv2_w": 0.05 * jax.random.normal(ks[10], (Cout, Cout, 3, 3), dtype=jnp.float32),
        "conv2_b": 0.01 * jax.random.normal(ks[11], (Cout,), dtype=jnp.float32),
    }

    out = resblock_forward(x, emb, params)
    out = jax.block_until_ready(out)

    ref = reference_resblock(x, emb, params)
    assert out.shape == (B, Cout, H, W)
    # tolerance accounts for bf16 matmul operands (f32 accumulation)
    assert jnp.allclose(out, ref, atol=3e-2, rtol=3e-2), float(jnp.max(jnp.abs(out - ref)))

    print("KERNEL_OK")
</pallas_src>

<mosaic_0001>
module attributes {stable_mosaic.version = 11 : i64} {
  func.func @resblock_kernel(%arg0: i32, %arg1: memref<2x32x256xf32, #tpu.memory_space<vmem>>, %arg2: memref<2x1x64xf32, #tpu.memory_space<vmem>>, %arg3: memref<9x1x256xf32, #tpu.memory_space<vmem>>, %arg4: memref<32x1xf32, #tpu.memory_space<vmem>>, %arg5: memref<32x1xf32, #tpu.memory_space<vmem>>, %arg6: memref<32x288xbf16, #tpu.memory_space<vmem>>, %arg7: memref<32x1xf32, #tpu.memory_space<vmem>>, %arg8: memref<32x64xf32, #tpu.memory_space<vmem>>, %arg9: memref<32x1xf32, #tpu.memory_space<vmem>>, %arg10: memref<32x1xf32, #tpu.memory_space<vmem>>, %arg11: memref<32x1xf32, #tpu.memory_space<vmem>>, %arg12: memref<32x288xbf16, #tpu.memory_space<vmem>>, %arg13: memref<32x1xf32, #tpu.memory_space<vmem>>, %arg14: memref<32x32xf32, #tpu.memory_space<vmem>>, %arg15: memref<32x32xf32, #tpu.memory_space<vmem>>, %arg16: memref<2x32x256xf32, #tpu.memory_space<vmem>>, %arg17: memref<288x512xbf16, #tpu.memory_space<vmem>>) attributes {dimension_semantics = [#tpu.dimension_semantics<parallel>], iteration_bounds = array<i64: 2>, scalar_prefetch = 0 : i64, scratch_operands = 1 : i64, tpu.core_type = #tpu.core_type<tc>, window_params = [{transform_indices = @transform_0, window_bounds = array<i64: 2, 32, 256>}, {transform_indices = @transform_1, window_bounds = array<i64: 2, 1, 64>}, {pipeline_mode = #tpu.pipeline_mode<synchronous>, transform_indices = @transform_2, window_bounds = array<i64: 9, 1, 256>}, {pipeline_mode = #tpu.pipeline_mode<synchronous>, transform_indices = @transform_3, window_bounds = array<i64: 32, 1>}, {pipeline_mode = #tpu.pipeline_mode<synchronous>, transform_indices = @transform_4, window_bounds = array<i64: 32, 1>}, {pipeline_mode = #tpu.pipeline_mode<synchronous>, transform_indices = @transform_5, window_bounds = array<i64: 32, 288>}, {pipeline_mode = #tpu.pipeline_mode<synchronous>, transform_indices = @transform_6, window_bounds = array<i64: 32, 1>}, {pipeline_mode = #tpu.pipeline_mode<synchronous>, transform_indices = @transform_7, window_bounds = array<i64: 32, 64>}, {pipeline_mode = #tpu.pipeline_mode<synchronous>, transform_indices = @transform_8, window_bounds = array<i64: 32, 1>}, {pipeline_mode = #tpu.pipeline_mode<synchronous>, transform_indices = @transform_9, window_bounds = array<i64: 32, 1>}, {pipeline_mode = #tpu.pipeline_mode<synchronous>, transform_indices = @transform_10, window_bounds = array<i64: 32, 1>}, {pipeline_mode = #tpu.pipeline_mode<synchronous>, transform_indices = @transform_11, window_bounds = array<i64: 32, 288>}, {pipeline_mode = #tpu.pipeline_mode<synchronous>, transform_indices = @transform_12, window_bounds = array<i64: 32, 1>}, {pipeline_mode = #tpu.pipeline_mode<synchronous>, transform_indices = @transform_13, window_bounds = array<i64: 32, 32>}, {pipeline_mode = #tpu.pipeline_mode<synchronous>, transform_indices = @transform_14, window_bounds = array<i64: 32, 32>}, {transform_indices = @transform_15, window_bounds = array<i64: 2, 32, 256>}]} {
    %c0 = arith.constant 0 : index
    %c0_0 = arith.constant 0 : index
    %c0_1 = arith.constant 0 : index
    %0 = vector.load %arg1[%c0, %c0_0, %c0_1] : memref<2x32x256xf32, #tpu.memory_space<vmem>>, vector<1x32x256xf32>
    %1 = vector.shape_cast %0 : vector<1x32x256xf32> to vector<32x256xf32>
    %c0_2 = arith.constant 0 : index
    %c0_3 = arith.constant 0 : index
    %2 = vector.load %arg4[%c0_2, %c0_3] : memref<32x1xf32, #tpu.memory_space<vmem>>, vector<32x1xf32>
    %c0_4 = arith.constant 0 : index
    %c0_5 = arith.constant 0 : index
    %3 = vector.load %arg5[%c0_4, %c0_5] : memref<32x1xf32, #tpu.memory_space<vmem>>, vector<32x1xf32>
    %cst = arith.constant dense<0.000000e+00> : vector<32xf32>
    %4 = vector.multi_reduction <add>, %1, %cst [1] : vector<32x256xf32> to vector<32xf32>
    %5 = vector.shape_cast %4 : vector<32xf32> to vector<32x1xf32>
    %6 = arith.mulf %1, %1 : vector<32x256xf32>
    %cst_6 = arith.constant dense<0.000000e+00> : vector<32xf32>
    %7 = vector.multi_reduction <add>, %6, %cst_6 [1] : vector<32x256xf32> to vector<32xf32>
    %8 = vector.shape_cast %7 : vector<32xf32> to vector<32x1xf32>
    %cst_7 = arith.constant 3.906250e-03 : f32
    %9 = vector.broadcast %cst_7 : f32 to vector<32x1xf32>
    %10 = arith.mulf %5, %9 : vector<32x1xf32>
    %cst_8 = arith.constant 3.906250e-03 : f32
    %11 = vector.broadcast %cst_8 : f32 to vector<32x1xf32>
    %12 = arith.mulf %8, %11 : vector<32x1xf32>
    %13 = arith.mulf %10, %10 : vector<32x1xf32>
    %14 = arith.subf %12, %13 : vector<32x1xf32>
    %cst_9 = arith.constant 0.000000e+00 : f32
    %15 = vector.broadcast %cst_9 : f32 to vector<32x1xf32>
    %16 = arith.maximumf %14, %15 : vector<32x1xf32>
    %cst_10 = arith.constant 9.99999974E-6 : f32
    %17 = vector.broadcast %cst_10 : f32 to vector<32x1xf32>
    %18 = arith.addf %16, %17 : vector<32x1xf32>
    %19 = math.rsqrt %18 : vector<32x1xf32>
    %20 = vector.broadcast %10 : vector<32x1xf32> to vector<32x256xf32>
    %21 = arith.subf %1, %20 : vector<32x256xf32>
    %22 = vector.broadcast %19 : vector<32x1xf32> to vector<32x256xf32>
    %23 = arith.mulf %21, %22 : vector<32x256xf32>
    %24 = vector.broadcast %2 : vector<32x1xf32> to vector<32x256xf32>
    %25 = arith.mulf %23, %24 : vector<32x256xf32>
    %26 = vector.broadcast %3 : vector<32x1xf32> to vector<32x256xf32>
    %27 = arith.addf %25, %26 : vector<32x256xf32>
    %28 = arith.negf %27 : vector<32x256xf32>
    %29 = math.exp %28 : vector<32x256xf32>
    %cst_11 = arith.constant 1.000000e+00 : f32
    %30 = vector.broadcast %cst_11 : f32 to vector<32x256xf32>
    %31 = arith.addf %30, %29 : vector<32x256xf32>
    %32 = arith.divf %30, %31 : vector<32x256xf32>
    %33 = arith.mulf %27, %32 : vector<32x256xf32>
    %c17_i32 = arith.constant 17 : i32
    %34 = tpu.dynamic_rotate %33 by %c17_i32 dim 1 : vector<32x256xf32>, i32 -> vector<32x256xf32>
    %c0_12 = arith.constant 0 : index
    %c0_13 = arith.constant 0 : index
    %c0_14 = arith.constant 0 : index
    %35 = vector.load %arg3[%c0_12, %c0_13, %c0_14] : memref<9x1x256xf32, #tpu.memory_space<vmem>>, vector<1x1x256xf32>
    %36 = vector.shape_cast %35 : vector<1x1x256xf32> to vector<1x256xf32>
    %37 = vector.broadcast %36 : vector<1x256xf32> to vector<32x256xf32>
    %38 = arith.mulf %34, %37 : vector<32x256xf32>
    %39 = arith.truncf %38 : vector<32x256xf32> to vector<32x256xbf16>
    %c0_15 = arith.constant 0 : index
    %c0_16 = arith.constant 0 : index
    %40 = vector.load %arg17[%c0_15, %c0_16] : memref<288x512xbf16, #tpu.memory_space<vmem>>, vector<32x256xbf16>
    tpu.vector_store %arg17[%c0_15, %c0_16], %39 {strides = array<i32>} : memref<288x512xbf16, #tpu.memory_space<vmem>>, vector<32x256xbf16>,
    %c16_i32 = arith.constant 16 : i32
    %41 = tpu.dynamic_rotate %33 by %c16_i32 dim 1 : vector<32x256xf32>, i32 -> vector<32x256xf32>
    %c1 = arith.constant 1 : index
    %c0_17 = arith.constant 0 : index
    %c0_18 = arith.constant 0 : index
    %42 = vector.load %arg3[%c1, %c0_17, %c0_18] : memref<9x1x256xf32, #tpu.memory_space<vmem>>, vector<1x1x256xf32>
    %43 = vector.shape_cast %42 : vector<1x1x256xf32> to vector<1x256xf32>
    %44 = vector.broadcast %43 : vector<1x256xf32> to vector<32x256xf32>
    %45 = arith.mulf %41, %44 : vector<32x256xf32>
    %46 = arith.truncf %45 : vector<32x256xf32> to vector<32x256xbf16>
    %c32 = arith.constant 32 : index
    %c0_19 = arith.constant 0 : index
    %47 = vector.load %arg17[%c32, %c0_19] : memref<288x512xbf16, #tpu.memory_space<vmem>>, vector<32x256xbf16>
    tpu.vector_store %arg17[%c32, %c0_19], %46 {strides = array<i32>} : memref<288x512xbf16, #tpu.memory_space<vmem>>, vector<32x256xbf16>,
    %c15_i32 = arith.constant 15 : i32
    %48 = tpu.dynamic_rotate %33 by %c15_i32 dim 1 : vector<32x256xf32>, i32 -> vector<32x256xf32>
    %c2 = arith.constant 2 : index
    %c0_20 = arith.constant 0 : index
    %c0_21 = arith.constant 0 : index
    %49 = vector.load %arg3[%c2, %c0_20, %c0_21] : memref<9x1x256xf32, #tpu.memory_space<vmem>>, vector<1x1x256xf32>
    %50 = vector.shape_cast %49 : vector<1x1x256xf32> to vector<1x256xf32>
    %51 = vector.broadcast %50 : vector<1x256xf32> to vector<32x256xf32>
    %52 = arith.mulf %48, %51 : vector<32x256xf32>
    %53 = arith.truncf %52 : vector<32x256xf32> to vector<32x256xbf16>
    %c64 = arith.constant 64 : index
    %c0_22 = arith.constant 0 : index
    %54 = vector.load %arg17[%c64, %c0_22] : memref<288x512xbf16, #tpu.memory_space<vmem>>, vector<32x256xbf16>
    tpu.vector_store %arg17[%c64, %c0_22], %53 {strides = array<i32>} : memref<288x512xbf16, #tpu.memory_space<vmem>>, vector<32x256xbf16>,
    %c1_i32 = arith.constant 1 : i32
    %55 = tpu.dynamic_rotate %33 by %c1_i32 dim 1 : vector<32x256xf32>, i32 -> vector<32x256xf32>
    %c3 = arith.constant 3 : index
    %c0_23 = arith.constant 0 : index
    %c0_24 = arith.constant 0 : index
    %56 = vector.load %arg3[%c3, %c0_23, %c0_24] : memref<9x1x256xf32, #tpu.memory_space<vmem>>, vector<1x1x256xf32>
    %57 = vector.shape_cast %56 : vector<1x1x256xf32> to vector<1x256xf32>
    %58 = vector.broadcast %57 : vector<1x256xf32> to vector<32x256xf32>
    %59 = arith.mulf %55, %58 : vector<32x256xf32>
    %60 = arith.truncf %59 : vector<32x256xf32> to vector<32x256xbf16>
    %c96 = arith.constant 96 : index
    %c0_25 = arith.constant 0 : index
    %61 = vector.load %arg17[%c96, %c0_25] : memref<288x512xbf16, #tpu.memory_space<vmem>>, vector<32x256xbf16>
    tpu.vector_store %arg17[%c96, %c0_25], %60 {strides = array<i32>} : memref<288x512xbf16, #tpu.memory_space<vmem>>, vector<32x256xbf16>,
    %62 = arith.truncf %33 : vector<32x256xf32> to vector<32x256xbf16>
    %c128 = arith.constant 128 : index
    %c0_26 = arith.constant 0 : index
    %63 = vector.load %arg17[%c128, %c0_26] : memref<288x512xbf16, #tpu.memory_space<vmem>>, vector<32x256xbf16>
    tpu.vector_store %arg17[%c128, %c0_26], %62 {strides = array<i32>} : memref<288x512xbf16, #tpu.memory_space<vmem>>, vector<32x256xbf16>,
    %c255_i32 = arith.constant 255 : i32
    %64 = tpu.dynamic_rotate %33 by %c255_i32 dim 1 : vector<32x256xf32>, i32 -> vector<32x256xf32>
    %c5 = arith.constant 5 : index
    %c0_27 = arith.constant 0 : index
    %c0_28 = arith.constant 0 : index
    %65 = vector.load %arg3[%c5, %c0_27, %c0_28] : memref<9x1x256xf32, #tpu.memory_space<vmem>>, vector<1x1x256xf32>
    %66 = vector.shape_cast %65 : vector<1x1x256xf32> to vector<1x256xf32>
    %67 = vector.broadcast %66 : vector<1x256xf32> to vector<32x256xf32>
    %68 = arith.mulf %64, %67 : vector<32x256xf32>
    %69 = arith.truncf %68 : vector<32x256xf32> to vector<32x256xbf16>
    %c160 = arith.constant 160 : index
    %c0_29 = arith.constant 0 : index
    %70 = vector.load %arg17[%c160, %c0_29] : memref<288x512xbf16, #tpu.memory_space<vmem>>, vector<32x256xbf16>
    tpu.vector_store %arg17[%c160, %c0_29], %69 {strides = array<i32>} : memref<288x512xbf16, #tpu.memory_space<vmem>>, vector<32x256xbf16>,
    %c241_i32 = arith.constant 241 : i32
    %71 = tpu.dynamic_rotate %33 by %c241_i32 dim 1 : vector<32x256xf32>, i32 -> vector<32x256xf32>
    %c6 = arith.constant 6 : index
    %c0_30 = arith.constant 0 : index
    %c0_31 = arith.constant 0 : index
    %72 = vector.load %arg3[%c6, %c0_30, %c0_31] : memref<9x1x256xf32, #tpu.memory_space<vmem>>, vector<1x1x256xf32>
    %73 = vector.shape_cast %72 : vector<1x1x256xf32> to vector<1x256xf32>
    %74 = vector.broadcast %73 : vector<1x256xf32> to vector<32x256xf32>
    %75 = arith.mulf %71, %74 : vector<32x256xf32>
    %76 = arith.truncf %75 : vector<32x256xf32> to vector<32x256xbf16>
    %c192 = arith.constant 192 : index
    %c0_32 = arith.constant 0 : index
    %77 = vector.load %arg17[%c192, %c0_32] : memref<288x512xbf16, #tpu.memory_space<vmem>>, vector<32x256xbf16>
    tpu.vector_store %arg17[%c192, %c0_32], %76 {strides = array<i32>} : memref<288x512xbf16, #tpu.memory_space<vmem>>, vector<32x256xbf16>,
    %c240_i32 = arith.constant 240 : i32
    %78 = tpu.dynamic_rotate %33 by %c240_i32 dim 1 : vector<32x256xf32>, i32 -> vector<32x256xf32>
    %c7 = arith.constant 7 : index
    %c0_33 = arith.constant 0 : index
    %c0_34 = arith.constant 0 : index
    %79 = vector.load %arg3[%c7, %c0_33, %c0_34] : memref<9x1x256xf32, #tpu.memory_space<vmem>>, vector<1x1x256xf32>
    %80 = vector.shape_cast %79 : vector<1x1x256xf32> to vector<1x256xf32>
    %81 = vector.broadcast %80 : vector<1x256xf32> to vector<32x256xf32>
    %82 = arith.mulf %78, %81 : vector<32x256xf32>
    %83 = arith.truncf %82 : vector<32x256xf32> to vector<32x256xbf16>
    %c224 = arith.constant 224 : index
    %c0_35 = arith.constant 0 : index
    %84 = vector.load %arg17[%c224, %c0_35] : memref<288x512xbf16, #tpu.memory_space<vmem>>, vector<32x256xbf16>
    tpu.vector_store %arg17[%c224, %c0_35], %83 {strides = array<i32>} : memref<288x512xbf16, #tpu.memory_space<vmem>>, vector<32x256xbf16>,
    %c239_i32 = arith.constant 239 : i32
    %85 = tpu.dynamic_rotate %33 by %c239_i32 dim 1 : vector<32x256xf32>, i32 -> vector<32x256xf32>
    %c8 = arith.constant 8 : index
    %c0_36 = arith.constant 0 : index
    %c0_37 = arith.constant 0 : index
    %86 = vector.load %arg3[%c8, %c0_36, %c0_37] : memref<9x1x256xf32, #tpu.memory_space<vmem>>, vector<1x1x256xf32>
    %87 = vector.shape_cast %86 : vector<1x1x256xf32> to vector<1x256xf32>
    %88 = vector.broadcast %87 : vector<1x256xf32> to vector<32x256xf32>
    %89 = arith.mulf %85, %88 : vector<32x256xf32>
    %90 = arith.truncf %89 : vector<32x256xf32> to vector<32x256xbf16>
    %c256 = arith.constant 256 : index
    %c0_38 = arith.constant 0 : index
    %91 = vector.load %arg17[%c256, %c0_38] : memref<288x512xbf16, #tpu.memory_space<vmem>>, vector<32x256xbf16>
    tpu.vector_store %arg17[%c256, %c0_38], %90 {strides = array<i32>} : memref<288x512xbf16, #tpu.memory_space<vmem>>, vector<32x256xbf16>,
    %c1_39 = arith.constant 1 : index
    %c0_40 = arith.constant 0 : index
    %c0_41 = arith.constant 0 : index
    %92 = vector.load %arg1[%c1_39, %c0_40, %c0_41] : memref<2x32x256xf32, #tpu.memory_space<vmem>>, vector<1x32x256xf32>
    %93 = vector.shape_cast %92 : vector<1x32x256xf32> to vector<32x256xf32>
    %c0_42 = arith.constant 0 : index
    %c0_43 = arith.constant 0 : index
    %94 = vector.load %arg4[%c0_42, %c0_43] : memref<32x1xf32, #tpu.memory_space<vmem>>, vector<32x1xf32>
    %c0_44 = arith.constant 0 : index
    %c0_45 = arith.constant 0 : index
    %95 = vector.load %arg5[%c0_44, %c0_45] : memref<32x1xf32, #tpu.memory_space<vmem>>, vector<32x1xf32>
    %cst_46 = arith.constant dense<0.000000e+00> : vector<32xf32>
    %96 = vector.multi_reduction <add>, %93, %cst_46 [1] : vector<32x256xf32> to vector<32xf32>
    %97 = vector.shape_cast %96 : vector<32xf32> to vector<32x1xf32>
    %98 = arith.mulf %93, %93 : vector<32x256xf32>
    %cst_47 = arith.constant dense<0.000000e+00> : vector<32xf32>
    %99 = vector.multi_reduction <add>, %98, %cst_47 [1] : vector<32x256xf32> to vector<32xf32>
    %100 = vector.shape_cast %99 : vector<32xf32> to vector<32x1xf32>
    %cst_48 = arith.constant 3.906250e-03 : f32
    %101 = vector.broadcast %cst_48 : f32 to vector<32x1xf32>
    %102 = arith.mulf %97, %101 : vector<32x1xf32>
    %cst_49 = arith.constant 3.906250e-03 : f32
    %103 = vector.broadcast %cst_49 : f32 to vector<32x1xf32>
    %104 = arith.mulf %100, %103 : vector<32x1xf32>
    %105 = arith.mulf %102, %102 : vector<32x1xf32>
    %106 = arith.subf %104, %105 : vector<32x1xf32>
    %cst_50 = arith.constant 0.000000e+00 : f32
    %107 = vector.broadcast %cst_50 : f32 to vector<32x1xf32>
    %108 = arith.maximumf %106, %107 : vector<32x1xf32>
    %cst_51 = arith.constant 9.99999974E-6 : f32
    %109 = vector.broadcast %cst_51 : f32 to vector<32x1xf32>
    %110 = arith.addf %108, %109 : vector<32x1xf32>
    %111 = math.rsqrt %110 : vector<32x1xf32>
    %112 = vector.broadcast %102 : vector<32x1xf32> to vector<32x256xf32>
    %113 = arith.subf %93, %112 : vector<32x256xf32>
    %114 = vector.broadcast %111 : vector<32x1xf32> to vector<32x256xf32>
    %115 = arith.mulf %113, %114 : vector<32x256xf32>
    %116 = vector.broadcast %94 : vector<32x1xf32> to vector<32x256xf32>
    %117 = arith.mulf %115, %116 : vector<32x256xf32>
    %118 = vector.broadcast %95 : vector<32x1xf32> to vector<32x256xf32>
    %119 = arith.addf %117, %118 : vector<32x256xf32>
    %120 = arith.negf %119 : vector<32x256xf32>
    %121 = math.exp %120 : vector<32x256xf32>
    %cst_52 = arith.constant 1.000000e+00 : f32
    %122 = vector.broadcast %cst_52 : f32 to vector<32x256xf32>
    %123 = arith.addf %122, %121 : vector<32x256xf32>
    %124 = arith.divf %122, %123 : vector<32x256xf32>
    %125 = arith.mulf %119, %124 : vector<32x256xf32>
    %c17_i32_53 = arith.constant 17 : i32
    %126 = tpu.dynamic_rotate %125 by %c17_i32_53 dim 1 : vector<32x256xf32>, i32 -> vector<32x256xf32>
    %c0_54 = arith.constant 0 : index
    %c0_55 = arith.constant 0 : index
    %c0_56 = arith.constant 0 : index
    %127 = vector.load %arg3[%c0_54, %c0_55, %c0_56] : memref<9x1x256xf32, #tpu.memory_space<vmem>>, vector<1x1x256xf32>
    %128 = vector.shape_cast %127 : vector<1x1x256xf32> to vector<1x256xf32>
    %129 = vector.broadcast %128 : vector<1x256xf32> to vector<32x256xf32>
    %130 = arith.mulf %126, %129 : vector<32x256xf32>
    %131 = arith.truncf %130 : vector<32x256xf32> to vector<32x256xbf16>
    %c0_57 = arith.constant 0 : index
    %c256_58 = arith.constant 256 : index
    %132 = vector.load %arg17[%c0_57, %c256_58] : memref<288x512xbf16, #tpu.memory_space<vmem>>, vector<32x256xbf16>
    tpu.vector_store %arg17[%c0_57, %c256_58], %131 {strides = array<i32>} : memref<288x512xbf16, #tpu.memory_space<vmem>>, vector<32x256xbf16>,
    %c16_i32_59 = arith.constant 16 : i32
    %133 = tpu.dynamic_rotate %125 by %c16_i32_59 dim 1 : vector<32x256xf32>, i32 -> vector<32x256xf32>
    %c1_60 = arith.constant 1 : index
    %c0_61 = arith.constant 0 : index
    %c0_62 = arith.constant 0 : index
    %134 = vector.load %arg3[%c1_60, %c0_61, %c0_62] : memref<9x1x256xf32, #tpu.memory_space<vmem>>, vector<1x1x256xf32>
    %135 = vector.shape_cast %134 : vector<1x1x256xf32> to vector<1x256xf32>
    %136 = vector.broadcast %135 : vector<1x256xf32> to vector<32x256xf32>
    %137 = arith.mulf %133, %136 : vector<32x256xf32>
    %138 = arith.truncf %137 : vector<32x256xf32> to vector<32x256xbf16>
    %c32_63 = arith.constant 32 : index
    %c256_64 = arith.constant 256 : index
    %139 = vector.load %arg17[%c32_63, %c256_64] : memref<288x512xbf16, #tpu.memory_space<vmem>>, vector<32x256xbf16>
    tpu.vector_store %arg17[%c32_63, %c256_64], %138 {strides = array<i32>} : memref<288x512xbf16, #tpu.memory_space<vmem>>, vector<32x256xbf16>,
    %c15_i32_65 = arith.constant 15 : i32
    %140 = tpu.dynamic_rotate %125 by %c15_i32_65 dim 1 : vector<32x256xf32>, i32 -> vector<32x256xf32>
    %c2_66 = arith.constant 2 : index
    %c0_67 = arith.constant 0 : index
    %c0_68 = arith.constant 0 : index
    %141 = vector.load %arg3[%c2_66, %c0_67, %c0_68] : memref<9x1x256xf32, #tpu.memory_space<vmem>>, vector<1x1x256xf32>
    %142 = vector.shape_cast %141 : vector<1x1x256xf32> to vector<1x256xf32>
    %143 = vector.broadcast %142 : vector<1x256xf32> to vector<32x256xf32>
    %144 = arith.mulf %140, %143 : vector<32x256xf32>
    %145 = arith.truncf %144 : vector<32x256xf32> to vector<32x256xbf16>
    %c64_69 = arith.constant 64 : index
    %c256_70 = arith.constant 256 : index
    %146 = vector.load %arg17[%c64_69, %c256_70] : memref<288x512xbf16, #tpu.memory_space<vmem>>, vector<32x256xbf16>
    tpu.vector_store %arg17[%c64_69, %c256_70], %145 {strides = array<i32>} : memref<288x512xbf16, #tpu.memory_space<vmem>>, vector<32x256xbf16>,
    %c1_i32_71 = arith.constant 1 : i32
    %147 = tpu.dynamic_rotate %125 by %c1_i32_71 dim 1 : vector<32x256xf32>, i32 -> vector<32x256xf32>
    %c3_72 = arith.constant 3 : index
    %c0_73 = arith.constant 0 : index
    %c0_74 = arith.constant 0 : index
    %148 = vector.load %arg3[%c3_72, %c0_73, %c0_74] : memref<9x1x256xf32, #tpu.memory_space<vmem>>, vector<1x1x256xf32>
    %149 = vector.shape_cast %148 : vector<1x1x256xf32> to vector<1x256xf32>
    %150 = vector.broadcast %149 : vector<1x256xf32> to vector<32x256xf32>
    %151 = arith.mulf %147, %150 : vector<32x256xf32>
    %152 = arith.truncf %151 : vector<32x256xf32> to vector<32x256xbf16>
    %c96_75 = arith.constant 96 : index
    %c256_76 = arith.constant 256 : index
    %153 = vector.load %arg17[%c96_75, %c256_76] : memref<288x512xbf16, #tpu.memory_space<vmem>>, vector<32x256xbf16>
    tpu.vector_store %arg17[%c96_75, %c256_76], %152 {strides = array<i32>} : memref<288x512xbf16, #tpu.memory_space<vmem>>, vector<32x256xbf16>,
    %154 = arith.truncf %125 : vector<32x256xf32> to vector<32x256xbf16>
    %c128_77 = arith.constant 128 : index
    %c256_78 = arith.constant 256 : index
    %155 = vector.load %arg17[%c128_77, %c256_78] : memref<288x512xbf16, #tpu.memory_space<vmem>>, vector<32x256xbf16>
    tpu.vector_store %arg17[%c128_77, %c256_78], %154 {strides = array<i32>} : memref<288x512xbf16, #tpu.memory_space<vmem>>, vector<32x256xbf16>,
    %c255_i32_79 = arith.constant 255 : i32
    %156 = tpu.dynamic_rotate %125 by %c255_i32_79 dim 1 : vector<32x256xf32>, i32 -> vector<32x256xf32>
    %c5_80 = arith.constant 5 : index
    %c0_81 = arith.constant 0 : index
    %c0_82 = arith.constant 0 : index
    %157 = vector.load %arg3[%c5_80, %c0_81, %c0_82] : memref<9x1x256xf32, #tpu.memory_space<vmem>>, vector<1x1x256xf32>
    %158 = vector.shape_cast %157 : vector<1x1x256xf32> to vector<1x256xf32>
    %159 = vector.broadcast %158 : vector<1x256xf32> to vector<32x256xf32>
    %160 = arith.mulf %156, %159 : vector<32x256xf32>
    %161 = arith.truncf %160 : vector<32x256xf32> to vector<32x256xbf16>
    %c160_83 = arith.constant 160 : index
    %c256_84 = arith.constant 256 : index
    %162 = vector.load %arg17[%c160_83, %c256_84] : memref<288x512xbf16, #tpu.memory_space<vmem>>, vector<32x256xbf16>
    tpu.vector_store %arg17[%c160_83, %c256_84], %161 {strides = array<i32>} : memref<288x512xbf16, #tpu.memory_space<vmem>>, vector<32x256xbf16>,
    %c241_i32_85 = arith.constant 241 : i32
    %163 = tpu.dynamic_rotate %125 by %c241_i32_85 dim 1 : vector<32x256xf32>, i32 -> vector<32x256xf32>
    %c6_86 = arith.constant 6 : index
    %c0_87 = arith.constant 0 : index
    %c0_88 = arith.constant 0 : index
    %164 = vector.load %arg3[%c6_86, %c0_87, %c0_88] : memref<9x1x256xf32, #tpu.memory_space<vmem>>, vector<1x1x256xf32>
    %165 = vector.shape_cast %164 : vector<1x1x256xf32> to vector<1x256xf32>
    %166 = vector.broadcast %165 : vector<1x256xf32> to vector<32x256xf32>
    %167 = arith.mulf %163, %166 : vector<32x256xf32>
    %168 = arith.truncf %167 : vector<32x256xf32> to vector<32x256xbf16>
    %c192_89 = arith.constant 192 : index
    %c256_90 = arith.constant 256 : index
    %169 = vector.load %arg17[%c192_89, %c256_90] : memref<288x512xbf16, #tpu.memory_space<vmem>>, vector<32x256xbf16>
    tpu.vector_store %arg17[%c192_89, %c256_90], %168 {strides = array<i32>} : memref<288x512xbf16, #tpu.memory_space<vmem>>, vector<32x256xbf16>,
    %c240_i32_91 = arith.constant 240 : i32
    %170 = tpu.dynamic_rotate %125 by %c240_i32_91 dim 1 : vector<32x256xf32>, i32 -> vector<32x256xf32>
    %c7_92 = arith.constant 7 : index
    %c0_93 = arith.constant 0 : index
    %c0_94 = arith.constant 0 : index
    %171 = vector.load %arg3[%c7_92, %c0_93, %c0_94] : memref<9x1x256xf32, #tpu.memory_space<vmem>>, vector<1x1x256xf32>
    %172 = vector.shape_cast %171 : vector<1x1x256xf32> to vector<1x256xf32>
    %173 = vector.broadcast %172 : vector<1x256xf32> to vector<32x256xf32>
    %174 = arith.mulf %170, %173 : vector<32x256xf32>
    %175 = arith.truncf %174 : vector<32x256xf32> to vector<32x256xbf16>
    %c224_95 = arith.constant 224 : index
    %c256_96 = arith.constant 256 : index
    %176 = vector.load %arg17[%c224_95, %c256_96] : memref<288x512xbf16, #tpu.memory_space<vmem>>, vector<32x256xbf16>
    tpu.vector_store %arg17[%c224_95, %c256_96], %175 {strides = array<i32>} : memref<288x512xbf16, #tpu.memory_space<vmem>>, vector<32x256xbf16>,
    %c239_i32_97 = arith.constant 239 : i32
    %177 = tpu.dynamic_rotate %125 by %c239_i32_97 dim 1 : vector<32x256xf32>, i32 -> vector<32x256xf32>
    %c8_98 = arith.constant 8 : index
    %c0_99 = arith.constant 0 : index
    %c0_100 = arith.constant 0 : index
    %178 = vector.load %arg3[%c8_98, %c0_99, %c0_100] : memref<9x1x256xf32, #tpu.memory_space<vmem>>, vector<1x1x256xf32>
    %179 = vector.shape_cast %178 : vector<1x1x256xf32> to vector<1x256xf32>
    %180 = vector.broadcast %179 : vector<1x256xf32> to vector<32x256xf32>
    %181 = arith.mulf %177, %180 : vector<32x256xf32>
    %182 = arith.truncf %181 : vector<32x256xf32> to vector<32x256xbf16>
    %c256_101 = arith.constant 256 : index
    %c256_102 = arith.constant 256 : index
    %183 = vector.load %arg17[%c256_101, %c256_102] : memref<288x512xbf16, #tpu.memory_space<vmem>>, vector<32x256xbf16>
    tpu.vector_store %arg17[%c256_101, %c256_102], %182 {strides = array<i32>} : memref<288x512xbf16, #tpu.memory_space<vmem>>, vector<32x256xbf16>,
    %c0_103 = arith.constant 0 : index
    %c0_104 = arith.constant 0 : index
    %184 = vector.load %arg6[%c0_103, %c0_104] : memref<32x288xbf16, #tpu.memory_space<vmem>>, vector<32x288xbf16>
    %c0_105 = arith.constant 0 : index
    %c0_106 = arith.constant 0 : index
    %185 = vector.load %arg17[%c0_105, %c0_106] : memref<288x512xbf16, #tpu.memory_space<vmem>>, vector<288x512xbf16>
    %cst_107 = arith.constant dense<0.000000e+00> : vector<32x512xf32>
    %186 = tpu.matmul %184, %185, %cst_107 {dimension_numbers = #tpu.dot_dimension_numbers<[1], [0], [0], [1], [0, 0, 1, 1], [], []>} : vector<32x288xbf16>, vector<288x512xbf16>, vector<32x512xf32> -> vector<32x512xf32>
    %c0_108 = arith.constant 0 : index
    %c0_109 = arith.constant 0 : index
    %187 = vector.load %arg7[%c0_108, %c0_109] : memref<32x1xf32, #tpu.memory_space<vmem>>, vector<32x1xf32>
    %188 = vector.broadcast %187 : vector<32x1xf32> to vector<32x512xf32>
    %189 = arith.addf %186, %188 : vector<32x512xf32>
    %c0_110 = arith.constant 0 : index
    %c0_111 = arith.constant 0 : index
    %c0_112 = arith.constant 0 : index
    %190 = vector.load %arg2[%c0_110, %c0_111, %c0_112] : memref<2x1x64xf32, #tpu.memory_space<vmem>>, vector<1x1x64xf32>
    %191 = vector.shape_cast %190 : vector<1x1x64xf32> to vector<1x64xf32>
    %192 = arith.negf %191 : vector<1x64xf32>
    %193 = math.exp %192 : vector<1x64xf32>
    %cst_113 = arith.constant 1.000000e+00 : f32
    %194 = vector.broadcast %cst_113 : f32 to vector<1x64xf32>
    %195 = arith.addf %194, %193 : vector<1x64xf32>
    %196 = arith.divf %194, %195 : vector<1x64xf32>
    %197 = arith.mulf %191, %196 : vector<1x64xf32>
    %c0_114 = arith.constant 0 : index
    %c0_115 = arith.constant 0 : index
    %198 = vector.load %arg8[%c0_114, %c0_115] : memref<32x64xf32, #tpu.memory_space<vmem>>, vector<32x64xf32>
    %199 = vector.broadcast %197 : vector<1x64xf32> to vector<32x64xf32>
    %200 = arith.mulf %198, %199 : vector<32x64xf32>
    %cst_116 = arith.constant dense<0.000000e+00> : vector<32xf32>
    %201 = vector.multi_reduction <add>, %200, %cst_116 [1] : vector<32x64xf32> to vector<32xf32>
    %202 = vector.shape_cast %201 : vector<32xf32> to vector<32x1xf32>
    %c0_117 = arith.constant 0 : index
    %c0_118 = arith.constant 0 : index
    %203 = vector.load %arg9[%c0_117, %c0_118] : memref<32x1xf32, #tpu.memory_space<vmem>>, vector<32x1xf32>
    %204 = arith.addf %202, %203 : vector<32x1xf32>
    %205 = vector.extract_strided_slice %189 {offsets = [0, 0], sizes = [32, 256], strides = [1, 1]} : vector<32x512xf32> to vector<32x256xf32>
    %206 = vector.broadcast %204 : vector<32x1xf32> to vector<32x256xf32>
    %207 = arith.addf %205, %206 : vector<32x256xf32>
    %c0_119 = arith.constant 0 : index
    %c0_120 = arith.constant 0 : index
    %208 = vector.load %arg10[%c0_119, %c0_120] : memref<32x1xf32, #tpu.memory_space<vmem>>, vector<32x1xf32>
    %c0_121 = arith.constant 0 : index
    %c0_122 = arith.constant 0 : index
    %209 = vector.load %arg11[%c0_121, %c0_122] : memref<32x1xf32, #tpu.memory_space<vmem>>, vector<32x1xf32>
    %cst_123 = arith.constant dense<0.000000e+00> : vector<32xf32>
    %210 = vector.multi_reduction <add>, %207, %cst_123 [1] : vector<32x256xf32> to vector<32xf32>
    %211 = vector.shape_cast %210 : vector<32xf32> to vector<32x1xf32>
    %212 = arith.mulf %207, %207 : vector<32x256xf32>
    %cst_124 = arith.constant dense<0.000000e+00> : vector<32xf32>
    %213 = vector.multi_reduction <add>, %212, %cst_124 [1] : vector<32x256xf32> to vector<32xf32>
    %214 = vector.shape_cast %213 : vector<32xf32> to vector<32x1xf32>
    %cst_125 = arith.constant 3.906250e-03 : f32
    %215 = vector.broadcast %cst_125 : f32 to vector<32x1xf32>
    %216 = arith.mulf %211, %215 : vector<32x1xf32>
    %cst_126 = arith.constant 3.906250e-03 : f32
    %217 = vector.broadcast %cst_126 : f32 to vector<32x1xf32>
    %218 = arith.mulf %214, %217 : vector<32x1xf32>
    %219 = arith.mulf %216, %216 : vector<32x1xf32>
    %220 = arith.subf %218, %219 : vector<32x1xf32>
    %cst_127 = arith.constant 0.000000e+00 : f32
    %221 = vector.broadcast %cst_127 : f32 to vector<32x1xf32>
    %222 = arith.maximumf %220, %221 : vector<32x1xf32>
    %cst_128 = arith.constant 9.99999974E-6 : f32
    %223 = vector.broadcast %cst_128 : f32 to vector<32x1xf32>
    %224 = arith.addf %222, %223 : vector<32x1xf32>
    %225 = math.rsqrt %224 : vector<32x1xf32>
    %226 = vector.broadcast %216 : vector<32x1xf32> to vector<32x256xf32>
    %227 = arith.subf %207, %226 : vector<32x256xf32>
    %228 = vector.broadcast %225 : vector<32x1xf32> to vector<32x256xf32>
    %229 = arith.mulf %227, %228 : vector<32x256xf32>
    %230 = vector.broadcast %208 : vector<32x1xf32> to vector<32x256xf32>
    %231 = arith.mulf %229, %230 : vector<32x256xf32>
    %232 = vector.broadcast %209 : vector<32x1xf32> to vector<32x256xf32>
    %233 = arith.addf %231, %232 : vector<32x256xf32>
    %234 = arith.negf %233 : vector<32x256xf32>
    %235 = math.exp %234 : vector<32x256xf32>
    %cst_129 = arith.constant 1.000000e+00 : f32
    %236 = vector.broadcast %cst_129 : f32 to vector<32x256xf32>
    %237 = arith.addf %236, %235 : vector<32x256xf32>
    %238 = arith.divf %236, %237 : vector<32x256xf32>
    %239 = arith.mulf %233, %238 : vector<32x256xf32>
    %c17_i32_130 = arith.constant 17 : i32
    %240 = tpu.dynamic_rotate %239 by %c17_i32_130 dim 1 : vector<32x256xf32>, i32 -> vector<32x256xf32>
    %c0_131 = arith.constant 0 : index
    %c0_132 = arith.constant 0 : index
    %c0_133 = arith.constant 0 : index
    %241 = vector.load %arg3[%c0_131, %c0_132, %c0_133] : memref<9x1x256xf32, #tpu.memory_space<vmem>>, vector<1x1x256xf32>
    %242 = vector.shape_cast %241 : vector<1x1x256xf32> to vector<1x256xf32>
    %243 = vector.broadcast %242 : vector<1x256xf32> to vector<32x256xf32>
    %244 = arith.mulf %240, %243 : vector<32x256xf32>
    %245 = arith.truncf %244 : vector<32x256xf32> to vector<32x256xbf16>
    %c0_134 = arith.constant 0 : index
    %c0_135 = arith.constant 0 : index
    %246 = vector.load %arg17[%c0_134, %c0_135] : memref<288x512xbf16, #tpu.memory_space<vmem>>, vector<32x256xbf16>
    tpu.vector_store %arg17[%c0_134, %c0_135], %245 {strides = array<i32>} : memref<288x512xbf16, #tpu.memory_space<vmem>>, vector<32x256xbf16>,
    %c16_i32_136 = arith.constant 16 : i32
    %247 = tpu.dynamic_rotate %239 by %c16_i32_136 dim 1 : vector<32x256xf32>, i32 -> vector<32x256xf32>
    %c1_137 = arith.constant 1 : index
    %c0_138 = arith.constant 0 : index
    %c0_139 = arith.constant 0 : index
    %248 = vector.load %arg3[%c1_137, %c0_138, %c0_139] : memref<9x1x256xf32, #tpu.memory_space<vmem>>, vector<1x1x256xf32>
    %249 = vector.shape_cast %248 : vector<1x1x256xf32> to vector<1x256xf32>
    %250 = vector.broadcast %249 : vector<1x256xf32> to vector<32x256xf32>
    %251 = arith.mulf %247, %250 : vector<32x256xf32>
    %252 = arith.truncf %251 : vector<32x256xf32> to vector<32x256xbf16>
    %c32_140 = arith.constant 32 : index
    %c0_141 = arith.constant 0 : index
    %253 = vector.load %arg17[%c32_140, %c0_141] : memref<288x512xbf16, #tpu.memory_space<vmem>>, vector<32x256xbf16>
    tpu.vector_store %arg17[%c32_140, %c0_141], %252 {strides = array<i32>} : memref<288x512xbf16, #tpu.memory_space<vmem>>, vector<32x256xbf16>,
    %c15_i32_142 = arith.constant 15 : i32
    %254 = tpu.dynamic_rotate %239 by %c15_i32_142 dim 1 : vector<32x256xf32>, i32 -> vector<32x256xf32>
    %c2_143 = arith.constant 2 : index
    %c0_144 = arith.constant 0 : index
    %c0_145 = arith.constant 0 : index
    %255 = vector.load %arg3[%c2_143, %c0_144, %c0_145] : memref<9x1x256xf32, #tpu.memory_space<vmem>>, vector<1x1x256xf32>
    %256 = vector.shape_cast %255 : vector<1x1x256xf32> to vector<1x256xf32>
    %257 = vector.broadcast %256 : vector<1x256xf32> to vector<32x256xf32>
    %258 = arith.mulf %254, %257 : vector<32x256xf32>
    %259 = arith.truncf %258 : vector<32x256xf32> to vector<32x256xbf16>
    %c64_146 = arith.constant 64 : index
    %c0_147 = arith.constant 0 : index
    %260 = vector.load %arg17[%c64_146, %c0_147] : memref<288x512xbf16, #tpu.memory_space<vmem>>, vector<32x256xbf16>
    tpu.vector_store %arg17[%c64_146, %c0_147], %259 {strides = array<i32>} : memref<288x512xbf16, #tpu.memory_space<vmem>>, vector<32x256xbf16>,
    %c1_i32_148 = arith.constant 1 : i32
    %261 = tpu.dynamic_rotate %239 by %c1_i32_148 dim 1 : vector<32x256xf32>, i32 -> vector<32x256xf32>
    %c3_149 = arith.constant 3 : index
    %c0_150 = arith.constant 0 : index
    %c0_151 = arith.constant 0 : index
    %262 = vector.load %arg3[%c3_149, %c0_150, %c0_151] : memref<9x1x256xf32, #tpu.memory_space<vmem>>, vector<1x1x256xf32>
    %263 = vector.shape_cast %262 : vector<1x1x256xf32> to vector<1x256xf32>
    %264 = vector.broadcast %263 : vector<1x256xf32> to vector<32x256xf32>
    %265 = arith.mulf %261, %264 : vector<32x256xf32>
    %266 = arith.truncf %265 : vector<32x256xf32> to vector<32x256xbf16>
    %c96_152 = arith.constant 96 : index
    %c0_153 = arith.constant 0 : index
    %267 = vector.load %arg17[%c96_152, %c0_153] : memref<288x512xbf16, #tpu.memory_space<vmem>>, vector<32x256xbf16>
    tpu.vector_store %arg17[%c96_152, %c0_153], %266 {strides = array<i32>} : memref<288x512xbf16, #tpu.memory_space<vmem>>, vector<32x256xbf16>,
    %268 = arith.truncf %239 : vector<32x256xf32> to vector<32x256xbf16>
    %c128_154 = arith.constant 128 : index
    %c0_155 = arith.constant 0 : index
    %269 = vector.load %arg17[%c128_154, %c0_155] : memref<288x512xbf16, #tpu.memory_space<vmem>>, vector<32x256xbf16>
    tpu.vector_store %arg17[%c128_154, %c0_155], %268 {strides = array<i32>} : memref<288x512xbf16, #tpu.memory_space<vmem>>, vector<32x256xbf16>,
    %c255_i32_156 = arith.constant 255 : i32
    %270 = tpu.dynamic_rotate %239 by %c255_i32_156 dim 1 : vector<32x256xf32>, i32 -> vector<32x256xf32>
    %c5_157 = arith.constant 5 : index
    %c0_158 = arith.constant 0 : index
    %c0_159 = arith.constant 0 : index
    %271 = vector.load %arg3[%c5_157, %c0_158, %c0_159] : memref<9x1x256xf32, #tpu.memory_space<vmem>>, vector<1x1x256xf32>
    %272 = vector.shape_cast %271 : vector<1x1x256xf32> to vector<1x256xf32>
    %273 = vector.broadcast %272 : vector<1x256xf32> to vector<32x256xf32>
    %274 = arith.mulf %270, %273 : vector<32x256xf32>
    %275 = arith.truncf %274 : vector<32x256xf32> to vector<32x256xbf16>
    %c160_160 = arith.constant 160 : index
    %c0_161 = arith.constant 0 : index
    %276 = vector.load %arg17[%c160_160, %c0_161] : memref<288x512xbf16, #tpu.memory_space<vmem>>, vector<32x256xbf16>
    tpu.vector_store %arg17[%c160_160, %c0_161], %275 {strides = array<i32>} : memref<288x512xbf16, #tpu.memory_space<vmem>>, vector<32x256xbf16>,
    %c241_i32_162 = arith.constant 241 : i32
    %277 = tpu.dynamic_rotate %239 by %c241_i32_162 dim 1 : vector<32x256xf32>, i32 -> vector<32x256xf32>
    %c6_163 = arith.constant 6 : index
    %c0_164 = arith.constant 0 : index
    %c0_165 = arith.constant 0 : index
    %278 = vector.load %arg3[%c6_163, %c0_164, %c0_165] : memref<9x1x256xf32, #tpu.memory_space<vmem>>, vector<1x1x256xf32>
    %279 = vector.shape_cast %278 : vector<1x1x256xf32> to vector<1x256xf32>
    %280 = vector.broadcast %279 : vector<1x256xf32> to vector<32x256xf32>
    %281 = arith.mulf %277, %280 : vector<32x256xf32>
    %282 = arith.truncf %281 : vector<32x256xf32> to vector<32x256xbf16>
    %c192_166 = arith.constant 192 : index
    %c0_167 = arith.constant 0 : index
    %283 = vector.load %arg17[%c192_166, %c0_167] : memref<288x512xbf16, #tpu.memory_space<vmem>>, vector<32x256xbf16>
    tpu.vector_store %arg17[%c192_166, %c0_167], %282 {strides = array<i32>} : memref<288x512xbf16, #tpu.memory_space<vmem>>, vector<32x256xbf16>,
    %c240_i32_168 = arith.constant 240 : i32
    %284 = tpu.dynamic_rotate %239 by %c240_i32_168 dim 1 : vector<32x256xf32>, i32 -> vector<32x256xf32>
    %c7_169 = arith.constant 7 : index
    %c0_170 = arith.constant 0 : index
    %c0_171 = arith.constant 0 : index
    %285 = vector.load %arg3[%c7_169, %c0_170, %c0_171] : memref<9x1x256xf32, #tpu.memory_space<vmem>>, vector<1x1x256xf32>
    %286 = vector.shape_cast %285 : vector<1x1x256xf32> to vector<1x256xf32>
    %287 = vector.broadcast %286 : vector<1x256xf32> to vector<32x256xf32>
    %288 = arith.mulf %284, %287 : vector<32x256xf32>
    %289 = arith.truncf %288 : vector<32x256xf32> to vector<32x256xbf16>
    %c224_172 = arith.constant 224 : index
    %c0_173 = arith.constant 0 : index
    %290 = vector.load %arg17[%c224_172, %c0_173] : memref<288x512xbf16, #tpu.memory_space<vmem>>, vector<32x256xbf16>
    tpu.vector_store %arg17[%c224_172, %c0_173], %289 {strides = array<i32>} : memref<288x512xbf16, #tpu.memory_space<vmem>>, vector<32x256xbf16>,
    %c239_i32_174 = arith.constant 239 : i32
    %291 = tpu.dynamic_rotate %239 by %c239_i32_174 dim 1 : vector<32x256xf32>, i32 -> vector<32x256xf32>
    %c8_175 = arith.constant 8 : index
    %c0_176 = arith.constant 0 : index
    %c0_177 = arith.constant 0 : index
    %292 = vector.load %arg3[%c8_175, %c0_176, %c0_177] : memref<9x1x256xf32, #tpu.memory_space<vmem>>, vector<1x1x256xf32>
    %293 = vector.shape_cast %292 : vector<1x1x256xf32> to vector<1x256xf32>
    %294 = vector.broadcast %293 : vector<1x256xf32> to vector<32x256xf32>
    %295 = arith.mulf %291, %294 : vector<32x256xf32>
    %296 = arith.truncf %295 : vector<32x256xf32> to vector<32x256xbf16>
    %c256_178 = arith.constant 256 : index
    %c0_179 = arith.constant 0 : index
    %297 = vector.load %arg17[%c256_178, %c0_179] : memref<288x512xbf16, #tpu.memory_space<vmem>>, vector<32x256xbf16>
    tpu.vector_store %arg17[%c256_178, %c0_179], %296 {strides = array<i32>} : memref<288x512xbf16, #tpu.memory_space<vmem>>, vector<32x256xbf16>,
    %c1_180 = arith.constant 1 : index
    %c0_181 = arith.constant 0 : index
    %c0_182 = arith.constant 0 : index
    %298 = vector.load %arg2[%c1_180, %c0_181, %c0_182] : memref<2x1x64xf32, #tpu.memory_space<vmem>>, vector<1x1x64xf32>
    %299 = vector.shape_cast %298 : vector<1x1x64xf32> to vector<1x64xf32>
    %300 = arith.negf %299 : vector<1x64xf32>
    %301 = math.exp %300 : vector<1x64xf32>
    %cst_183 = arith.constant 1.000000e+00 : f32
    %302 = vector.broadcast %cst_183 : f32 to vector<1x64xf32>
    %303 = arith.addf %302, %301 : vector<1x64xf32>
    %304 = arith.divf %302, %303 : vector<1x64xf32>
    %305 = arith.mulf %299, %304 : vector<1x64xf32>
    %c0_184 = arith.constant 0 : index
    %c0_185 = arith.constant 0 : index
    %306 = vector.load %arg8[%c0_184, %c0_185] : memref<32x64xf32, #tpu.memory_space<vmem>>, vector<32x64xf32>
    %307 = vector.broadcast %305 : vector<1x64xf32> to vector<32x64xf32>
    %308 = arith.mulf %306, %307 : vector<32x64xf32>
    %cst_186 = arith.constant dense<0.000000e+00> : vector<32xf32>
    %309 = vector.multi_reduction <add>, %308, %cst_186 [1] : vector<32x64xf32> to vector<32xf32>
    %310 = vector.shape_cast %309 : vector<32xf32> to vector<32x1xf32>
    %c0_187 = arith.constant 0 : index
    %c0_188 = arith.constant 0 : index
    %311 = vector.load %arg9[%c0_187, %c0_188] : memref<32x1xf32, #tpu.memory_space<vmem>>, vector<32x1xf32>
    %312 = arith.addf %310, %311 : vector<32x1xf32>
    %313 = vector.extract_strided_slice %189 {offsets = [0, 256], sizes = [32, 256], strides = [1, 1]} : vector<32x512xf32> to vector<32x256xf32>
    %314 = vector.broadcast %312 : vector<32x1xf32> to vector<32x256xf32>
    %315 = arith.addf %313, %314 : vector<32x256xf32>
    %c0_189 = arith.constant 0 : index
    %c0_190 = arith.constant 0 : index
    %316 = vector.load %arg10[%c0_189, %c0_190] : memref<32x1xf32, #tpu.memory_space<vmem>>, vector<32x1xf32>
    %c0_191 = arith.constant 0 : index
    %c0_192 = arith.constant 0 : index
    %317 = vector.load %arg11[%c0_191, %c0_192] : memref<32x1xf32, #tpu.memory_space<vmem>>, vector<32x1xf32>
    %cst_193 = arith.constant dense<0.000000e+00> : vector<32xf32>
    %318 = vector.multi_reduction <add>, %315, %cst_193 [1] : vector<32x256xf32> to vector<32xf32>
    %319 = vector.shape_cast %318 : vector<32xf32> to vector<32x1xf32>
    %320 = arith.mulf %315, %315 : vector<32x256xf32>
    %cst_194 = arith.constant dense<0.000000e+00> : vector<32xf32>
    %321 = vector.multi_reduction <add>, %320, %cst_194 [1] : vector<32x256xf32> to vector<32xf32>
    %322 = vector.shape_cast %321 : vector<32xf32> to vector<32x1xf32>
    %cst_195 = arith.constant 3.906250e-03 : f32
    %323 = vector.broadcast %cst_195 : f32 to vector<32x1xf32>
    %324 = arith.mulf %319, %323 : vector<32x1xf32>
    %cst_196 = arith.constant 3.906250e-03 : f32
    %325 = vector.broadcast %cst_196 : f32 to vector<32x1xf32>
    %326 = arith.mulf %322, %325 : vector<32x1xf32>
    %327 = arith.mulf %324, %324 : vector<32x1xf32>
    %328 = arith.subf %326, %327 : vector<32x1xf32>
    %cst_197 = arith.constant 0.000000e+00 : f32
    %329 = vector.broadcast %cst_197 : f32 to vector<32x1xf32>
    %330 = arith.maximumf %328, %329 : vector<32x1xf32>
    %cst_198 = arith.constant 9.99999974E-6 : f32
    %331 = vector.broadcast %cst_198 : f32 to vector<32x1xf32>
    %332 = arith.addf %330, %331 : vector<32x1xf32>
    %333 = math.rsqrt %332 : vector<32x1xf32>
    %334 = vector.broadcast %324 : vector<32x1xf32> to vector<32x256xf32>
    %335 = arith.subf %315, %334 : vector<32x256xf32>
    %336 = vector.broadcast %333 : vector<32x1xf32> to vector<32x256xf32>
    %337 = arith.mulf %335, %336 : vector<32x256xf32>
    %338 = vector.broadcast %316 : vector<32x1xf32> to vector<32x256xf32>
    %339 = arith.mulf %337, %338 : vector<32x256xf32>
    %340 = vector.broadcast %317 : vector<32x1xf32> to vector<32x256xf32>
    %341 = arith.addf %339, %340 : vector<32x256xf32>
    %342 = arith.negf %341 : vector<32x256xf32>
    %343 = math.exp %342 : vector<32x256xf32>
    %cst_199 = arith.constant 1.000000e+00 : f32
    %344 = vector.broadcast %cst_199 : f32 to vector<32x256xf32>
    %345 = arith.addf %344, %343 : vector<32x256xf32>
    %346 = arith.divf %344, %345 : vector<32x256xf32>
    %347 = arith.mulf %341, %346 : vector<32x256xf32>
    %c17_i32_200 = arith.constant 17 : i32
    %348 = tpu.dynamic_rotate %347 by %c17_i32_200 dim 1 : vector<32x256xf32>, i32 -> vector<32x256xf32>
    %c0_201 = arith.constant 0 : index
    %c0_202 = arith.constant 0 : index
    %c0_203 = arith.constant 0 : index
    %349 = vector.load %arg3[%c0_201, %c0_202, %c0_203] : memref<9x1x256xf32, #tpu.memory_space<vmem>>, vector<1x1x256xf32>
    %350 = vector.shape_cast %349 : vector<1x1x256xf32> to vector<1x256xf32>
    %351 = vector.broadcast %350 : vector<1x256xf32> to vector<32x256xf32>
    %352 = arith.mulf %348, %351 : vector<32x256xf32>
    %353 = arith.truncf %352 : vector<32x256xf32> to vector<32x256xbf16>
    %c0_204 = arith.constant 0 : index
    %c256_205 = arith.constant 256 : index
    %354 = vector.load %arg17[%c0_204, %c256_205] : memref<288x512xbf16, #tpu.memory_space<vmem>>, vector<32x256xbf16>
    tpu.vector_store %arg17[%c0_204, %c256_205], %353 {strides = array<i32>} : memref<288x512xbf16, #tpu.memory_space<vmem>>, vector<32x256xbf16>,
    %c16_i32_206 = arith.constant 16 : i32
    %355 = tpu.dynamic_rotate %347 by %c16_i32_206 dim 1 : vector<32x256xf32>, i32 -> vector<32x256xf32>
    %c1_207 = arith.constant 1 : index
    %c0_208 = arith.constant 0 : index
    %c0_209 = arith.constant 0 : index
    %356 = vector.load %arg3[%c1_207, %c0_208, %c0_209] : memref<9x1x256xf32, #tpu.memory_space<vmem>>, vector<1x1x256xf32>
    %357 = vector.shape_cast %356 : vector<1x1x256xf32> to vector<1x256xf32>
    %358 = vector.broadcast %357 : vector<1x256xf32> to vector<32x256xf32>
    %359 = arith.mulf %355, %358 : vector<32x256xf32>
    %360 = arith.truncf %359 : vector<32x256xf32> to vector<32x256xbf16>
    %c32_210 = arith.constant 32 : index
    %c256_211 = arith.constant 256 : index
    %361 = vector.load %arg17[%c32_210, %c256_211] : memref<288x512xbf16, #tpu.memory_space<vmem>>, vector<32x256xbf16>
    tpu.vector_store %arg17[%c32_210, %c256_211], %360 {strides = array<i32>} : memref<288x512xbf16, #tpu.memory_space<vmem>>, vector<32x256xbf16>,
    %c15_i32_212 = arith.constant 15 : i32
    %362 = tpu.dynamic_rotate %347 by %c15_i32_212 dim 1 : vector<32x256xf32>, i32 -> vector<32x256xf32>
    %c2_213 = arith.constant 2 : index
    %c0_214 = arith.constant 0 : index
    %c0_215 = arith.constant 0 : index
    %363 = vector.load %arg3[%c2_213, %c0_214, %c0_215] : memref<9x1x256xf32, #tpu.memory_space<vmem>>, vector<1x1x256xf32>
    %364 = vector.shape_cast %363 : vector<1x1x256xf32> to vector<1x256xf32>
    %365 = vector.broadcast %364 : vector<1x256xf32> to vector<32x256xf32>
    %366 = arith.mulf %362, %365 : vector<32x256xf32>
    %367 = arith.truncf %366 : vector<32x256xf32> to vector<32x256xbf16>
    %c64_216 = arith.constant 64 : index
    %c256_217 = arith.constant 256 : index
    %368 = vector.load %arg17[%c64_216, %c256_217] : memref<288x512xbf16, #tpu.memory_space<vmem>>, vector<32x256xbf16>
    tpu.vector_store %arg17[%c64_216, %c256_217], %367 {strides = array<i32>} : memref<288x512xbf16, #tpu.memory_space<vmem>>, vector<32x256xbf16>,
    %c1_i32_218 = arith.constant 1 : i32
    %369 = tpu.dynamic_rotate %347 by %c1_i32_218 dim 1 : vector<32x256xf32>, i32 -> vector<32x256xf32>
    %c3_219 = arith.constant 3 : index
    %c0_220 = arith.constant 0 : index
    %c0_221 = arith.constant 0 : index
    %370 = vector.load %arg3[%c3_219, %c0_220, %c0_221] : memref<9x1x256xf32, #tpu.memory_space<vmem>>, vector<1x1x256xf32>
    %371 = vector.shape_cast %370 : vector<1x1x256xf32> to vector<1x256xf32>
    %372 = vector.broadcast %371 : vector<1x256xf32> to vector<32x256xf32>
    %373 = arith.mulf %369, %372 : vector<32x256xf32>
    %374 = arith.truncf %373 : vector<32x256xf32> to vector<32x256xbf16>
    %c96_222 = arith.constant 96 : index
    %c256_223 = arith.constant 256 : index
    %375 = vector.load %arg17[%c96_222, %c256_223] : memref<288x512xbf16, #tpu.memory_space<vmem>>, vector<32x256xbf16>
    tpu.vector_store %arg17[%c96_222, %c256_223], %374 {strides = array<i32>} : memref<288x512xbf16, #tpu.memory_space<vmem>>, vector<32x256xbf16>,
    %376 = arith.truncf %347 : vector<32x256xf32> to vector<32x256xbf16>
    %c128_224 = arith.constant 128 : index
    %c256_225 = arith.constant 256 : index
    %377 = vector.load %arg17[%c128_224, %c256_225] : memref<288x512xbf16, #tpu.memory_space<vmem>>, vector<32x256xbf16>
    tpu.vector_store %arg17[%c128_224, %c256_225], %376 {strides = array<i32>} : memref<288x512xbf16, #tpu.memory_space<vmem>>, vector<32x256xbf16>,
    %c255_i32_226 = arith.constant 255 : i32
    %378 = tpu.dynamic_rotate %347 by %c255_i32_226 dim 1 : vector<32x256xf32>, i32 -> vector<32x256xf32>
    %c5_227 = arith.constant 5 : index
    %c0_228 = arith.constant 0 : index
    %c0_229 = arith.constant 0 : index
    %379 = vector.load %arg3[%c5_227, %c0_228, %c0_229] : memref<9x1x256xf32, #tpu.memory_space<vmem>>, vector<1x1x256xf32>
    %380 = vector.shape_cast %379 : vector<1x1x256xf32> to vector<1x256xf32>
    %381 = vector.broadcast %380 : vector<1x256xf32> to vector<32x256xf32>
    %382 = arith.mulf %378, %381 : vector<32x256xf32>
    %383 = arith.truncf %382 : vector<32x256xf32> to vector<32x256xbf16>
    %c160_230 = arith.constant 160 : index
    %c256_231 = arith.constant 256 : index
    %384 = vector.load %arg17[%c160_230, %c256_231] : memref<288x512xbf16, #tpu.memory_space<vmem>>, vector<32x256xbf16>
    tpu.vector_store %arg17[%c160_230, %c256_231], %383 {strides = array<i32>} : memref<288x512xbf16, #tpu.memory_space<vmem>>, vector<32x256xbf16>,
    %c241_i32_232 = arith.constant 241 : i32
    %385 = tpu.dynamic_rotate %347 by %c241_i32_232 dim 1 : vector<32x256xf32>, i32 -> vector<32x256xf32>
    %c6_233 = arith.constant 6 : index
    %c0_234 = arith.constant 0 : index
    %c0_235 = arith.constant 0 : index
    %386 = vector.load %arg3[%c6_233, %c0_234, %c0_235] : memref<9x1x256xf32, #tpu.memory_space<vmem>>, vector<1x1x256xf32>
    %387 = vector.shape_cast %386 : vector<1x1x256xf32> to vector<1x256xf32>
    %388 = vector.broadcast %387 : vector<1x256xf32> to vector<32x256xf32>
    %389 = arith.mulf %385, %388 : vector<32x256xf32>
    %390 = arith.truncf %389 : vector<32x256xf32> to vector<32x256xbf16>
    %c192_236 = arith.constant 192 : index
    %c256_237 = arith.constant 256 : index
    %391 = vector.load %arg17[%c192_236, %c256_237] : memref<288x512xbf16, #tpu.memory_space<vmem>>, vector<32x256xbf16>
    tpu.vector_store %arg17[%c192_236, %c256_237], %390 {strides = array<i32>} : memref<288x512xbf16, #tpu.memory_space<vmem>>, vector<32x256xbf16>,
    %c240_i32_238 = arith.constant 240 : i32
    %392 = tpu.dynamic_rotate %347 by %c240_i32_238 dim 1 : vector<32x256xf32>, i32 -> vector<32x256xf32>
    %c7_239 = arith.constant 7 : index
    %c0_240 = arith.constant 0 : index
    %c0_241 = arith.constant 0 : index
    %393 = vector.load %arg3[%c7_239, %c0_240, %c0_241] : memref<9x1x256xf32, #tpu.memory_space<vmem>>, vector<1x1x256xf32>
    %394 = vector.shape_cast %393 : vector<1x1x256xf32> to vector<1x256xf32>
    %395 = vector.broadcast %394 : vector<1x256xf32> to vector<32x256xf32>
    %396 = arith.mulf %392, %395 : vector<32x256xf32>
    %397 = arith.truncf %396 : vector<32x256xf32> to vector<32x256xbf16>
    %c224_242 = arith.constant 224 : index
    %c256_243 = arith.constant 256 : index
    %398 = vector.load %arg17[%c224_242, %c256_243] : memref<288x512xbf16, #tpu.memory_space<vmem>>, vector<32x256xbf16>
    tpu.vector_store %arg17[%c224_242, %c256_243], %397 {strides = array<i32>} : memref<288x512xbf16, #tpu.memory_space<vmem>>, vector<32x256xbf16>,
    %c239_i32_244 = arith.constant 239 : i32
    %399 = tpu.dynamic_rotate %347 by %c239_i32_244 dim 1 : vector<32x256xf32>, i32 -> vector<32x256xf32>
    %c8_245 = arith.constant 8 : index
    %c0_246 = arith.constant 0 : index
    %c0_247 = arith.constant 0 : index
    %400 = vector.load %arg3[%c8_245, %c0_246, %c0_247] : memref<9x1x256xf32, #tpu.memory_space<vmem>>, vector<1x1x256xf32>
    %401 = vector.shape_cast %400 : vector<1x1x256xf32> to vector<1x256xf32>
    %402 = vector.broadcast %401 : vector<1x256xf32> to vector<32x256xf32>
    %403 = arith.mulf %399, %402 : vector<32x256xf32>
    %404 = arith.truncf %403 : vector<32x256xf32> to vector<32x256xbf16>
    %c256_248 = arith.constant 256 : index
    %c256_249 = arith.constant 256 : index
    %405 = vector.load %arg17[%c256_248, %c256_249] : memref<288x512xbf16, #tpu.memory_space<vmem>>, vector<32x256xbf16>
    tpu.vector_store %arg17[%c256_248, %c256_249], %404 {strides = array<i32>} : memref<288x512xbf16, #tpu.memory_space<vmem>>, vector<32x256xbf16>,
    %c0_250 = arith.constant 0 : index
    %c0_251 = arith.constant 0 : index
    %406 = vector.load %arg12[%c0_250, %c0_251] : memref<32x288xbf16, #tpu.memory_space<vmem>>, vector<32x288xbf16>
    %c0_252 = arith.constant 0 : index
    %c0_253 = arith.constant 0 : index
    %407 = vector.load %arg17[%c0_252, %c0_253] : memref<288x512xbf16, #tpu.memory_space<vmem>>, vector<288x512xbf16>
    %cst_254 = arith.constant dense<0.000000e+00> : vector<32x512xf32>
    %408 = tpu.matmul %406, %407, %cst_254 {dimension_numbers = #tpu.dot_dimension_numbers<[1], [0], [0], [1], [0, 0, 1, 1], [], []>} : vector<32x288xbf16>, vector<288x512xbf16>, vector<32x512xf32> -> vector<32x512xf32>
    %c0_255 = arith.constant 0 : index
    %c0_256 = arith.constant 0 : index
    %409 = vector.load %arg13[%c0_255, %c0_256] : memref<32x1xf32, #tpu.memory_space<vmem>>, vector<32x1xf32>
    %410 = vector.broadcast %409 : vector<32x1xf32> to vector<32x512xf32>
    %411 = arith.addf %408, %410 : vector<32x512xf32>
    %c0_257 = arith.constant 0 : index
    %c0_258 = arith.constant 0 : index
    %c0_259 = arith.constant 0 : index
    %412 = vector.load %arg1[%c0_257, %c0_258, %c0_259] : memref<2x32x256xf32, #tpu.memory_space<vmem>>, vector<1x32x256xf32>
    %413 = vector.shape_cast %412 : vector<1x32x256xf32> to vector<32x256xf32>
    %414 = vector.extract_strided_slice %411 {offsets = [0, 0], sizes = [32, 256], strides = [1, 1]} : vector<32x512xf32> to vector<32x256xf32>
    %415 = arith.addf %413, %414 : vector<32x256xf32>
    %c0_260 = arith.constant 0 : index
    %c0_261 = arith.constant 0 : index
    %c0_262 = arith.constant 0 : index
    %416 = vector.load %arg16[%c0_260, %c0_261, %c0_262] : memref<2x32x256xf32, #tpu.memory_space<vmem>>, vector<1x32x256xf32>
    %417 = vector.shape_cast %416 : vector<1x32x256xf32> to vector<32x256xf32>
    %418 = vector.shape_cast %415 : vector<32x256xf32> to vector<1x32x256xf32>
    tpu.vector_store %arg16[%c0_260, %c0_261, %c0_262], %418 {strides = array<i32>} : memref<2x32x256xf32, #tpu.memory_space<vmem>>, vector<1x32x256xf32>,
    %c1_263 = arith.constant 1 : index
    %c0_264 = arith.constant 0 : index
    %c0_265 = arith.constant 0 : index
    %419 = vector.load %arg1[%c1_263, %c0_264, %c0_265] : memref<2x32x256xf32, #tpu.memory_space<vmem>>, vector<1x32x256xf32>
    %420 = vector.shape_cast %419 : vector<1x32x256xf32> to vector<32x256xf32>
    %421 = vector.extract_strided_slice %411 {offsets = [0, 256], sizes = [32, 256], strides = [1, 1]} : vector<32x512xf32> to vector<32x256xf32>
    %422 = arith.addf %420, %421 : vector<32x256xf32>
    %c1_266 = arith.constant 1 : index
    %c0_267 = arith.constant 0 : index
    %c0_268 = arith.constant 0 : index
    %423 = vector.load %arg16[%c1_266, %c0_267, %c0_268] : memref<2x32x256xf32, #tpu.memory_space<vmem>>, vector<1x32x256xf32>
    %424 = vector.shape_cast %423 : vector<1x32x256xf32> to vector<32x256xf32>
    %425 = vector.shape_cast %422 : vector<32x256xf32> to vector<1x32x256xf32>
    tpu.vector_store %arg16[%c1_266, %c0_267, %c0_268], %425 {strides = array<i32>} : memref<2x32x256xf32, #tpu.memory_space<vmem>>, vector<1x32x256xf32>,
    return
  }
  func.func @transform_0(%arg0: i32) -> (i32, i32, i32) {
    %c0_i32 = arith.constant 0 : i32
    %c0_i32_0 = arith.constant 0 : i32
    %c0_i32_1 = arith.constant 0 : i32
    return %arg0, %c0_i32, %c0_i32_0 : i32, i32, i32
  }
  func.func @transform_1(%arg0: i32) -> (i32, i32, i32) {
    %c0_i32 = arith.constant 0 : i32
    %c0_i32_0 = arith.constant 0 : i32
    %c0_i32_1 = arith.constant 0 : i32
    return %arg0, %c0_i32, %c0_i32_0 : i32, i32, i32
  }
  func.func @transform_2(%arg0: i32) -> (i32, i32, i32) {
    %c0_i32 = arith.constant 0 : i32
    %c0_i32_0 = arith.constant 0 : i32
    %c0_i32_1 = arith.constant 0 : i32
    %c0_i32_2 = arith.constant 0 : i32
    return %c0_i32, %c0_i32_0, %c0_i32_1 : i32, i32, i32
  }
  func.func @transform_3(%arg0: i32) -> (i32, i32) {
    %c0_i32 = arith.constant 0 : i32
    %c0_i32_0 = arith.constant 0 : i32
    %c0_i32_1 = arith.constant 0 : i32
    return %c0_i32, %c0_i32_0 : i32, i32
  }
  func.func @transform_4(%arg0: i32) -> (i32, i32) {
    %c0_i32 = arith.constant 0 : i32
    %c0_i32_0 = arith.constant 0 : i32
    %c0_i32_1 = arith.constant 0 : i32
    return %c0_i32, %c0_i32_0 : i32, i32
  }
  func.func @transform_5(%arg0: i32) -> (i32, i32) {
    %c0_i32 = arith.constant 0 : i32
    %c0_i32_0 = arith.constant 0 : i32
    %c0_i32_1 = arith.constant 0 : i32
    return %c0_i32, %c0_i32_0 : i32, i32
  }
  func.func @transform_6(%arg0: i32) -> (i32, i32) {
    %c0_i32 = arith.constant 0 : i32
    %c0_i32_0 = arith.constant 0 : i32
    %c0_i32_1 = arith.constant 0 : i32
    return %c0_i32, %c0_i32_0 : i32, i32
  }
  func.func @transform_7(%arg0: i32) -> (i32, i32) {
    %c0_i32 = arith.constant 0 : i32
    %c0_i32_0 = arith.constant 0 : i32
    %c0_i32_1 = arith.constant 0 : i32
    return %c0_i32, %c0_i32_0 : i32, i32
  }
  func.func @transform_8(%arg0: i32) -> (i32, i32) {
    %c0_i32 = arith.constant 0 : i32
    %c0_i32_0 = arith.constant 0 : i32
    %c0_i32_1 = arith.constant 0 : i32
    return %c0_i32, %c0_i32_0 : i32, i32
  }
  func.func @transform_9(%arg0: i32) -> (i32, i32) {
    %c0_i32 = arith.constant 0 : i32
    %c0_i32_0 = arith.constant 0 : i32
    %c0_i32_1 = arith.constant 0 : i32
    return %c0_i32, %c0_i32_0 : i32, i32
  }
  func.func @transform_10(%arg0: i32) -> (i32, i32) {
    %c0_i32 = arith.constant 0 : i32
    %c0_i32_0 = arith.constant 0 : i32
    %c0_i32_1 = arith.constant 0 : i32
    return %c0_i32, %c0_i32_0 : i32, i32
  }
  func.func @transform_11(%arg0: i32) -> (i32, i32) {
    %c0_i32 = arith.constant 0 : i32
    %c0_i32_0 = arith.constant 0 : i32
    %c0_i32_1 = arith.constant 0 : i32
    return %c0_i32, %c0_i32_0 : i32, i32
  }
  func.func @transform_12(%arg0: i32) -> (i32, i32) {
    %c0_i32 = arith.constant 0 : i32
    %c0_i32_0 = arith.constant 0 : i32
    %c0_i32_1 = arith.constant 0 : i32
    return %c0_i32, %c0_i32_0 : i32, i32
  }
  func.func @transform_13(%arg0: i32) -> (i32, i32) {
    %c0_i32 = arith.constant 0 : i32
    %c0_i32_0 = arith.constant 0 : i32
    %c0_i32_1 = arith.constant 0 : i32
    return %c0_i32, %c0_i32_0 : i32, i32
  }
  func.func @transform_14(%arg0: i32) -> (i32, i32) {
    %c0_i32 = arith.constant 0 : i32
    %c0_i32_0 = arith.constant 0 : i32
    %c0_i32_1 = arith.constant 0 : i32
    return %c0_i32, %c0_i32_0 : i32, i32
  }
  func.func @transform_15(%arg0: i32) -> (i32, i32, i32) {
    %c0_i32 = arith.constant 0 : i32
    %c0_i32_0 = arith.constant 0 : i32
    %c0_i32_1 = arith.constant 0 : i32
    return %arg0, %c0_i32, %c0_i32_0 : i32, i32, i32
  }
}

</mosaic_0001>

<bundles_post_ra>
// kernel: tpu_custom_call.1
= control target key start
LH: loop header
LB: loop body
LE: loop exit
PB: predicated region body
PF: predicated region fallthrough
CT: control target
= control target key end

     0   :  { %s9609_s0 = inlined_call_operand.hbm [shape: f32[4,32,256], index: 0, kind: input, shape index: {}]   ;;  %s9610_s1 = inlined_call_operand.vmem [shape: f32[4,1,64], index: 1, kind: input, shape index: {}]   ;;  %s9611_s2 = inlined_call_operand.vmem [shape: f32[9,1,256], index: 2, kind: input, shape index: {}]   ;;  %s9612_s3 = inlined_call_operand.vmem [shape: f32[32,1], index: 3, kind: input, shape index: {}]   ;;  %s9613_s4 = inlined_call_operand.vmem [shape: f32[32,1], index: 4, kind: input, shape index: {}]   ;;  %s9614_s5 = inlined_call_operand.vmem [shape: bf16[32,288], index: 5, kind: input, shape index: {}]   ;;  %s9615_s6 = inlined_call_operand.vmem [shape: f32[32,1], index: 6, kind: input, shape index: {}]   ;;  %s9616_s7 = inlined_call_operand.vmem [shape: f32[32,64], index: 7, kind: input, shape index: {}]   ;;  %s9617_s8 = inlined_call_operand.vmem [shape: f32[32,1], index: 8, kind: input, shape index: {}]   ;;  %s9618_s9 = inlined_call_operand.vmem [shape: f32[32,1], index: 9, kind: input, shape index: {}]   ;;  %s9619_s10 = inlined_call_operand.vmem [shape: f32[32,1], index: 10, kind: input, shape index: {}]   ;;  %s9620_s11 = inlined_call_operand.vmem [shape: bf16[32,288], index: 11, kind: input, shape index: {}]   ;;  %s9621_s12 = inlined_call_operand.vmem [shape: f32[32,1], index: 12, kind: input, shape index: {}]   ;;  %s9622_s13 = inlined_call_operand.vmem [shape: f32[32,32], index: 13, kind: input, shape index: {}]   ;;  %s9623_s14 = inlined_call_operand.vmem [shape: f32[32,32], index: 14, kind: input, shape index: {}]   ;;  %s9624_s15 = inlined_call_operand.hbm [shape: f32[4,32,256], index: 15, kind: output, shape index: {}]  }
   0x1   :  { %9656 = sst [smem:[#allocation15_spill]] %s9609_s0 }
   0x2   :  { %9657 = sst [smem:[#allocation16_spill]] %s9610_s1 }
   0x3   :  { %9658 = sst [smem:[#allocation17_spill]] %s9612_s3 }
   0x4   :  { %9659 = sst [smem:[#allocation18_spill]] %s9624_s15 }
   0x5   :  { %20 = vsyncpa [#allocation4], 0 }
   0x6   :  { %22 = vsyncpa [#allocation4 + $0x1], 0 }
   0x7   :  { %23 = vsyncpa [#allocation5], 0 }
   0x8   :  { %25 = vsyncpa [#allocation5 + $0x1], 0  ;;  %s6518_s18 = smov 0   ;;  %s6520_s19 = smov 0  }
   0x9   :  { %s6522_s20 = smov 0   ;;  %s6524_s21 = smov 0  }
   0xa LB: > { %9660 = sst [smem:[#allocation9_spill]] %s6412_s18  ;;  %s6539_s13 = sadd.s32 4294967295, %s6424_s21   ;;  %s6424_s21 = sphi %s6524_s21, %s9842_s21   ;;  %s6420_s20 = sphi %s6522_s20, %s9844_s20   ;;  %s6416_s19 = sphi %s6520_s19, %s9846_s19   ;;  %s6412_s18 = sphi %s6518_s18, %s9845_s18  }
   0xb   : > { %9661 = sst [smem:[#allocation10_spill]] %s6420_s20  ;;  %s5187_s14 = sadd.s32 4294967294, %s6424_s21  }
   0xc   : > { %s6543_s22 = sadd.s32 1, %s6424_s21   ;;  %s38_s23 = sadd.s32 1, %s6420_s20 }
   0xd   : > { %9662 = sst [smem:[#allocation11_spill]] %s6543_s22  ;;  %s35_s24 = ssub.s32 %s6424_s21, %s6543_s22 }
   0xe   : > { %p45_p0 = scmp.ne.s32.totalorder %s6420_s20, %s6416_s19  ;;  %p36_p1 = scmp.eq.s32.totalorder %s35_s24, 0 }
   0xf   : > { %p46_p2 = scmp.eq.s32.totalorder %s6424_s21, 0  ;;  %p51_p3 = scmp.ne.s32.totalorder %s6416_s19, %s6412_s18 }
  0x10   : > { %p52_p4 = scmp.eq.s32.totalorder %s6539_s13, 0  ;;  %p374_p7 = scmp.eq.s32.totalorder %s6539_s13, 1 }
  0x11   : > { %s6555_s25 = scalar_select %p36_p1, %s6420_s20, %s38_s23  }
  0x12   : > { %p6557_p5 = por %p46_p2, %p45_p0  ;;  %p6561_p6 = por %p52_p4, %p51_p3 }
  0x13   : > { %9663 = sst [smem:[#allocation12_spill]] %s6555_s25  ;;  %p380_p8 = scmp.eq.s32.totalorder %s5187_s14, 1 }
  0x14   : > { %p6111_p10 = scmp.lt.s32.totalorder %s6424_s21, 2  ;;  %p6568_p11 = por %p374_p7, %p45_p0 }
  0x15   : > { %p6572_p12 = por %p380_p8, %p51_p3  ;;  %s439_s30 = sand.u32 1, %s6420_s20  }
  0x16   : > { %s9666_s28 = scalar_select %p6568_p11, 1, 0 }
  0x17   : > { %s9668_s29 = scalar_select %p6572_p12, 1, 0 }
  0x18   : > { %9667 = sst [smem:[#allocation13_spill]] %s9666_s28  ;;  %s5932_s16 = sshll.u32 %s6424_s21, 7 }
  0x19   : > { %9669 = sst [smem:[#allocation14_spill]] %s9668_s29  ;;  %s5190_s17 = sshll.u32 %s439_s30, 7 }
  0x1a   : > { %s9670_s0 = sld [smem:[#allocation15_spill]]  ;;  %s443_s14 = scalar_lea.vmem [#allocation3], %s5190_s17 }
  0x1b   : > { %s452_s18 = sshll.u32 %s443_s14, 4  ;;  %p6583_p13 = pnand %p6111_p10, %p6557_p5  ;;  %s453_s18 = int_to_ptr.vmem [resolvable:$true] %s452_s18 }
  0x1c   : > { %p5194_p0 = scmp.ge.s32.totalorder %s6424_s21, 1  ;;  %p468_p1 = scmp.lt.s32.totalorder %s6424_s21, 3 }
  0x1d   : > { %s440_s20 = scalar_lea.sflag [#allocation4], %s439_s30  ;;  %p6332_p3 = pneg %p6583_p13 }
  0x20   : > { %s449_s25 = scalar_lea.hbm %s9670_s0, %s5932_s16  ;;  %s6335_s26 = scalar_lea.hbm %s9670_s0, 256 }
  0x21   : > { %s450_s22 = sshll.u32 %s449_s25, 4  ;;  %s451_s22 = int_to_ptr.hbm [resolvable:$true] %s450_s22 }
  0x22   : > { %s6328_s29 = sshra.s32 %s451_s22, 4  ;;  %s6329_s29 = int_to_ptr.hbm [resolvable:$true] %s6328_s29 }
  0x23   : > { %s6330_s28 = scalar_lea.hbm %s6329_s29, 128  ;;  %p6336_p5 = scmp.lt.s32.totalorder %s6329_s29, %s9670_s0 }
  0x24   : > { %p6331_p2 = scmp.ne.s32.totalorder %s6329_s29, %s6330_s28  ;;  %p6337_p8 = scmp.lt.s32.totalorder %s6335_s26, %s6330_s28 }
  0x26   : > { %p6333_p4 = pnand %p6332_p3, %p6331_p2  ;;  %p6338_p10 = por %p6337_p8, %p6336_p5 }
  0x28   : > { %p6334_p7 = pneg %p6333_p4 }
  0x2a   : > { %p6339_p9 = pnand %p6338_p10, %p6334_p7 }
  0x2c   : > { %6342 = shalt.err (!%p6339_p9)
}
  0x2d   : > { %s6426_s30 = smov 256   ;;  %s6427_s24 = smov 16  }
  0x2e   : > { %6106 = dma.hbm_to_vmem [thread:$0]  (!%p6583_p13), %s451_s22, 2048, %s453_s18, %s440_s20, %s6426_s30, %s6426_s30, %s6427_s24  }
  0x2f   : > { %p469_p2 = pnand %p5194_p0, %p468_p1 }
  0x30   : > { %s6604_s14 = sand.u32 (!%p469_p2), 1, %s6416_s19  }
  0x31   : > { %472 = sbr.rel (%p469_p2) target bundleno = 2306 (0x902), region = 80  ;;  %s9633_s28 = sshll.u32 (!%p469_p2), %s6604_s14, 7 }
  0x32   : > { %s475_s29 = scalar_lea.sflag (!%p469_p2), [#allocation4], %s6604_s14  ;;  %s6610_s25 = scalar_lea.vmem (!%p469_p2), [#allocation3], %s9633_s28 }
  0x36   : > { %6403 = dma.done.wait (%p6561_p6), %s475_s29, 2048  }
  0x37   : > { %6405 = vsyncadd (%p6561_p6), %s475_s29, 4294965248  ;;  %v6428_v0 = vmov 0   ;;  %v6617_v1 = vld [vmem:[%s6610_s25 + $0x20] sm:$0xff]  ;;  %v6620_v2 = vld [vmem:[%s6610_s25 + $0x28] sm:$0xff]  ;;  %s9672_s3 = sld [smem:[#allocation17_spill]]  ;;  %s9650_s27 = smov 17  }
  0x38   : > { %6157 = vset.pattern.permute.xlu2 %v6428_v0  ;;  %6158 = vset.pattern.permute.xlu0 %v6428_v0  ;;  %v6623_v3 = vld [vmem:[%s6610_s25] sm:$0xff]  ;;  %v560_v4 = vadd.f32 %v6620_v2, %v6617_v1  ;;  %v6628_v5 = vld [vmem:[%s6610_s25 + $0x8] sm:$0xff]  ;;  %v6637_v9 = vld [vmem:[%s6610_s25 + $0x10] sm:$0xff]  ;;  %v570_v21 = vmul.f32 %v6617_v1, %v6617_v1  ;;  %v571_v22 = vmul.f32 %v6620_v2, %v6620_v2  ;;  %s9654_s16 = smov 16   ;;  %s9648_s26 = smov 15  }
  0x39   : > { %6159 = vset.pattern.permute.xlu1 %v6428_v0  ;;  %v566_v6 = vmul.f32 %v6623_v3, %v6623_v3  ;;  %v554_v7 = vadd.f32 %v6628_v5, %v6623_v3  ;;  %v567_v8 = vmul.f32 %v6628_v5, %v6628_v5  ;;  %v6640_v10 = vld [vmem:[%s6610_s25 + $0x18] sm:$0xff]  ;;  %v6643_v12 = vld [vmem:[%s6610_s25 + $0x30] sm:$0xff]  ;;  %v568_v14 = vmul.f32 %v6637_v9, %v6637_v9  ;;  %v551_v29 = vld [vmem:[%s9613_s4 + $0x8] sm:$0xff]  ;;  %s9646_s17 = smov 1   ;;  %s9642_s23 = smov 127  }
  0x3a   : > { %561 = vadd.xlane.f32.xlu1 %v560_v4  ;;  %v6646_v13 = vld [vmem:[%s6610_s25 + $0x38] sm:$0xff]  ;;  %v569_v15 = vmul.f32 %v6640_v10, %v6640_v10  ;;  %v557_v17 = vadd.f32 %v6640_v10, %v6637_v9  ;;  %v572_v19 = vmul.f32 %v6643_v12, %v6643_v12  ;;  %v580_v24 = vadd.f32 %v571_v22, %v570_v21  ;;  %v550_v30 = vld [vmem:[%s9613_s4] sm:$0xff]  ;;  %v552_v32 = vld [vmem:[%s9613_s4 + $0x10] sm:$0xff]  ;;  %s9640_s29 = smov 113   ;;  %s9644_s15 = smov 112  }
  0x3b   : > { %555 = vadd.xlane.f32.xlu0 %v554_v7  ;;  %v574_v11 = vadd.f32 %v567_v8, %v566_v6  ;;  %v563_v16 = vadd.f32 %v6646_v13, %v6643_v12  ;;  %v573_v20 = vmul.f32 %v6646_v13, %v6646_v13  ;;  %v553_v31 = vld [vmem:[%s9613_s4 + $0x18] sm:$0xff]  ;;  %s9634_s22 = smov 111   ;;  %s5197_s18 = sshll.u32 %s6539_s13, 1 }
  0x3c   : > { %v577_v18 = vadd.f32 %v569_v15, %v568_v14  ;;  %p532_p6 = scmp.lt.s32.totalorder %s5197_s18, 3  ;;  %s9687_s1 = sld [smem:[#allocation16_spill]] }
  0x3d   : > { %575 = vadd.xlane.f32.xlu2 %v574_v11  ;;  %v583_v23 = vadd.f32 %v573_v20, %v572_v19  ;;  %v546_v25 = vld [vmem:[%s9672_s3] sm:$0xff]  ;;  %v547_v26 = vld [vmem:[%s9672_s3 + $0x8] sm:$0xff]  ;;  %v548_v27 = vld [vmem:[%s9672_s3 + $0x10] sm:$0xff]  ;;  %s9732_s24 = smov 127   ;;  %s9750_s0 = smov 112  }
  0x3e   : > { %v549_v28 = vld [vmem:[%s9672_s3 + $0x18] sm:$0xff]  ;;  %s9848_s18 = smov (!%p532_p6, %s5197_s18), 3  ;;  %s6090_s30 = sshll.u32 %s6539_s13, 7 }
  0x3f   : > { %s5089_s13 = scalar_lea.sflag [#allocation5], %s6604_s14 }
  0x42   : > { %564 = vadd.xlane.f32.xlu1 %v563_v16 }
  0x43   : > { %558 = vadd.xlane.f32.xlu0 %v557_v17 }
  0x45   : > { %578 = vadd.xlane.f32.xlu2 %v577_v18 }
  0x4a   : > { %584 = vadd.xlane.f32.xlu1 %v583_v23 }
  0x4b   : > { %581 = vadd.xlane.f32.xlu0 %v580_v24 }
  0x5d   : > { %668 = vperm.xlu2 %6157, %v546_v25  }
  0x5f   : > { %673 = vperm.xlu0 %6158, %v547_v26  }
  0x63   : > { %678 = vperm.xlu1 %6159, %v548_v27  }
  0x65   : > { %683 = vperm.xlu2 %6157, %v549_v28  }
  0x6b   : > { %701 = vperm.xlu1 %6159, %v551_v29  }
  0x6d   : > { %696 = vperm.xlu2 %6157, %v550_v30  }
  0x73   : > { %711 = vperm.xlu1 %6159, %v553_v31  }
  0x75   : > { %706 = vperm.xlu2 %6157, %v552_v32  }
  0xad   : > { %v562_v33 = vpop.xlane.xlu1 %561 }
  0xae   : > { %v556_v34 = vpop.xlane.xlu0 %555  ;;  %v6694_v49 = vmul.f32 0.00390625, %v562_v33 }
  0xaf   : > { %v586_v35 = vmul.f32 0.00390625, %v556_v34 }
  0xb0   : > { %v576_v36 = vpop.xlane.xlu2 %575  ;;  %v596_v57 = vmul.f32 %v6694_v49, %v6694_v49 }
  0xb1   : > { %v590_v37 = vmul.f32 0.00390625, %v576_v36  ;;  %v594_v38 = vmul.f32 %v586_v35, %v586_v35  ;;  %v650_v18 = vsub.f32 %v6623_v3, %v586_v35  ;;  %v651_v19 = vsub.f32 %v6628_v5, %v586_v35 }
  0xb3   : > { %v598_v39 = vsub.f32 %v590_v37, %v594_v38 }
  0xb5   : > { %v602_v40 = vmax.f32 %v598_v39, 0.0  ;;  %v565_v41 = vpop.xlane.xlu1 %564 }
  0xb6   : > { %v559_v42 = vpop.xlane.xlu0 %558  ;;  %v6690_v46 = vmul.f32 0.00390625, %v565_v41 }
  0xb7   : > { %v606_v43 = vadd.f32 1e-05, %v602_v40  ;;  %v6688_v44 = vmul.f32 0.00390625, %v559_v42 }
  0xb8   : > { %v579_v45 = vpop.xlane.xlu2 %578  ;;  %v597_v53 = vmul.f32 %v6690_v46, %v6690_v46 }
  0xb9   : > { %6160 = vrsqrt.f32 %v606_v43  ;;  %v591_v47 = vmul.f32 0.00390625, %v579_v45  ;;  %v595_v48 = vmul.f32 %v6688_v44, %v6688_v44  ;;  %vm616_vm0 = vweird.f32 %v606_v43 }
  0xbb   : > { %v599_v50 = vsub.f32 %v591_v47, %v595_v48  ;;  %v654_v47 = vsub.f32 %v6617_v1, %v6694_v49  ;;  %v655_v48 = vsub.f32 %v6620_v2, %v6694_v49 }
  0xbd   : > { %v585_v51 = vpop.xlane.xlu1 %584  ;;  %v603_v52 = vmax.f32 %v599_v50, 0.0  ;;  %v652_v50 = vsub.f32 %v6637_v9, %v6688_v44 }
  0xbe   : > { %v593_v54 = vmul.f32 0.00390625, %v585_v51  ;;  %v582_v55 = vpop.xlane.xlu0 %581  ;;  %v653_v51 = vsub.f32 %v6640_v10, %v6688_v44 }
  0xbf   : > { %v6161_v56 = vpop.eup %6160  ;;  %v592_v58 = vmul.f32 0.00390625, %v582_v55  ;;  %v607_v60 = vadd.f32 1e-05, %v603_v52 }
  0xc0   : > { %v611_v59 = vmul.f32 %v6161_v56, %v606_v43  ;;  %v601_v61 = vsub.f32 %v593_v54, %v597_v53  ;;  %v669_v62 = vpop.permute.xlu2 %668  ;;  %vm617_vm1 = vweird.f32 %v6161_v56 }
  0xc1   : > { %v600_v63 = vsub.f32 %v592_v58, %v596_v57  ;;  %6162 = vrsqrt.f32 %v607_v60  ;;  %vm618_vm2 = vmor %vm616_vm0, %vm617_vm1  ;;  %vm626_vm3 = vweird.f32 %v607_v60 }
  0xc2   : > { %v612_v0 = vmul.f32 %v6161_v56, %v611_v59  ;;  %v605_v4 = vmax.f32 %v601_v61, 0.0 }
  0xc3   : > { %v604_v6 = vmax.f32 %v600_v63, 0.0 }
  0xc4   : > { %v613_v7 = vmul.f32 0.5, %v612_v0  ;;  %v6700_v8 = vadd.f32 1e-05, %v605_v4  ;;  %v656_v4 = vsub.f32 %v6643_v12, %v6690_v46 }
  0xc5   : > { %v608_v11 = vadd.f32 1e-05, %v604_v6 }
  0xc6   : > { %v614_v14 = vsub.f32 1.5, %v613_v7  ;;  %6164 = vrsqrt.f32 %v6700_v8  ;;  %vm646_vm10 = vweird.f32 %v6700_v8 }
  0xc7   : > { %6166 = vrsqrt.f32 %v608_v11  ;;  %v6163_v15 = vpop.eup %6162  ;;  %vm636_vm6 = vweird.f32 %v608_v11 }
  0xc8   : > { %v615_v16 = vmul.f32 %v6161_v56, %v614_v14  ;;  %v6703_v17 = vpop.permute.xlu2 %683  ;;  %v621_v20 = vmul.f32 %v6163_v15, %v607_v60  ;;  %vm627_vm4 = vweird.f32 %v6163_v15 }
  0xc9   : > { %vm628_vm7 = vmor %vm626_vm3, %vm627_vm4 }
  0xca   : > { %v619_v21 = vsel %vm618_vm2, %v6161_v56, %v615_v16  ;;  %v622_v22 = vmul.f32 %v6163_v15, %v621_v20 }
  0xcb   : > { %v658_v23 = vmul.f32 %v650_v18, %v619_v21  ;;  %v659_v24 = vmul.f32 %v651_v19, %v619_v21 }
  0xcc   : > { %v6165_v25 = vpop.eup %6164  ;;  %v623_v27 = vmul.f32 0.5, %v622_v22 }
  0xcd   : > { %v6167_v26 = vpop.eup %6166  ;;  %v641_v28 = vmul.f32 %v6165_v25, %v6700_v8  ;;  %v686_v31 = vmul.f32 %v669_v62, %v658_v23  ;;  %v687_v32 = vmul.f32 %v669_v62, %v659_v24  ;;  %vm647_vm9 = vweird.f32 %v6165_v25 }
  0xce   : > { %v631_v29 = vmul.f32 %v6167_v26, %v608_v11  ;;  %v624_v33 = vsub.f32 1.5, %v623_v27  ;;  %vm637_vm5 = vweird.f32 %v6167_v26  ;;  %vm648_vm11 = vmor %vm646_vm10, %vm647_vm9  ;;  %v657_v8 = vsub.f32 %v6646_v13, %v6690_v46 }
  0xcf   : > { %v642_v30 = vmul.f32 %v6165_v25, %v641_v28  ;;  %vm638_vm8 = vmor %vm636_vm6, %vm637_vm5 }
  0xd0   : > { %v632_v34 = vmul.f32 %v6167_v26, %v631_v29  ;;  %v697_v3 = vpop.permute.xlu2 %696  ;;  %v625_v41 = vmul.f32 %v6163_v15, %v624_v33 }
  0xd1   : > { %v643_v36 = vmul.f32 0.5, %v642_v30  ;;  %v6708_v5 = vadd.f32 %v697_v3, %v686_v31  ;;  %v6710_v35 = vadd.f32 %v697_v3, %v687_v32  ;;  %v674_v9 = vpop.permute.xlu0 %673 }
  0xd2   : > { %v633_v37 = vmul.f32 0.5, %v632_v34  ;;  %v629_v52 = vsel %vm628_vm7, %v6163_v15, %v625_v41 }
  0xd3   : > { %v5198_v38 = vmul.f32 -1.442695, %v6708_v5  ;;  %v5199_v39 = vmul.f32 -1.442695, %v6710_v35  ;;  %v644_v42 = vsub.f32 1.5, %v643_v36  ;;  %v660_v1 = vmul.f32 %v652_v50, %v629_v52 }
  0xd4   : > { %v634_v40 = vsub.f32 1.5, %v633_v37  ;;  %v661_v58 = vmul.f32 %v653_v51, %v629_v52 }
  0xd5   : > { %6168 = vpow2.f32 %v5198_v38  ;;  %v679_v43 = vpop.permute.xlu1 %678  ;;  %v645_v54 = vmul.f32 %v6165_v25, %v644_v42  ;;  %v688_v6 = vmul.f32 %v674_v9, %v660_v1 }
  0xd6   : > { %6170 = vpow2.f32 %v5199_v39  ;;  %v635_v45 = vmul.f32 %v6167_v26, %v634_v40  ;;  %v689_v7 = vmul.f32 %v674_v9, %v661_v58 }
  0xd7   : > { %v649_v10 = vsel %vm648_vm11, %v6165_v25, %v645_v54 }
  0xd8   : > { %v639_v53 = vsel %vm638_vm8, %v6167_v26, %v635_v45  ;;  %v707_v61 = vpop.permute.xlu2 %706  ;;  %v664_v11 = vmul.f32 %v656_v4, %v649_v10  ;;  %v665_v19 = vmul.f32 %v657_v8, %v649_v10 }
  0xd9   : > { %v662_v55 = vmul.f32 %v654_v47, %v639_v53  ;;  %v663_v56 = vmul.f32 %v655_v48, %v639_v53 }
  0xda   : > { %v692_v22 = vmul.f32 %v6703_v17, %v664_v11  ;;  %v693_v24 = vmul.f32 %v6703_v17, %v665_v19 }
  0xdb   : > { %v6169_v57 = vpop.eup %6168  ;;  %v690_v59 = vmul.f32 %v679_v43, %v662_v55  ;;  %v691_v2 = vmul.f32 %v679_v43, %v663_v56 }
  0xdc   : > { %v6171_v49 = vpop.eup %6170  ;;  %v6723_v60 = vadd.f32 1.0, %v6169_v57 }
  0xdd   : > { %v6725_v44 = vadd.f32 1.0, %v6171_v49  ;;  %v6727_v62 = vadd.f32 %v707_v61, %v690_v59  ;;  %v6729_v63 = vadd.f32 %v707_v61, %v691_v2  ;;  %v702_v0 = vpop.permute.xlu1 %701 }
  0xde   : > { %6172 = vrcp.f32 %v6723_v60  ;;  %v6739_v16 = vadd.f32 %v702_v0, %v688_v6  ;;  %v6741_v18 = vadd.f32 %v702_v0, %v689_v7  ;;  %v763_v28 = vand.u32 2147483647, %v6723_v60 }
  0xdf   : > { %6174 = vrcp.f32 %v6725_v44  ;;  %v5202_v14 = vmul.f32 -1.442695, %v6727_v62  ;;  %v5203_v15 = vmul.f32 -1.442695, %v6729_v63  ;;  %v765_v29 = vand.u32 2147483648, %v6723_v60 }
  0xe0   : > { %v5200_v12 = vmul.f32 -1.442695, %v6739_v16  ;;  %v5201_v20 = vmul.f32 -1.442695, %v6741_v18  ;;  %v778_v32 = vand.u32 2147483647, %v6725_v44  ;;  %vm759_vm14 = vweird.f32 %v6723_v60 }
  0xe1   : > { %6176 = vpow2.f32 %v5202_v14  ;;  %v780_v33 = vand.u32 2147483648, %v6725_v44  ;;  %v766_v42 = vor.u32 1.1754944e-38, %v765_v29  ;;  %vm774_vm0 = vweird.f32 %v6725_v44 }
  0xe2   : > { %6178 = vpow2.f32 %v5203_v15  ;;  %vm764_vm1 = vcmp.eq.f32.partialorder %v763_v28, 8.507059e+37  ;;  %vm779_vm3 = vcmp.eq.f32.partialorder %v778_v32, 8.507059e+37 }
  0xe3   : > { %6180 = vpow2.f32 %v5200_v12  ;;  %v781_v48 = vor.u32 1.1754944e-38, %v780_v33 }
  0xe4   : > { %v6173_v21 = vpop.eup %6172  ;;  %6182 = vpow2.f32 %v5201_v20 }
  0xe5   : > { %v6175_v13 = vpop.eup %6174  ;;  %v755_v46 = vmul.f32 %v6173_v21, %v6723_v60  ;;  %v712_v23 = vpop.permute.xlu1 %711  ;;  %vm760_vm12 = vweird.f32 %v6173_v21 }
  0xe6   : > { %v770_v25 = vmul.f32 %v6175_v13, %v6725_v44  ;;  %v6749_v26 = vadd.f32 %v712_v23, %v692_v22  ;;  %v6758_v37 = vadd.f32 %v712_v23, %v693_v24  ;;  %vm775_vm13 = vweird.f32 %v6175_v13  ;;  %vm761_vm15 = vmor %vm759_vm14, %vm760_vm12 }
  0xe7   : > { %v756_v27 = vsub.f32 1.0, %v755_v46  ;;  %v6177_v30 = vpop.eup %6176  ;;  %vm776_vm2 = vmor %vm774_vm0, %vm775_vm13 }
  0xe8   : > { %v771_v31 = vsub.f32 1.0, %v770_v25  ;;  %v5204_v34 = vmul.f32 -1.442695, %v6749_v26  ;;  %v6179_v3 = vpop.eup %6178  ;;  %v6756_v36 = vadd.f32 1.0, %v6177_v30  ;;  %v5205_v50 = vmul.f32 -1.442695, %v6758_v37 }
  0xe9   : > { %v757_v17 = vmul.f32 %v6173_v21, %v756_v27  ;;  %v6760_v39 = vadd.f32 1.0, %v6179_v3  ;;  %v6181_v40 = vpop.eup %6180 }
  0xea   : > { %v772_v38 = vmul.f32 %v6175_v13, %v771_v31  ;;  %6184 = vpow2.f32 %v5204_v34  ;;  %v6183_v45 = vpop.eup %6182  ;;  %v6768_v53 = vadd.f32 1.0, %v6181_v40  ;;  %v823_v57 = vand.u32 2147483647, %v6756_v36 }
  0xeb   : > { %v758_v41 = vadd.f32 %v6173_v21, %v757_v17  ;;  %6186 = vrcp.f32 %v6756_v36  ;;  %v6774_v1 = vadd.f32 1.0, %v6183_v45  ;;  %v825_v59 = vand.u32 2147483648, %v6756_v36 }
  0xec   : > { %v773_v43 = vadd.f32 %v6175_v13, %v772_v38  ;;  %6188 = vrcp.f32 %v6760_v39  ;;  %v838_v2 = vand.u32 2147483647, %v6760_v39  ;;  %v840_v61 = vand.u32 2147483648, %v6760_v39 }
  0xed   : > { %v762_v47 = vsel %vm761_vm15, %v6173_v21, %v758_v41  ;;  %6190 = vrcp.f32 %v6768_v53  ;;  %vm819_vm4 = vweird.f32 %v6756_v36  ;;  %vm834_vm5 = vweird.f32 %v6760_v39 }
  0xee   : > { %v767_v51 = vsel %vm764_vm1, %v766_v42, %v762_v47  ;;  %v777_v52 = vsel %vm776_vm2, %v6175_v13, %v773_v43  ;;  %6192 = vpow2.f32 %v5205_v50  ;;  %vm6793_vm6 = vcmp.eq.f32.partialorder %v823_v57, 8.507059e+37 }
  0xef   : > { %v782_v54 = vsel %vm779_vm3, %v781_v48, %v777_v52  ;;  %v6771_v55 = vmul.f32 %v767_v51, %v6708_v5  ;;  %6194 = vrcp.f32 %v6774_v1  ;;  %vm6797_vm7 = vcmp.eq.f32.partialorder %v838_v2, 8.507059e+37 }
  0xf0   : > { %v6185_v56 = vpop.eup %6184  ;;  %v6784_v60 = vmul.f32 %v782_v54, %v6710_v35  ;;  %v826_v35 = vor.u32 1.1754944e-38, %v825_v59  ;;  %v841_v11 = vor.u32 1.1754944e-38, %v840_v61  ;;  %vm789_vm10 = vweird.f32 %v6768_v53 }
  0xf1   : > { %v6187_v58 = vpop.eup %6186  ;;  %v6779_v49 = vadd.f32 1.0, %v6185_v56  ;;  %882 = vrot.lane.b32.xlu0 %v6771_v55, %s9650_s27  ;;  %v793_v22 = vand.u32 2147483647, %v6768_v53  ;;  %v795_v13 = vand.u32 2147483648, %v6768_v53  ;;  %vm804_vm12 = vweird.f32 %v6774_v1 }
  0xf2   : > { %v6189_v5 = vpop.eup %6188  ;;  %v815_v9 = vmul.f32 %v6187_v58, %v6756_v36  ;;  %vm820_vm8 = vweird.f32 %v6187_v58  ;;  %v1075_v14 = vpack.c.bf16 %v6784_v60, %v6771_v55  ;;  %v808_v29 = vand.u32 2147483647, %v6774_v1 }
  0xf3   : > { %v830_v10 = vmul.f32 %v6189_v5, %v6760_v39  ;;  %6196 = vrcp.f32 %v6779_v49  ;;  %v6191_v7 = vpop.eup %6190  ;;  %vm835_vm9 = vweird.f32 %v6189_v5  ;;  %vm821_vm11 = vmor %vm819_vm4, %vm820_vm8  ;;  %v810_v17 = vand.u32 2147483648, %v6774_v1 }
  0xf4   : > { %v816_v44 = vsub.f32 1.0, %v815_v9  ;;  %v6193_v15 = vpop.eup %6192  ;;  %v785_v12 = vmul.f32 %v6191_v7, %v6768_v53  ;;  %1079 = vst [vmem:[#allocation2 + $0x100] sm:$0xff] %v1075_v14  ;;  %vm836_vm13 = vmor %vm834_vm5, %vm835_vm9  ;;  %vm790_vm14 = vweird.f32 %v6191_v7  ;;  %vm794_vm1 = vcmp.eq.f32.partialorder %v793_v22, 8.507059e+37 }
  0xf5   : > { %v831_v4 = vsub.f32 1.0, %v830_v10  ;;  %v6195_v20 = vpop.eup %6194  ;;  %v6807_v46 = vadd.f32 1.0, %v6193_v15  ;;  %vm791_vm0 = vmor %vm789_vm10, %vm790_vm14  ;;  %v796_v41 = vor.u32 1.1754944e-38, %v795_v13  ;;  %v811_v51 = vor.u32 1.1754944e-38, %v810_v17 }
  0xf6   : > { %v817_v8 = vmul.f32 %v6187_v58, %v816_v44  ;;  %v786_v24 = vsub.f32 1.0, %v785_v12  ;;  %v800_v25 = vmul.f32 %v6195_v20, %v6774_v1  ;;  %vm805_vm15 = vweird.f32 %v6195_v20 }
  0xf7   : > { %v832_v19 = vmul.f32 %v6189_v5, %v831_v4  ;;  %6198 = vrcp.f32 %v6807_v46  ;;  %vm806_vm2 = vmor %vm804_vm12, %vm805_vm15  ;;  %vm809_vm4 = vcmp.eq.f32.partialorder %v808_v29, 8.507059e+37  ;;  %vm849_vm5 = vweird.f32 %v6779_v49 }
  0xf8   : > { %v818_v21 = vadd.f32 %v6187_v58, %v817_v8  ;;  %v787_v32 = vmul.f32 %v6191_v7, %v786_v24  ;;  %v801_v33 = vsub.f32 1.0, %v800_v25  ;;  %v870_v9 = vand.u32 2147483648, %v6807_v46 }
  0xf9   : > { %v833_v23 = vadd.f32 %v6189_v5, %v832_v19  ;;  %v6197_v27 = vpop.eup %6196  ;;  %vm864_vm9 = vweird.f32 %v6807_v46 }
  0xfa   : > { %v822_v28 = vsel %vm821_vm11, %v6187_v58, %v818_v21  ;;  %v845_v36 = vmul.f32 %v6197_v27, %v6779_v49  ;;  %v788_v39 = vadd.f32 %v6191_v7, %v787_v32  ;;  %v802_v40 = vmul.f32 %v6195_v20, %v801_v33 }
  0xfb   : > { %v827_v30 = vsel %vm6793_vm6, %v826_v35, %v822_v28  ;;  %v837_v31 = vsel %vm836_vm13, %v6189_v5, %v833_v23  ;;  %vm850_vm3 = vweird.f32 %v6197_v27  ;;  %v871_v0 = vor.u32 1.1754944e-38, %v870_v9 }
  0xfc   : > { %v842_v34 = vsel %vm6797_vm7, %v841_v11, %v837_v31  ;;  %v6823_v3 = vmul.f32 %v827_v30, %v6727_v62  ;;  %v846_v42 = vsub.f32 1.0, %v845_v36  ;;  %v853_v62 = vand.u32 2147483647, %v6779_v49  ;;  %vm851_vm6 = vmor %vm849_vm5, %vm850_vm3  ;;  %v909_v11 = vld [vmem:[%s9611_s2] sm:$0x3] }
  0xfd   : > { %v6828_v38 = vmul.f32 %v842_v34, %v6729_v63  ;;  %v792_v43 = vsel %vm791_vm0, %v6191_v7, %v788_v39  ;;  %v803_v45 = vadd.f32 %v6195_v20, %v802_v40  ;;  %v855_v63 = vand.u32 2147483648, %v6779_v49  ;;  %v6199_v48 = vpop.eup %6198 }
  0xfe   : > { %886 = vrot.lane.b32.xlu1 %v6823_v3, %s9650_s27  ;;  %v797_v50 = vsel %vm794_vm1, %v796_v41, %v792_v43  ;;  %v847_v52 = vmul.f32 %v6197_v27, %v846_v42  ;;  %v860_v56 = vmul.f32 %v6199_v48, %v6807_v46  ;;  %vm854_vm7 = vcmp.eq.f32.partialorder %v853_v62, 8.507059e+37 }
  0xff   : > { %v1077_v47 = vpack.c.bf16 %v6828_v38, %v6823_v3  ;;  %v807_v53 = vsel %vm806_vm2, %v6195_v20, %v803_v45  ;;  %v6842_v54 = vmul.f32 %v797_v50, %v6739_v16  ;;  %v856_v1 = vor.u32 1.1754944e-38, %v855_v63  ;;  %v5206_v50 = vld [vmem:[%s9611_s2 + $0x2] sm:$0x3] }
 0x100   : > { %v812_v57 = vsel %vm809_vm4, %v811_v51, %v807_v53  ;;  %v848_v58 = vadd.f32 %v6197_v27, %v847_v52  ;;  %v861_v2 = vsub.f32 1.0, %v860_v56  ;;  %v868_v16 = vand.u32 2147483647, %v6807_v46 }
 0x101   : > { %1081 = vst [vmem:[#allocation2 + $0x120] sm:$0xff] %v1077_v47  ;;  %v6847_v59 = vmul.f32 %v812_v57, %v6741_v18  ;;  %884 = vrot.lane.b32.xlu2 %v6842_v54, %s9650_s27  ;;  %vm865_vm8 = vweird.f32 %v6199_v48  ;;  %v911_v14 = vperm.slane %v909_v11, 0  ;;  %v912_v15 = vperm.slane %v909_v11, 1 }
 0x102   : > { %v852_v5 = vsel %vm851_vm6, %v6197_v27, %v848_v58  ;;  %v862_v10 = vmul.f32 %v6199_v48, %v861_v2  ;;  %vm866_vm10 = vmor %vm864_vm9, %vm865_vm8  ;;  %vm869_vm11 = vcmp.eq.f32.partialorder %v868_v16, 8.507059e+37  ;;  %v959_v53 = vperm.slane %v5206_v50, 0 }
 0x103   : > { %v857_v61 = vsel %vm854_vm7, %v856_v1, %v852_v5  ;;  %v1076_v49 = vpack.c.bf16 %v6847_v59, %v6842_v54  ;;  %v960_v56 = vperm.slane %v5206_v50, 1 }
 0x104   : > { %v6856_v18 = vmul.f32 %v857_v61, %v6749_v26  ;;  %v863_v44 = vadd.f32 %v6199_v48, %v862_v10 }
 0x105   : > { %1080 = vst [vmem:[#allocation2 + $0x110] sm:$0xff] %v1076_v49 }
 0x106   : > { %892 = vrot.lane.b32.xlu1 %v6847_v59, %s9650_s27  ;;  %888 = vrot.lane.b32.xlu0 %v6856_v18, %s9650_s27  ;;  %v867_v35 = vsel %vm866_vm10, %v6199_v48, %v863_v44 }
 0x107   : > { %v872_v4 = vsel %vm869_vm11, %v871_v0, %v867_v35 }
 0x108   : > { %v6864_v6 = vmul.f32 %v872_v4, %v6758_v37  ;;  %v898_v37 = vlaneseq }
 0x109   : > { %890 = vrot.lane.b32.xlu2 %v6784_v60, %s9650_s27 }
 0x10a   : > { %v1078_v26 = vpack.c.bf16 %v6864_v6, %v6856_v18  ;;  %v6932_v8 = vand.u32 127, %v898_v37 }
 0x10c   : > { %1082 = vst [vmem:[#allocation2 + $0x130] sm:$0xff] %v1078_v26  ;;  %vm900_vm12 = vcmp.lt.s32.totalorder %v6932_v8, 17  ;;  %vm947_vm13 = vcmp.lt.s32.totalorder %v6932_v8, 16  ;;  %vm995_vm14 = vcmp.lt.s32.totalorder %v6932_v8, 15  ;;  %vm9653_vm15 = vcmp.lt.s32.totalorder %v6932_v8, 1 }
 0x10d   : > { %vm9639_vm0 = vcmp.lt.s32.totalorder %v6932_v8, 127  ;;  %vm9638_vm1 = vcmp.lt.s32.totalorder %v6932_v8, 113  ;;  %vm9637_vm2 = vcmp.lt.s32.totalorder %v6932_v8, 112  ;;  %vm9636_vm3 = vcmp.lt.s32.totalorder %v6932_v8, 111 }
 0x10e   : > { %931 = vrot.lane.b32.xlu1 %v6771_v55, %s9654_s16  ;;  %894 = vrot.lane.b32.xlu0 %v6828_v38, %s9650_s27 }
 0x111   : > { %896 = vrot.lane.b32.xlu2 %v6864_v6, %s9650_s27 }
 0x116   : > { %937 = vrot.lane.b32.xlu1 %v6856_v18, %s9654_s16  ;;  %933 = vrot.lane.b32.xlu0 %v6842_v54, %s9654_s16 }
 0x119   : > { %935 = vrot.lane.b32.xlu2 %v6823_v3, %s9654_s16 }
 0x11e   : > { %943 = vrot.lane.b32.xlu1 %v6828_v38, %s9654_s16  ;;  %939 = vrot.lane.b32.xlu0 %v6784_v60, %s9654_s16 }
 0x121   : > { %941 = vrot.lane.b32.xlu2 %v6847_v59, %s9654_s16 }
 0x126   : > { %981 = vrot.lane.b32.xlu1 %v6842_v54, %s9648_s26  ;;  %945 = vrot.lane.b32.xlu0 %v6864_v6, %s9654_s16 }
 0x129   : > { %979 = vrot.lane.b32.xlu2 %v6771_v55, %s9648_s26 }
 0x12e   : > { %987 = vrot.lane.b32.xlu1 %v6784_v60, %s9648_s26  ;;  %983 = vrot.lane.b32.xlu0 %v6823_v3, %s9648_s26 }
 0x131   : > { %985 = vrot.lane.b32.xlu2 %v6856_v18, %s9648_s26 }
 0x136   : > { %993 = vrot.lane.b32.xlu1 %v6864_v6, %s9648_s26  ;;  %989 = vrot.lane.b32.xlu0 %v6847_v59, %s9648_s26 }
 0x139   : > { %991 = vrot.lane.b32.xlu2 %v6828_v38, %s9648_s26 }
 0x13e   : > { %1031 = vrot.lane.b32.xlu1 %v6823_v3, %s9646_s17  ;;  %1027 = vrot.lane.b32.xlu0 %v6771_v55, %s9646_s17 }
 0x141   : > { %1029 = vrot.lane.b32.xlu2 %v6842_v54, %s9646_s17 }
 0x146   : > { %1037 = vrot.lane.b32.xlu1 %v6847_v59, %s9646_s17  ;;  %1033 = vrot.lane.b32.xlu0 %v6856_v18, %s9646_s17 }
 0x149   : > { %1035 = vrot.lane.b32.xlu2 %v6784_v60, %s9646_s17 }
 0x14e   : > { %1083 = vrot.lane.b32.xlu1 %v6771_v55, %s9642_s23  ;;  %1039 = vrot.lane.b32.xlu0 %v6828_v38, %s9646_s17 }
 0x151   : > { %1041 = vrot.lane.b32.xlu2 %v6864_v6, %s9646_s17 }
 0x156   : > { %1089 = vrot.lane.b32.xlu1 %v6856_v18, %s9642_s23  ;;  %1085 = vrot.lane.b32.xlu0 %v6842_v54, %s9642_s23 }
 0x159   : > { %1087 = vrot.lane.b32.xlu2 %v6823_v3, %s9642_s23 }
 0x15b   : > { %v885_v7 = vpop.permute.xlu2 %884 }
 0x15e   : > { %1095 = vrot.lane.b32.xlu1 %v6828_v38, %s9642_s23  ;;  %1091 = vrot.lane.b32.xlu0 %v6784_v60, %s9642_s23 }
 0x161   : > { %1093 = vrot.lane.b32.xlu2 %v6847_v59, %s9642_s23 }
 0x163   : > { %v883_v19 = vpop.permute.xlu0 %882  ;;  %v891_v12 = vpop.permute.xlu2 %890 }
 0x164   : > { %v901_v20 = vsel %vm900_vm12, %v883_v19, %v891_v12  ;;  %v905_v21 = vsel %vm900_vm12, %v891_v12, %v883_v19 }
 0x165   : > { %v915_v22 = vmul.f32 %v911_v14, %v905_v21  ;;  %v916_v13 = vmul.f32 %v912_v15, %v901_v20  ;;  %v5207_v21 = vld [vmem:[%s9611_s2 + $0x4] sm:$0x3] }
 0x166   : > { %1133 = vrot.lane.b32.xlu1 %v6842_v54, %s9640_s29  ;;  %1097 = vrot.lane.b32.xlu0 %v6864_v6, %s9642_s23 }
 0x167   : > { %v923_v46 = vpack.c.bf16 %v916_v13, %v915_v22 }
 0x169   : > { %927 = vst [vmem:[#allocation2] sm:$0xff] %v923_v46  ;;  %1131 = vrot.lane.b32.xlu2 %v6771_v55, %s9640_s29 }
 0x16b   : > { %v897_v23 = vpop.permute.xlu2 %896 }
 0x16e   : > { %1139 = vrot.lane.b32.xlu1 %v6784_v60, %s9640_s29  ;;  %1135 = vrot.lane.b32.xlu0 %v6823_v3, %s9640_s29 }
 0x170   : > { %v887_v24 = vpop.permute.xlu1 %886 }
 0x171   : > { %1137 = vrot.lane.b32.xlu2 %v6856_v18, %s9640_s29 }
 0x173   : > { %v936_v25 = vpop.permute.xlu2 %935 }
 0x176   : > { %1145 = vrot.lane.b32.xlu1 %v6864_v6, %s9640_s29  ;;  %1141 = vrot.lane.b32.xlu0 %v6847_v59, %s9640_s29 }
 0x178   : > { %v893_v27 = vpop.permute.xlu1 %892  ;;  %v889_v32 = vpop.permute.xlu0 %888 }
 0x179   : > { %v902_v28 = vsel %vm900_vm12, %v885_v7, %v893_v27  ;;  %v906_v29 = vsel %vm900_vm12, %v893_v27, %v885_v7  ;;  %1143 = vrot.lane.b32.xlu2 %v6828_v38, %s9640_s29  ;;  %v904_v33 = vsel %vm900_vm12, %v889_v32, %v897_v23  ;;  %v908_v34 = vsel %vm900_vm12, %v897_v23, %v889_v32 }
 0x17a   : > { %v917_v30 = vmul.f32 %v911_v14, %v906_v29  ;;  %v918_v31 = vmul.f32 %v912_v15, %v902_v28  ;;  %v921_v36 = vmul.f32 %v911_v14, %v908_v34  ;;  %v922_v39 = vmul.f32 %v912_v15, %v904_v33 }
 0x17b   : > { %v942_v40 = vpop.permute.xlu2 %941 }
 0x17c   : > { %v924_v17 = vpack.c.bf16 %v918_v31, %v917_v30  ;;  %v926_v41 = vpack.c.bf16 %v922_v39, %v921_v36 }
 0x17e   : > { %928 = vst [vmem:[#allocation2 + $0x10] sm:$0xff] %v924_v17  ;;  %1183 = vrot.lane.b32.xlu1 %v6823_v3, %s9644_s15  ;;  %1179 = vrot.lane.b32.xlu0 %v6771_v55, %s9644_s15 }
 0x17f   : > { %930 = vst [vmem:[#allocation2 + $0x30] sm:$0xff] %v926_v41 }
 0x180   : > { %v932_v42 = vpop.permute.xlu1 %931  ;;  %v895_v62 = vpop.permute.xlu0 %894 }
 0x181   : > { %1181 = vrot.lane.b32.xlu2 %v6842_v54, %s9644_s15  ;;  %v903_v43 = vsel %vm900_vm12, %v887_v24, %v895_v62  ;;  %v907_v45 = vsel %vm900_vm12, %v895_v62, %v887_v24 }
 0x182   : > { %v919_v63 = vmul.f32 %v911_v14, %v907_v45  ;;  %v920_v47 = vmul.f32 %v912_v15, %v903_v43 }
 0x183   : > { %v980_v48 = vpop.permute.xlu2 %979 }
 0x184   : > { %v925_v51 = vpack.c.bf16 %v920_v47, %v919_v63 }
 0x186   : > { %1189 = vrot.lane.b32.xlu1 %v6847_v59, %s9644_s15  ;;  %929 = vst [vmem:[#allocation2 + $0x20] sm:$0xff] %v925_v51  ;;  %1185 = vrot.lane.b32.xlu0 %v6856_v18, %s9644_s15 }
 0x188   : > { %v938_v52 = vpop.permute.xlu1 %937  ;;  %v934_v57 = vpop.permute.xlu0 %933 }
 0x189   : > { %1187 = vrot.lane.b32.xlu2 %v6784_v60, %s9644_s15  ;;  %v949_v58 = vsel %vm947_vm13, %v934_v57, %v942_v40  ;;  %v953_v1 = vsel %vm947_vm13, %v942_v40, %v934_v57 }
 0x18a   : > { %v965_v2 = vmul.f32 %v959_v53, %v953_v1  ;;  %v966_v5 = vmul.f32 %v960_v56, %v949_v58 }
 0x18b   : > { %v986_v16 = vpop.permute.xlu2 %985 }
 0x18c   : > { %v972_v9 = vpack.c.bf16 %v966_v5, %v965_v2 }
 0x18e   : > { %1227 = vrot.lane.b32.xlu1 %v6771_v55, %s9634_s22  ;;  %976 = vst [vmem:[#allocation2 + $0x50] sm:$0xff] %v972_v9  ;;  %1191 = vrot.lane.b32.xlu0 %v6828_v38, %s9644_s15 }
 0x190   : > { %v944_v61 = vpop.permute.xlu1 %943  ;;  %v940_v35 = vpop.permute.xlu0 %939 }
 0x191   : > { %v950_v10 = vsel %vm947_vm13, %v936_v25, %v944_v61  ;;  %v954_v49 = vsel %vm947_vm13, %v944_v61, %v936_v25  ;;  %1193 = vrot.lane.b32.xlu2 %v6864_v6, %s9644_s15  ;;  %v948_v55 = vsel %vm947_vm13, %v932_v42, %v940_v35  ;;  %v952_v4 = vsel %vm947_vm13, %v940_v35, %v932_v42 }
 0x192   : > { %v967_v44 = vmul.f32 %v959_v53, %v954_v49  ;;  %v968_v0 = vmul.f32 %v960_v56, %v950_v10  ;;  %v963_v37 = vmul.f32 %v959_v53, %v952_v4  ;;  %v964_v7 = vmul.f32 %v960_v56, %v948_v55 }
 0x193   : > { %v992_v11 = vpop.permute.xlu2 %991 }
 0x194   : > { %v973_v26 = vpack.c.bf16 %v968_v0, %v967_v44  ;;  %v971_v14 = vpack.c.bf16 %v964_v7, %v963_v37 }
 0x196   : > { %977 = vst [vmem:[#allocation2 + $0x60] sm:$0xff] %v973_v26  ;;  %1233 = vrot.lane.b32.xlu1 %v6856_v18, %s9634_s22  ;;  %1229 = vrot.lane.b32.xlu0 %v6842_v54, %s9634_s22  ;;  %v1008_v54 = vperm.slane %v5207_v21, 1 }
 0x197   : > { %975 = vst [vmem:[#allocation2 + $0x40] sm:$0xff] %v971_v14  ;;  %v7069_v14 = vld [vmem:[%s6610_s25 + $0x50] sm:$0xff] }
 0x198   : > { %v982_v15 = vpop.permute.xlu1 %981  ;;  %v946_v19 = vpop.permute.xlu0 %945 }
 0x199   : > { %1231 = vrot.lane.b32.xlu2 %v6823_v3, %s9634_s22  ;;  %v951_v12 = vsel %vm947_vm13, %v938_v52, %v946_v19  ;;  %v955_v20 = vsel %vm947_vm13, %v946_v19, %v938_v52  ;;  %v1007_v3 = vperm.slane %v5207_v21, 0 }
 0x19a   : > { %v969_v18 = vmul.f32 %v959_v53, %v955_v20  ;;  %v970_v22 = vmul.f32 %v960_v56, %v951_v12 }
 0x19b   : > { %v1030_v13 = vpop.permute.xlu2 %1029 }
 0x19c   : > { %v974_v46 = vpack.c.bf16 %v970_v22, %v969_v18 }
 0x19e   : > { %1239 = vrot.lane.b32.xlu1 %v6828_v38, %s9634_s22  ;;  %978 = vst [vmem:[#allocation2 + $0x70] sm:$0xff] %v974_v46  ;;  %1235 = vrot.lane.b32.xlu0 %v6784_v60, %s9634_s22  ;;  %v7084_v46 = vld [vmem:[%s6610_s25 + $0x48] sm:$0xff] }
 0x1a0   : > { %v988_v23 = vpop.permute.xlu1 %987  ;;  %v984_v29 = vpop.permute.xlu0 %983 }
 0x1a1   : > { %v996_v24 = vsel %vm995_vm14, %v980_v48, %v988_v23  ;;  %v1000_v25 = vsel %vm995_vm14, %v988_v23, %v980_v48  ;;  %1237 = vrot.lane.b32.xlu2 %v6847_v59, %s9634_s22  ;;  %v998_v38 = vsel %vm995_vm14, %v984_v29, %v992_v11  ;;  %v1002_v30 = vsel %vm995_vm14, %v992_v11, %v984_v29 }
 0x1a2   : > { %v1011_v27 = vmul.f32 %v1007_v3, %v1000_v25  ;;  %v1012_v28 = vmul.f32 %v1008_v54, %v996_v24  ;;  %v1015_v60 = vmul.f32 %v1007_v3, %v1002_v30  ;;  %v1016_v32 = vmul.f32 %v1008_v54, %v998_v38 }
 0x1a3   : > { %v1036_v33 = vpop.permute.xlu2 %1035  ;;  %v1305_v38 = vmul.f32 %v7084_v46, %v7084_v46 }
 0x1a4   : > { %v1019_v31 = vpack.c.bf16 %v1012_v28, %v1011_v27  ;;  %v1021_v34 = vpack.c.bf16 %v1016_v32, %v1015_v60  ;;  %v7109_v32 = vld [vmem:[%s6610_s25 + $0x60] sm:$0xff] }
 0x1a6   : > { %1023 = vst [vmem:[#allocation2 + $0x80] sm:$0xff] %v1019_v31  ;;  %1241 = vrot.lane.b32.xlu0 %v6864_v6, %s9634_s22  ;;  %v5208_v6 = vld [vmem:[%s9611_s2 + $0x6] sm:$0x3]  ;;  %s9739_s22 = smov 113  }
 0x1a7   : > { %1025 = vst [vmem:[#allocation2 + $0xa0] sm:$0xff] %v1021_v34  ;;  %v1055_v51 = vperm.slane %v5208_v6, 0  ;;  %v1056_v52 = vperm.slane %v5208_v6, 1 }
 0x1a8   : > { %v994_v17 = vpop.permute.xlu1 %993  ;;  %v990_v41 = vpop.permute.xlu0 %989 }
 0x1a9   : > { %v999_v59 = vsel %vm995_vm14, %v986_v16, %v994_v17  ;;  %v1003_v36 = vsel %vm995_vm14, %v994_v17, %v986_v16  ;;  %v997_v42 = vsel %vm995_vm14, %v982_v15, %v990_v41  ;;  %v1001_v62 = vsel %vm995_vm14, %v990_v41, %v982_v15  ;;  %v7072_v15 = vld [vmem:[%s6610_s25 + $0x58] sm:$0xff] }
 0x1aa   : > { %v1017_v39 = vmul.f32 %v1007_v3, %v1003_v36  ;;  %v1018_v40 = vmul.f32 %v1008_v54, %v999_v59  ;;  %v1013_v45 = vmul.f32 %v1007_v3, %v1001_v62  ;;  %v1014_v63 = vmul.f32 %v1008_v54, %v997_v42  ;;  %v5209_v54 = vld [vmem:[%s9611_s2 + $0xa] sm:$0x3]  ;;  %v7117_v36 = vld [vmem:[%s6610_s25 + $0x70] sm:$0xff] }
 0x1ab   : > { %v1042_v47 = vpop.permute.xlu2 %1041  ;;  %v1295_v22 = vadd.f32 %v7072_v15, %v7069_v14  ;;  %v7096_v27 = vperm.slane %v5209_v54, 0  ;;  %v7098_v28 = vperm.slane %v5209_v54, 1 }
 0x1ac   : > { %v1022_v43 = vpack.c.bf16 %v1018_v40, %v1017_v39  ;;  %v1020_v48 = vpack.c.bf16 %v1014_v63, %v1013_v45  ;;  %v7120_v39 = vld [vmem:[%s6610_s25 + $0x78] sm:$0xff] }
 0x1ad   : > { %v1311_v6 = vmul.f32 %v7120_v39, %v7120_v39 }
 0x1ae   : > { %1026 = vst [vmem:[#allocation2 + $0xb0] sm:$0xff] %v1022_v43 }
 0x1af   : > { %1024 = vst [vmem:[#allocation2 + $0x90] sm:$0xff] %v1020_v48 }
 0x1b0   : > { %v1032_v50 = vpop.permute.xlu1 %1031  ;;  %v1028_v53 = vpop.permute.xlu0 %1027 }
 0x1b1   : > { %v1044_v56 = vsel %vm9653_vm15, %v1028_v53, %v1036_v33  ;;  %v1048_v57 = vsel %vm9653_vm15, %v1036_v33, %v1028_v53  ;;  %v7112_v33 = vld [vmem:[%s6610_s25 + $0x68] sm:$0xff] }
 0x1b2   : > { %v1059_v58 = vmul.f32 %v1055_v51, %v1048_v57  ;;  %v1060_v1 = vmul.f32 %v1056_v52, %v1044_v56  ;;  %v1298_v42 = vadd.f32 %v7112_v33, %v7109_v32 }
 0x1b3   : > { %v7056_v2 = vpop.permute.xlu2 %1087 }
 0x1b4   : > { %v1067_v5 = vpack.c.bf16 %v1060_v1, %v1059_v58  ;;  %v1306_v58 = vmul.f32 %v7069_v14, %v7069_v14  ;;  %v1308_v1 = vmul.f32 %v7109_v32, %v7109_v32 }
 0x1b6   : > { %1071 = vst [vmem:[#allocation2 + $0xc0] sm:$0xff] %v1067_v5 }
 0x1b8   : > { %v1038_v16 = vpop.permute.xlu1 %1037  ;;  %v1034_v44 = vpop.permute.xlu0 %1033 }
 0x1b9   : > { %v1045_v9 = vsel %vm9653_vm15, %v1030_v13, %v1038_v16  ;;  %v1049_v61 = vsel %vm9653_vm15, %v1038_v16, %v1030_v13  ;;  %v1047_v0 = vsel %vm9653_vm15, %v1034_v44, %v1042_v47  ;;  %v1051_v35 = vsel %vm9653_vm15, %v1042_v47, %v1034_v44  ;;  %v7081_v13 = vld [vmem:[%s6610_s25 + $0x40] sm:$0xff] }
 0x1ba   : > { %v1061_v10 = vmul.f32 %v1055_v51, %v1049_v61  ;;  %v1062_v49 = vmul.f32 %v1056_v52, %v1045_v9  ;;  %v1065_v4 = vmul.f32 %v1055_v51, %v1051_v35  ;;  %v1066_v26 = vmul.f32 %v1056_v52, %v1047_v0 }
 0x1bb   : > { %v1094_v37 = vpop.permute.xlu2 %1093  ;;  %v1292_v24 = vadd.f32 %v7084_v46, %v7081_v13  ;;  %v1304_v29 = vmul.f32 %v7081_v13, %v7081_v13  ;;  %v1310_v47 = vmul.f32 %v7117_v36, %v7117_v36  ;;  %v1307_v35 = vmul.f32 %v7072_v15, %v7072_v15 }
 0x1bc   : > { %v1068_v55 = vpack.c.bf16 %v1062_v49, %v1061_v10  ;;  %v1070_v7 = vpack.c.bf16 %v1066_v26, %v1065_v4  ;;  %v1309_v10 = vmul.f32 %v7112_v33, %v7112_v33 }
 0x1bd   : > { %v1312_v59 = vadd.f32 %v1305_v38, %v1304_v29  ;;  %v5358_v44 = vld [vmem:[#allocation2 + $0xc0] sm:$0xf]  ;;  %v1321_v0 = vadd.f32 %v1311_v6, %v1310_v47  ;;  %v5959_v29 = vld [vmem:[#allocation2 + $0xa4] sm:$0xf]  ;;  %v5953_v47 = vld [vmem:[#allocation2 + $0x6c] sm:$0xf0] }
 0x1be   : > { %1072 = vst [vmem:[#allocation2 + $0xd0] sm:$0xff] %v1068_v55 }
 0x1bf   : > { %1074 = vst [vmem:[#allocation2 + $0xf0] sm:$0xff] %v1070_v7  ;;  %v5963_v7 = vld [vmem:[#allocation2 + $0xc4] sm:$0xf] }
 0x1c0   : > { %v7066_v11 = vpop.permute.xlu1 %1083  ;;  %v1040_v19 = vpop.permute.xlu0 %1039 }
 0x1c1   : > { %v1046_v12 = vsel %vm9653_vm15, %v1032_v50, %v1040_v19  ;;  %v1050_v20 = vsel %vm9653_vm15, %v1040_v19, %v1032_v50  ;;  %v1301_v50 = vadd.f32 %v7120_v39, %v7117_v36 }
 0x1c2   : > { %v1063_v21 = vmul.f32 %v1055_v51, %v1050_v20  ;;  %v1064_v18 = vmul.f32 %v1056_v52, %v1046_v12  ;;  %v5961_v12 = vld [vmem:[#allocation2 + $0xac] sm:$0xf0] }
 0x1c3   : > { %v7086_v3 = vpop.permute.xlu2 %1131 }
 0x1c4   : > { %v1069_v23 = vpack.c.bf16 %v1064_v18, %v1063_v21  ;;  %v1318_v21 = vadd.f32 %v1309_v10, %v1308_v1  ;;  %v5342_v18 = vld [vmem:[#allocation2 + $0xa0] sm:$0xf] }
 0x1c5   : > { %v5965_v57 = vld [vmem:[#allocation2 + $0xcc] sm:$0xf0]  ;;  %v5360_v61 = vld [vmem:[#allocation2 + $0xd0] sm:$0xf0] }
 0x1c6   : > { %1073 = vst [vmem:[#allocation2 + $0xe0] sm:$0xff] %v1069_v23  ;;  %v5969_v62 = vld [vmem:[#allocation2 + $0xec] sm:$0xf0]  ;;  %v5376_v63 = vld [vmem:[#allocation2 + $0xf0] sm:$0xf0]  ;;  %v5363_v19 = vor.u32 %v5963_v7, %v5360_v61  ;;  %v1315_v23 = vadd.f32 %v1307_v35, %v1306_v58 }
 0x1c7   : > { %v5294_v58 = vld [vmem:[#allocation2 + $0x40] sm:$0xf]  ;;  %v5947_v61 = vld [vmem:[#allocation2 + $0x44] sm:$0xf] }
 0x1c8   : > { %1296 = vadd.xlane.f32.xlu1 %v1295_v22  ;;  %v7094_v25 = vpop.permute.xlu1 %1089  ;;  %v1086_v30 = vpop.permute.xlu0 %1085  ;;  %v5943_v7 = vld [vmem:[#allocation2 + $0x24] sm:$0xf] }
 0x1c9   : > { %v1101_v31 = vsel %vm9639_vm0, %v1086_v30, %v1094_v37  ;;  %v1105_v60 = vsel %vm9639_vm0, %v1094_v37, %v1086_v30  ;;  %v5359_v37 = vor.u32 %v5965_v57, %v5358_v44  ;;  %v5957_v30 = vld [vmem:[#allocation2 + $0x8c] sm:$0xf0] }
 0x1ca   : > { %1293 = vadd.xlane.f32.xlu2 %v1292_v24  ;;  %v1117_v34 = vmul.f32 %v7096_v27, %v1101_v31  ;;  %v1118_v17 = vmul.f32 %v7098_v28, %v1105_v60  ;;  %v5343_v24 = vor.u32 %v5961_v12, %v5342_v18  ;;  %v5328_v60 = vld [vmem:[#allocation2 + $0x90] sm:$0xf0] }
 0x1cb   : > { %v7122_v40 = vpop.permute.xlu2 %1137 }
 0x1cc   : > { %v1124_v41 = vpack.c.bf16 %v1118_v17, %v1117_v34 }
 0x1cd   : > { %v5374_v43 = vld [vmem:[#allocation2 + $0xe0] sm:$0xf]  ;;  %v5967_v45 = vld [vmem:[#allocation2 + $0xe4] sm:$0xf] }
 0x1ce   : > { %1128 = vst [vmem:[#allocation2 + $0x150] sm:$0xff] %v1124_v41  ;;  %v5375_v51 = vor.u32 %v5969_v62, %v5374_v43  ;;  %v5379_v52 = vor.u32 %v5967_v45, %v5376_v63  ;;  %v5210_v41 = vld [vmem:[%s9611_s2 + $0xc] sm:$0x3]  ;;  %v5955_v45 = vld [vmem:[#allocation2 + $0x84] sm:$0xf] }
 0x1cf   : > { %v5331_v63 = vor.u32 %v5955_v45, %v5328_v60 }
 0x1d0   : > { %1313 = vadd.xlane.f32.xlu1 %v1312_v59  ;;  %v1096_v48 = vpop.permute.xlu1 %1095  ;;  %1299 = vadd.xlane.f32.xlu0 %v1298_v42  ;;  %v1092_v9 = vpop.permute.xlu0 %1091  ;;  %v5326_v59 = vld [vmem:[#allocation2 + $0x80] sm:$0xf] }
 0x1d1   : > { %v1102_v53 = vsel %vm9639_vm0, %v7056_v2, %v1096_v48  ;;  %v1106_v56 = vsel %vm9639_vm0, %v1096_v48, %v7056_v2  ;;  %2497 = vmatpush.bf16.msra.mxu0 %v5375_v51  ;;  %2554 = vmatpush.bf16.msra.mxu3 %v5379_v52  ;;  %v1100_v2 = vsel %vm9639_vm0, %v7066_v11, %v1092_v9  ;;  %v1159_v48 = vperm.slane %v5210_v41, 0  ;;  %v5310_v51 = vld [vmem:[#allocation2 + $0x60] sm:$0xf] }
 0x1d2   : > { %v1119_v5 = vmul.f32 %v7096_v27, %v1102_v53  ;;  %v1120_v16 = vmul.f32 %v7098_v28, %v1106_v56  ;;  %v1104_v49 = vsel %vm9639_vm0, %v1092_v9, %v7066_v11  ;;  %1302 = vadd.xlane.f32.xlu2 %v1301_v50  ;;  %v1115_v4 = vmul.f32 %v7096_v27, %v1100_v2  ;;  %v5344_v11 = vld [vmem:[#allocation2 + $0xb0] sm:$0xf0]  ;;  %v5951_v56 = vld [vmem:[#allocation2 + $0x64] sm:$0xf] }
 0x1d3   : > { %v1116_v26 = vmul.f32 %v7098_v28, %v1104_v49  ;;  %v1144_v22 = vpop.permute.xlu2 %1143  ;;  %v5347_v38 = vor.u32 %v5959_v29, %v5344_v11  ;;  %v5327_v43 = vor.u32 %v5957_v30, %v5326_v59  ;;  %v5312_v50 = vld [vmem:[#allocation2 + $0x70] sm:$0xf0]  ;;  %v5311_v53 = vor.u32 %v5953_v47, %v5310_v51  ;;  %v5949_v49 = vld [vmem:[#allocation2 + $0x4c] sm:$0xf0] }
 0x1d4   : > { %v1125_v55 = vpack.c.bf16 %v1120_v16, %v1119_v5  ;;  %v5315_v57 = vor.u32 %v5951_v56, %v5312_v50  ;;  %v5295_v35 = vor.u32 %v5949_v49, %v5294_v58  ;;  %v5264_v30 = vld [vmem:[#allocation2 + $0x10] sm:$0xf0]  ;;  %v1284_v50 = vld [vmem:[%s9672_s3] sm:$0xff]  ;;  %v1287_v56 = vld [vmem:[%s9672_s3 + $0x18] sm:$0xff] }
 0x1d5   : > { %v1123_v20 = vpack.c.bf16 %v1116_v26, %v1115_v4  ;;  %2498 = vmatpush.bf16.msra.mxu0 %v5359_v37  ;;  %2555 = vmatpush.bf16.msra.mxu3 %v5363_v19  ;;  %v5278_v26 = vld [vmem:[#allocation2 + $0x20] sm:$0xf]  ;;  %v5945_v19 = vld [vmem:[#allocation2 + $0x2c] sm:$0xf0] }
 0x1d6   : > { %1129 = vst [vmem:[#allocation2 + $0x160] sm:$0xff] %v1125_v55  ;;  %v5296_v55 = vld [vmem:[#allocation2 + $0x50] sm:$0xf0] }
 0x1d7   : > { %1127 = vst [vmem:[#allocation2 + $0x140] sm:$0xff] %v1123_v20  ;;  %v5299_v4 = vor.u32 %v5947_v61, %v5296_v55  ;;  %v5279_v20 = vor.u32 %v5945_v19, %v5278_v26  ;;  %v1291_v19 = vld [vmem:[%s9613_s4 + $0x18] sm:$0xff] }
 0x1d8   : > { %1322 = vadd.xlane.f32.xlu1 %v1321_v0  ;;  %v7156_v54 = vpop.permute.xlu1 %1133  ;;  %1319 = vadd.xlane.f32.xlu0 %v1318_v21  ;;  %v1098_v31 = vpop.permute.xlu0 %1097  ;;  %v5280_v21 = vld [vmem:[#allocation2 + $0x30] sm:$0xf0] }
 0x1d9   : > { %2499 = vmatpush.bf16.msra.mxu0 %v5343_v24  ;;  %2556 = vmatpush.bf16.msra.mxu3 %v5347_v38  ;;  %v1103_v34 = vsel %vm9639_vm0, %v7094_v25, %v1098_v31  ;;  %v1107_v17 = vsel %vm9639_vm0, %v1098_v31, %v7094_v25  ;;  %v1160_v25 = vperm.slane %v5210_v41, 1 }
 0x1da   : > { %1316 = vadd.xlane.f32.xlu2 %v1315_v23  ;;  %v1121_v42 = vmul.f32 %v7096_v27, %v1103_v34  ;;  %v1122_v62 = vmul.f32 %v7098_v28, %v1107_v17  ;;  %v5941_v23 = vld [vmem:[#allocation2 + $0xc] sm:$0xf0]  ;;  %v5262_v34 = vld [vmem:[#allocation2] sm:$0xf] }
 0x1db   : > { %v7176_v1 = vpop.permute.xlu2 %1181 }
 0x1dc   : > { %v1126_v6 = vpack.c.bf16 %v1122_v62, %v1121_v42  ;;  %v5263_v62 = vor.u32 %v5941_v23, %v5262_v34 }
 0x1dd   : > { %2500 = vmatpush.bf16.msra.mxu0 %v5327_v43  ;;  %2557 = vmatpush.bf16.msra.mxu3 %v5331_v63  ;;  %v5939_v43 = vld [vmem:[#allocation2 + $0x4] sm:$0xf]  ;;  %v5211_v63 = vld [vmem:[%s9611_s2 + $0xe] sm:$0x3] }
 0x1de   : > { %1130 = vst [vmem:[#allocation2 + $0x170] sm:$0xff] %v1126_v6  ;;  %v5267_v45 = vor.u32 %v5939_v43, %v5264_v30 }
 0x1e0   : > { %v1140_v52 = vpop.permute.xlu1 %1139  ;;  %v1136_v9 = vpop.permute.xlu0 %1135 }
 0x1e1   : > { %v1148_v27 = vsel %vm9638_vm1, %v7086_v3, %v1140_v52  ;;  %v1152_v28 = vsel %vm9638_vm1, %v1140_v52, %v7086_v3  ;;  %2501 = vmatpush.bf16.msra.mxu0 %v5311_v53  ;;  %2558 = vmatpush.bf16.msra.mxu3 %v5315_v57  ;;  %v1150_v10 = vsel %vm9638_vm1, %v1136_v9, %v1144_v22 }
 0x1e2   : > { %v1163_v5 = vmul.f32 %v1159_v48, %v1148_v27  ;;  %v1164_v16 = vmul.f32 %v1160_v25, %v1152_v28  ;;  %v1154_v2 = vsel %vm9638_vm1, %v1144_v22, %v1136_v9  ;;  %v1167_v0 = vmul.f32 %v1159_v48, %v1150_v10  ;;  %v1288_v10 = vld [vmem:[%s9613_s4] sm:$0xff] }
 0x1e3   : > { %v1168_v3 = vmul.f32 %v1160_v25, %v1154_v2  ;;  %v5283_v22 = vor.u32 %v5943_v7, %v5280_v21  ;;  %v1188_v17 = vpop.permute.xlu2 %1187 }
 0x1e4   : > { %v1171_v44 = vpack.c.bf16 %v1164_v16, %v1163_v5  ;;  %v1289_v5 = vld [vmem:[%s9613_s4 + $0x8] sm:$0xff] }
 0x1e5   : > { %v1173_v37 = vpack.c.bf16 %v1168_v3, %v1167_v0  ;;  %2502 = vmatpush.bf16.msra.mxu0 %v5295_v35  ;;  %2559 = vmatpush.bf16.msra.mxu3 %v5299_v4  ;;  %v1290_v35 = vld [vmem:[%s9613_s4 + $0x10] sm:$0xff] }
 0x1e6   : > { %1175 = vst [vmem:[#allocation2 + $0x180] sm:$0xff] %v1171_v44 }
 0x1e7   : > { %1177 = vst [vmem:[#allocation2 + $0x1a0] sm:$0xff] %v1173_v37 }
 0x1e8   : > { %v1146_v12 = vpop.permute.xlu1 %1145  ;;  %v1142_v38 = vpop.permute.xlu0 %1141 }
 0x1e9   : > { %v1151_v11 = vsel %vm9638_vm1, %v7122_v40, %v1146_v12  ;;  %v1155_v18 = vsel %vm9638_vm1, %v1146_v12, %v7122_v40  ;;  %2503 = vmatpush.bf16.msra.mxu0 %v5279_v20  ;;  %2560 = vmatpush.bf16.msra.mxu3 %v5283_v22  ;;  %v1149_v31 = vsel %vm9638_vm1, %v7156_v54, %v1142_v38  ;;  %v1285_v40 = vld [vmem:[%s9672_s3 + $0x8] sm:$0xff]  ;;  %v5212_v22 = vld [vmem:[%s9611_s2 + $0x10] sm:$0x3] }
 0x1ea   : > { %v1169_v24 = vmul.f32 %v1159_v48, %v1151_v11  ;;  %v1170_v29 = vmul.f32 %v1160_v25, %v1155_v18  ;;  %v1153_v60 = vsel %vm9638_vm1, %v1142_v38, %v7156_v54  ;;  %v1165_v41 = vmul.f32 %v1159_v48, %v1149_v31  ;;  %v1286_v54 = vld [vmem:[%s9672_s3 + $0x10] sm:$0xff] }
 0x1eb   : > { %v1166_v42 = vmul.f32 %v1160_v25, %v1153_v60  ;;  %v1207_v48 = vperm.slane %v5211_v63, 0  ;;  %v1208_v25 = vperm.slane %v5211_v63, 1  ;;  %v1194_v57 = vpop.permute.xlu2 %1193  ;;  %v1256_v38 = vperm.slane %v5212_v22, 1 }
 0x1ec   : > { %v1174_v59 = vpack.c.bf16 %v1170_v29, %v1169_v24  ;;  %1411 = vperm.xlu0 %6158, %v1285_v40   ;;  %v1255_v29 = vperm.slane %v5212_v22, 0 }
 0x1ed   : > { %v1172_v47 = vpack.c.bf16 %v1166_v42, %v1165_v41  ;;  %2504 = vmatpush.bf16.msra.mxu0 %v5263_v62  ;;  %2561 = vmatpush.bf16.msra.mxu3 %v5267_v45 }
 0x1ee   : > { %1178 = vst [vmem:[#allocation2 + $0x1b0] sm:$0xff] %v1174_v59 }
 0x1ef   : > { %1176 = vst [vmem:[#allocation2 + $0x190] sm:$0xff] %v1172_v47 }
 0x1f0   : > { %v1184_v6 = vpop.permute.xlu1 %1183  ;;  %v1180_v51 = vpop.permute.xlu0 %1179 }
 0x1f1   : > { %1416 = vperm.xlu1 %6159, %v1286_v54   ;;  %v1196_v52 = vsel %vm9637_vm2, %v1180_v51, %v1188_v17  ;;  %v1200_v53 = vsel %vm9637_vm2, %v1188_v17, %v1180_v51 }
 0x1f2   : > { %1406 = vperm.xlu2 %6157, %v1284_v50   ;;  %v1211_v27 = vmul.f32 %v1207_v48, %v1196_v52  ;;  %v1212_v28 = vmul.f32 %v1208_v25, %v1200_v53 }
 0x1f3   : > { %v1232_v37 = vpop.permute.xlu2 %1231 }
 0x1f4   : > { %v1219_v58 = vpack.c.bf16 %v1212_v28, %v1211_v27  ;;  %1421 = vperm.xlu0 %6158, %v1287_v56  }
 0x1f5   : > { %v5993_v28 = vld [vmem:[#allocation2 + $0x1ac] sm:$0xf0] }
 0x1f6   : > { %1223 = vst [vmem:[#allocation2 + $0x1c0] sm:$0xff] %v1219_v58  ;;  %v5470_v58 = vld [vmem:[#allocation2 + $0x1a0] sm:$0xf] }
 0x1f8   : > { %v1190_v16 = vpop.permute.xlu1 %1189  ;;  %v1186_v44 = vpop.permute.xlu0 %1185 }
 0x1f9   : > { %v1197_v9 = vsel %vm9637_vm2, %v7176_v1, %v1190_v16  ;;  %v1201_v61 = vsel %vm9637_vm2, %v1190_v16, %v7176_v1  ;;  %1439 = vperm.xlu1 %6159, %v1289_v5   ;;  %v1199_v0 = vsel %vm9637_vm2, %v1186_v44, %v1194_v57  ;;  %v1203_v3 = vsel %vm9637_vm2, %v1194_v57, %v1186_v44  ;;  %v5989_v16 = vld [vmem:[#allocation2 + $0x18c] sm:$0xf0] }
 0x1fa   : > { %v1213_v2 = vmul.f32 %v1207_v48, %v1197_v9  ;;  %v1214_v49 = vmul.f32 %v1208_v25, %v1201_v61  ;;  %1434 = vperm.xlu2 %6157, %v1288_v10   ;;  %v1217_v1 = vmul.f32 %v1207_v48, %v1199_v0  ;;  %v1218_v4 = vmul.f32 %v1208_v25, %v1203_v3  ;;  %v5985_v3 = vld [vmem:[#allocation2 + $0x16c] sm:$0xf0] }
 0x1fb   : > { %v1238_v30 = vpop.permute.xlu2 %1237  ;;  %v5471_v5 = vor.u32 %v5993_v28, %v5470_v58 }
 0x1fc   : > { %v1220_v55 = vpack.c.bf16 %v1214_v49, %v1213_v2  ;;  %v1222_v26 = vpack.c.bf16 %v1218_v4, %v1217_v1  ;;  %1444 = vperm.xlu0 %6158, %v1290_v35   ;;  %v5454_v2 = vld [vmem:[#allocation2 + $0x180] sm:$0xf] }
 0x1fd   : > { %v5486_v51 = vld [vmem:[#allocation2 + $0x1c0] sm:$0xf]  ;;  %v5455_v0 = vor.u32 %v5989_v16, %v5454_v2  ;;  %v5408_v16 = vld [vmem:[#allocation2 + $0x130] sm:$0xf0] }
 0x1fe   : > { %1224 = vst [vmem:[#allocation2 + $0x1d0] sm:$0xff] %v1220_v55  ;;  %v5438_v55 = vld [vmem:[#allocation2 + $0x160] sm:$0xf] }
 0x1ff   : > { %1226 = vst [vmem:[#allocation2 + $0x1f0] sm:$0xff] %v1222_v26  ;;  %v5439_v1 = vor.u32 %v5985_v3, %v5438_v55  ;;  %v5422_v4 = vld [vmem:[#allocation2 + $0x140] sm:$0xf]  ;;  %v5981_v26 = vld [vmem:[#allocation2 + $0x14c] sm:$0xf0] }
 0x200   : > { %v1228_v7 = vpop.permute.xlu1 %1227  ;;  %v1192_v12 = vpop.permute.xlu0 %1191 }
 0x201   : > { %v1198_v20 = vsel %vm9637_vm2, %v1184_v6, %v1192_v12  ;;  %v1202_v21 = vsel %vm9637_vm2, %v1192_v12, %v1184_v6 }
 0x202   : > { %1449 = vperm.xlu2 %6157, %v1291_v19   ;;  %v1215_v11 = vmul.f32 %v1207_v48, %v1198_v20  ;;  %v1216_v18 = vmul.f32 %v1208_v25, %v1202_v21  ;;  %v5406_v19 = vld [vmem:[#allocation2 + $0x120] sm:$0xf] }
 0x204   : > { %v1221_v23 = vpack.c.bf16 %v1216_v18, %v1215_v11 }
 0x205   : > { %v5997_v47 = vld [vmem:[#allocation2 + $0x1cc] sm:$0xf0] }
 0x206   : > { %1225 = vst [vmem:[#allocation2 + $0x1e0] sm:$0xff] %v1221_v23  ;;  %v6001_v42 = vld [vmem:[#allocation2 + $0x1ec] sm:$0xf0]  ;;  %v5487_v27 = vor.u32 %v5997_v47, %v5486_v51  ;;  %v5991_v47 = vld [vmem:[#allocation2 + $0x1a4] sm:$0xf] }
 0x208   : > { %v1234_v24 = vpop.permute.xlu1 %1233  ;;  %v1230_v31 = vpop.permute.xlu0 %1229 }
 0x209   : > { %v1245_v60 = vsel %vm9636_vm3, %v1230_v31, %v1238_v30  ;;  %v1249_v40 = vsel %vm9636_vm3, %v1238_v30, %v1230_v31  ;;  %v5390_v31 = vld [vmem:[#allocation2 + $0x100] sm:$0xf] }
 0x20a   : > { %v1261_v34 = vmul.f32 %v1255_v29, %v1245_v60  ;;  %v1262_v17 = vmul.f32 %v1256_v38, %v1249_v40 }
 0x20c   : > { %v1268_v59 = vpack.c.bf16 %v1262_v17, %v1261_v34 }
 0x20d   : > { %v5502_v41 = vld [vmem:[#allocation2 + $0x1e0] sm:$0xf]  ;;  %v5999_v30 = vld [vmem:[#allocation2 + $0x1e4] sm:$0xf] }
 0x20e   : > { %1272 = vst [vmem:[#allocation2 + $0x210] sm:$0xff] %v1268_v59  ;;  %v5503_v43 = vor.u32 %v6001_v42, %v5502_v41  ;;  %v5504_v59 = vld [vmem:[#allocation2 + $0x1f0] sm:$0xf0] }
 0x20f   : > { %v5507_v42 = vor.u32 %v5999_v30, %v5504_v59 }
 0x210   : > { %v1240_v62 = vpop.permute.xlu1 %1239  ;;  %2516 = vmatpush.bf16.msra.mxu1 %v5503_v43  ;;  %v1236_v48 = vpop.permute.xlu0 %1235  ;;  %v5995_v43 = vld [vmem:[#allocation2 + $0x1c4] sm:$0xf] }
 0x211   : > { %v1246_v45 = vsel %vm9636_vm3, %v1232_v37, %v1240_v62  ;;  %v1250_v63 = vsel %vm9636_vm3, %v1240_v62, %v1232_v37  ;;  %v1244_v25 = vsel %vm9636_vm3, %v1228_v7, %v1236_v48  ;;  %v1248_v50 = vsel %vm9636_vm3, %v1236_v48, %v1228_v7  ;;  %v5977_v7 = vld [vmem:[#allocation2 + $0x12c] sm:$0xf0]  ;;  %v5488_v62 = vld [vmem:[#allocation2 + $0x1d0] sm:$0xf0]  ;;  %v5987_v48 = vld [vmem:[#allocation2 + $0x184] sm:$0xf] }
 0x212   : > { %v1263_v54 = vmul.f32 %v1255_v29, %v1246_v45  ;;  %v1264_v6 = vmul.f32 %v1256_v38, %v1250_v63  ;;  %v1259_v53 = vmul.f32 %v1255_v29, %v1244_v25  ;;  %v1260_v56 = vmul.f32 %v1256_v38, %v1248_v50  ;;  %v5472_v63 = vld [vmem:[#allocation2 + $0x1b0] sm:$0xf0] }
 0x213   : > { %v5423_v37 = vor.u32 %v5981_v26, %v5422_v4  ;;  %v5407_v18 = vor.u32 %v5977_v7, %v5406_v19  ;;  %v5491_v45 = vor.u32 %v5995_v43, %v5488_v62  ;;  %v5440_v50 = vld [vmem:[#allocation2 + $0x170] sm:$0xf0] }
 0x214   : > { %v1269_v52 = vpack.c.bf16 %v1264_v6, %v1263_v54  ;;  %v1267_v57 = vpack.c.bf16 %v1260_v56, %v1259_v53  ;;  %2517 = vmatpush.bf16.msra.mxu1 %v5487_v27  ;;  %v5475_v54 = vor.u32 %v5991_v47, %v5472_v63  ;;  %v5456_v6 = vld [vmem:[#allocation2 + $0x190] sm:$0xf0]  ;;  %v5979_v56 = vld [vmem:[#allocation2 + $0x144] sm:$0xf] }
 0x215   : > { %v6005_v60 = vld [vmem:[#allocation2 + $0x20c] sm:$0xf0]  ;;  %v5520_v17 = vld [vmem:[#allocation2 + $0x210] sm:$0xf0]  ;;  %v5459_v25 = vor.u32 %v5987_v48, %v5456_v6 }
 0x216   : > { %1273 = vst [vmem:[#allocation2 + $0x220] sm:$0xff] %v1269_v52  ;;  %v5983_v52 = vld [vmem:[#allocation2 + $0x164] sm:$0xf] }
 0x217   : > { %1271 = vst [vmem:[#allocation2 + $0x200] sm:$0xff] %v1267_v57  ;;  %v5443_v53 = vor.u32 %v5983_v52, %v5440_v50  ;;  %v5424_v57 = vld [vmem:[#allocation2 + $0x150] sm:$0xf0] }
 0x218   : > { %2518 = vmatpush.bf16.msra.mxu1 %v5471_v5  ;;  %v1242_v9 = vpop.permute.xlu0 %1241  ;;  %v5427_v58 = vor.u32 %v5979_v56, %v5424_v57 }
 0x219   : > { %v1247_v61 = vsel %vm9636_vm3, %v1234_v24, %v1242_v9  ;;  %v1251_v10 = vsel %vm9636_vm3, %v1242_v9, %v1234_v24  ;;  %v5973_v24 = vld [vmem:[#allocation2 + $0x10c] sm:$0xf0] }
 0x21a   : > { %v1265_v49 = vmul.f32 %v1255_v29, %v1247_v61  ;;  %v1266_v44 = vmul.f32 %v1256_v38, %v1251_v10  ;;  %v5391_v40 = vor.u32 %v5973_v24, %v5390_v31  ;;  %v5975_v10 = vld [vmem:[#allocation2 + $0x124] sm:$0xf] }
 0x21c   : > { %v1270_v35 = vpack.c.bf16 %v1266_v44, %v1265_v49  ;;  %2519 = vmatpush.bf16.msra.mxu1 %v5455_v0  ;;  %v5411_v49 = vor.u32 %v5975_v10, %v5408_v16  ;;  %v5392_v0 = vld [vmem:[#allocation2 + $0x110] sm:$0xf0] }
 0x21d   : > { %v5534_v12 = vld [vmem:[#allocation2 + $0x220] sm:$0xf]  ;;  %v6007_v21 = vld [vmem:[#allocation2 + $0x224] sm:$0xf] }
 0x21e   : > { %1274 = vst [vmem:[#allocation2 + $0x230] sm:$0xff] %v1270_v35  ;;  %v5518_v29 = vld [vmem:[#allocation2 + $0x200] sm:$0xf]  ;;  %v6003_v38 = vld [vmem:[#allocation2 + $0x204] sm:$0xf] }
 0x21f   : > { %v5519_v34 = vor.u32 %v6005_v60, %v5518_v29  ;;  %v5523_v41 = vor.u32 %v6003_v38, %v5520_v17 }
 0x220   : > { %2520 = vmatpush.bf16.msra.mxu1 %v5439_v1  ;;  %v5971_v1 = vld [vmem:[#allocation2 + $0x104] sm:$0xf] }
 0x221   : > { %v5395_v4 = vor.u32 %v5971_v1, %v5392_v0 }
 0x224   : > { %2521 = vmatpush.bf16.msra.mxu1 %v5423_v37 }
 0x225   : > { %v6009_v20 = vld [vmem:[#allocation2 + $0x22c] sm:$0xf0]  ;;  %v5536_v11 = vld [vmem:[#allocation2 + $0x230] sm:$0xf0] }
 0x226   : > { %v5535_v22 = vor.u32 %v6009_v20, %v5534_v12  ;;  %v5539_v23 = vor.u32 %v6007_v21, %v5536_v11 }
 0x228   : > { %2522 = vmatpush.bf16.msra.mxu1 %v5407_v18  ;;  %2541 = vmatpush.bf16.msra.mxu2 %v5535_v22 }
 0x229   : > { %2598 = vmatpush.bf16.msrb.mxu0 %v5539_v23 }
 0x22c   : > { %2523 = vmatpush.bf16.msra.mxu1 %v5391_v40  ;;  %2542 = vmatpush.bf16.msra.mxu2 %v5519_v34 }
 0x22d   : > { %2599 = vmatpush.bf16.msrb.mxu0 %v5523_v41 }
 0x230   : > { %2573 = vmatpush.bf16.msrb.mxu2 %v5507_v42 }
 0x234   : > { %2574 = vmatpush.bf16.msrb.mxu2 %v5491_v45 }
 0x238   : > { %2575 = vmatpush.bf16.msrb.mxu2 %v5475_v54 }
 0x23b   : > { %v1297_v51 = vpop.xlane.xlu1 %1296 }
 0x23c   : > { %2576 = vmatpush.bf16.msrb.mxu2 %v5459_v25  ;;  %v7270_v12 = vmul.f32 0.00390625, %v1297_v51 }
 0x23d   : > { %v1294_v27 = vpop.xlane.xlu2 %1293 }
 0x23e   : > { %v7260_v28 = vmul.f32 0.00390625, %v1294_v27  ;;  %v1333_v29 = vmul.f32 %v7270_v12, %v7270_v12 }
 0x240   : > { %2577 = vmatpush.bf16.msrb.mxu2 %v5443_v53  ;;  %v1332_v5 = vmul.f32 %v7260_v28, %v7260_v28  ;;  %v1388_v25 = vsub.f32 %v7081_v13, %v7260_v28  ;;  %v1389_v50 = vsub.f32 %v7084_v46, %v7260_v28 }
 0x243   : > { %v1314_v9 = vpop.xlane.xlu1 %1313  ;;  %v1300_v2 = vpop.xlane.xlu0 %1299 }
 0x244   : > { %2578 = vmatpush.bf16.msrb.mxu2 %v5427_v58  ;;  %v1328_v61 = vmul.f32 0.00390625, %v1314_v9  ;;  %v7266_v37 = vmul.f32 0.00390625, %v1300_v2 }
 0x245   : > { %v1303_v3 = vpop.xlane.xlu2 %1302 }
 0x246   : > { %v1336_v44 = vsub.f32 %v1328_v61, %v1332_v5  ;;  %v7264_v55 = vmul.f32 0.00390625, %v1303_v3  ;;  %v1334_v18 = vmul.f32 %v7266_v37, %v7266_v37 }
 0x248   : > { %2579 = vmatpush.bf16.msrb.mxu2 %v5411_v49  ;;  %v1340_v35 = vmax.f32 %v1336_v44, 0.0  ;;  %v1335_v7 = vmul.f32 %v7264_v55, %v7264_v55 }
 0x24a   : > { %v1344_v26 = vadd.f32 1e-05, %v1340_v35 }
 0x24b   : > { %v1323_v19 = vpop.xlane.xlu1 %1322  ;;  %v1320_v21 = vpop.xlane.xlu0 %1319 }
 0x24c   : > { %2580 = vmatpush.bf16.msrb.mxu2 %v5395_v4  ;;  %6200 = vrsqrt.f32 %v1344_v26  ;;  %v1331_v20 = vmul.f32 0.00390625, %v1323_v19  ;;  %v1330_v22 = vmul.f32 0.00390625, %v1320_v21  ;;  %vm1354_vm4 = vweird.f32 %v1344_v26 }
 0x24d   : > { %v1317_v23 = vpop.xlane.xlu2 %1316  ;;  %v1394_v4 = vsub.f32 %v7117_v36, %v7264_v55 }
 0x24e   : > { %v1339_v11 = vsub.f32 %v1331_v20, %v1335_v7  ;;  %v1329_v38 = vmul.f32 0.00390625, %v1317_v23  ;;  %v1338_v30 = vsub.f32 %v1330_v22, %v1334_v18 }
 0x250   : > { %v1343_v24 = vmax.f32 %v1339_v11, 0.0  ;;  %v1337_v40 = vsub.f32 %v1329_v38, %v1333_v29  ;;  %v1342_v34 = vmax.f32 %v1338_v30, 0.0 }
 0x252   : > { %v6201_v31 = vpop.eup %6200  ;;  %v1347_v60 = vadd.f32 1e-05, %v1343_v24  ;;  %v1341_v59 = vmax.f32 %v1337_v40, 0.0  ;;  %v7276_v41 = vadd.f32 1e-05, %v1342_v34  ;;  %v1392_v34 = vsub.f32 %v7109_v32, %v7266_v37 }
 0x253   : > { %v1349_v17 = vmul.f32 %v6201_v31, %v1344_v26  ;;  %vm1355_vm5 = vweird.f32 %v6201_v31  ;;  %v1395_v26 = vsub.f32 %v7120_v39, %v7264_v55  ;;  %v1390_v39 = vsub.f32 %v7069_v14, %v7270_v12 }
 0x254   : > { %6202 = vrsqrt.f32 %v1347_v60  ;;  %v1345_v62 = vadd.f32 1e-05, %v1341_v59  ;;  %vm1356_vm6 = vmor %vm1354_vm4, %vm1355_vm5  ;;  %vm1384_vm7 = vweird.f32 %v1347_v60  ;;  %v1391_v55 = vsub.f32 %v7072_v15, %v7270_v12 }
 0x255   : > { %v1350_v42 = vmul.f32 %v6201_v31, %v1349_v17  ;;  %6204 = vrsqrt.f32 %v7276_v41  ;;  %v1407_v45 = vpop.permute.xlu2 %1406  ;;  %vm1374_vm5 = vweird.f32 %v7276_v41  ;;  %v1393_v14 = vsub.f32 %v7112_v33, %v7266_v37 }
 0x256   : > { %6206 = vrsqrt.f32 %v1345_v62  ;;  %vm1364_vm4 = vweird.f32 %v1345_v62 }
 0x257   : > { %v1351_v43 = vmul.f32 0.5, %v1350_v42 }
 0x259   : > { %v1352_v63 = vsub.f32 1.5, %v1351_v43 }
 0x25a   : > { %v6203_v47 = vpop.eup %6202 }
 0x25b   : > { %v1379_v54 = vmul.f32 %v6203_v47, %v1347_v60  ;;  %v1353_v6 = vmul.f32 %v6201_v31, %v1352_v63  ;;  %v6205_v48 = vpop.eup %6204  ;;  %vm1385_vm8 = vweird.f32 %v6203_v47 }
 0x25c   : > { %v1369_v52 = vmul.f32 %v6205_v48, %v7276_v41  ;;  %v6207_v56 = vpop.eup %6206  ;;  %vm1386_vm9 = vmor %vm1384_vm7, %vm1385_vm8  ;;  %vm1375_vm11 = vweird.f32 %v6205_v48 }
 0x25d   : > { %v1380_v51 = vmul.f32 %v6203_v47, %v1379_v54  ;;  %v1357_v53 = vsel %vm1356_vm6, %v6201_v31, %v1353_v6  ;;  %v1359_v5 = vmul.f32 %v6207_v56, %v1345_v62  ;;  %v1435_v10 = vpop.permute.xlu2 %1434  ;;  %vm1365_vm10 = vweird.f32 %v6207_v56  ;;  %vm1376_vm7 = vmor %vm1374_vm5, %vm1375_vm11 }
 0x25e   : > { %v1396_v27 = vmul.f32 %v1388_v25, %v1357_v53  ;;  %v1397_v57 = vmul.f32 %v1389_v50, %v1357_v53  ;;  %v1370_v16 = vmul.f32 %v6205_v48, %v1369_v52  ;;  %v1412_v2 = vpop.permute.xlu0 %1411  ;;  %vm1366_vm6 = vmor %vm1364_vm4, %vm1365_vm10 }
 0x25f   : > { %v1381_v58 = vmul.f32 0.5, %v1380_v51  ;;  %v1360_v49 = vmul.f32 %v6207_v56, %v1359_v5 }
 0x260   : > { %v1424_v9 = vmul.f32 %v1407_v45, %v1396_v27  ;;  %v1425_v61 = vmul.f32 %v1407_v45, %v1397_v57  ;;  %v1371_v44 = vmul.f32 0.5, %v1370_v16 }
 0x261   : > { %v1382_v13 = vsub.f32 1.5, %v1381_v58  ;;  %v1361_v0 = vmul.f32 0.5, %v1360_v49 }
 0x262   : > { %v7284_v46 = vadd.f32 %v1435_v10, %v1424_v9  ;;  %v7286_v28 = vadd.f32 %v1435_v10, %v1425_v61  ;;  %v1372_v3 = vsub.f32 1.5, %v1371_v44 }
 0x263   : > { %v1417_v35 = vpop.permute.xlu1 %1416  ;;  %v1383_v1 = vmul.f32 %v6203_v47, %v1382_v13  ;;  %v1362_v20 = vsub.f32 1.5, %v1361_v0 }
 0x264   : > { %v5221_v7 = vmul.f32 -1.442695, %v7284_v46  ;;  %v5222_v19 = vmul.f32 -1.442695, %v7286_v28  ;;  %v1373_v11 = vmul.f32 %v6205_v48, %v1372_v3 }
 0x265   : > { %v1387_v21 = vsel %vm1386_vm9, %v6203_v47, %v1383_v1  ;;  %v1363_v36 = vmul.f32 %v6207_v56, %v1362_v20  ;;  %v1450_v40 = vpop.permute.xlu2 %1449 }
 0x266   : > { %6208 = vpow2.f32 %v5221_v7  ;;  %v1402_v18 = vmul.f32 %v1394_v4, %v1387_v21  ;;  %v1403_v22 = vmul.f32 %v1395_v26, %v1387_v21  ;;  %v1422_v23 = vpop.permute.xlu0 %1421  ;;  %v1377_v60 = vsel %vm1376_vm7, %v6205_v48, %v1373_v11 }
 0x267   : > { %6210 = vpow2.f32 %v5222_v19  ;;  %v1367_v24 = vsel %vm1366_vm6, %v6207_v56, %v1363_v36  ;;  %v1400_v45 = vmul.f32 %v1392_v34, %v1377_v60  ;;  %v1401_v63 = vmul.f32 %v1393_v14, %v1377_v60 }
 0x268   : > { %v1430_v29 = vmul.f32 %v1422_v23, %v1402_v18  ;;  %v1431_v38 = vmul.f32 %v1422_v23, %v1403_v22  ;;  %v1398_v30 = vmul.f32 %v1390_v39, %v1367_v24  ;;  %v1399_v31 = vmul.f32 %v1391_v55, %v1367_v24 }
 0x269   : > { %v1428_v48 = vmul.f32 %v1417_v35, %v1400_v45  ;;  %v1429_v25 = vmul.f32 %v1417_v35, %v1401_v63 }
 0x26a   : > { %v7305_v15 = vadd.f32 %v1450_v40, %v1430_v29  ;;  %v7307_v12 = vadd.f32 %v1450_v40, %v1431_v38  ;;  %v1426_v41 = vmul.f32 %v1412_v2, %v1398_v30  ;;  %v1427_v42 = vmul.f32 %v1412_v2, %v1399_v31 }
 0x26b   : > { %v1440_v17 = vpop.permute.xlu1 %1439 }
 0x26c   : > { %v6209_v59 = vpop.eup %6208  ;;  %v5227_v47 = vmul.f32 -1.442695, %v7305_v15  ;;  %v5228_v32 = vmul.f32 -1.442695, %v7307_v12  ;;  %v7311_v6 = vadd.f32 %v1440_v17, %v1426_v41  ;;  %v7313_v33 = vadd.f32 %v1440_v17, %v1427_v42 }
 0x26d   : > { %v6211_v62 = vpop.eup %6210  ;;  %v1484_v43 = vadd.f32 1.0, %v6209_v59 }
 0x26e   : > { %v1485_v54 = vadd.f32 1.0, %v6211_v62  ;;  %v1445_v37 = vpop.permute.xlu0 %1444  ;;  %v5223_v50 = vmul.f32 -1.442695, %v7311_v6  ;;  %v5224_v51 = vmul.f32 -1.442695, %v7313_v33 }
 0x26f   : > { %6212 = vrcp.f32 %v1484_v43  ;;  %v7317_v52 = vadd.f32 %v1445_v37, %v1428_v48  ;;  %v7319_v53 = vadd.f32 %v1445_v37, %v1429_v25  ;;  %v1503_v49 = vand.u32 2147483648, %v1484_v43 }
 0x270   : > { %6214 = vrcp.f32 %v1485_v54  ;;  %v1501_v1 = vand.u32 2147483647, %v1484_v43  ;;  %v1516_v26 = vand.u32 2147483647, %v1485_v54  ;;  %v1518_v7 = vand.u32 2147483648, %v1485_v54 }
 0x271   : > { %6216 = vpow2.f32 %v5227_v47  ;;  %v5225_v27 = vmul.f32 -1.442695, %v7317_v52  ;;  %v5226_v57 = vmul.f32 -1.442695, %v7319_v53  ;;  %vm1497_vm9 = vweird.f32 %v1484_v43 }
 0x272   : > { %6218 = vpow2.f32 %v5228_v32  ;;  %vm1512_vm10 = vweird.f32 %v1485_v54  ;;  %v1504_v21 = vor.u32 1.1754944e-38, %v1503_v49  ;;  %vm1502_vm5 = vcmp.eq.f32.partialorder %v1501_v1, 8.507059e+37 }
 0x273   : > { %6220 = vpow2.f32 %v5223_v50  ;;  %vm7339_vm7 = vcmp.eq.f32.partialorder %v1516_v26, 8.507059e+37  ;;  %v1519_v30 = vor.u32 1.1754944e-38, %v1518_v7 }
 0x274   : > { %6222 = vpow2.f32 %v5224_v51 }
 0x275   : > { %v6213_v56 = vpop.eup %6212  ;;  %6224 = vpow2.f32 %v5225_v27 }
 0x276   : > { %v6215_v58 = vpop.eup %6214  ;;  %v1493_v5 = vmul.f32 %v6213_v56, %v1484_v43  ;;  %6226 = vpow2.f32 %v5226_v57  ;;  %vm1498_vm8 = vweird.f32 %v6213_v56 }
 0x277   : > { %v6217_v16 = vpop.eup %6216  ;;  %v1508_v9 = vmul.f32 %v6215_v58, %v1485_v54  ;;  %vm1513_vm11 = vweird.f32 %v6215_v58  ;;  %vm1499_vm4 = vmor %vm1497_vm9, %vm1498_vm8 }
 0x278   : > { %v6219_v61 = vpop.eup %6218  ;;  %v1494_v10 = vsub.f32 1.0, %v1493_v5  ;;  %v7323_v2 = vadd.f32 1.0, %v6217_v16  ;;  %vm7335_vm6 = vmor %vm1512_vm10, %vm1513_vm11 }
 0x279   : > { %v6221_v13 = vpop.eup %6220  ;;  %v1509_v44 = vsub.f32 1.0, %v1508_v9  ;;  %v7325_v0 = vadd.f32 1.0, %v6219_v61 }
 0x27a   : > { %v6223_v3 = vpop.eup %6222  ;;  %v1495_v35 = vmul.f32 %v6213_v56, %v1494_v10  ;;  %6228 = vrcp.f32 %v7323_v2  ;;  %v7329_v18 = vadd.f32 1.0, %v6221_v13  ;;  %v1591_v39 = vand.u32 2147483647, %v7323_v2 }
 0x27b   : > { %v1510_v4 = vmul.f32 %v6215_v58, %v1509_v44  ;;  %6230 = vrcp.f32 %v7325_v0  ;;  %v6225_v20 = vpop.eup %6224  ;;  %v7331_v22 = vadd.f32 1.0, %v6223_v3  ;;  %v1593_v55 = vand.u32 2147483648, %v7323_v2 }
 0x27c   : > { %v1496_v19 = vadd.f32 %v6213_v56, %v1495_v35  ;;  %v6227_v23 = vpop.eup %6226  ;;  %6232 = vrcp.f32 %v7329_v18  ;;  %v1606_v34 = vand.u32 2147483647, %v7325_v0  ;;  %v7350_v14 = vadd.f32 1.0, %v6225_v20 }
 0x27d   : > { %v1511_v11 = vadd.f32 %v6215_v58, %v1510_v4  ;;  %vm1587_vm8 = vweird.f32 %v7323_v2  ;;  %v1608_v41 = vand.u32 2147483648, %v7325_v0  ;;  %6234 = vrcp.f32 %v7331_v22 }
 0x27e   : > { %v1500_v36 = vsel %vm1499_vm4, %v6213_v56, %v1496_v19  ;;  %vm7356_vm9 = vcmp.eq.f32.partialorder %v1591_v39, 8.507059e+37  ;;  %v1594_v62 = vor.u32 1.1754944e-38, %v1593_v55  ;;  %vm1602_vm10 = vweird.f32 %v7325_v0 }
 0x27f   : > { %v1505_v24 = vsel %vm1502_vm5, %v1504_v21, %v1500_v36  ;;  %v1515_v60 = vsel %vm7335_vm6, %v6215_v58, %v1511_v11  ;;  %v1531_v63 = vand.u32 2147483647, %v7329_v18  ;;  %v1533_v47 = vand.u32 2147483648, %v7329_v18 }
 0x280   : > { %v6229_v31 = vpop.eup %6228  ;;  %v7347_v40 = vmul.f32 %v1505_v24, %v7284_v46  ;;  %v1520_v43 = vsel %vm7339_vm7, %v1519_v30, %v1515_v60  ;;  %vm7368_vm11 = vcmp.eq.f32.partialorder %v1606_v34, 8.507059e+37  ;;  %v7372_v37 = vadd.f32 1.0, %v6227_v23 }
 0x281   : > { %v6231_v17 = vpop.eup %6230  ;;  %v1583_v59 = vmul.f32 %v6229_v31, %v7323_v2  ;;  %6236 = vrcp.f32 %v7350_v14  ;;  %vm1588_vm4 = vweird.f32 %v6229_v31  ;;  %v1609_v50 = vor.u32 1.1754944e-38, %v1608_v41 }
 0x282   : > { %v1598_v46 = vmul.f32 %v6231_v17, %v7325_v0  ;;  %1620 = vrot.lane.b32.xlu1 %v7347_v40, %s9650_s27  ;;  %v6233_v48 = vpop.eup %6232  ;;  %vm1527_vm5 = vweird.f32 %v7329_v18  ;;  %v7377_v51 = vmul.f32 %v1520_v43, %v7286_v28  ;;  %vm1603_vm6 = vweird.f32 %v6231_v17  ;;  %vm1589_vm3 = vmor %vm1587_vm8, %vm1588_vm4 }
 0x283   : > { %v1584_v45 = vsub.f32 1.0, %v1583_v59  ;;  %v1523_v27 = vmul.f32 %v6233_v48, %v7329_v18  ;;  %v6235_v57 = vpop.eup %6234  ;;  %vm7380_vm7 = vcmp.eq.f32.partialorder %v1531_v63, 8.507059e+37  ;;  %v1534_v16 = vor.u32 1.1754944e-38, %v1533_v47  ;;  %vm1604_vm1 = vmor %vm1602_vm10, %vm1603_vm6 }
 0x284   : > { %v1599_v54 = vsub.f32 1.0, %v1598_v46  ;;  %6238 = vrcp.f32 %v7372_v37  ;;  %v1538_v28 = vmul.f32 %v6235_v57, %v7331_v22  ;;  %vm1542_vm2 = vweird.f32 %v7331_v22 }
 0x285   : > { %v1585_v25 = vmul.f32 %v6229_v31, %v1584_v45  ;;  %v1524_v61 = vsub.f32 1.0, %v1523_v27  ;;  %vm1528_vm0 = vweird.f32 %v6233_v48  ;;  %v1546_v13 = vand.u32 2147483647, %v7331_v22 }
 0x286   : > { %v1600_v56 = vmul.f32 %v6231_v17, %v1599_v54  ;;  %v1548_v49 = vand.u32 2147483648, %v7331_v22  ;;  %v1539_v1 = vsub.f32 1.0, %v1538_v28  ;;  %vm1543_vm8 = vweird.f32 %v6235_v57 }
 0x287   : > { %v1586_v58 = vadd.f32 %v6229_v31, %v1585_v25  ;;  %v6237_v44 = vpop.eup %6236  ;;  %v1525_v35 = vmul.f32 %v6233_v48, %v1524_v61  ;;  %v1804_v39 = vpack.c.bf16 %v7377_v51, %v7347_v40  ;;  %v1561_v23 = vand.u32 2147483647, %v7350_v14 }
 0x288   : > { %v1601_v9 = vadd.f32 %v6231_v17, %v1600_v56  ;;  %v1553_v0 = vmul.f32 %v6237_v44, %v7350_v14  ;;  %v1540_v20 = vmul.f32 %v6235_v57, %v1539_v1  ;;  %v1549_v11 = vor.u32 1.1754944e-38, %v1548_v49 }
 0x289   : > { %v1590_v10 = vsel %vm1589_vm3, %v6229_v31, %v1586_v58  ;;  %vm1557_vm3 = vweird.f32 %v7350_v14  ;;  %v1526_v19 = vadd.f32 %v6233_v48, %v1525_v35  ;;  %1808 = vst [vmem:[#allocation2 + $0x108] sm:$0xff] %v1804_v39  ;;  %vm1547_vm10 = vcmp.eq.f32.partialorder %v1546_v13, 8.507059e+37 }
 0x28a   : > { %v1595_v2 = vsel %vm7356_vm9, %v1594_v62, %v1590_v10  ;;  %v1605_v3 = vsel %vm1604_vm1, %v6231_v17, %v1601_v9  ;;  %v6239_v21 = vpop.eup %6238  ;;  %vm1529_vm1 = vmor %vm1527_vm5, %vm1528_vm0  ;;  %v1554_v36 = vsub.f32 1.0, %v1553_v0  ;;  %v1541_v55 = vadd.f32 %v6235_v57, %v1540_v20 }
 0x28b   : > { %v1610_v4 = vsel %vm7368_vm11, %v1609_v50, %v1605_v3  ;;  %v7398_v26 = vmul.f32 %v1595_v2, %v7305_v15  ;;  %v1563_v15 = vand.u32 2147483648, %v7350_v14  ;;  %v1568_v24 = vmul.f32 %v6239_v21, %v7372_v37  ;;  %vm1544_vm0 = vmor %vm1542_vm2, %vm1543_vm8 }
 0x28c   : > { %v7403_v7 = vmul.f32 %v1610_v4, %v7307_v12  ;;  %v1530_v12 = vsel %vm1529_vm1, %v6233_v48, %v1526_v19  ;;  %v1555_v29 = vmul.f32 %v6237_v44, %v1554_v36  ;;  %vm1558_vm9 = vweird.f32 %v6237_v44  ;;  %v1644_v48 = vld [vmem:[%s9611_s2] sm:$0x3]  ;;  %v5935_v36 = vld [vmem:[%s9614_s5 + $0x10] sm:$0xf0] }
 0x28d   : > { %1626 = vrot.lane.b32.xlu1 %v7398_v26, %s9650_s27  ;;  %v1535_v18 = vsel %vm7380_vm7, %v1534_v16, %v1530_v12  ;;  %v1545_v30 = vsel %vm1544_vm0, %v6235_v57, %v1541_v55  ;;  %v1569_v60 = vsub.f32 1.0, %v1568_v24  ;;  %v1564_v59 = vor.u32 1.1754944e-38, %v1563_v15  ;;  %vm1559_vm2 = vmor %vm1557_vm3, %vm1558_vm9 }
 0x28e   : > { %v1807_v38 = vpack.c.bf16 %v7403_v7, %v7398_v26  ;;  %v7422_v31 = vmul.f32 %v1535_v18, %v7311_v6  ;;  %v1550_v34 = vsel %vm1547_vm10, %v1549_v11, %v1545_v30  ;;  %v1556_v17 = vadd.f32 %v6237_v44, %v1555_v29  ;;  %v5246_v11 = vld [vmem:[%s9614_s5 + $0x8] sm:$0xf]  ;;  %v5229_v29 = vld [vmem:[%s9611_s2 + $0x2] sm:$0x3] }
 0x28f   : > { %v1578_v41 = vand.u32 2147483648, %v7372_v37  ;;  %v7426_v22 = vmul.f32 %v1550_v34, %v7313_v33  ;;  %v1570_v42 = vmul.f32 %v6239_v21, %v1569_v60  ;;  %vm1573_vm11 = vweird.f32 %v6239_v21 }
 0x290   : > { %1811 = vst [vmem:[#allocation2 + $0x138] sm:$0xff] %v1807_v38  ;;  %v1576_v62 = vand.u32 2147483647, %v7372_v37  ;;  %1622 = vrot.lane.b32.xlu0 %v7422_v31, %s9650_s27  ;;  %v1560_v6 = vsel %vm1559_vm2, %v6237_v44, %v1556_v17  ;;  %vm1562_vm4 = vcmp.eq.f32.partialorder %v1561_v23, 8.507059e+37  ;;  %vm1572_vm5 = vweird.f32 %v7372_v37  ;;  %v5238_v17 = vld [vmem:[%s9614_s5] sm:$0xf] }
 0x291   : > { %v1565_v46 = vsel %vm1562_vm4, %v1564_v59, %v1560_v6  ;;  %v1571_v43 = vadd.f32 %v6239_v21, %v1570_v42  ;;  %v1805_v33 = vpack.c.bf16 %v7426_v22, %v7422_v31  ;;  %vm1574_vm6 = vmor %vm1572_vm5, %vm1573_vm11  ;;  %v1579_v45 = vor.u32 1.1754944e-38, %v1578_v41  ;;  %v5934_v59 = vld [vmem:[%s9614_s5 + $0x8] sm:$0xf0] }
 0x292   : > { %v7437_v14 = vmul.f32 %v1565_v46, %v7317_v52  ;;  %vm1577_vm7 = vcmp.eq.f32.partialorder %v1576_v62, 8.507059e+37  ;;  %v1646_v56 = vperm.slane %v1644_v48, 0  ;;  %v1647_v27 = vperm.slane %v1644_v48, 1 }
 0x293   : > { %v1575_v63 = vsel %vm1574_vm6, %v6239_v21, %v1571_v43  ;;  %1809 = vst [vmem:[#allocation2 + $0x118] sm:$0xff] %v1805_v33  ;;  %vm9652_vm3 = vcmask 261120   ;;  %v7566_v15 = vor.u32 %v5935_v36, %v5246_v11  ;;  %v1692_v60 = vperm.slane %v5229_v29, 0 }
 0x294   : > { %v1580_v47 = vsel %vm1577_vm7, %v1579_v45, %v1575_v63  ;;  %1624 = vrot.lane.b32.xlu2 %v7437_v14, %s9650_s27  ;;  %v1693_v34 = vperm.slane %v5229_v29, 1  ;;  %v7596_v62 = vor.u32 %v5934_v59, %v5238_v17  ;;  %vm2757_vm10 = vcmask 523264  }
 0x295   : > { %v7442_v54 = vmul.f32 %v1580_v47, %v7319_v53  ;;  %5548 = vmatmul.msk.bf16.vlgmr.msra.gmra.mxu2 %vm9652_vm3, %v7566_v15  ;;  %vm9691_vm2 = vcmp.lt.s32.totalorder %v6932_v8, 127 }
 0x296   : > { %2505 = vmatmul.bf16.vlgmr.msra.gmra.mxu0 %v7596_v62  ;;  %2562 = vmatmul.bf16.vlgmr.msra.gmra.mxu3 %v7596_v62  ;;  %vm9692_vm11 = vmmov %vm9691_vm2 }
 0x297   : > { %1632 = vrot.lane.b32.xlu1 %v7442_v54, %s9650_s27  ;;  %v1806_v52 = vpack.c.bf16 %v7442_v54, %v7437_v14  ;;  %vm9693_vm4 = vmmov %vm9691_vm2 }
 0x298   : > { %1628 = vrot.lane.b32.xlu0 %v7377_v51, %s9650_s27  ;;  %vm9694_vm5 = vmmov %vm9691_vm2 }
 0x299   : > { %1810 = vst [vmem:[#allocation2 + $0x128] sm:$0xff] %v1806_v52  ;;  %vm9695_vm6 = vmmov %vm9691_vm2 }
 0x29a   : > { %vm9696_vm7 = vmmov %vm9691_vm2 }
 0x29c   : > { %1630 = vrot.lane.b32.xlu2 %v7426_v22, %s9650_s27 }
 0x29f   : > { %1668 = vrot.lane.b32.xlu1 %v7422_v31, %s9654_s16 }
 0x2a0   : > { %1634 = vrot.lane.b32.xlu0 %v7403_v7, %s9650_s27  ;;  %s9725_s27 = smov 17  }
 0x2a4   : > { %1666 = vrot.lane.b32.xlu2 %v7347_v40, %s9654_s16 }
 0x2a7   : > { %1674 = vrot.lane.b32.xlu1 %v7377_v51, %s9654_s16 }
 0x2a8   : > { %1670 = vrot.lane.b32.xlu0 %v7437_v14, %s9654_s16 }
 0x2ac   : > { %1672 = vrot.lane.b32.xlu2 %v7398_v26, %s9654_s16 }
 0x2af   : > { %1680 = vrot.lane.b32.xlu1 %v7403_v7, %s9654_s16 }
 0x2b0   : > { %1676 = vrot.lane.b32.xlu0 %v7426_v22, %s9654_s16 }
 0x2b4   : > { %1678 = vrot.lane.b32.xlu2 %v7442_v54, %s9654_s16 }
 0x2b7   : > { %1716 = vrot.lane.b32.xlu1 %v7437_v14, %s9648_s26 }
 0x2b8   : > { %1712 = vrot.lane.b32.xlu0 %v7347_v40, %s9648_s26 }
 0x2bc   : > { %1714 = vrot.lane.b32.xlu2 %v7422_v31, %s9648_s26 }
 0x2bf   : > { %1722 = vrot.lane.b32.xlu1 %v7426_v22, %s9648_s26 }
 0x2c0   : > { %1718 = vrot.lane.b32.xlu0 %v7398_v26, %s9648_s26 }
 0x2c4   : > { %1720 = vrot.lane.b32.xlu2 %v7377_v51, %s9648_s26 }
 0x2c7   : > { %1758 = vrot.lane.b32.xlu1 %v7347_v40, %s9646_s17 }
 0x2c8   : > { %1724 = vrot.lane.b32.xlu0 %v7442_v54, %s9648_s26 }
 0x2cc   : > { %1726 = vrot.lane.b32.xlu2 %v7403_v7, %s9648_s26  ;;  %s9730_s26 = smov 15  }
 0x2cf   : > { %1764 = vrot.lane.b32.xlu1 %v7398_v26, %s9646_s17 }
 0x2d0   : > { %1760 = vrot.lane.b32.xlu0 %v7422_v31, %s9646_s17 }
 0x2d4   : > { %1762 = vrot.lane.b32.xlu2 %v7437_v14, %s9646_s17 }
 0x2d7   : > { %1770 = vrot.lane.b32.xlu1 %v7442_v54, %s9646_s17 }
 0x2d8   : > { %1766 = vrot.lane.b32.xlu0 %v7377_v51, %s9646_s17 }
 0x2dc   : > { %1768 = vrot.lane.b32.xlu2 %v7426_v22, %s9646_s17 }
 0x2df   : > { %1814 = vrot.lane.b32.xlu1 %v7422_v31, %s9642_s23 }
 0x2e0   : > { %1772 = vrot.lane.b32.xlu0 %v7403_v7, %s9646_s17 }
 0x2e4   : > { %1812 = vrot.lane.b32.xlu2 %v7347_v40, %s9642_s23 }
 0x2e7   : > { %1820 = vrot.lane.b32.xlu1 %v7377_v51, %s9642_s23 }
 0x2e8   : > { %1816 = vrot.lane.b32.xlu0 %v7437_v14, %s9642_s23 }
 0x2ec   : > { %1818 = vrot.lane.b32.xlu2 %v7398_v26, %s9642_s23 }
 0x2ee   : > { %v1625_v53 = vpop.permute.xlu2 %1624 }
 0x2ef   : > { %1826 = vrot.lane.b32.xlu1 %v7403_v7, %s9642_s23 }
 0x2f0   : > { %1822 = vrot.lane.b32.xlu0 %v7426_v22, %s9642_s23 }
 0x2f4   : > { %1824 = vrot.lane.b32.xlu2 %v7442_v54, %s9642_s23  ;;  %v1621_v32 = vpop.permute.xlu1 %1620  ;;  %s7594_s23 = scalar_lea.vmem %s9687_s1, %s9848_s18 }
 0x2f6   : > { %v1631_v37 = vpop.permute.xlu2 %1630 }
 0x2f7   : > { %1862 = vrot.lane.b32.xlu1 %v7437_v14, %s9640_s29 }
 0x2f8   : > { %1858 = vrot.lane.b32.xlu0 %v7347_v40, %s9640_s29 }
 0x2fc   : > { %1860 = vrot.lane.b32.xlu2 %v7422_v31, %s9640_s29 }
 0x2fe   : > { %v7527_v25 = vpop.permute.xlu2 %1666 }
 0x2ff   : > { %1868 = vrot.lane.b32.xlu1 %v7426_v22, %s9640_s29  ;;  %v1627_v50 = vpop.permute.xlu1 %1626 }
 0x300   : > { %1864 = vrot.lane.b32.xlu0 %v7398_v26, %s9640_s29 }
 0x302   : > { %v1623_v57 = vpop.permute.xlu0 %1622 }
 0x303   : > { %v1637_v58 = vsel %vm900_vm12, %v1623_v57, %v1631_v37  ;;  %v1641_v5 = vsel %vm900_vm12, %v1631_v37, %v1623_v57 }
 0x304   : > { %v1652_v16 = vmul.f32 %v1646_v56, %v1641_v5  ;;  %v1653_v9 = vmul.f32 %v1647_v27, %v1637_v58  ;;  %1866 = vrot.lane.b32.xlu2 %v7377_v51, %s9640_s29 }
 0x306   : > { %v1659_v61 = vpack.c.bf16 %v1653_v9, %v1652_v16  ;;  %v7539_v28 = vpop.permute.xlu2 %1672 }
 0x307   : > { %1904 = vrot.lane.b32.xlu1 %v7347_v40, %s9644_s15 }
 0x308   : > { %1663 = vst [vmem:[#allocation2 + $0x18] sm:$0xff] %v1659_v61  ;;  %1870 = vrot.lane.b32.xlu0 %v7442_v54, %s9640_s29 }
 0x309   : > { %v1633_v10 = vpop.permute.xlu1 %1632 }
 0x30a   : > { %v1629_v13 = vpop.permute.xlu0 %1628  ;;  %v1638_v49 = vsel %vm900_vm12, %v1625_v53, %v1633_v10  ;;  %v1642_v44 = vsel %vm900_vm12, %v1633_v10, %v1625_v53  ;;  %v7610_v53 = vld [vmem:[%s7594_s23] sm:$0x1] }
 0x30b   : > { %v1636_v2 = vsel %vm900_vm12, %v1621_v32, %v1629_v13  ;;  %v1640_v3 = vsel %vm900_vm12, %v1629_v13, %v1621_v32  ;;  %v1654_v35 = vmul.f32 %v1646_v56, %v1642_v44  ;;  %v1655_v1 = vmul.f32 %v1647_v27, %v1638_v49  ;;  %v5230_v44 = vld [vmem:[%s9611_s2 + $0x4] sm:$0x3] }
 0x30c   : > { %v1650_v4 = vmul.f32 %v1646_v56, %v1640_v3  ;;  %v1651_v0 = vmul.f32 %v1647_v27, %v1636_v2  ;;  %1872 = vrot.lane.b32.xlu2 %v7403_v7, %s9640_s29  ;;  %v5556_v32 = vmul.f32 -1.442695, %v7610_v53  ;;  %s9688_s29 = smov 111  }
 0x30d   : > { %v1660_v19 = vpack.c.bf16 %v1655_v1, %v1654_v35 }
 0x30e   : > { %v1658_v20 = vpack.c.bf16 %v1651_v0, %v1650_v4  ;;  %v1679_v21 = vpop.permute.xlu2 %1678  ;;  %6240 = vpow2.f32 %v5556_v32  ;;  %v1738_v4 = vperm.slane %v5230_v44, 0  ;;  %v1739_v0 = vperm.slane %v5230_v44, 1 }
 0x30f   : > { %1664 = vst [vmem:[#allocation2 + $0x28] sm:$0xff] %v1660_v19  ;;  %1910 = vrot.lane.b32.xlu1 %v7398_v26, %s9644_s15  ;;  %v5250_v19 = vld [vmem:[%s9614_s5 + $0x18] sm:$0xf] }
 0x310   : > { %1906 = vrot.lane.b32.xlu0 %v7422_v31, %s9644_s15  ;;  %1662 = vst [vmem:[#allocation2 + $0x8] sm:$0xff] %v1658_v20 }
 0x311   : > { %v1669_v39 = vpop.permute.xlu1 %1668 }
 0x312   : > { %v1635_v12 = vpop.permute.xlu0 %1634 }
 0x313   : > { %v1639_v55 = vsel %vm900_vm12, %v1627_v50, %v1635_v12  ;;  %v1643_v23 = vsel %vm900_vm12, %v1635_v12, %v1627_v50  ;;  %v5258_v50 = vld [vmem:[%s9614_s5 + $0x20] sm:$0xf] }
 0x314   : > { %v1656_v24 = vmul.f32 %v1646_v56, %v1643_v23  ;;  %v1657_v18 = vmul.f32 %v1647_v27, %v1639_v55  ;;  %1908 = vrot.lane.b32.xlu2 %v7437_v14, %s9644_s15  ;;  %v5938_v56 = vld [vmem:[%s9614_s5 + $0x28] sm:$0xf0]  ;;  %v6241_v2 = vpop.eup %6240 }
 0x315   : > { %v7626_v27 = vor.u32 %v5938_v56, %v5258_v50  ;;  %v7645_v35 = vadd.f32 1.0, %v6241_v2 }
 0x316   : > { %v1661_v38 = vpack.c.bf16 %v1657_v18, %v1656_v24  ;;  %v7579_v30 = vpop.permute.xlu2 %1714  ;;  %v5933_v24 = vld [vmem:[%s9614_s5 + $0x4] sm:$0xf] }
 0x317   : > { %1916 = vrot.lane.b32.xlu1 %v7442_v54, %s9644_s15  ;;  %5549 = vmatmul.msk.bf16.gmra.mxu2 %vm9652_vm3, %v7626_v27  ;;  %6242 = vrcp.f32 %v7645_v35  ;;  %vm2735_vm8 = vweird.f32 %v7645_v35  ;;  %v2741_v56 = vand.u32 2147483648, %v7645_v35 }
 0x318   : > { %1665 = vst [vmem:[#allocation2 + $0x38] sm:$0xff] %v1661_v38  ;;  %1912 = vrot.lane.b32.xlu0 %v7377_v51, %s9644_s15 }
 0x319   : > { %v1675_v41 = vpop.permute.xlu1 %1674  ;;  %v2742_v2 = vor.u32 1.1754944e-38, %v2741_v56 }
 0x31a   : > { %v1671_v42 = vpop.permute.xlu0 %1670  ;;  %v1682_v6 = vsel %vm947_vm13, %v7527_v25, %v1675_v41  ;;  %v1686_v46 = vsel %vm947_vm13, %v1675_v41, %v7527_v25 }
 0x31b   : > { %v1684_v43 = vsel %vm947_vm13, %v1671_v42, %v1679_v21  ;;  %v1688_v33 = vsel %vm947_vm13, %v1679_v21, %v1671_v42  ;;  %v1696_v45 = vmul.f32 %v1692_v60, %v1686_v46  ;;  %v1697_v63 = vmul.f32 %v1693_v34, %v1682_v6 }
 0x31c   : > { %v1700_v47 = vmul.f32 %v1692_v60, %v1688_v33  ;;  %v1701_v52 = vmul.f32 %v1693_v34, %v1684_v43  ;;  %1914 = vrot.lane.b32.xlu2 %v7426_v22, %s9644_s15 }
 0x31d   : > { %v1704_v37 = vpack.c.bf16 %v1697_v63, %v1696_v45  ;;  %v7668_v55 = vpop.eup %6242 }
 0x31e   : > { %v1706_v48 = vpack.c.bf16 %v1701_v52, %v1700_v47  ;;  %v1721_v25 = vpop.permute.xlu2 %1720  ;;  %vm2736_vm1 = vweird.f32 %v7668_v55 }
 0x31f   : > { %1708 = vst [vmem:[#allocation2 + $0x48] sm:$0xff] %v1704_v37  ;;  %1952 = vrot.lane.b32.xlu1 %v7422_v31, %s9688_s29  ;;  %vm7717_vm0 = vmor %vm2735_vm8, %vm2736_vm1 }
 0x320   : > { %1918 = vrot.lane.b32.xlu0 %v7403_v7, %s9644_s15  ;;  %1710 = vst [vmem:[#allocation2 + $0x68] sm:$0xff] %v1706_v48  ;;  %v5231_v48 = vld [vmem:[%s9611_s2 + $0x6] sm:$0x3]  ;;  %vm9697_vm8 = vmmov %vm9691_vm2  ;;  %s9731_s15 = smov 1  }
 0x321   : > { %v1681_v57 = vpop.permute.xlu1 %1680  ;;  %vm9698_vm1 = vmmov %vm9691_vm2 }
 0x322   : > { %v1677_v58 = vpop.permute.xlu0 %1676  ;;  %v1685_v31 = vsel %vm947_vm13, %v7539_v28, %v1681_v57  ;;  %v1689_v5 = vsel %vm947_vm13, %v1681_v57, %v7539_v28  ;;  %v1784_v57 = vperm.slane %v5231_v48, 0 }
 0x323   : > { %v1683_v16 = vsel %vm947_vm13, %v1669_v39, %v1677_v58  ;;  %v1687_v9 = vsel %vm947_vm13, %v1677_v58, %v1669_v39  ;;  %v1702_v61 = vmul.f32 %v1692_v60, %v1689_v5  ;;  %v1703_v10 = vmul.f32 %v1693_v34, %v1685_v31 }
 0x324   : > { %v1698_v13 = vmul.f32 %v1692_v60, %v1687_v9  ;;  %v1699_v49 = vmul.f32 %v1693_v34, %v1683_v16  ;;  %1950 = vrot.lane.b32.xlu2 %v7347_v40, %s9688_s29  ;;  %v5937_v40 = vld [vmem:[%s9614_s5 + $0x20] sm:$0xf0]  ;;  %v2731_v60 = vmul.f32 %v7668_v55, %v7645_v35  ;;  %v1785_v58 = vperm.slane %v5231_v48, 1  ;;  %v5936_v9 = vld [vmem:[%s9614_s5 + $0x1c] sm:$0xf] }
 0x325   : > { %v1707_v28 = vpack.c.bf16 %v1703_v10, %v1702_v61  ;;  %v7657_v20 = vor.u32 %v5937_v40, %v5250_v19  ;;  %v2739_v5 = vand.u32 2147483647, %v7645_v35 }
 0x326   : > { %v1705_v3 = vpack.c.bf16 %v1699_v49, %v1698_v13  ;;  %v1727_v1 = vpop.permute.xlu2 %1726  ;;  %v2732_v33 = vsub.f32 1.0, %v2731_v60  ;;  %v5252_v13 = vld [vmem:[%s9614_s5 + $0x24] sm:$0xf0] }
 0x327   : > { %1711 = vst [vmem:[#allocation2 + $0x78] sm:$0xff] %v1707_v28  ;;  %1958 = vrot.lane.b32.xlu1 %v7377_v51, %s9688_s29  ;;  %2510 = vmatmul.bf16.gmra.mxu0 %v7657_v20  ;;  %v7731_v28 = vor.u32 %v5936_v9, %v5252_v13  ;;  %vm2740_vm9 = vcmp.eq.f32.partialorder %v2739_v5, 8.507059e+37  ;;  %v2749_v5 = vld [vmem:[%s9616_s7 + $0x18] sm:$0xff] }
 0x328   : > { %1954 = vrot.lane.b32.xlu0 %v7437_v14, %s9688_s29  ;;  %1709 = vst [vmem:[#allocation2 + $0x58] sm:$0xff] %v1705_v3  ;;  %2567 = vmatmul.bf16.gmra.mxu3 %v7657_v20 }
 0x329   : > { %v1717_v21 = vpop.permute.xlu1 %1716 }
 0x32a   : > { %v1713_v11 = vpop.permute.xlu0 %1712 }
 0x32b   : > { %v1728_v51 = vsel %vm995_vm14, %v1713_v11, %v1721_v25  ;;  %v1732_v14 = vsel %vm995_vm14, %v1721_v25, %v1713_v11 }
 0x32c   : > { %v1742_v36 = vmul.f32 %v1738_v4, %v1732_v14  ;;  %v1743_v39 = vmul.f32 %v1739_v0, %v1728_v51  ;;  %1956 = vrot.lane.b32.xlu2 %v7398_v26, %s9688_s29  ;;  %v5240_v26 = vld [vmem:[%s9614_s5 + $0xc] sm:$0xf0] }
 0x32d   : > { %v7682_v38 = vor.u32 %v5933_v24, %v5240_v26 }
 0x32e   : > { %v1750_v12 = vpack.c.bf16 %v1743_v39, %v1742_v36  ;;  %v7670_v23 = vpop.permute.xlu2 %1762 }
 0x32f   : > { %1964 = vrot.lane.b32.xlu1 %v7403_v7, %s9688_s29  ;;  %2581 = vmatmul.bf16.vlgmr.msrb.gmra.mxu2 %v7682_v38 }
 0x330   : > { %1754 = vst [vmem:[#allocation2 + $0x88] sm:$0xff] %v1750_v12  ;;  %1960 = vrot.lane.b32.xlu0 %v7426_v22, %s9688_s29  ;;  %2524 = vmatmul.bf16.vlgmr.msra.gmra.mxu1 %v7682_v38 }
 0x331   : > { %v1723_v18 = vpop.permute.xlu1 %1722 }
 0x332   : > { %v1719_v29 = vpop.permute.xlu0 %1718  ;;  %v1729_v7 = vsel %vm995_vm14, %v7579_v30, %v1723_v18  ;;  %v1733_v22 = vsel %vm995_vm14, %v1723_v18, %v7579_v30 }
 0x333   : > { %v1731_v34 = vsel %vm995_vm14, %v1719_v29, %v1727_v1  ;;  %v1735_v17 = vsel %vm995_vm14, %v1727_v1, %v1719_v29  ;;  %v1744_v59 = vmul.f32 %v1738_v4, %v1733_v22  ;;  %v1745_v41 = vmul.f32 %v1739_v0, %v1729_v7  ;;  %v2748_v7 = vld [vmem:[%s9616_s7 + $0x10] sm:$0xff] }
 0x334   : > { %v1748_v42 = vmul.f32 %v1738_v4, %v1735_v17  ;;  %v1749_v6 = vmul.f32 %v1739_v0, %v1731_v34  ;;  %1962 = vrot.lane.b32.xlu2 %v7442_v54, %s9688_s29  ;;  %v2733_v54 = vmul.f32 %v7668_v55, %v2732_v33 }
 0x335   : > { %v1751_v46 = vpack.c.bf16 %v1745_v41, %v1744_v59 }
 0x336   : > { %v1753_v43 = vpack.c.bf16 %v1749_v6, %v1748_v42  ;;  %v1769_v30 = vpop.permute.xlu2 %1768  ;;  %v2734_v31 = vadd.f32 %v7668_v55, %v2733_v54  ;;  %v2746_v6 = vld [vmem:[%s9616_s7] sm:$0xff] }
 0x337   : > { %1755 = vst [vmem:[#allocation2 + $0x98] sm:$0xff] %v1751_v46  ;;  %5550 = vmatmul.msk.bf16.vlgmr.msrb.gmra.mxu0 %vm9652_vm3, %v7566_v15 }
 0x338   : > { %1757 = vst [vmem:[#allocation2 + $0xb8] sm:$0xff] %v1753_v43  ;;  %v2738_v1 = vsel %vm7717_vm0, %v7668_v55, %v2734_v31  ;;  %vm9699_vm0 = vcmp.lt.s32.totalorder %v6932_v8, 113 }
 0x339   : > { %v1759_v45 = vpop.permute.xlu1 %1758  ;;  %v2743_v19 = vsel %vm2740_vm9, %v2742_v2, %v2738_v1  ;;  %vm9700_vm9 = vmmov %vm9699_vm0 }
 0x33a   : > { %v1725_v63 = vpop.permute.xlu0 %1724  ;;  %v2745_v11 = vmul.f32 %v2743_v19, %v7610_v53 }
 0x33b   : > { %v1730_v47 = vsel %vm995_vm14, %v1717_v21, %v1725_v63  ;;  %v1734_v52 = vsel %vm995_vm14, %v1725_v63, %v1717_v21 }
 0x33c   : > { %v1746_v32 = vmul.f32 %v1738_v4, %v1734_v52  ;;  %v1747_v37 = vmul.f32 %v1739_v0, %v1730_v47  ;;  %v2751_v60 = vperm.slane %v2745_v11, 0 }
 0x33e   : > { %v1752_v25 = vpack.c.bf16 %v1747_v37, %v1746_v32  ;;  %v7712_v50 = vpop.permute.xlu2 %1812  ;;  %v2755_v42 = vmul.f32 %v2751_v60, %v2748_v7 }
 0x33f   : > { %2586 = vmatmul.bf16.gmra.mxu2 %v7731_v28 }
 0x340   : > { %1756 = vst [vmem:[#allocation2 + $0xa8] sm:$0xff] %v1752_v25  ;;  %2529 = vmatmul.bf16.gmra.mxu1 %v7731_v28  ;;  %v2764_v52 = vsel %vm2757_vm10, %v2755_v42, 0.0 }
 0x341   : > { %v1765_v61 = vpop.permute.xlu1 %1764 }
 0x342   : > { %v1761_v10 = vpop.permute.xlu0 %1760 }
 0x343   : > { %v1775_v49 = vsel %vm9653_vm15, %v1761_v10, %v1769_v30  ;;  %v1779_v44 = vsel %vm9653_vm15, %v1769_v30, %v1761_v10  ;;  %v5232_v30 = vld [vmem:[%s9611_s2 + $0xa] sm:$0x3] }
 0x344   : > { %v1790_v3 = vmul.f32 %v1784_v57, %v1779_v44  ;;  %v1791_v35 = vmul.f32 %v1785_v58, %v1775_v49  ;;  %v1838_v32 = vperm.slane %v5232_v30, 0  ;;  %v1839_v37 = vperm.slane %v5232_v30, 1 }
 0x346   : > { %v1797_v4 = vpack.c.bf16 %v1791_v35, %v1790_v3  ;;  %v7738_v0 = vpop.permute.xlu2 %1818 }
 0x347   : > { %5551 = vmatmul.msk.bf16.gmra.mxu0 %vm9652_vm3, %v7626_v27 }
 0x348   : > { %1801 = vst [vmem:[#allocation2 + $0xd8] sm:$0xff] %v1797_v4 }
 0x349   : > { %v1771_v40 = vpop.permute.xlu1 %1770 }
 0x34a   : > { %v1767_v21 = vpop.permute.xlu0 %1766  ;;  %v1776_v51 = vsel %vm9653_vm15, %v7670_v23, %v1771_v40  ;;  %v1780_v14 = vsel %vm9653_vm15, %v1771_v40, %v7670_v23  ;;  %v2747_v23 = vld [vmem:[%s9616_s7 + $0x8] sm:$0xff] }
 0x34b   : > { %v1774_v36 = vsel %vm9653_vm15, %v1759_v45, %v1767_v21  ;;  %v1778_v39 = vsel %vm9653_vm15, %v1767_v21, %v1759_v45  ;;  %v1792_v12 = vmul.f32 %v1784_v57, %v1780_v14  ;;  %v1793_v55 = vmul.f32 %v1785_v58, %v1776_v51 }
 0x34c   : > { %v1788_v24 = vmul.f32 %v1784_v57, %v1778_v39  ;;  %v1789_v26 = vmul.f32 %v1785_v58, %v1774_v36  ;;  %v2754_v41 = vmul.f32 %v2751_v60, %v2747_v23  ;;  %v2753_v45 = vmul.f32 %v2751_v60, %v2746_v6  ;;  %v5962_v6 = vld [vmem:[#allocation2 + $0xb4] sm:$0xf0] }
 0x34d   : > { %v1798_v53 = vpack.c.bf16 %v1793_v55, %v1792_v12 }
 0x34e   : > { %v1796_v18 = vpack.c.bf16 %v1789_v26, %v1788_v24  ;;  %v1825_v29 = vpop.permute.xlu2 %1824  ;;  %v2761_v47 = vsel %vm2757_vm10, %v2754_v41, 0.0  ;;  %v2758_v25 = vsel %vm2757_vm10, %v2753_v45, 0.0  ;;  %v5958_v45 = vld [vmem:[#allocation2 + $0x94] sm:$0xf0] }
 0x34f   : > { %1802 = vst [vmem:[#allocation2 + $0xe8] sm:$0xff] %v1798_v53  ;;  %v5966_v21 = vld [vmem:[#allocation2 + $0xd4] sm:$0xf0]  ;;  %v5368_v23 = vld [vmem:[#allocation2 + $0xd8] sm:$0xf0] }
 0x350   : > { %1800 = vst [vmem:[#allocation2 + $0xc8] sm:$0xff] %v1796_v18 }
 0x351   : > { %v1815_v22 = vpop.permute.xlu1 %1814 }
 0x352   : > { %v1773_v34 = vpop.permute.xlu0 %1772 }
 0x353   : > { %v1777_v17 = vsel %vm9653_vm15, %v1765_v61, %v1773_v34  ;;  %v1781_v59 = vsel %vm9653_vm15, %v1773_v34, %v1765_v61  ;;  %v5350_v34 = vld [vmem:[#allocation2 + $0xa8] sm:$0xf] }
 0x354   : > { %v1794_v46 = vmul.f32 %v1784_v57, %v1781_v59  ;;  %v1795_v43 = vmul.f32 %v1785_v58, %v1777_v17  ;;  %v5233_v17 = vld [vmem:[%s9611_s2 + $0xc] sm:$0x3] }
 0x355   : > { %v7803_v30 = vperm.slane %v5233_v17, 1 }
 0x356   : > { %v1799_v33 = vpack.c.bf16 %v1795_v43, %v1794_v46  ;;  %v7769_v63 = vpop.permute.xlu2 %1860  ;;  %v5382_v44 = vld [vmem:[#allocation2 + $0xe8] sm:$0xf]  ;;  %v5968_v2 = vld [vmem:[#allocation2 + $0xec] sm:$0xf]  ;;  %v5352_v46 = vld [vmem:[#allocation2 + $0xb8] sm:$0xf0] }
 0x357   : > { %v5366_v4 = vld [vmem:[#allocation2 + $0xc8] sm:$0xf]  ;;  %v5964_v39 = vld [vmem:[#allocation2 + $0xcc] sm:$0xf]  ;;  %v7801_v43 = vperm.slane %v5233_v17, 0 }
 0x358   : > { %1803 = vst [vmem:[#allocation2 + $0xf8] sm:$0xff] %v1799_v33  ;;  %v5367_v36 = vor.u32 %v5966_v21, %v5366_v4  ;;  %v5371_v7 = vor.u32 %v5964_v39, %v5368_v23  ;;  %v5286_v23 = vld [vmem:[#allocation2 + $0x28] sm:$0xf] }
 0x359   : > { %2762 = vadd.xlane.f32.xlu1 %v2761_v47  ;;  %v1821_v54 = vpop.permute.xlu1 %1820 }
 0x35a   : > { %2765 = vadd.xlane.f32.xlu0 %v2764_v52  ;;  %v1817_v48 = vpop.permute.xlu0 %1816  ;;  %v1828_v56 = vsel %vm9691_vm2, %v7712_v50, %v1821_v54  ;;  %v1832_v57 = vsel %vm9692_vm11, %v1821_v54, %v7712_v50  ;;  %v2756_v50 = vmul.f32 %v2751_v60, %v2749_v5  ;;  %vm9701_vm2 = vmmov %vm9699_vm0 }
 0x35b   : > { %v1830_v58 = vsel %vm9693_vm4, %v1817_v48, %v1825_v29  ;;  %v1834_v31 = vsel %vm9694_vm5, %v1825_v29, %v1817_v48  ;;  %v1842_v16 = vmul.f32 %v1838_v32, %v1828_v56  ;;  %v1843_v9 = vmul.f32 %v1839_v37, %v1832_v57  ;;  %v2076_v48 = vld [vmem:[%s9615_s6] sm:$0xff]  ;;  %vm9702_vm11 = vmmov %vm9699_vm0 }
 0x35c   : > { %v1846_v61 = vmul.f32 %v1838_v32, %v1830_v58  ;;  %v1847_v10 = vmul.f32 %v1839_v37, %v1834_v31  ;;  %v2767_v14 = vsel %vm2757_vm10, %v2756_v50, 0.0  ;;  %v5956_v31 = vld [vmem:[#allocation2 + $0x8c] sm:$0xf]  ;;  %vm9703_vm4 = vmmov %vm9699_vm0 }
 0x35d   : > { %v1850_v13 = vpack.c.bf16 %v1843_v9, %v1842_v16  ;;  %2759 = vadd.xlane.f32.xlu2 %v2758_v25  ;;  %v5334_v25 = vld [vmem:[#allocation2 + $0x88] sm:$0xf]  ;;  %v5954_v16 = vld [vmem:[#allocation2 + $0x74] sm:$0xf0]  ;;  %vm9704_vm5 = vmmov %vm9699_vm0 }
 0x35e   : > { %v1852_v49 = vpack.c.bf16 %v1847_v10, %v1846_v61  ;;  %v1867_v3 = vpop.permute.xlu2 %1866  ;;  %v5335_v58 = vor.u32 %v5958_v45, %v5334_v25  ;;  %v5320_v61 = vld [vmem:[#allocation2 + $0x78] sm:$0xf0]  ;;  %v5318_v10 = vld [vmem:[#allocation2 + $0x68] sm:$0xf]  ;;  %v5942_v45 = vld [vmem:[#allocation2 + $0x14] sm:$0xf0] }
 0x35f   : > { %v5970_v35 = vld [vmem:[#allocation2 + $0xf4] sm:$0xf0]  ;;  %v5384_v1 = vld [vmem:[#allocation2 + $0xf8] sm:$0xf0]  ;;  %1854 = vst [vmem:[#allocation2 + $0x148] sm:$0xff] %v1850_v13 }
 0x360   : > { %v5383_v19 = vor.u32 %v5970_v35, %v5382_v44  ;;  %v5387_v40 = vor.u32 %v5968_v2, %v5384_v1  ;;  %1856 = vst [vmem:[#allocation2 + $0x168] sm:$0xff] %v1852_v49  ;;  %v5950_v13 = vld [vmem:[#allocation2 + $0x54] sm:$0xf0]  ;;  %v2078_v49 = vld [vmem:[%s9615_s6 + $0x10] sm:$0xff]  ;;  %v5319_v44 = vor.u32 %v5954_v16, %v5318_v10  ;;  %v5952_v2 = vld [vmem:[#allocation2 + $0x6c] sm:$0xf] }
 0x361   : > { %v1827_v11 = vpop.permute.xlu1 %1826  ;;  %v5302_v35 = vld [vmem:[#allocation2 + $0x48] sm:$0xf]  ;;  %v5234_v25 = vld [vmem:[%s9611_s2 + $0xe] sm:$0x3] }
 0x362   : > { %2611 = vmatpush.bf16.msrb.mxu1 %v5383_v19  ;;  %2668 = vmatpush.bf16.msra.mxu0 %v5387_v40  ;;  %v1823_v51 = vpop.permute.xlu0 %1822  ;;  %v1831_v12 = vsel %vm9695_vm6, %v7738_v0, %v1827_v11  ;;  %v1835_v55 = vsel %vm9696_vm7, %v1827_v11, %v7738_v0  ;;  %v5960_v0 = vld [vmem:[#allocation2 + $0xac] sm:$0xf]  ;;  %v5303_v19 = vor.u32 %v5950_v13, %v5302_v35  ;;  %v5304_v40 = vld [vmem:[#allocation2 + $0x58] sm:$0xf0]  ;;  %vm9705_vm6 = vmmov %vm9699_vm0 }
 0x363   : > { %v1829_v24 = vsel %vm9697_vm8, %v1815_v22, %v1823_v51  ;;  %v1833_v26 = vsel %vm9698_vm1, %v1823_v51, %v1815_v22  ;;  %v1848_v53 = vmul.f32 %v1838_v32, %v1831_v12  ;;  %v1849_v18 = vmul.f32 %v1839_v37, %v1835_v55  ;;  %vm9706_vm7 = vmmov %vm9699_vm0 }
 0x364   : > { %v1844_v29 = vmul.f32 %v1838_v32, %v1829_v24  ;;  %v1845_v60 = vmul.f32 %v1839_v37, %v1833_v26  ;;  %v5351_v22 = vor.u32 %v5962_v6, %v5350_v34  ;;  %v5355_v33 = vor.u32 %v5960_v0, %v5352_v46  ;;  %v5336_v32 = vld [vmem:[#allocation2 + $0x98] sm:$0xf0]  ;;  %v5948_v24 = vld [vmem:[#allocation2 + $0x4c] sm:$0xf] }
 0x365   : > { %v1853_v59 = vpack.c.bf16 %v1849_v18, %v1848_v53  ;;  %2768 = vadd.xlane.f32.xlu2 %v2767_v14  ;;  %v5339_v5 = vor.u32 %v5956_v31, %v5336_v32  ;;  %v2079_v14 = vld [vmem:[%s9615_s6 + $0x18] sm:$0xff]  ;;  %v5307_v26 = vor.u32 %v5948_v24, %v5304_v40  ;;  %v5944_v34 = vld [vmem:[#allocation2 + $0x2c] sm:$0xf]  ;;  %vm9707_vm8 = vcmp.lt.s32.totalorder %v6932_v8, 112 }
 0x366   : > { %v1851_v41 = vpack.c.bf16 %v1845_v60, %v1844_v29  ;;  %2612 = vmatpush.bf16.msrb.mxu1 %v5367_v36  ;;  %2669 = vmatpush.bf16.msra.mxu0 %v5371_v7  ;;  %v1873_v42 = vpop.permute.xlu2 %1872  ;;  %v5946_v53 = vld [vmem:[#allocation2 + $0x34] sm:$0xf0]  ;;  %v5288_v29 = vld [vmem:[#allocation2 + $0x38] sm:$0xf0]  ;;  %vm9708_vm1 = vmmov %vm9707_vm8 }
 0x367   : > { %1857 = vst [vmem:[#allocation2 + $0x178] sm:$0xff] %v1853_v59  ;;  %v5287_v7 = vor.u32 %v5946_v53, %v5286_v23  ;;  %v5291_v17 = vor.u32 %v5944_v34, %v5288_v29  ;;  %v5270_v59 = vld [vmem:[#allocation2 + $0x8] sm:$0xf] }
 0x368   : > { %1855 = vst [vmem:[#allocation2 + $0x158] sm:$0xff] %v1851_v41 }
 0x369   : > { %v7805_v47 = vpop.permute.xlu1 %1862 }
 0x36a   : > { %2613 = vmatpush.bf16.msrb.mxu1 %v5351_v22  ;;  %v1859_v52 = vpop.permute.xlu0 %1858  ;;  %2670 = vmatpush.bf16.msra.mxu0 %v5355_v33  ;;  %v2077_v33 = vld [vmem:[%s9615_s6 + $0x8] sm:$0xff] }
 0x36b   : > { %v1874_v37 = vsel %vm9699_vm0, %v1859_v52, %v1867_v3  ;;  %v1878_v54 = vsel %vm9700_vm9, %v1867_v3, %v1859_v52  ;;  %v5323_v3 = vor.u32 %v5952_v2, %v5320_v61  ;;  %vm9709_vm0 = vmmov %vm9708_vm1 }
 0x36c   : > { %v1888_v56 = vmul.f32 %v7801_v43, %v1874_v37  ;;  %v1889_v57 = vmul.f32 %v7803_v30, %v1878_v54  ;;  %v5271_v37 = vor.u32 %v5942_v45, %v5270_v59  ;;  %v5272_v54 = vld [vmem:[#allocation2 + $0x18] sm:$0xf0]  ;;  %vm9710_vm9 = vmmov %vm9709_vm0 }
 0x36e   : > { %v1896_v9 = vpack.c.bf16 %v1889_v57, %v1888_v56  ;;  %2082 = vperm.xlu0 %6158, %v2076_v48   ;;  %2614 = vmatpush.bf16.msrb.mxu1 %v5335_v58  ;;  %v7819_v50 = vpop.permute.xlu2 %1908  ;;  %v1931_v57 = vperm.slane %v5234_v25, 1 }
 0x36f   : > { %2671 = vmatpush.bf16.msra.mxu0 %v5339_v5 }
 0x370   : > { %1900 = vst [vmem:[#allocation2 + $0x188] sm:$0xff] %v1896_v9 }
 0x371   : > { %v1869_v1 = vpop.permute.xlu1 %1868 }
 0x372   : > { %2615 = vmatpush.bf16.msrb.mxu1 %v5319_v44  ;;  %v1865_v4 = vpop.permute.xlu0 %1864  ;;  %v1875_v21 = vsel %vm9701_vm2, %v7769_v63, %v1869_v1  ;;  %v1879_v11 = vsel %vm9702_vm11, %v1869_v1, %v7769_v63  ;;  %2092 = vperm.xlu1 %6159, %v2078_v49   ;;  %vm9711_vm2 = vmmov %vm9709_vm0 }
 0x373   : > { %2672 = vmatpush.bf16.msra.mxu0 %v5323_v3  ;;  %v1877_v51 = vsel %vm9703_vm4, %v1865_v4, %v1873_v42  ;;  %v1890_v36 = vmul.f32 %v7801_v43, %v1875_v21  ;;  %v1891_v39 = vmul.f32 %v7803_v30, %v1879_v11  ;;  %v1881_v12 = vsel %vm9704_vm5, %v1873_v42, %v1865_v4  ;;  %v5940_v42 = vld [vmem:[#allocation2 + $0xc] sm:$0xf]  ;;  %vm9712_vm11 = vmmov %vm9709_vm0 }
 0x374   : > { %v1894_v55 = vmul.f32 %v7801_v43, %v1877_v51  ;;  %v1895_v63 = vmul.f32 %v7803_v30, %v1881_v12  ;;  %v5275_v48 = vor.u32 %v5940_v42, %v5272_v54  ;;  %vm9713_vm4 = vmmov %vm9709_vm0  ;;  %v5235_v12 = vld [vmem:[%s9611_s2 + $0x10] sm:$0x3] }
 0x375   : > { %v1897_v18 = vpack.c.bf16 %v1891_v39, %v1890_v36  ;;  %vm9714_vm5 = vmmov %vm9709_vm0  ;;  %v1976_v24 = vperm.slane %v5235_v12, 0 }
 0x376   : > { %2097 = vperm.xlu0 %6158, %v2079_v14   ;;  %2616 = vmatpush.bf16.msrb.mxu1 %v5303_v19  ;;  %v1899_v60 = vpack.c.bf16 %v1895_v63, %v1894_v55  ;;  %v1915_v6 = vpop.permute.xlu2 %1914  ;;  %v1977_v63 = vperm.slane %v5235_v12, 1 }
 0x377   : > { %2673 = vmatpush.bf16.msra.mxu0 %v5307_v26  ;;  %1901 = vst [vmem:[#allocation2 + $0x198] sm:$0xff] %v1897_v18 }
 0x378   : > { %1903 = vst [vmem:[#allocation2 + $0x1b8] sm:$0xff] %v1899_v60 }
 0x379   : > { %v1905_v41 = vpop.permute.xlu1 %1904 }
 0x37a   : > { %2617 = vmatpush.bf16.msrb.mxu1 %v5287_v7  ;;  %v1871_v0 = vpop.permute.xlu0 %1870 }
 0x37b   : > { %2674 = vmatpush.bf16.msra.mxu0 %v5291_v17  ;;  %v1876_v22 = vsel %vm9705_vm6, %v7805_v47, %v1871_v0  ;;  %v1880_v46 = vsel %vm9706_vm7, %v1871_v0, %v7805_v47  ;;  %v1930_v47 = vperm.slane %v5234_v25, 0  ;;  %vm9715_vm6 = vcmp.lt.s32.totalorder %v6932_v8, 111 }
 0x37c   : > { %v1892_v52 = vmul.f32 %v7801_v43, %v1876_v22  ;;  %v1893_v32 = vmul.f32 %v7803_v30, %v1880_v46  ;;  %vm9716_vm7 = vmmov %vm9715_vm6 }
 0x37d   : > { %2087 = vperm.xlu2 %6157, %v2077_v33  }
 0x37e   : > { %v1898_v56 = vpack.c.bf16 %v1893_v32, %v1892_v52  ;;  %2618 = vmatpush.bf16.msrb.mxu1 %v5271_v37  ;;  %v1951_v9 = vpop.permute.xlu2 %1950 }
 0x37f   : > { %2675 = vmatpush.bf16.msra.mxu0 %v5275_v48 }
 0x380   : > { %1902 = vst [vmem:[#allocation2 + $0x1a8] sm:$0xff] %v1898_v56 }
 0x381   : > { %2619 = vmatmul.bf16.vlgmr.msrb.gmra.mxu1 %v7596_v62  ;;  %v1911_v58 = vpop.permute.xlu1 %1910 }
 0x382   : > { %2676 = vmatmul.bf16.vlgmr.msra.gmra.mxu0 %v7596_v62  ;;  %v1907_v43 = vpop.permute.xlu0 %1906 }
 0x383   : > { %v1921_v30 = vsel %vm9707_vm8, %v1907_v43, %v1915_v6  ;;  %v1925_v31 = vsel %vm9708_vm1, %v1915_v6, %v1907_v43  ;;  %vm9717_vm8 = vmmov %vm9715_vm6 }
 0x384   : > { %v1936_v5 = vmul.f32 %v1930_v47, %v1921_v30  ;;  %v1937_v16 = vmul.f32 %v1931_v57, %v1925_v31  ;;  %vm9718_vm1 = vmmov %vm9715_vm6 }
 0x386   : > { %v1943_v61 = vpack.c.bf16 %v1937_v16, %v1936_v5  ;;  %v1957_v21 = vpop.permute.xlu2 %1956 }
 0x388   : > { %1947 = vst [vmem:[#allocation2 + $0x1d8] sm:$0xff] %v1943_v61  ;;  %v5478_v61 = vld [vmem:[#allocation2 + $0x1a8] sm:$0xf] }
 0x389   : > { %v1917_v10 = vpop.permute.xlu1 %1916 }
 0x38a   : > { %v1913_v13 = vpop.permute.xlu0 %1912  ;;  %v1922_v49 = vsel %vm9709_vm0, %v7819_v50, %v1917_v10  ;;  %v1926_v62 = vsel %vm9710_vm9, %v1917_v10, %v7819_v50  ;;  %vm9719_vm0 = vmmov %vm9718_vm1  ;;  %v5992_v10 = vld [vmem:[#allocation2 + $0x1ac] sm:$0xf] }
 0x38b   : > { %v1920_v44 = vsel %vm9711_vm2, %v1905_v41, %v1913_v13  ;;  %v1924_v2 = vsel %vm9712_vm11, %v1913_v13, %v1905_v41  ;;  %v1938_v3 = vmul.f32 %v1930_v47, %v1922_v49  ;;  %v1939_v35 = vmul.f32 %v1931_v57, %v1926_v62  ;;  %vm9720_vm9 = vmmov %vm9719_vm0  ;;  %v5994_v62 = vld [vmem:[#allocation2 + $0x1b4] sm:$0xf0] }
 0x38c   : > { %v1934_v1 = vmul.f32 %v1930_v47, %v1920_v44  ;;  %v1935_v4 = vmul.f32 %v1931_v57, %v1924_v2  ;;  %vm9721_vm2 = vmmov %vm9719_vm0  ;;  %v5480_v44 = vld [vmem:[#allocation2 + $0x1b8] sm:$0xf0]  ;;  %v5479_v2 = vor.u32 %v5994_v62, %v5478_v61 }
 0x38d   : > { %v1944_v19 = vpack.c.bf16 %v1939_v35, %v1938_v3  ;;  %vm9722_vm11 = vmmov %vm9719_vm0  ;;  %v5483_v3 = vor.u32 %v5992_v10, %v5480_v44  ;;  %v5990_v35 = vld [vmem:[#allocation2 + $0x194] sm:$0xf0] }
 0x38e   : > { %v1942_v40 = vpack.c.bf16 %v1935_v4, %v1934_v1  ;;  %v1963_v26 = vpop.permute.xlu2 %1962  ;;  %v5464_v1 = vld [vmem:[#allocation2 + $0x198] sm:$0xf0]  ;;  %v5462_v4 = vld [vmem:[#allocation2 + $0x188] sm:$0xf] }
 0x38f   : > { %1948 = vst [vmem:[#allocation2 + $0x1e8] sm:$0xff] %v1944_v19  ;;  %v5998_v37 = vld [vmem:[#allocation2 + $0x1d4] sm:$0xf0]  ;;  %v5496_v54 = vld [vmem:[#allocation2 + $0x1d8] sm:$0xf0] }
 0x390   : > { %1946 = vst [vmem:[#allocation2 + $0x1c8] sm:$0xff] %v1942_v40  ;;  %v5988_v19 = vld [vmem:[#allocation2 + $0x18c] sm:$0xf]  ;;  %v5463_v40 = vor.u32 %v5990_v35, %v5462_v4 }
 0x391   : > { %2624 = vmatmul.bf16.gmra.mxu1 %v7657_v20  ;;  %v1953_v11 = vpop.permute.xlu1 %1952 }
 0x392   : > { %2681 = vmatmul.bf16.gmra.mxu0 %v7657_v20  ;;  %v1919_v50 = vpop.permute.xlu0 %1918 }
 0x393   : > { %v1923_v51 = vsel %vm9713_vm4, %v1911_v58, %v1919_v50  ;;  %v1927_v14 = vsel %vm9714_vm5, %v1919_v50, %v1911_v58  ;;  %v5448_v50 = vld [vmem:[#allocation2 + $0x178] sm:$0xf0] }
 0x394   : > { %v1940_v36 = vmul.f32 %v1930_v47, %v1923_v51  ;;  %v1941_v39 = vmul.f32 %v1931_v57, %v1927_v14 }
 0x396   : > { %v1945_v55 = vpack.c.bf16 %v1941_v39, %v1940_v36  ;;  %v5510_v42 = vld [vmem:[#allocation2 + $0x1e8] sm:$0xf]  ;;  %v6000_v6 = vld [vmem:[#allocation2 + $0x1ec] sm:$0xf] }
 0x397   : > { %v5494_v22 = vld [vmem:[#allocation2 + $0x1c8] sm:$0xf]  ;;  %v5996_v45 = vld [vmem:[#allocation2 + $0x1cc] sm:$0xf] }
 0x398   : > { %1949 = vst [vmem:[#allocation2 + $0x1f8] sm:$0xff] %v1945_v55  ;;  %v5495_v56 = vor.u32 %v5998_v37, %v5494_v22  ;;  %v5499_v47 = vor.u32 %v5996_v45, %v5496_v54  ;;  %v5446_v36 = vld [vmem:[#allocation2 + $0x168] sm:$0xf]  ;;  %v5984_v55 = vld [vmem:[#allocation2 + $0x16c] sm:$0xf] }
 0x399   : > { %v1959_v53 = vpop.permute.xlu1 %1958  ;;  %v5400_v22 = vld [vmem:[#allocation2 + $0x118] sm:$0xf0] }
 0x39a   : > { %v1955_v20 = vpop.permute.xlu0 %1954  ;;  %v1966_v18 = vsel %vm9715_vm6, %v1951_v9, %v1959_v53  ;;  %v1970_v29 = vsel %vm9716_vm7, %v1959_v53, %v1951_v9  ;;  %v5432_v53 = vld [vmem:[#allocation2 + $0x158] sm:$0xf0] }
 0x39b   : > { %v1968_v60 = vsel %vm9717_vm8, %v1955_v20, %v1963_v26  ;;  %v1972_v23 = vsel %vm9718_vm1, %v1963_v26, %v1955_v20  ;;  %v1980_v7 = vmul.f32 %v1976_v24, %v1966_v18  ;;  %v1981_v34 = vmul.f32 %v1977_v63, %v1970_v29  ;;  %v5982_v26 = vld [vmem:[#allocation2 + $0x154] sm:$0xf0]  ;;  %v5430_v18 = vld [vmem:[#allocation2 + $0x148] sm:$0xf] }
 0x39c   : > { %v1984_v17 = vmul.f32 %v1976_v24, %v1968_v60  ;;  %v1985_v59 = vmul.f32 %v1977_v63, %v1972_v23  ;;  %v5431_v60 = vor.u32 %v5982_v26, %v5430_v18  ;;  %v5980_v23 = vld [vmem:[#allocation2 + $0x14c] sm:$0xf] }
 0x39d   : > { %v1988_v41 = vpack.c.bf16 %v1981_v34, %v1980_v7  ;;  %v5435_v7 = vor.u32 %v5980_v23, %v5432_v53  ;;  %v5414_v34 = vld [vmem:[#allocation2 + $0x128] sm:$0xf] }
 0x39e   : > { %v1990_v0 = vpack.c.bf16 %v1985_v59, %v1984_v17  ;;  %v5976_v17 = vld [vmem:[#allocation2 + $0x12c] sm:$0xf]  ;;  %v5978_v59 = vld [vmem:[#allocation2 + $0x134] sm:$0xf0] }
 0x39f   : > { %v6002_v46 = vld [vmem:[#allocation2 + $0x1f4] sm:$0xf0]  ;;  %v5512_v33 = vld [vmem:[#allocation2 + $0x1f8] sm:$0xf0]  ;;  %1992 = vst [vmem:[#allocation2 + $0x208] sm:$0xff] %v1988_v41  ;;  %v5415_v41 = vor.u32 %v5978_v59, %v5414_v34 }
 0x3a0   : > { %v5511_v52 = vor.u32 %v6002_v46, %v5510_v42  ;;  %v5515_v32 = vor.u32 %v6000_v6, %v5512_v33  ;;  %1994 = vst [vmem:[#allocation2 + $0x228] sm:$0xff] %v1990_v0  ;;  %v5416_v0 = vld [vmem:[#allocation2 + $0x138] sm:$0xf0]  ;;  %v5974_v6 = vld [vmem:[#allocation2 + $0x114] sm:$0xf0] }
 0x3a1   : > { %v1965_v48 = vpop.permute.xlu1 %1964  ;;  %v5419_v42 = vor.u32 %v5976_v17, %v5416_v0  ;;  %v5398_v33 = vld [vmem:[#allocation2 + $0x108] sm:$0xf] }
 0x3a2   : > { %2630 = vmatpush.bf16.msrb.mxu3 %v5511_v52  ;;  %2687 = vmatpush.bf16.msra.mxu1 %v5515_v32  ;;  %v1961_v25 = vpop.permute.xlu0 %1960  ;;  %v1969_v57 = vsel %vm9719_vm0, %v1957_v21, %v1965_v48  ;;  %v1973_v58 = vsel %vm9720_vm9, %v1965_v48, %v1957_v21  ;;  %v5467_v21 = vor.u32 %v5988_v19, %v5464_v1  ;;  %v5972_v52 = vld [vmem:[#allocation2 + $0x10c] sm:$0xf]  ;;  %v2563_v1 = vpop.f32.mrf.mxu3 }
 0x3a3   : > { %v1967_v43 = vsel %vm9721_vm2, %v1953_v11, %v1961_v25  ;;  %v1971_v30 = vsel %vm9722_vm11, %v1961_v25, %v1953_v11  ;;  %v1986_v31 = vmul.f32 %v1976_v24, %v1969_v57  ;;  %v1987_v5 = vmul.f32 %v1977_v63, %v1973_v58  ;;  %v5986_v11 = vld [vmem:[#allocation2 + $0x174] sm:$0xf0]  ;;  %v2772_v57 = vld [vmem:[%s9617_s8 + $0x10] sm:$0xff] }
 0x3a4   : > { %v1982_v16 = vmul.f32 %v1976_v24, %v1967_v43  ;;  %v1983_v9 = vmul.f32 %v1977_v63, %v1971_v30  ;;  %v5447_v12 = vor.u32 %v5986_v11, %v5446_v36  ;;  %v5451_v24 = vor.u32 %v5984_v55, %v5448_v50 }
 0x3a5   : > { %v1991_v13 = vpack.c.bf16 %v1987_v5, %v1986_v31  ;;  %v5399_v45 = vor.u32 %v5974_v6, %v5398_v33  ;;  %v5403_v37 = vor.u32 %v5972_v52, %v5400_v22 }
 0x3a6   : > { %v1989_v49 = vpack.c.bf16 %v1983_v9, %v1982_v16  ;;  %2631 = vmatpush.bf16.msrb.mxu3 %v5495_v56  ;;  %2688 = vmatpush.bf16.msra.mxu1 %v5499_v47  ;;  %v5526_v20 = vld [vmem:[#allocation2 + $0x208] sm:$0xf]  ;;  %v6004_v25 = vld [vmem:[#allocation2 + $0x20c] sm:$0xf]  ;;  %v2773_v9 = vld [vmem:[%s9617_s8 + $0x18] sm:$0xff] }
 0x3a7   : > { %1995 = vst [vmem:[#allocation2 + $0x238] sm:$0xff] %v1991_v13  ;;  %v5542_v51 = vld [vmem:[#allocation2 + $0x228] sm:$0xf]  ;;  %v6008_v32 = vld [vmem:[#allocation2 + $0x22c] sm:$0xf]  ;;  %v2544_v13 = vpop.f32.mrf.mxu2 }
 0x3a8   : > { %1993 = vst [vmem:[#allocation2 + $0x218] sm:$0xff] %v1989_v49  ;;  %v2771_v47 = vld [vmem:[%s9617_s8 + $0x8] sm:$0xff]  ;;  %v2506_v49 = vpop.f32.mrf.mxu0 }
 0x3aa   : > { %2632 = vmatpush.bf16.msrb.mxu3 %v5479_v2  ;;  %2689 = vmatpush.bf16.msra.mxu1 %v5483_v3 }
 0x3ad   : > { %v2525_v4 = vpop.f32.mrf.mxu1 }
 0x3ae   : > { %2633 = vmatpush.bf16.msrb.mxu3 %v5463_v40  ;;  %2690 = vmatpush.bf16.msra.mxu1 %v5467_v21  ;;  %v6010_v14 = vld [vmem:[#allocation2 + $0x234] sm:$0xf0]  ;;  %v5544_v46 = vld [vmem:[#allocation2 + $0x238] sm:$0xf0]  ;;  %v2565_v21 = vpop.f32.mrf.mxu3 }
 0x3af   : > { %v5543_v39 = vor.u32 %v6010_v14, %v5542_v51  ;;  %v6006_v63 = vld [vmem:[#allocation2 + $0x214] sm:$0xf0]  ;;  %v5547_v54 = vor.u32 %v6008_v32, %v5544_v46  ;;  %v5528_v48 = vld [vmem:[#allocation2 + $0x218] sm:$0xf0]  ;;  %v2546_v62 = vpop.f32.mrf.mxu2 }
 0x3b0   : > { %v5527_v29 = vor.u32 %v6006_v63, %v5526_v20  ;;  %v5531_v56 = vor.u32 %v6004_v25, %v5528_v48  ;;  %v2508_v44 = vpop.f32.mrf.mxu0 }
 0x3b1   : > { %2655 = vmatpush.bf16.msra.mxu2 %v5543_v39 }
 0x3b2   : > { %2634 = vmatpush.bf16.msrb.mxu3 %v5447_v12  ;;  %2691 = vmatpush.bf16.msra.mxu1 %v5451_v24 }
 0x3b5   : > { %2656 = vmatpush.bf16.msra.mxu2 %v5527_v29  ;;  %v2527_v11 = vpop.f32.mrf.mxu1 }
 0x3b6   : > { %2635 = vmatpush.bf16.msrb.mxu3 %v5431_v60  ;;  %2692 = vmatpush.bf16.msra.mxu1 %v5435_v7  ;;  %v2568_v14 = vpop.f32.mrf.mxu3 }
 0x3b7   : > { %v2549_v2 = vpop.f32.mrf.mxu2 }
 0x3b8   : > { %5552 = vmatmul.msk.bf16.vlgmr.msra.gmra.mxu2 %vm9652_vm3, %v7566_v15 }
 0x3ba   : > { %2636 = vmatpush.bf16.msrb.mxu3 %v5415_v41  ;;  %2693 = vmatpush.bf16.msra.mxu1 %v5419_v42 }
 0x3bd   : > { %v2530_v12 = vpop.f32.mrf.mxu1 }
 0x3be   : > { %2637 = vmatpush.bf16.msrb.mxu3 %v5399_v45  ;;  %2694 = vmatpush.bf16.msra.mxu1 %v5403_v37  ;;  %v2570_v6 = vpop.f32.mrf.mxu3 }
 0x3bf   : > { %v7917_v3 = vpop.f32.mrf.mxu2 }
 0x3c1   : > { %2638 = vmatmul.bf16.vlgmr.msrb.gmra.mxu3 %v7682_v38  ;;  %2695 = vmatmul.bf16.vlgmr.msra.gmra.mxu1 %v7682_v38  ;;  %v2770_v38 = vld [vmem:[%s9617_s8] sm:$0xff] }
 0x3c2   : > { %2712 = vmatpush.bf16.msra.mxu3 %v5547_v54 }
 0x3c5   : > { %v2532_v34 = vpop.f32.mrf.mxu1 }
 0x3c6   : > { %2713 = vmatpush.bf16.msra.mxu3 %v5531_v56 }
 0x3c7   : > { %v2582_v19 = vpop.f32.mrf.mxu2 }
 0x3c8   : > { %5553 = vmatmul.msk.bf16.gmra.mxu2 %vm9652_vm3, %v7626_v27 }
 0x3cc   : > { %v2763_v58 = vpop.xlane.xlu1 %2762 }
 0x3cd   : > { %v2766_v43 = vpop.xlane.xlu0 %2765  ;;  %v2775_v30 = vadd.f32 %v2771_v47, %v2763_v58 }
 0x3ce   : > { %v2776_v31 = vadd.f32 %v2772_v57, %v2766_v43 }
 0x3cf   : > { %2785 = vperm.xlu0 %6158, %v2775_v30   ;;  %v2584_v50 = vpop.f32.mrf.mxu2 }
 0x3d0   : > { %2790 = vperm.xlu2 %6157, %v2776_v31   ;;  %v2760_v5 = vpop.xlane.xlu2 %2759 }
 0x3d1   : > { %2643 = vmatmul.bf16.gmra.mxu3 %v7731_v28  ;;  %v2774_v16 = vadd.f32 %v2770_v38, %v2760_v5  ;;  %2700 = vmatmul.bf16.gmra.mxu1 %v7731_v28  ;;  %v2511_v28 = vpop.f32.mrf.mxu0 }
 0x3d3   : > { %2780 = vperm.xlu1 %6159, %v2774_v16  }
 0x3d7   : > { %v2587_v55 = vpop.f32.mrf.mxu2 }
 0x3d8   : > { %v2769_v61 = vpop.xlane.xlu2 %2768 }
 0x3d9   : > { %v2777_v10 = vadd.f32 %v2773_v9, %v2769_v61  ;;  %v2513_v35 = vpop.f32.mrf.mxu0 }
 0x3db   : > { %2795 = vperm.xlu0 %6158, %v2777_v10  }
 0x3df   : > { %v2589_v31 = vpop.f32.mrf.mxu2 }
 0x3e0   : > { %v7923_v39 = vpop.permute.xlu2 %2087  ;;  %v7931_v7 = vpop.permute.xlu0 %2082 }
 0x3e1   : > { %5554 = vmatmul.msk.bf16.vlgmr.msra.gmra.mxu3 %vm9652_vm3, %v7566_v15  ;;  %v2601_v40 = vpop.f32.mrf.mxu0  ;;  %v2509_v17 = vadd.f32 %v2508_v44, %v7923_v39  ;;  %v2566_v59 = vadd.f32 %v2565_v21, %v7923_v39  ;;  %v2507_v0 = vadd.f32 %v2506_v49, %v7931_v7  ;;  %v2564_v42 = vadd.f32 %v2563_v1, %v7931_v7 }
 0x3e3   : > { %v2528_v46 = vadd.f32 %v2527_v11, %v2509_v17  ;;  %v2585_v33 = vadd.f32 %v2584_v50, %v2566_v59  ;;  %v2526_v45 = vadd.f32 %v2525_v4, %v2507_v0  ;;  %v2583_v52 = vadd.f32 %v2582_v19, %v2564_v42  ;;  %v2806_v17 = vld [vmem:[%s9618_s9] sm:$0xff]  ;;  %v2809_v59 = vld [vmem:[%s9618_s9 + $0x18] sm:$0xff]  ;;  %v2808_v42 = vld [vmem:[%s9618_s9 + $0x10] sm:$0xff] }
 0x3e4   : > { %v7919_v51 = vpop.permute.xlu1 %2092  ;;  %v2810_v0 = vld [vmem:[%s9619_s10] sm:$0xff] }
 0x3e5   : > { %v2569_v36 = vadd.f32 %v2568_v14, %v7919_v51  ;;  %v2547_v32 = vadd.f32 %v2546_v62, %v2528_v46  ;;  %v2545_v43 = vadd.f32 %v2544_v13, %v2526_v45  ;;  %v2602_v30 = vadd.f32 %v2601_v40, %v2583_v52  ;;  %v2812_v46 = vld [vmem:[%s9619_s10 + $0x10] sm:$0xff] }
 0x3e7   : > { %v2588_v63 = vadd.f32 %v2587_v55, %v2569_v36 }
 0x3e8   : > { %v7935_v41 = vpop.permute.xlu0 %2097 }
 0x3e9   : > { %v2603_v15 = vpop.f32.mrf.mxu0  ;;  %v2514_v47 = vadd.f32 %v2513_v35, %v7935_v41  ;;  %v2571_v57 = vadd.f32 %v2570_v6, %v7935_v41  ;;  %v2807_v6 = vld [vmem:[%s9618_s9 + $0x8] sm:$0xff] }
 0x3ea   : > { %v2604_v37 = vadd.f32 %v2603_v15, %v2585_v33  ;;  %v2811_v33 = vld [vmem:[%s9619_s10 + $0x8] sm:$0xff] }
 0x3eb   : > { %v2533_v44 = vadd.f32 %v2532_v34, %v2514_v47 }
 0x3ed   : > { %v2552_v11 = vadd.f32 %v7917_v3, %v2533_v44 }
 0x3f1   : > { %5555 = vmatmul.msk.bf16.gmra.mxu3 %vm9652_vm3, %v7626_v27  ;;  %v2512_v27 = vadd.f32 %v2511_v28, %v7919_v51  ;;  %v2606_v26 = vpop.f32.mrf.mxu0 }
 0x3f2   : > { %v2607_v20 = vadd.f32 %v2606_v26, %v2588_v63 }
 0x3f3   : > { %v2531_v24 = vadd.f32 %v2530_v12, %v2512_v27 }
 0x3f5   : > { %v2550_v53 = vadd.f32 %v2549_v2, %v2531_v24  ;;  %v2590_v2 = vadd.f32 %v2589_v31, %v2571_v57 }
 0x3f9   : > { %v2608_v4 = vpop.f32.mrf.mxu0 }
 0x3fa   : > { %v2609_v50 = vadd.f32 %v2608_v4, %v2590_v2 }
 0x3fe   : > { %v2620_v22 = vpop.f32.mrf.mxu1 }
 0x3ff   : > { %v2621_v48 = vadd.f32 %v2620_v22, %v7931_v7  ;;  %v2813_v22 = vld [vmem:[%s9619_s10 + $0x18] sm:$0xff] }
 0x406   : > { %v2622_v61 = vpop.f32.mrf.mxu1 }
 0x407   : > { %v2623_v19 = vadd.f32 %v2622_v61, %v7923_v39 }
 0x40e   : > { %v2625_v12 = vpop.f32.mrf.mxu1 }
 0x40f   : > { %v2626_v3 = vadd.f32 %v2625_v12, %v7919_v51 }
 0x42a   : > { %v2791_v18 = vpop.permute.xlu2 %2790 }
 0x42b   : > { %v7925_v29 = vadd.f32 %v2791_v18, %v2550_v53  ;;  %v7927_v60 = vadd.f32 %v2791_v18, %v2607_v20 }
 0x42d   : > { %v2820_v23 = vadd.f32 %v7927_v60, %v7925_v29  ;;  %v2830_v18 = vmul.f32 %v7925_v29, %v7925_v29 }
 0x42f   : > { %2821 = vadd.xlane.f32.xlu0 %v2820_v23  ;;  %v2831_v23 = vmul.f32 %v7927_v60, %v7927_v60 }
 0x431   : > { %v2840_v34 = vadd.f32 %v2831_v23, %v2830_v18 }
 0x441   : > { %v2786_v54 = vpop.permute.xlu0 %2785 }
 0x442   : > { %v7940_v25 = vadd.f32 %v2786_v54, %v2547_v32  ;;  %v7942_v56 = vadd.f32 %v2786_v54, %v2604_v37 }
 0x444   : > { %v2639_v58 = vpop.f32.mrf.mxu3  ;;  %v2817_v5 = vadd.f32 %v7942_v56, %v7940_v25  ;;  %v2828_v16 = vmul.f32 %v7940_v25, %v7940_v25  ;;  %v2829_v9 = vmul.f32 %v7942_v56, %v7942_v56 }
 0x445   : > { %v7946_v38 = vadd.f32 %v2639_v58, %v2621_v48  ;;  %v2781_v10 = vpop.permute.xlu1 %2780 }
 0x446   : > { %v7954_v49 = vadd.f32 %v2781_v10, %v2545_v43  ;;  %v7956_v62 = vadd.f32 %v2781_v10, %v2602_v30  ;;  %2818 = vadd.xlane.f32.xlu2 %v2817_v5  ;;  %v2837_v13 = vadd.f32 %v2829_v9, %v2828_v16 }
 0x448   : > { %2838 = vadd.xlane.f32.xlu0 %v2837_v13  ;;  %v2814_v28 = vadd.f32 %v7956_v62, %v7954_v49  ;;  %v2826_v35 = vmul.f32 %v7954_v49, %v7954_v49  ;;  %v2827_v1 = vmul.f32 %v7956_v62, %v7956_v62 }
 0x44a   : > { %2815 = vadd.xlane.f32.xlu1 %v2814_v28  ;;  %v2834_v40 = vadd.f32 %v2827_v1, %v2826_v35 }
 0x44c   : > { %v2641_v21 = vpop.f32.mrf.mxu3 }
 0x44d   : > { %v7966_v15 = vadd.f32 %v2641_v21, %v2623_v19  ;;  %v2796_v14 = vpop.permute.xlu0 %2795 }
 0x44e   : > { %2835 = vadd.xlane.f32.xlu2 %v2834_v40  ;;  %v7968_v27 = vadd.f32 %v2796_v14, %v2552_v11  ;;  %v7970_v36 = vadd.f32 %v2796_v14, %v2609_v50 }
 0x450   : > { %v2823_v55 = vadd.f32 %v7970_v36, %v7968_v27  ;;  %v2832_v24 = vmul.f32 %v7968_v27, %v7968_v27  ;;  %v2833_v63 = vmul.f32 %v7970_v36, %v7970_v36 }
 0x452   : > { %2824 = vadd.xlane.f32.xlu1 %v2823_v55  ;;  %v2843_v26 = vadd.f32 %v2833_v63, %v2832_v24 }
 0x454   : > { %v2644_v53 = vpop.f32.mrf.mxu3 }
 0x455   : > { %v7979_v20 = vadd.f32 %v2644_v53, %v2626_v3 }
 0x456   : > { %2844 = vadd.xlane.f32.xlu2 %v2843_v26 }
 0x45a   : > { %2841 = vadd.xlane.f32.xlu1 %v2840_v34 }
 0x45c   : > { %2928 = vperm.xlu0 %6158, %v2806_v17  }
 0x464   : > { %2943 = vperm.xlu0 %6158, %v2809_v59  }
 0x46c   : > { %2956 = vperm.xlu0 %6158, %v2810_v0  }
 0x46e   : > { %2938 = vperm.xlu2 %6157, %v2808_v42  }
 0x473   : > { %2933 = vperm.xlu1 %6159, %v2807_v6  }
 0x474   : > { %2971 = vperm.xlu0 %6158, %v2813_v22  }
 0x476   : > { %2966 = vperm.xlu2 %6157, %v2812_v46  }
 0x47b   : > { %2961 = vperm.xlu1 %6159, %v2811_v33  }
 0x4a2   : > { %v2822_v45 = vpop.xlane.xlu0 %2821 }
 0x4a3   : > { %v8019_v35 = vmul.f32 0.00390625, %v2822_v45 }
 0x4a5   : > { %v2856_v11 = vmul.f32 %v8019_v35, %v8019_v35 }
 0x4b9   : > { %v2819_v52 = vpop.xlane.xlu2 %2818 }
 0x4ba   : > { %v8009_v32 = vmul.f32 0.00390625, %v2819_v52 }
 0x4bb   : > { %v2839_v37 = vpop.xlane.xlu0 %2838 }
 0x4bc   : > { %v2855_v54 = vmul.f32 %v8009_v32, %v8009_v32  ;;  %v2851_v48 = vmul.f32 0.00390625, %v2839_v37 }
 0x4bd   : > { %v2816_v47 = vpop.xlane.xlu1 %2815 }
 0x4be   : > { %v2846_v57 = vmul.f32 0.00390625, %v2816_v47  ;;  %v2859_v58 = vsub.f32 %v2851_v48, %v2855_v54 }
 0x4c0   : > { %v2854_v43 = vmul.f32 %v2846_v57, %v2846_v57  ;;  %v2863_v5 = vmax.f32 %v2859_v58, 0.0  ;;  %v2910_v22 = vsub.f32 %v7954_v49, %v2846_v57  ;;  %v2911_v46 = vsub.f32 %v7956_v62, %v2846_v57 }
 0x4c1   : > { %v2836_v30 = vpop.xlane.xlu2 %2835 }
 0x4c2   : > { %v2850_v31 = vmul.f32 0.00390625, %v2836_v30  ;;  %v8015_v13 = vadd.f32 1e-05, %v2863_v5 }
 0x4c4   : > { %v2858_v16 = vsub.f32 %v2850_v31, %v2854_v43  ;;  %vm2886_vm11 = vweird.f32 %v8015_v13 }
 0x4c5   : > { %v2825_v9 = vpop.xlane.xlu1 %2824 }
 0x4c6   : > { %v2862_v61 = vmax.f32 %v2858_v16, 0.0  ;;  %v8013_v10 = vmul.f32 0.00390625, %v2825_v9 }
 0x4c8   : > { %v2866_v44 = vadd.f32 1e-05, %v2862_v61  ;;  %v2857_v2 = vmul.f32 %v8013_v10, %v8013_v10 }
 0x4c9   : > { %v2845_v28 = vpop.xlane.xlu2 %2844 }
 0x4ca   : > { %6244 = vrsqrt.f32 %v2866_v44  ;;  %v2853_v1 = vmul.f32 0.00390625, %v2845_v28  ;;  %vm2876_vm5 = vweird.f32 %v2866_v44  ;;  %v2917_v28 = vsub.f32 %v7970_v36, %v8013_v10 }
 0x4cb   : > { %6246 = vrsqrt.f32 %v8015_v13  ;;  %v2914_v36 = vsub.f32 %v7925_v29, %v8019_v35  ;;  %v2912_v29 = vsub.f32 %v7940_v25, %v8009_v32 }
 0x4cc   : > { %v2861_v4 = vsub.f32 %v2853_v1, %v2857_v2  ;;  %v2916_v2 = vsub.f32 %v7968_v27, %v8013_v10  ;;  %v2915_v10 = vsub.f32 %v7927_v60, %v8019_v35  ;;  %v2913_v60 = vsub.f32 %v7942_v56, %v8009_v32 }
 0x4cd   : > { %v2842_v19 = vpop.xlane.xlu1 %2841 }
 0x4ce   : > { %v2865_v40 = vmax.f32 %v2861_v4, 0.0  ;;  %v2852_v21 = vmul.f32 0.00390625, %v2842_v19  ;;  %v2929_v50 = vpop.permute.xlu0 %2928 }
 0x4d0   : > { %v6245_v14 = vpop.eup %6244  ;;  %v2869_v12 = vadd.f32 1e-05, %v2865_v40  ;;  %v2860_v55 = vsub.f32 %v2852_v21, %v2856_v11 }
 0x4d1   : > { %v8024_v24 = vpop.eup %6246  ;;  %v2871_v63 = vmul.f32 %v6245_v14, %v2866_v44  ;;  %vm2877_vm4 = vweird.f32 %v6245_v14  ;;  %v2939_v57 = vpop.permute.xlu2 %2938 }
 0x4d2   : > { %6248 = vrsqrt.f32 %v2869_v12  ;;  %v2864_v3 = vmax.f32 %v2860_v55, 0.0  ;;  %v2881_v53 = vmul.f32 %v8024_v24, %v8015_v13  ;;  %vm2878_vm6 = vmor %vm2876_vm5, %vm2877_vm4  ;;  %vm2906_vm8 = vweird.f32 %v2869_v12 }
 0x4d3   : > { %v2872_v26 = vmul.f32 %v6245_v14, %v2871_v63  ;;  %vm2887_vm9 = vweird.f32 %v8024_v24 }
 0x4d4   : > { %v2868_v18 = vadd.f32 1e-05, %v2864_v3  ;;  %v2882_v0 = vmul.f32 %v8024_v24, %v2881_v53  ;;  %vm2888_vm5 = vmor %vm2886_vm11, %vm2887_vm9 }
 0x4d5   : > { %v2873_v23 = vmul.f32 0.5, %v2872_v26 }
 0x4d6   : > { %6250 = vrsqrt.f32 %v2868_v18  ;;  %v2944_v34 = vpop.permute.xlu0 %2943  ;;  %v2883_v37 = vmul.f32 0.5, %v2882_v0  ;;  %vm2896_vm2 = vweird.f32 %v2868_v18 }
 0x4d7   : > { %v2874_v17 = vsub.f32 1.5, %v2873_v23 }
 0x4d8   : > { %v6249_v59 = vpop.eup %6248  ;;  %v2884_v9 = vsub.f32 1.5, %v2883_v37 }
 0x4d9   : > { %v2901_v42 = vmul.f32 %v6249_v59, %v2869_v12  ;;  %v2875_v6 = vmul.f32 %v6245_v14, %v2874_v17  ;;  %vm2907_vm7 = vweird.f32 %v6249_v59  ;;  %v2967_v0 = vpop.permute.xlu2 %2966 }
 0x4da   : > { %vm2908_vm1 = vmor %vm2906_vm8, %vm2907_vm7 }
 0x4db   : > { %v2902_v33 = vmul.f32 %v6249_v59, %v2901_v42  ;;  %v2879_v45 = vsel %vm2878_vm6, %v6245_v14, %v2875_v6 }
 0x4dc   : > { %v6251_v52 = vpop.eup %6250  ;;  %v2918_v54 = vmul.f32 %v2910_v22, %v2879_v45  ;;  %v2919_v48 = vmul.f32 %v2911_v46, %v2879_v45 }
 0x4dd   : > { %v2903_v47 = vmul.f32 0.5, %v2902_v33  ;;  %v2891_v58 = vmul.f32 %v6251_v52, %v2868_v18  ;;  %vm2897_vm0 = vweird.f32 %v6251_v52 }
 0x4de   : > { %v2946_v43 = vmul.f32 %v2929_v50, %v2918_v54  ;;  %v2947_v30 = vmul.f32 %v2929_v50, %v2919_v48  ;;  %v2957_v31 = vpop.permute.xlu0 %2956  ;;  %v2885_v50 = vmul.f32 %v8024_v24, %v2884_v9  ;;  %vm2898_vm4 = vmor %vm2896_vm2, %vm2897_vm0 }
 0x4df   : > { %v2904_v5 = vsub.f32 1.5, %v2903_v47  ;;  %v2892_v16 = vmul.f32 %v6251_v52, %v2891_v58 }
 0x4e0   : > { %v8031_v61 = vadd.f32 %v2957_v31, %v2946_v43  ;;  %v8033_v49 = vadd.f32 %v2957_v31, %v2947_v30  ;;  %v2889_v18 = vsel %vm2888_vm5, %v8024_v24, %v2885_v50 }
 0x4e1   : > { %v2893_v62 = vmul.f32 0.5, %v2892_v16  ;;  %v2905_v44 = vmul.f32 %v6249_v59, %v2904_v5  ;;  %v2920_v6 = vmul.f32 %v2912_v29, %v2889_v18  ;;  %v2921_v22 = vmul.f32 %v2913_v60, %v2889_v18 }
 0x4e2   : > { %v5557_v1 = vmul.f32 -1.442695, %v8031_v61  ;;  %v5558_v4 = vmul.f32 -1.442695, %v8033_v49 }
 0x4e3   : > { %v2894_v19 = vsub.f32 1.5, %v2893_v62  ;;  %v2909_v40 = vsel %vm2908_vm1, %v6249_v59, %v2905_v44 }
 0x4e4   : > { %v2924_v21 = vmul.f32 %v2916_v2, %v2909_v40  ;;  %v2925_v11 = vmul.f32 %v2917_v28, %v2909_v40  ;;  %6252 = vpow2.f32 %v5557_v1 }
 0x4e5   : > { %v2895_v27 = vmul.f32 %v6251_v52, %v2894_v19  ;;  %6254 = vpow2.f32 %v5558_v4  ;;  %v2934_v14 = vpop.permute.xlu1 %2933 }
 0x4e6   : > { %v2952_v12 = vmul.f32 %v2944_v34, %v2924_v21  ;;  %v2972_v55 = vpop.permute.xlu0 %2971  ;;  %v2953_v3 = vmul.f32 %v2944_v34, %v2925_v11  ;;  %v2948_v56 = vmul.f32 %v2934_v14, %v2920_v6  ;;  %v2949_v37 = vmul.f32 %v2934_v14, %v2921_v22 }
 0x4e7   : > { %v2899_v63 = vsel %vm2898_vm4, %v6251_v52, %v2895_v27 }
 0x4e8   : > { %v2922_v26 = vmul.f32 %v2914_v36, %v2899_v63  ;;  %v2923_v53 = vmul.f32 %v2915_v10, %v2899_v63  ;;  %v8051_v23 = vadd.f32 %v2972_v55, %v2952_v12  ;;  %v8058_v46 = vadd.f32 %v2972_v55, %v2953_v3 }
 0x4ea   : > { %v6253_v13 = vpop.eup %6252  ;;  %v2950_v35 = vmul.f32 %v2939_v57, %v2922_v26  ;;  %v2951_v17 = vmul.f32 %v2939_v57, %v2923_v53  ;;  %v5563_v34 = vmul.f32 -1.442695, %v8051_v23  ;;  %v5564_v54 = vmul.f32 -1.442695, %v8058_v46 }
 0x4eb   : > { %v6255_v59 = vpop.eup %6254  ;;  %v3006_v42 = vadd.f32 1.0, %v6253_v13 }
 0x4ec   : > { %v8060_v24 = vadd.f32 %v2967_v0, %v2950_v35  ;;  %v8062_v33 = vadd.f32 %v2967_v0, %v2951_v17  ;;  %v3007_v25 = vadd.f32 1.0, %v6255_v59  ;;  %6256 = vpow2.f32 %v5563_v34 }
 0x4ed   : > { %6258 = vrcp.f32 %v3006_v42  ;;  %v2962_v32 = vpop.permute.xlu1 %2961  ;;  %v3023_v1 = vand.u32 2147483647, %v3006_v42  ;;  %v3025_v21 = vand.u32 2147483648, %v3006_v42  ;;  %vm3019_vm7 = vweird.f32 %v3006_v42 }
 0x4ee   : > { %v5561_v45 = vmul.f32 -1.442695, %v8060_v24  ;;  %v5562_v52 = vmul.f32 -1.442695, %v8062_v33  ;;  %6260 = vrcp.f32 %v3007_v25  ;;  %v8067_v48 = vadd.f32 %v2962_v32, %v2948_v56 }
 0x4ef   : > { %v8069_v47 = vadd.f32 %v2962_v32, %v2949_v37  ;;  %v3038_v50 = vand.u32 2147483647, %v3007_v25  ;;  %vm3034_vm8 = vweird.f32 %v3007_v25  ;;  %v3040_v27 = vand.u32 2147483648, %v3007_v25 }
 0x4f0   : > { %6262 = vpow2.f32 %v5561_v45  ;;  %v5559_v43 = vmul.f32 -1.442695, %v8067_v48  ;;  %vm3024_vm1 = vcmp.eq.f32.partialorder %v3023_v1, 8.507059e+37  ;;  %v3026_v55 = vor.u32 1.1754944e-38, %v3025_v21 }
 0x4f1   : > { %6264 = vpow2.f32 %v5562_v52  ;;  %v5560_v9 = vmul.f32 -1.442695, %v8069_v47  ;;  %vm3039_vm2 = vcmp.eq.f32.partialorder %v3038_v50, 8.507059e+37  ;;  %v3041_v35 = vor.u32 1.1754944e-38, %v3040_v27 }
 0x4f2   : > { %v6257_v58 = vpop.eup %6256  ;;  %6266 = vpow2.f32 %v5564_v54 }
 0x4f3   : > { %v6259_v30 = vpop.eup %6258  ;;  %v8072_v31 = vadd.f32 1.0, %v6257_v58 }
 0x4f4   : > { %v6261_v5 = vpop.eup %6260  ;;  %v3015_v16 = vmul.f32 %v6259_v30, %v3006_v42  ;;  %vm3020_vm6 = vweird.f32 %v6259_v30 }
 0x4f5   : > { %v3030_v62 = vmul.f32 %v6261_v5, %v3007_v25  ;;  %6268 = vrcp.f32 %v8072_v31  ;;  %vm3035_vm0 = vweird.f32 %v6261_v5  ;;  %vm3021_vm9 = vmor %vm3019_vm7, %vm3020_vm6  ;;  %v3115_v26 = vand.u32 2147483648, %v8072_v31 }
 0x4f6   : > { %v6263_v57 = vpop.eup %6262  ;;  %v3016_v44 = vsub.f32 1.0, %v3015_v16  ;;  %6270 = vpow2.f32 %v5559_v43  ;;  %v3113_v29 = vand.u32 2147483647, %v8072_v31  ;;  %vm3036_vm11 = vmor %vm3034_vm8, %vm3035_vm0  ;;  %vm3109_vm4 = vweird.f32 %v8072_v31 }
 0x4f7   : > { %v6265_v2 = vpop.eup %6264  ;;  %v8076_v28 = vadd.f32 1.0, %v6263_v57  ;;  %v3031_v4 = vsub.f32 1.0, %v3030_v62  ;;  %6272 = vpow2.f32 %v5560_v9  ;;  %v3116_v32 = vor.u32 1.1754944e-38, %v3115_v26 }
 0x4f8   : > { %v8078_v19 = vadd.f32 1.0, %v6265_v2  ;;  %v3017_v40 = vmul.f32 %v6259_v30, %v3016_v44  ;;  %v6267_v11 = vpop.eup %6266  ;;  %vm8106_vm5 = vcmp.eq.f32.partialorder %v3113_v29, 8.507059e+37 }
 0x4f9   : > { %6274 = vrcp.f32 %v8076_v28  ;;  %v3032_v10 = vmul.f32 %v6261_v5, %v3031_v4  ;;  %v8084_v63 = vadd.f32 1.0, %v6267_v11  ;;  %v3083_v45 = vand.u32 2147483647, %v8076_v28 }
 0x4fa   : > { %6276 = vrcp.f32 %v8078_v19  ;;  %v3018_v36 = vadd.f32 %v6259_v30, %v3017_v40  ;;  %v3085_v52 = vand.u32 2147483648, %v8076_v28  ;;  %v3098_v43 = vand.u32 2147483647, %v8078_v19 }
 0x4fb   : > { %v8082_v14 = vpop.eup %6268  ;;  %v3033_v18 = vadd.f32 %v6261_v5, %v3032_v10  ;;  %6278 = vrcp.f32 %v8084_v63  ;;  %vm3079_vm7 = vweird.f32 %v8076_v28  ;;  %v3100_v57 = vand.u32 2147483648, %v8078_v19 }
 0x4fc   : > { %v6271_v12 = vpop.eup %6270  ;;  %v3105_v3 = vmul.f32 %v8082_v14, %v8072_v31  ;;  %v3022_v53 = vsel %vm3021_vm9, %v6259_v30, %v3018_v36  ;;  %vm3110_vm6 = vweird.f32 %v8082_v14  ;;  %vm3084_vm9 = vcmp.eq.f32.partialorder %v3083_v45, 8.507059e+37 }
 0x4fd   : > { %v6273_v60 = vpop.eup %6272  ;;  %v3027_v13 = vsel %vm3024_vm1, %v3026_v55, %v3022_v53  ;;  %v3037_v59 = vsel %vm3036_vm11, %v6261_v5, %v3033_v18  ;;  %v8096_v42 = vadd.f32 1.0, %v6271_v12  ;;  %vm3094_vm1 = vweird.f32 %v8078_v19  ;;  %vm8136_vm11 = vmor %vm3109_vm4, %vm3110_vm6 }
 0x4fe   : > { %v3106_v17 = vsub.f32 1.0, %v3105_v3  ;;  %v8093_v0 = vmul.f32 %v3027_v13, %v8031_v61  ;;  %v3042_v56 = vsel %vm3039_vm2, %v3041_v35, %v3037_v59  ;;  %v8119_v16 = vadd.f32 1.0, %v6273_v60 }
 0x4ff   : > { %v6275_v34 = vpop.eup %6274  ;;  %v8104_v61 = vmul.f32 %v3042_v56, %v8033_v49  ;;  %6280 = vrcp.f32 %v8096_v42  ;;  %v3086_v4 = vor.u32 1.1754944e-38, %v3085_v52  ;;  %vm8128_vm2 = vcmp.eq.f32.partialorder %v3098_v43, 8.507059e+37 }
 0x500   : > { %v6277_v6 = vpop.eup %6276  ;;  %v3075_v22 = vmul.f32 %v6275_v34, %v8076_v28  ;;  %v3107_v25 = vmul.f32 %v8082_v14, %v3106_v17  ;;  %3188 = vrot.lane.b32.xlu0 %v8093_v0, %s9654_s16  ;;  %3142 = vrot.lane.b32.xlu1 %v8093_v0, %s9725_s27  ;;  %vm3080_vm8 = vweird.f32 %v6275_v34  ;;  %6282 = vrcp.f32 %v8119_v16 }
 0x501   : > { %v3090_v37 = vmul.f32 %v6277_v6, %v8078_v19  ;;  %v3326_v49 = vpack.c.bf16 %v8104_v61, %v8093_v0  ;;  %3150 = vrot.lane.b32.xlu2 %v8104_v61, %s9725_s27  ;;  %v6279_v9 = vpop.eup %6278  ;;  %vm3095_vm0 = vweird.f32 %v6277_v6  ;;  %vm3081_vm3 = vmor %vm3079_vm7, %vm3080_vm8  ;;  %v3101_v36 = vor.u32 1.1754944e-38, %v3100_v57 }
 0x502   : > { %v3076_v58 = vsub.f32 1.0, %v3075_v22  ;;  %v3108_v30 = vadd.f32 %v8082_v14, %v3107_v25  ;;  %v3120_v2 = vmul.f32 %v6279_v9, %v8084_v63  ;;  %vm3096_vm15 = vmor %vm3094_vm1, %vm3095_vm0  ;;  %v3128_v31 = vand.u32 2147483647, %v8084_v63 }
 0x503   : > { %v3091_v5 = vsub.f32 1.0, %v3090_v37  ;;  %3330 = vst [vmem:[#allocation2 + $0x100] sm:$0xff] %v3326_v49  ;;  %v3130_v10 = vand.u32 2147483648, %v8084_v63  ;;  %vm3125_vm4 = vweird.f32 %v6279_v9  ;;  %vm3049_vm7 = vweird.f32 %v8096_v42 }
 0x504   : > { %v3077_v62 = vmul.f32 %v6275_v34, %v3076_v58  ;;  %v3112_v11 = vsel %vm8136_vm11, %v8082_v14, %v3108_v30  ;;  %v3121_v50 = vsub.f32 1.0, %v3120_v2  ;;  %vm3129_vm6 = vcmp.eq.f32.partialorder %v3128_v31, 8.507059e+37 }
 0x505   : > { %v3092_v44 = vmul.f32 %v6277_v6, %v3091_v5  ;;  %v6281_v12 = vpop.eup %6280  ;;  %v3117_v19 = vsel %vm8106_vm5, %v3116_v32, %v3112_v11  ;;  %v3131_v13 = vor.u32 1.1754944e-38, %v3130_v10  ;;  %v3070_v37 = vand.u32 2147483648, %v8119_v16 }
 0x506   : > { %v3078_v1 = vadd.f32 %v6275_v34, %v3077_v62  ;;  %v3122_v26 = vmul.f32 %v6279_v9, %v3121_v50  ;;  %v3045_v18 = vmul.f32 %v6281_v12, %v8096_v42  ;;  %v6283_v17 = vpop.eup %6282  ;;  %vm3050_vm5 = vweird.f32 %v6281_v12 }
 0x507   : > { %v3093_v21 = vadd.f32 %v6277_v6, %v3092_v44  ;;  %v3060_v56 = vmul.f32 %v6283_v17, %v8119_v16  ;;  %vm3051_vm8 = vmor %vm3049_vm7, %vm3050_vm5  ;;  %vm3065_vm0 = vweird.f32 %v6283_v17  ;;  %v3068_v43 = vand.u32 2147483647, %v8119_v16 }
 0x508   : > { %v3082_v27 = vsel %vm3081_vm3, %v6275_v34, %v3078_v1  ;;  %3196 = vrot.lane.b32.xlu1 %v8104_v61, %s9654_s16  ;;  %v3123_v60 = vadd.f32 %v6279_v9, %v3122_v26  ;;  %v3046_v35 = vsub.f32 1.0, %v3045_v18  ;;  %v3071_v5 = vor.u32 1.1754944e-38, %v3070_v37  ;;  %v3166_v26 = vld [vmem:[%s9611_s2] sm:$0x3] }
 0x509   : > { %v3087_v55 = vsel %vm3084_vm9, %v3086_v4, %v3082_v27  ;;  %v3097_v3 = vsel %vm3096_vm15, %v6277_v6, %v3093_v21  ;;  %vm3124_vm15 = vweird.f32 %v8084_v63  ;;  %3234 = vrot.lane.b32.xlu2 %v8093_v0, %s9730_s26  ;;  %v3055_v6 = vand.u32 2147483648, %v8096_v42 }
 0x50a   : > { %v3102_v14 = vsel %vm8128_vm2, %v3101_v36, %v3097_v3  ;;  %v8153_v53 = vmul.f32 %v3087_v55, %v8060_v24  ;;  %vm3126_vm3 = vmor %vm3124_vm15, %vm3125_vm4  ;;  %v3053_v24 = vand.u32 2147483647, %v8096_v42  ;;  %v3047_v22 = vmul.f32 %v6281_v12, %v3046_v35  ;;  %v3540_v3 = vld [vmem:[%s9616_s7] sm:$0xff] }
 0x50b   : > { %v8159_v29 = vmul.f32 %v3102_v14, %v8062_v33  ;;  %v3127_v59 = vsel %vm3126_vm3, %v6279_v9, %v3123_v60  ;;  %v8168_v33 = vmul.f32 %v3117_v19, %v8051_v23  ;;  %v3061_v45 = vsub.f32 1.0, %v3060_v56  ;;  %v3543_v14 = vld [vmem:[%s9616_s7 + $0x18] sm:$0xff] }
 0x50c   : > { %v3132_v63 = vsel %vm3129_vm6, %v3131_v13, %v3127_v59  ;;  %v3048_v32 = vadd.f32 %v6281_v12, %v3047_v22  ;;  %vm3054_vm1 = vcmp.eq.f32.partialorder %v3053_v24, 8.507059e+37  ;;  %v3056_v23 = vor.u32 1.1754944e-38, %v3055_v6  ;;  %v3542_v24 = vld [vmem:[%s9616_s7 + $0x10] sm:$0xff] }
 0x50d   : > { %v3328_v34 = vpack.c.bf16 %v8159_v29, %v8153_v53  ;;  %v8173_v25 = vmul.f32 %v3132_v63, %v8058_v46  ;;  %v3062_v58 = vmul.f32 %v6283_v17, %v3061_v45  ;;  %vm3064_vm9 = vweird.f32 %v8119_v16  ;;  %v5565_v45 = vld [vmem:[%s9611_s2 + $0x2] sm:$0x3] }
 0x50e   : > { %v3052_v54 = vsel %vm3051_vm8, %v6281_v12, %v3048_v32  ;;  %vm3066_vm2 = vmor %vm3064_vm9, %vm3065_vm0  ;;  %vm3069_vm11 = vcmp.eq.f32.partialorder %v3068_v43, 8.507059e+37  ;;  %v8249_v60 = vperm.slane %v3166_v26, 0  ;;  %v8251_v13 = vperm.slane %v3166_v26, 1  ;;  %v3541_v43 = vld [vmem:[%s9616_s7 + $0x8] sm:$0xff] }
 0x50f   : > { %3332 = vst [vmem:[#allocation2 + $0x120] sm:$0xff] %v3328_v34  ;;  %v3329_v52 = vpack.c.bf16 %v8173_v25, %v8168_v33  ;;  %v3057_v46 = vsel %vm3054_vm1, %v3056_v23, %v3052_v54  ;;  %v3063_v30 = vadd.f32 %v6283_v17, %v3062_v58  ;;  %v8268_v54 = vperm.slane %v5565_v45, 0 }
 0x510   : > { %v8182_v42 = vmul.f32 %v3057_v46, %v8067_v48  ;;  %v5572_v48 = vld [vmem:[%s7594_s23 + $0x1] sm:$0x1]  ;;  %v8270_v58 = vperm.slane %v5565_v45, 1  ;;  %s9837_s23 = sld [smem:[#allocation18_spill]] }
 0x511   : > { %3333 = vst [vmem:[#allocation2 + $0x130] sm:$0xff] %v3329_v52  ;;  %v3067_v49 = vsel %vm3066_vm2, %v6283_v17, %v3063_v30 }
 0x512   : > { %3144 = vrot.lane.b32.xlu2 %v8182_v42, %s9725_s27  ;;  %3190 = vrot.lane.b32.xlu1 %v8182_v42, %s9654_s16  ;;  %v3072_v9 = vsel %vm3069_vm11, %v3071_v5, %v3067_v49  ;;  %vm9742_vm11 = vcmp.lt.s32.totalorder %v6932_v8, 127 }
 0x513   : > { %v8189_v62 = vmul.f32 %v3072_v9, %v8069_v47  ;;  %v5573_v47 = vmul.f32 -1.442695, %v5572_v48 }
 0x515   : > { %v3327_v16 = vpack.c.bf16 %v8189_v62, %v8182_v42  ;;  %3152 = vrot.lane.b32.xlu0 %v8189_v62, %s9725_s27  ;;  %6284 = vpow2.f32 %v5573_v47 }
 0x516   : > { %s6378_s3 = scalar_lea.hbm %s9837_s23, 256 }
 0x517   : > { %3331 = vst [vmem:[#allocation2 + $0x110] sm:$0xff] %v3327_v16 }
 0x51a   : > { %3198 = vrot.lane.b32.xlu2 %v8189_v62, %s9654_s16  ;;  %3154 = vrot.lane.b32.xlu1 %v8159_v29, %s9725_s27 }
 0x51b   : > { %v6285_v57 = vpop.eup %6284 }
 0x51c   : > { %v3523_v44 = vadd.f32 1.0, %v6285_v57 }
 0x51d   : > { %3236 = vrot.lane.b32.xlu0 %v8182_v42, %s9730_s26 }
 0x51e   : > { %6286 = vrcp.f32 %v3523_v44  ;;  %vm3529_vm4 = vweird.f32 %v3523_v44  ;;  %v3535_v21 = vand.u32 2147483648, %v3523_v44  ;;  %v3533_v50 = vand.u32 2147483647, %v3523_v44 }
 0x520   : > { %v3536_v27 = vor.u32 1.1754944e-38, %v3535_v21  ;;  %vm3534_vm6 = vcmp.eq.f32.partialorder %v3533_v50, 8.507059e+37 }
 0x522   : > { %3192 = vrot.lane.b32.xlu2 %v8153_v53, %s9654_s16  ;;  %3238 = vrot.lane.b32.xlu1 %v8153_v53, %s9730_s26 }
 0x524   : > { %v6287_v2 = vpop.eup %6286 }
 0x525   : > { %3146 = vrot.lane.b32.xlu0 %v8153_v53, %s9725_s27  ;;  %v3525_v1 = vmul.f32 %v6287_v2, %v3523_v44  ;;  %vm3530_vm15 = vweird.f32 %v6287_v2 }
 0x526   : > { %vm3531_vm3 = vmor %vm3529_vm4, %vm3530_vm15 }
 0x527   : > { %v3526_v4 = vsub.f32 1.0, %v3525_v1  ;;  %vm9743_vm4 = vmmov %vm9742_vm11 }
 0x528   : > { %vm9744_vm15 = vmmov %vm9743_vm4 }
 0x529   : > { %v3527_v40 = vmul.f32 %v6287_v2, %v3526_v4 }
 0x52a   : > { %3156 = vrot.lane.b32.xlu2 %v8173_v25, %s9725_s27  ;;  %3148 = vrot.lane.b32.xlu1 %v8168_v33, %s9725_s27 }
 0x52b   : > { %v3528_v11 = vadd.f32 %v6287_v2, %v3527_v40 }
 0x52d   : > { %3200 = vrot.lane.b32.xlu0 %v8159_v29, %s9654_s16  ;;  %v3532_v36 = vsel %vm3531_vm3, %v6287_v2, %v3528_v11  ;;  %vm9745_vm3 = vmmov %vm9743_vm4 }
 0x52e   : > { %v3537_v31 = vsel %vm3534_vm6, %v3536_v27, %v3532_v36  ;;  %vm9746_vm6 = vmmov %vm9745_vm3 }
 0x52f   : > { %v3539_v12 = vmul.f32 %v5572_v48, %v3537_v31 }
 0x531   : > { %v3545_v55 = vperm.slane %v3539_v12, 0 }
 0x532   : > { %3240 = vrot.lane.b32.xlu2 %v8168_v33, %s9730_s26  ;;  %3202 = vrot.lane.b32.xlu1 %v8173_v25, %s9654_s16 }
 0x533   : > { %v3547_v18 = vmul.f32 %v3545_v55, %v3540_v3  ;;  %v3550_v35 = vmul.f32 %v3545_v55, %v3543_v14  ;;  %v3549_v63 = vmul.f32 %v3545_v55, %v3542_v24  ;;  %v3548_v9 = vmul.f32 %v3545_v55, %v3541_v43  ;;  %v5566_v14 = vld [vmem:[%s9611_s2 + $0x4] sm:$0x3] }
 0x535   : > { %3194 = vrot.lane.b32.xlu0 %v8168_v33, %s9654_s16  ;;  %v3551_v34 = vsel %vm2757_vm10, %v3547_v18, 0.0  ;;  %v3560_v32 = vsel %vm2757_vm10, %v3550_v35, 0.0  ;;  %v3557_v37 = vsel %vm2757_vm10, %v3549_v63, 0.0  ;;  %v3554_v44 = vsel %vm2757_vm10, %v3548_v9, 0.0  ;;  %s9826_s16 = sshll.u32 %s6604_s14, 7 }
 0x536   : > { %v8303_v18 = vperm.slane %v5566_v14, 0  ;;  %v8305_v35 = vperm.slane %v5566_v14, 1  ;;  %vm9733_vm10 = vcmp.lt.s32.totalorder %v6932_v8, 1 }
 0x537   : > { %vm9734_vm5 = vmmov %vm9733_vm10 }
 0x538   : > { %vm9735_vm7 = vmmov %vm9734_vm5 }
 0x539   : > { %vm9736_vm8 = vmmov %vm9734_vm5 }
 0x53a   : > { %3246 = vrot.lane.b32.xlu2 %v8159_v29, %s9730_s26  ;;  %3244 = vrot.lane.b32.xlu1 %v8189_v62, %s9730_s26  ;;  %vm9737_vm1 = vmmov %vm9734_vm5 }
 0x53b   : > { %vm9738_vm0 = vmmov %vm9737_vm1 }
 0x53c   : > { %vm9740_vm9 = vmmov %vm9738_vm0 }
 0x53d   : > { %3242 = vrot.lane.b32.xlu0 %v8104_v61, %s9730_s26  ;;  %vm9741_vm2 = vmmov %vm9738_vm0 }
 0x542   : > { %3282 = vrot.lane.b32.xlu2 %v8182_v42, %s9731_s15  ;;  %3280 = vrot.lane.b32.xlu1 %v8093_v0, %s9731_s15 }
 0x545   : > { %3248 = vrot.lane.b32.xlu0 %v8173_v25, %s9730_s26 }
 0x54a   : > { %3288 = vrot.lane.b32.xlu2 %v8104_v61, %s9731_s15  ;;  %3286 = vrot.lane.b32.xlu1 %v8168_v33, %s9731_s15 }
 0x54d   : > { %3284 = vrot.lane.b32.xlu0 %v8153_v53, %s9731_s15 }
 0x55b   : > { %v3151_v28 = vpop.permute.xlu2 %3150 }
 0x563   : > { %v8238_v10 = vpop.permute.xlu2 %3234 }
 0x56c   : > { %v3145_v19 = vpop.permute.xlu2 %3144 }
 0x572   : > { %v3143_v17 = vpop.permute.xlu1 %3142  ;;  %v3189_v46 = vpop.permute.xlu0 %3188 }
 0x573   : > { %v3158_v59 = vsel %vm900_vm12, %v3143_v17, %v3151_v28  ;;  %v3162_v6 = vsel %vm900_vm12, %v3151_v28, %v3143_v17  ;;  %3552 = vadd.xlane.f32.xlu2 %v3551_v34 }
 0x574   : > { %v3172_v22 = vmul.f32 %v8249_v60, %v3162_v6  ;;  %v3173_v56 = vmul.f32 %v8251_v13, %v3158_v59  ;;  %v3199_v23 = vpop.permute.xlu2 %3198  ;;  %3561 = vadd.xlane.f32.xlu1 %v3560_v32 }
 0x576   : > { %v3180_v52 = vpack.c.bf16 %v3173_v56, %v3172_v22 }
 0x577   : > { %3558 = vadd.xlane.f32.xlu0 %v3557_v37 }
 0x578   : > { %3184 = vst [vmem:[#allocation2] sm:$0xff] %v3180_v52 }
 0x57a   : > { %v3197_v30 = vpop.permute.xlu1 %3196 }
 0x57b   : > { %v3204_v5 = vsel %vm947_vm13, %v3189_v46, %v3197_v30  ;;  %v3208_v49 = vsel %vm947_vm13, %v3197_v30, %v3189_v46 }
 0x57c   : > { %v3218_v16 = vmul.f32 %v8268_v54, %v3208_v49  ;;  %v3219_v48 = vmul.f32 %v8270_v58, %v3204_v5  ;;  %v3193_v57 = vpop.permute.xlu2 %3192 }
 0x57e   : > { %v3226_v47 = vpack.c.bf16 %v3219_v48, %v3218_v16 }
 0x57f   : > { %3555 = vadd.xlane.f32.xlu0 %v3554_v44 }
 0x580   : > { %3230 = vst [vmem:[#allocation2 + $0x40] sm:$0xff] %v3226_v47 }
 0x584   : > { %v3191_v2 = vpop.permute.xlu1 %3190  ;;  %v3157_v1 = vpop.permute.xlu2 %3156 }
 0x585   : > { %v3205_v4 = vsel %vm947_vm13, %v3191_v2, %v3199_v23  ;;  %v3209_v40 = vsel %vm947_vm13, %v3199_v23, %v3191_v2 }
 0x586   : > { %v3220_v28 = vmul.f32 %v8268_v54, %v3209_v40  ;;  %v3221_v21 = vmul.f32 %v8270_v58, %v3205_v4 }
 0x587   : > { %v3153_v11 = vpop.permute.xlu0 %3152 }
 0x588   : > { %v3227_v50 = vpack.c.bf16 %v3221_v21, %v3220_v28  ;;  %v3159_v27 = vsel %vm900_vm12, %v3145_v19, %v3153_v11  ;;  %v3163_v36 = vsel %vm900_vm12, %v3153_v11, %v3145_v19 }
 0x589   : > { %v3174_v31 = vmul.f32 %v8249_v60, %v3163_v36  ;;  %v3175_v12 = vmul.f32 %v8251_v13, %v3159_v27 }
 0x58a   : > { %3231 = vst [vmem:[#allocation2 + $0x50] sm:$0xff] %v3227_v50 }
 0x58b   : > { %3292 = vrot.lane.b32.xlu2 %v8159_v29, %s9731_s15  ;;  %v3181_v55 = vpack.c.bf16 %v3175_v12, %v3174_v31 }
 0x58c   : > { %v3155_v3 = vpop.permute.xlu1 %3154  ;;  %v8296_v26 = vpop.permute.xlu2 %3240 }
 0x58d   : > { %3290 = vrot.lane.b32.xlu1 %v8189_v62, %s9731_s15  ;;  %3185 = vst [vmem:[#allocation2 + $0x10] sm:$0xff] %v3181_v55  ;;  %v5567_v55 = vld [vmem:[%s9611_s2 + $0x6] sm:$0x3] }
 0x58f   : > { %v3237_v19 = vpop.permute.xlu0 %3236 }
 0x593   : > { %3334 = vrot.lane.b32.xlu2 %v8093_v0, %s9732_s24  ;;  %3294 = vrot.lane.b32.xlu0 %v8173_v25, %s9731_s15 }
 0x594   : > { %v3239_v24 = vpop.permute.xlu1 %3238  ;;  %v3247_v17 = vpop.permute.xlu2 %3246 }
 0x595   : > { %v3252_v34 = vsel %vm995_vm14, %v3239_v24, %v3247_v17  ;;  %v3256_v59 = vsel %vm995_vm14, %v3247_v17, %v3239_v24  ;;  %3336 = vrot.lane.b32.xlu1 %v8182_v42, %s9732_s24  ;;  %v3306_v17 = vperm.slane %v5567_v55, 0 }
 0x596   : > { %v3268_v6 = vmul.f32 %v8303_v18, %v3256_v59  ;;  %v3269_v63 = vmul.f32 %v8305_v35, %v3252_v34  ;;  %v3307_v34 = vperm.slane %v5567_v55, 1 }
 0x597   : > { %v3147_v22 = vpop.permute.xlu0 %3146 }
 0x598   : > { %v3274_v56 = vpack.c.bf16 %v3269_v63, %v3268_v6  ;;  %v3160_v32 = vsel %vm900_vm12, %v3147_v22, %v3155_v3  ;;  %v3164_v45 = vsel %vm900_vm12, %v3155_v3, %v3147_v22 }
 0x599   : > { %v3176_v52 = vmul.f32 %v8249_v60, %v3164_v45  ;;  %v3177_v23 = vmul.f32 %v8251_v13, %v3160_v32 }
 0x59a   : > { %3278 = vst [vmem:[#allocation2 + $0xa0] sm:$0xff] %v3274_v56 }
 0x59b   : > { %v3182_v37 = vpack.c.bf16 %v3177_v23, %v3176_v52 }
 0x59c   : > { %v3149_v43 = vpop.permute.xlu1 %3148  ;;  %v8341_v28 = vpop.permute.xlu2 %3282 }
 0x59d   : > { %v3161_v46 = vsel %vm900_vm12, %v3149_v43, %v3157_v1  ;;  %v3165_v30 = vsel %vm900_vm12, %v3157_v1, %v3149_v43  ;;  %3186 = vst [vmem:[#allocation2 + $0x20] sm:$0xff] %v3182_v37 }
 0x59e   : > { %v3178_v5 = vmul.f32 %v8249_v60, %v3165_v30  ;;  %v3179_v49 = vmul.f32 %v8251_v13, %v3161_v46 }
 0x59f   : > { %v3201_v9 = vpop.permute.xlu0 %3200 }
 0x5a0   : > { %v3183_v16 = vpack.c.bf16 %v3179_v49, %v3178_v5  ;;  %v3206_v48 = vsel %vm947_vm13, %v3193_v57, %v3201_v9  ;;  %v3210_v47 = vsel %vm947_vm13, %v3201_v9, %v3193_v57  ;;  %v3563_v9 = vld [vmem:[%s9617_s8] sm:$0xff] }
 0x5a1   : > { %v3222_v44 = vmul.f32 %v8268_v54, %v3210_v47  ;;  %v3223_v2 = vmul.f32 %v8270_v58, %v3206_v48 }
 0x5a2   : > { %3187 = vst [vmem:[#allocation2 + $0x30] sm:$0xff] %v3183_v16  ;;  %v3566_v16 = vld [vmem:[%s9617_s8 + $0x18] sm:$0xff] }
 0x5a3   : > { %v3228_v4 = vpack.c.bf16 %v3223_v2, %v3222_v44 }
 0x5a4   : > { %v3203_v1 = vpop.permute.xlu1 %3202  ;;  %v3289_v59 = vpop.permute.xlu2 %3288 }
 0x5a5   : > { %3232 = vst [vmem:[#allocation2 + $0x60] sm:$0xff] %v3228_v4 }
 0x5a7   : > { %v3195_v40 = vpop.permute.xlu0 %3194 }
 0x5a8   : > { %v3207_v60 = vsel %vm947_vm13, %v3195_v40, %v3203_v1  ;;  %v3211_v13 = vsel %vm947_vm13, %v3203_v1, %v3195_v40 }
 0x5a9   : > { %v3224_v21 = vmul.f32 %v8268_v54, %v3211_v13  ;;  %v3225_v57 = vmul.f32 %v8270_v58, %v3207_v60 }
 0x5ab   : > { %v3229_v11 = vpack.c.bf16 %v3225_v57, %v3224_v21  ;;  %v3564_v21 = vld [vmem:[%s9617_s8 + $0x8] sm:$0xff] }
 0x5ac   : > { %v3245_v50 = vpop.permute.xlu1 %3244 }
 0x5ad   : > { %v3251_v27 = vsel %vm995_vm14, %v3237_v19, %v3245_v50  ;;  %v3255_v36 = vsel %vm995_vm14, %v3245_v50, %v3237_v19  ;;  %3233 = vst [vmem:[#allocation2 + $0x70] sm:$0xff] %v3229_v11 }
 0x5ae   : > { %v3266_v31 = vmul.f32 %v8303_v18, %v3255_v36  ;;  %v3267_v12 = vmul.f32 %v8305_v35, %v3251_v27 }
 0x5af   : > { %v3243_v54 = vpop.permute.xlu0 %3242 }
 0x5b0   : > { %v3273_v3 = vpack.c.bf16 %v3267_v12, %v3266_v31  ;;  %v3250_v58 = vsel %vm995_vm14, %v8238_v10, %v3243_v54  ;;  %v3254_v14 = vsel %vm995_vm14, %v3243_v54, %v8238_v10 }
 0x5b1   : > { %v3264_v19 = vmul.f32 %v8303_v18, %v3254_v14  ;;  %v3265_v24 = vmul.f32 %v8305_v35, %v3250_v58 }
 0x5b2   : > { %3277 = vst [vmem:[#allocation2 + $0x90] sm:$0xff] %v3273_v3 }
 0x5b3   : > { %v3272_v6 = vpack.c.bf16 %v3265_v24, %v3264_v19 }
 0x5b4   : > { %v3281_v63 = vpop.permute.xlu1 %3280 }
 0x5b5   : > { %v3296_v22 = vsel %vm9733_vm10, %v3281_v63, %v3289_v59  ;;  %v3300_v56 = vsel %vm9734_vm5, %v3289_v59, %v3281_v63  ;;  %3276 = vst [vmem:[#allocation2 + $0x80] sm:$0xff] %v3272_v6  ;;  %vm9747_vm10 = vmmov %vm9745_vm3 }
 0x5b6   : > { %v3310_v32 = vmul.f32 %v3306_v17, %v3300_v56  ;;  %v3311_v45 = vmul.f32 %v3307_v34, %v3296_v22  ;;  %vm9748_vm5 = vmmov %vm9745_vm3 }
 0x5b7   : > { %v3249_v10 = vpop.permute.xlu0 %3248 }
 0x5b8   : > { %v3318_v52 = vpack.c.bf16 %v3311_v45, %v3310_v32  ;;  %v3253_v23 = vsel %vm995_vm14, %v8296_v26, %v3249_v10  ;;  %v3257_v37 = vsel %vm995_vm14, %v3249_v10, %v8296_v26 }
 0x5b9   : > { %v3270_v43 = vmul.f32 %v8303_v18, %v3257_v37  ;;  %v3271_v46 = vmul.f32 %v8305_v35, %v3253_v23  ;;  %v3565_v18 = vld [vmem:[%s9617_s8 + $0x10] sm:$0xff]  ;;  %v8414_v37 = vpop.f32.mrf.mxu1 }
 0x5ba   : > { %3322 = vst [vmem:[#allocation2 + $0xc0] sm:$0xff] %v3318_v52 }
 0x5bb   : > { %v3275_v30 = vpack.c.bf16 %v3271_v46, %v3270_v43  ;;  %v8416_v43 = vpop.f32.mrf.mxu3 }
 0x5bc   : > { %v3287_v5 = vpop.permute.xlu1 %3286 }
 0x5bd   : > { %3279 = vst [vmem:[#allocation2 + $0xb0] sm:$0xff] %v3275_v30 }
 0x5bf   : > { %v3285_v49 = vpop.permute.xlu0 %3284 }
 0x5c1   : > { %v5711_v52 = vld [vmem:[#allocation2 + $0xc0] sm:$0xf]  ;;  %v6041_v23 = vld [vmem:[#allocation2 + $0xc4] sm:$0xf] }
 0x5c4   : > { %v6039_v46 = vld [vmem:[#allocation2 + $0xac] sm:$0xf0]  ;;  %v5697_v30 = vld [vmem:[#allocation2 + $0xb0] sm:$0xf0] }
 0x5e6   : > { %v3553_v48 = vpop.xlane.xlu2 %3552 }
 0x5e7   : > { %v3567_v47 = vadd.f32 %v3563_v9, %v3553_v48  ;;  %v3562_v26 = vpop.xlane.xlu1 %3561  ;;  %v6035_v48 = vld [vmem:[#allocation2 + $0x8c] sm:$0xf0] }
 0x5e8   : > { %v3570_v44 = vadd.f32 %v3566_v16, %v3562_v26  ;;  %v6033_v26 = vld [vmem:[#allocation2 + $0x84] sm:$0xf] }
 0x5e9   : > { %3573 = vperm.xlu1 %6159, %v3567_v47   ;;  %v5679_v47 = vld [vmem:[#allocation2 + $0x80] sm:$0xf] }
 0x5ea   : > { %3588 = vperm.xlu2 %6157, %v3570_v44   ;;  %v3559_v35 = vpop.xlane.xlu0 %3558  ;;  %v5681_v44 = vld [vmem:[#allocation2 + $0x90] sm:$0xf0] }
 0x5eb   : > { %v3569_v2 = vadd.f32 %v3565_v18, %v3559_v35  ;;  %v8418_v18 = vpop.f32.mrf.mxu0  ;;  %v8420_v35 = vpop.f32.mrf.mxu1 }
 0x5ed   : > { %3583 = vperm.xlu0 %6158, %v3569_v2   ;;  %v5680_v2 = vor.u32 %v6035_v48, %v5679_v47 }
 0x5ee   : > { %v3293_v4 = vpop.permute.xlu2 %3292 }
 0x5ef   : > { %v3298_v1 = vsel %vm9735_vm7, %v3285_v49, %v3293_v4  ;;  %v3302_v40 = vsel %vm9736_vm8, %v3293_v4, %v3285_v49  ;;  %v6037_v49 = vld [vmem:[#allocation2 + $0xa4] sm:$0xf]  ;;  %v5684_v4 = vor.u32 %v6033_v26, %v5681_v44  ;;  %vm9749_vm7 = vmmov %vm9745_vm3 }
 0x5f0   : > { %v3314_v60 = vmul.f32 %v3306_v17, %v3302_v40  ;;  %v3315_v13 = vmul.f32 %v3307_v34, %v3298_v1  ;;  %v5700_v16 = vor.u32 %v6037_v49, %v5697_v30  ;;  %v6031_v1 = vld [vmem:[#allocation2 + $0x6c] sm:$0xf0]  ;;  %v5665_v40 = vld [vmem:[#allocation2 + $0x70] sm:$0xf0] }
 0x5f1   : > { %3340 = vrot.lane.b32.xlu1 %v8168_v33, %s9732_s24 }
 0x5f2   : > { %v3320_v57 = vpack.c.bf16 %v3315_v13, %v3314_v60  ;;  %3338 = vrot.lane.b32.xlu2 %v8153_v53, %s9732_s24  ;;  %v3556_v11 = vpop.xlane.xlu0 %3555  ;;  %v8422_v60 = vpop.f32.mrf.mxu2 }
 0x5f3   : > { %v3568_v50 = vadd.f32 %v3564_v21, %v3556_v11  ;;  %v8424_v13 = vpop.f32.mrf.mxu3  ;;  %v5663_v21 = vld [vmem:[#allocation2 + $0x60] sm:$0xf] }
 0x5f4   : > { %3324 = vst [vmem:[#allocation2 + $0xe0] sm:$0xff] %v3320_v57  ;;  %v6029_v57 = vld [vmem:[#allocation2 + $0x64] sm:$0xf]  ;;  %v5664_v11 = vor.u32 %v6031_v1, %v5663_v21 }
 0x5f5   : > { %3578 = vperm.xlu0 %6158, %v3568_v50   ;;  %v5668_v50 = vor.u32 %v6029_v57, %v5665_v40 }
 0x5f6   : > { %v8434_v49 = vpop.permute.xlu2 %3334 }
 0x5f9   : > { %3346 = vrot.lane.b32.xlu1 %v8159_v29, %s9732_s24 }
 0x5fa   : > { %3344 = vrot.lane.b32.xlu2 %v8189_v62, %s9732_s24 }
 0x5fb   : > { %v5727_v59 = vld [vmem:[#allocation2 + $0xe0] sm:$0xf]  ;;  %v6045_v63 = vld [vmem:[#allocation2 + $0xe4] sm:$0xf] }
 0x5fd   : > { %3342 = vrot.lane.b32.xlu0 %v8104_v61, %s9732_s24 }
 0x5ff   : > { %v3291_v27 = vpop.permute.xlu1 %3290 }
 0x600   : > { %v3297_v36 = vsel %vm9737_vm1, %v8341_v28, %v3291_v27  ;;  %v3301_v31 = vsel %vm9738_vm0, %v3291_v27, %v8341_v28  ;;  %v6027_v27 = vld [vmem:[#allocation2 + $0x4c] sm:$0xf0] }
 0x601   : > { %v3312_v12 = vmul.f32 %v3306_v17, %v3301_v31  ;;  %v3313_v55 = vmul.f32 %v3307_v34, %v3297_v36  ;;  %v5649_v36 = vld [vmem:[#allocation2 + $0x50] sm:$0xf0]  ;;  %v5647_v31 = vld [vmem:[#allocation2 + $0x40] sm:$0xf] }
 0x602   : > { %3380 = vrot.lane.b32.xlu2 %v8093_v0, %s9739_s22 }
 0x603   : > { %v3319_v54 = vpack.c.bf16 %v3313_v55, %v3312_v12  ;;  %v6025_v12 = vld [vmem:[#allocation2 + $0x44] sm:$0xf]  ;;  %v8426_v55 = vpop.f32.mrf.mxu0 }
 0x605   : > { %3323 = vst [vmem:[#allocation2 + $0xd0] sm:$0xff] %v3319_v54  ;;  %3348 = vrot.lane.b32.xlu0 %v8173_v25, %s9732_s24  ;;  %v3295_v3 = vpop.permute.xlu0 %3294  ;;  %v5648_v54 = vor.u32 %v6027_v27, %v5647_v31 }
 0x606   : > { %v3299_v58 = vsel %vm9740_vm9, %v3287_v5, %v3295_v3  ;;  %v3303_v14 = vsel %vm9741_vm2, %v3295_v3, %v3287_v5  ;;  %v5695_v5 = vld [vmem:[#allocation2 + $0xa0] sm:$0xf]  ;;  %v5652_v3 = vor.u32 %v6025_v12, %v5649_v36 }
 0x607   : > { %v3316_v19 = vmul.f32 %v3306_v17, %v3303_v14  ;;  %v3317_v24 = vmul.f32 %v3307_v34, %v3299_v58  ;;  %v5696_v9 = vor.u32 %v6039_v46, %v5695_v5  ;;  %v6023_v58 = vld [vmem:[#allocation2 + $0x2c] sm:$0xf0]  ;;  %v5633_v14 = vld [vmem:[#allocation2 + $0x30] sm:$0xf0]  ;;  %v3337_v27 = vpop.permute.xlu1 %3336 }
 0x609   : > { %v3321_v28 = vpack.c.bf16 %v3317_v24, %v3316_v19  ;;  %v8428_v19 = vpop.f32.mrf.mxu1  ;;  %v5631_v24 = vld [vmem:[#allocation2 + $0x20] sm:$0xf] }
 0x60b   : > { %3325 = vst [vmem:[#allocation2 + $0xf0] sm:$0xff] %v3321_v28  ;;  %v6021_v28 = vld [vmem:[#allocation2 + $0x24] sm:$0xf] }
 0x60c   : > { %v6043_v45 = vld [vmem:[#allocation2 + $0xcc] sm:$0xf0]  ;;  %v5713_v10 = vld [vmem:[#allocation2 + $0xd0] sm:$0xf0] }
 0x60d   : > { %v5712_v17 = vor.u32 %v6043_v45, %v5711_v52  ;;  %v5716_v34 = vor.u32 %v6041_v23, %v5713_v10  ;;  %v5615_v45 = vld [vmem:[#allocation2] sm:$0xf]  ;;  %v6017_v10 = vld [vmem:[#allocation2 + $0x4] sm:$0xf] }
 0x612   : > { %v6047_v6 = vld [vmem:[#allocation2 + $0xec] sm:$0xf0]  ;;  %v5729_v22 = vld [vmem:[#allocation2 + $0xf0] sm:$0xf0] }
 0x613   : > { %v5728_v56 = vor.u32 %v6047_v6, %v5727_v59  ;;  %v5732_v32 = vor.u32 %v6045_v63, %v5729_v22  ;;  %v8430_v59 = vpop.f32.mrf.mxu2  ;;  %v8432_v6 = vpop.f32.mrf.mxu3  ;;  %v5632_v63 = vor.u32 %v6023_v58, %v5631_v24  ;;  %v5636_v22 = vor.u32 %v6021_v28, %v5633_v14 }
 0x614   : > { %v2659_v28 = vadd.f32 %v8422_v60, %v7946_v38 }
 0x615   : > { %4811 = vmatpush.bf16.msrb.mxu2 %v5728_v56  ;;  %4868 = vmatpush.bf16.msrb.mxu3 %v5732_v32  ;;  %v6019_v56 = vld [vmem:[#allocation2 + $0xc] sm:$0xf0]  ;;  %v5617_v32 = vld [vmem:[#allocation2 + $0x10] sm:$0xf0] }
 0x616   : > { %v5616_v52 = vor.u32 %v6019_v56, %v5615_v45  ;;  %v5620_v23 = vor.u32 %v6017_v10, %v5617_v32 }
 0x619   : > { %4812 = vmatpush.bf16.msrb.mxu2 %v5712_v17  ;;  %4869 = vmatpush.bf16.msrb.mxu3 %v5716_v34  ;;  %v2682_v17 = vpop.f32.mrf.mxu0  ;;  %v2701_v34 = vpop.f32.mrf.mxu1 }
 0x61b   : > { %v2663_v46 = vpop.f32.mrf.mxu2  ;;  %v2720_v30 = vpop.f32.mrf.mxu3 }
 0x61d   : > { %4813 = vmatpush.bf16.msrb.mxu2 %v5696_v9  ;;  %4870 = vmatpush.bf16.msrb.mxu3 %v5700_v16  ;;  %v2628_v9 = vadd.f32 %v8414_v37, %v7935_v41 }
 0x61f   : > { %v2647_v47 = vadd.f32 %v8416_v43, %v2628_v9 }
 0x621   : > { %4814 = vmatpush.bf16.msrb.mxu2 %v5680_v2  ;;  %4871 = vmatpush.bf16.msrb.mxu3 %v5684_v4  ;;  %v2684_v5 = vpop.f32.mrf.mxu0  ;;  %v2703_v16 = vpop.f32.mrf.mxu1 }
 0x622   : > { %v2685_v48 = vadd.f32 %v2684_v5, %v7935_v41  ;;  %v5568_v41 = vld [vmem:[%s9611_s2 + $0xa] sm:$0x3] }
 0x623   : > { %v2665_v26 = vpop.f32.mrf.mxu2  ;;  %v2722_v44 = vpop.f32.mrf.mxu3  ;;  %v8449_v43 = vperm.slane %v5568_v41, 0 }
 0x624   : > { %v2704_v2 = vadd.f32 %v2703_v16, %v2685_v48  ;;  %v2666_v4 = vadd.f32 %v2665_v26, %v2647_v47 }
 0x625   : > { %4815 = vmatpush.bf16.msrb.mxu2 %v5664_v11  ;;  %4872 = vmatpush.bf16.msrb.mxu3 %v5668_v50  ;;  %v8451_v50 = vperm.slane %v5568_v41, 1 }
 0x626   : > { %v2723_v1 = vadd.f32 %v2722_v44, %v2704_v2 }
 0x629   : > { %4816 = vmatpush.bf16.msrb.mxu2 %v5648_v54  ;;  %4873 = vmatpush.bf16.msrb.mxu3 %v5652_v3  ;;  %v2678_v54 = vadd.f32 %v8418_v18, %v7931_v7 }
 0x62b   : > { %v2697_v14 = vadd.f32 %v8420_v35, %v2678_v54  ;;  %v2664_v35 = vadd.f32 %v2663_v46, %v7979_v20 }
 0x62d   : > { %4817 = vmatpush.bf16.msrb.mxu2 %v5632_v63  ;;  %4874 = vmatpush.bf16.msrb.mxu3 %v5636_v22  ;;  %v2716_v63 = vadd.f32 %v8424_v13, %v2697_v14  ;;  %v2683_v22 = vadd.f32 %v2682_v17, %v7919_v51  ;;  %v2680_v51 = vadd.f32 %v8426_v55, %v7923_v39 }
 0x62f   : > { %v2702_v7 = vadd.f32 %v2701_v34, %v2683_v22  ;;  %v2699_v34 = vadd.f32 %v8428_v19, %v2680_v51  ;;  %v3605_v22 = vld [vmem:[%s9619_s10 + $0x10] sm:$0xff] }
 0x631   : > { %4818 = vmatpush.bf16.msrb.mxu2 %v5616_v52  ;;  %4875 = vmatpush.bf16.msrb.mxu3 %v5620_v23  ;;  %v2721_v10 = vadd.f32 %v2720_v30, %v2702_v7  ;;  %v2661_v30 = vadd.f32 %v8430_v59, %v7966_v15  ;;  %v2718_v5 = vadd.f32 %v8432_v6, %v2699_v34  ;;  %v3599_v7 = vld [vmem:[%s9618_s9] sm:$0xff] }
 0x644   : > { %v3589_v40 = vpop.permute.xlu2 %3588 }
 0x645   : > { %v8440_v21 = vadd.f32 %v3589_v40, %v2666_v4  ;;  %v8442_v57 = vadd.f32 %v3589_v40, %v2723_v1 }
 0x647   : > { %v3616_v11 = vadd.f32 %v8442_v57, %v8440_v21  ;;  %v3625_v39 = vmul.f32 %v8440_v21, %v8440_v21  ;;  %v3626_v55 = vmul.f32 %v8442_v57, %v8442_v57 }
 0x649   : > { %3617 = vadd.xlane.f32.xlu0 %v3616_v11  ;;  %v3636_v19 = vadd.f32 %v3626_v55, %v3625_v39 }
 0x64c   : > { %v3339_v37 = vpop.permute.xlu2 %3338 }
 0x654   : > { %v3345_v36 = vpop.permute.xlu2 %3344 }
 0x655   : > { %v3351_v31 = vsel %vm9742_vm11, %v3337_v27, %v3345_v36  ;;  %v3355_v12 = vsel %vm9743_vm4, %v3345_v36, %v3337_v27 }
 0x656   : > { %v3366_v3 = vmul.f32 %v8449_v43, %v3351_v31  ;;  %v3367_v58 = vmul.f32 %v8451_v50, %v3355_v12 }
 0x658   : > { %v3373_v24 = vpack.c.bf16 %v3367_v58, %v3366_v3 }
 0x65a   : > { %3377 = vst [vmem:[#allocation2 + $0x150] sm:$0xff] %v3373_v24 }
 0x65b   : > { %v3574_v56 = vpop.permute.xlu1 %3573 }
 0x65c   : > { %v8466_v32 = vadd.f32 %v3574_v56, %v2659_v28  ;;  %v8468_v45 = vadd.f32 %v3574_v56, %v2716_v63  ;;  %v3601_v56 = vld [vmem:[%s9618_s9 + $0x10] sm:$0xff] }
 0x65e   : > { %v3607_v18 = vadd.f32 %v8468_v45, %v8466_v32  ;;  %v3619_v11 = vmul.f32 %v8466_v32, %v8466_v32  ;;  %v3620_v41 = vmul.f32 %v8468_v45, %v8468_v45 }
 0x65f   : > { %v3584_v52 = vpop.permute.xlu0 %3583 }
 0x660   : > { %3608 = vadd.xlane.f32.xlu0 %v3607_v18  ;;  %v8473_v38 = vadd.f32 %v3584_v52, %v2664_v35  ;;  %v8475_v60 = vadd.f32 %v3584_v52, %v2721_v10  ;;  %v3627_v54 = vadd.f32 %v3620_v41, %v3619_v11  ;;  %v3604_v18 = vld [vmem:[%s9619_s10 + $0x8] sm:$0xff]  ;;  %v3603_v10 = vld [vmem:[%s9619_s10] sm:$0xff]  ;;  %v8593_v52 = vpop.permute.xlu2 %3380 }
 0x661   : > { %v3600_v35 = vld [vmem:[%s9618_s9 + $0x8] sm:$0xff] }
 0x662   : > { %v3613_v13 = vadd.f32 %v8475_v60, %v8473_v38  ;;  %v3623_v23 = vmul.f32 %v8473_v38, %v8473_v38  ;;  %v3624_v17 = vmul.f32 %v8475_v60, %v8475_v60 }
 0x663   : > { %v3341_v20 = vpop.permute.xlu1 %3340 }
 0x664   : > { %3614 = vadd.xlane.f32.xlu1 %v3613_v13  ;;  %v3633_v46 = vadd.f32 %v3624_v17, %v3623_v23 }
 0x666   : > { %3634 = vadd.xlane.f32.xlu2 %v3633_v46 }
 0x667   : > { %v3579_v9 = vpop.permute.xlu0 %3578 }
 0x668   : > { %v8493_v16 = vadd.f32 %v3579_v9, %v2661_v30  ;;  %v8495_v48 = vadd.f32 %v3579_v9, %v2718_v5 }
 0x66a   : > { %v3621_v47 = vmul.f32 %v8493_v16, %v8493_v16  ;;  %v3622_v15 = vmul.f32 %v8495_v48, %v8495_v48  ;;  %v3610_v2 = vadd.f32 %v8495_v48, %v8493_v16 }
 0x66b   : > { %v3347_v59 = vpop.permute.xlu1 %3346 }
 0x66c   : > { %v3352_v6 = vsel %vm9744_vm15, %v3339_v37, %v3347_v59  ;;  %v3356_v26 = vsel %vm9745_vm3, %v3347_v59, %v3339_v37  ;;  %3637 = vadd.xlane.f32.xlu1 %v3636_v19  ;;  %v3630_v44 = vadd.f32 %v3622_v15, %v3621_v47 }
 0x66d   : > { %v3368_v4 = vmul.f32 %v8449_v43, %v3352_v6  ;;  %v3369_v1 = vmul.f32 %v8451_v50, %v3356_v26 }
 0x66e   : > { %3631 = vadd.xlane.f32.xlu0 %v3630_v44  ;;  %3611 = vadd.xlane.f32.xlu2 %v3610_v2 }
 0x66f   : > { %v3374_v40 = vpack.c.bf16 %v3369_v1, %v3368_v4  ;;  %v3343_v27 = vpop.permute.xlu0 %3342 }
 0x670   : > { %v3350_v37 = vsel %vm9746_vm6, %v8434_v49, %v3343_v27  ;;  %v3354_v36 = vsel %vm9747_vm10, %v3343_v27, %v8434_v49 }
 0x671   : > { %3378 = vst [vmem:[#allocation2 + $0x160] sm:$0xff] %v3374_v40  ;;  %v3364_v31 = vmul.f32 %v8449_v43, %v3350_v37  ;;  %v3365_v12 = vmul.f32 %v8451_v50, %v3354_v36 }
 0x673   : > { %v3372_v3 = vpack.c.bf16 %v3365_v12, %v3364_v31 }
 0x674   : > { %3628 = vadd.xlane.f32.xlu1 %v3627_v54 }
 0x675   : > { %3376 = vst [vmem:[#allocation2 + $0x140] sm:$0xff] %v3372_v3 }
 0x677   : > { %v3349_v58 = vpop.permute.xlu0 %3348 }
 0x678   : > { %v3353_v14 = vsel %vm9748_vm5, %v3341_v20, %v3349_v58  ;;  %v3357_v24 = vsel %vm9749_vm7, %v3349_v58, %v3341_v20 }
 0x679   : > { %v3370_v28 = vmul.f32 %v8449_v43, %v3353_v14  ;;  %v3371_v63 = vmul.f32 %v8451_v50, %v3357_v24  ;;  %v3602_v43 = vld [vmem:[%s9618_s9 + $0x18] sm:$0xff] }
 0x67a   : > { %v3606_v50 = vld [vmem:[%s9619_s10 + $0x18] sm:$0xff] }
 0x67b   : > { %v3375_v49 = vpack.c.bf16 %v3371_v63, %v3370_v28 }
 0x67d   : > { %3379 = vst [vmem:[#allocation2 + $0x170] sm:$0xff] %v3375_v49 }
 0x682   : > { %3759 = vperm.xlu0 %6158, %v3605_v22  }
 0x686   : > { %3731 = vperm.xlu2 %6157, %v3601_v56  }
 0x68a   : > { %3721 = vperm.xlu0 %6158, %v3599_v7  }
 0x68d   : > { %3736 = vperm.xlu1 %6159, %v3602_v43  }
 0x68e   : > { %3764 = vperm.xlu2 %6157, %v3606_v50  }
 0x692   : > { %3754 = vperm.xlu0 %6158, %v3604_v18  }
 0x695   : > { %3726 = vperm.xlu1 %6159, %v3600_v35  }
 0x696   : > { %3749 = vperm.xlu2 %6157, %v3603_v10  }
 0x69a   : > { %3438 = vrot.lane.b32.xlu0 %v8159_v29, %s9750_s0 }
 0x69d   : > { %3430 = vrot.lane.b32.xlu1 %v8153_v53, %s9750_s0 }
 0x69e   : > { %3432 = vrot.lane.b32.xlu2 %v8168_v33, %s9750_s0 }
 0x6a2   : > { %3428 = vrot.lane.b32.xlu0 %v8182_v42, %s9750_s0 }
 0x6a5   : > { %3440 = vrot.lane.b32.xlu1 %v8173_v25, %s9750_s0 }
 0x6a6   : > { %3426 = vrot.lane.b32.xlu2 %v8093_v0, %s9750_s0 }
 0x6aa   : > { %3384 = vrot.lane.b32.xlu0 %v8153_v53, %s9739_s22 }
 0x6ad   : > { %3434 = vrot.lane.b32.xlu1 %v8104_v61, %s9750_s0 }
 0x6ae   : > { %3436 = vrot.lane.b32.xlu2 %v8189_v62, %s9750_s0 }
 0x6b2   : > { %3394 = vrot.lane.b32.xlu0 %v8173_v25, %s9739_s22 }
 0x6b5   : > { %3386 = vrot.lane.b32.xlu1 %v8168_v33, %s9739_s22 }
 0x6b6   : > { %3392 = vrot.lane.b32.xlu2 %v8159_v29, %s9739_s22 }
 0x6ba   : > { %3390 = vrot.lane.b32.xlu0 %v8189_v62, %s9739_s22 }
 0x6bc   : > { %v3618_v51 = vpop.xlane.xlu0 %3617 }
 0x6bd   : > { %3382 = vrot.lane.b32.xlu1 %v8182_v42, %s9739_s22  ;;  %v8599_v17 = vmul.f32 0.00390625, %v3618_v51 }
 0x6be   : > { %3388 = vrot.lane.b32.xlu2 %v8104_v61, %s9739_s22 }
 0x6bf   : > { %v3650_v30 = vmul.f32 %v8599_v17, %v8599_v17 }
 0x6c2   : > { %3484 = vrot.lane.b32.xlu0 %v8159_v29, %s9688_s29 }
 0x6c5   : > { %3476 = vrot.lane.b32.xlu1 %v8153_v53, %s9688_s29 }
 0x6c6   : > { %3478 = vrot.lane.b32.xlu2 %v8168_v33, %s9688_s29 }
 0x6ca   : > { %3474 = vrot.lane.b32.xlu0 %v8182_v42, %s9688_s29 }
 0x6cd   : > { %3486 = vrot.lane.b32.xlu1 %v8173_v25, %s9688_s29 }
 0x6ce   : > { %3472 = vrot.lane.b32.xlu2 %v8093_v0, %s9688_s29 }
 0x6d3   : > { %v3609_v33 = vpop.xlane.xlu0 %3608 }
 0x6d4   : > { %v8605_v55 = vmul.f32 0.00390625, %v3609_v33 }
 0x6d5   : > { %3480 = vrot.lane.b32.xlu1 %v8104_v61, %s9688_s29 }
 0x6d6   : > { %3482 = vrot.lane.b32.xlu2 %v8189_v62, %s9688_s29  ;;  %v3647_v4 = vmul.f32 %v8605_v55, %v8605_v55 }
 0x6d7   : > { %v3615_v53 = vpop.xlane.xlu1 %3614 }
 0x6d8   : > { %v3641_v29 = vmul.f32 0.00390625, %v3615_v53 }
 0x6d9   : > { %v3635_v13 = vpop.xlane.xlu2 %3634 }
 0x6da   : > { %v3645_v42 = vmul.f32 0.00390625, %v3635_v13  ;;  %v3649_v23 = vmul.f32 %v3641_v29, %v3641_v29  ;;  %v3707_v63 = vsub.f32 %v8473_v38, %v3641_v29  ;;  %v3708_v49 = vsub.f32 %v8475_v60, %v3641_v29 }
 0x6dc   : > { %v3653_v25 = vsub.f32 %v3645_v42, %v3649_v23 }
 0x6de   : > { %v3657_v20 = vmax.f32 %v3653_v25, 0.0 }
 0x6df   : > { %v3638_v0 = vpop.xlane.xlu1 %3637 }
 0x6e0   : > { %v3661_v34 = vadd.f32 1e-05, %v3657_v20  ;;  %v3646_v46 = vmul.f32 0.00390625, %v3638_v0 }
 0x6e1   : > { %v3612_v61 = vpop.xlane.xlu2 %3611  ;;  %v3632_v5 = vpop.xlane.xlu0 %3631 }
 0x6e2   : > { %6288 = vrsqrt.f32 %v3661_v34  ;;  %v3654_v62 = vsub.f32 %v3646_v46, %v3650_v30  ;;  %v8603_v39 = vmul.f32 0.00390625, %v3612_v61  ;;  %v3644_v47 = vmul.f32 0.00390625, %v3632_v5 }
 0x6e3   : > { %vm3689_vm1 = vweird.f32 %v3661_v34  ;;  %v3709_v61 = vsub.f32 %v8440_v21, %v8599_v17  ;;  %v3710_v5 = vsub.f32 %v8442_v57, %v8599_v17  ;;  %v3704_v21 = vsub.f32 %v8468_v45, %v8605_v55 }
 0x6e4   : > { %v3658_v9 = vmax.f32 %v3654_v62, 0.0  ;;  %v3648_v19 = vmul.f32 %v8603_v39, %v8603_v39 }
 0x6e6   : > { %v3662_v15 = vadd.f32 1e-05, %v3658_v9  ;;  %v3652_v59 = vsub.f32 %v3644_v47, %v3648_v19 }
 0x6e7   : > { %v3629_v6 = vpop.xlane.xlu1 %3628 }
 0x6e8   : > { %v6289_v26 = vpop.eup %6288  ;;  %6290 = vrsqrt.f32 %v3662_v15  ;;  %v3656_v44 = vmax.f32 %v3652_v59, 0.0  ;;  %v3643_v2 = vmul.f32 0.00390625, %v3629_v6  ;;  %vm3699_vm2 = vweird.f32 %v3662_v15 }
 0x6e9   : > { %v3684_v1 = vmul.f32 %v6289_v26, %v3661_v34  ;;  %v3732_v40 = vpop.permute.xlu2 %3731  ;;  %vm3690_vm8 = vweird.f32 %v6289_v26 }
 0x6ea   : > { %v8611_v11 = vadd.f32 1e-05, %v3656_v44  ;;  %v3651_v41 = vsub.f32 %v3643_v2, %v3647_v4  ;;  %vm3691_vm0 = vmor %vm3689_vm1, %vm3690_vm8 }
 0x6eb   : > { %v3685_v27 = vmul.f32 %v6289_v26, %v3684_v1 }
 0x6ec   : > { %6292 = vrsqrt.f32 %v8611_v11  ;;  %v3655_v37 = vmax.f32 %v3651_v41, 0.0  ;;  %vm3679_vm10 = vweird.f32 %v8611_v11 }
 0x6ed   : > { %v3686_v36 = vmul.f32 0.5, %v3685_v27 }
 0x6ee   : > { %v6291_v31 = vpop.eup %6290  ;;  %v3659_v12 = vadd.f32 1e-05, %v3655_v37 }
 0x6ef   : > { %v3687_v54 = vsub.f32 1.5, %v3686_v36  ;;  %v3694_v3 = vmul.f32 %v6291_v31, %v3662_v15  ;;  %vm3700_vm9 = vweird.f32 %v6291_v31 }
 0x6f0   : > { %6294 = vrsqrt.f32 %v3659_v12  ;;  %vm3701_vm11 = vmor %vm3699_vm2, %vm3700_vm9  ;;  %vm3669_vm15 = vweird.f32 %v3659_v12 }
 0x6f1   : > { %v3695_v58 = vmul.f32 %v6291_v31, %v3694_v3  ;;  %v3688_v14 = vmul.f32 %v6289_v26, %v3687_v54  ;;  %v3765_v24 = vpop.permute.xlu2 %3764  ;;  %v3706_v3 = vsub.f32 %v8495_v48, %v8603_v39 }
 0x6f2   : > { %v6293_v28 = vpop.eup %6292 }
 0x6f3   : > { %v3696_v22 = vmul.f32 0.5, %v3695_v58  ;;  %v3674_v56 = vmul.f32 %v6293_v28, %v8611_v11  ;;  %v3692_v7 = vsel %vm3691_vm0, %v6289_v26, %v3688_v14  ;;  %vm3680_vm3 = vweird.f32 %v6293_v28 }
 0x6f4   : > { %v3715_v43 = vmul.f32 %v3707_v63, %v3692_v7  ;;  %v3716_v50 = vmul.f32 %v3708_v49, %v3692_v7  ;;  %v3760_v18 = vpop.permute.xlu0 %3759  ;;  %v3703_v26 = vsub.f32 %v8466_v32, %v8605_v55  ;;  %vm3681_vm5 = vmor %vm3679_vm10, %vm3680_vm3  ;;  %v3705_v11 = vsub.f32 %v8493_v16, %v8603_v39  ;;  %v5570_v7 = vld [vmem:[%s9611_s2 + $0xe] sm:$0x3] }
 0x6f5   : > { %v3697_v35 = vsub.f32 1.5, %v3696_v22  ;;  %v3675_v10 = vmul.f32 %v6293_v28, %v3674_v56 }
 0x6f6   : > { %v6295_v51 = vpop.eup %6294  ;;  %v3743_v53 = vmul.f32 %v3732_v40, %v3715_v43  ;;  %v3744_v33 = vmul.f32 %v3732_v40, %v3716_v50 }
 0x6f7   : > { %v3676_v13 = vmul.f32 0.5, %v3675_v10  ;;  %v3664_v42 = vmul.f32 %v6295_v51, %v3659_v12  ;;  %v3698_v23 = vmul.f32 %v6291_v31, %v3697_v35  ;;  %vm3670_vm4 = vweird.f32 %v6295_v51 }
 0x6f8   : > { %v8617_v38 = vadd.f32 %v3760_v18, %v3743_v53  ;;  %v8619_v60 = vadd.f32 %v3760_v18, %v3744_v33  ;;  %vm3671_vm6 = vmor %vm3669_vm15, %vm3670_vm4  ;;  %v8667_v33 = vperm.slane %v5570_v7, 0  ;;  %vm9753_vm15 = vcmp.lt.s32.totalorder %v6932_v8, 112 }
 0x6f9   : > { %v3665_v29 = vmul.f32 %v6295_v51, %v3664_v42  ;;  %v3750_v25 = vpop.permute.xlu2 %3749  ;;  %v3677_v34 = vsub.f32 1.5, %v3676_v13  ;;  %v3702_v30 = vsel %vm3701_vm11, %v6291_v31, %v3698_v23  ;;  %v8672_v23 = vperm.slane %v5570_v7, 1  ;;  %vm9754_vm3 = vmmov %vm9753_vm15 }
 0x6fa   : > { %v5578_v20 = vmul.f32 -1.442695, %v8617_v38  ;;  %v5579_v0 = vmul.f32 -1.442695, %v8619_v60  ;;  %v3717_v19 = vmul.f32 %v3709_v61, %v3702_v30  ;;  %v3718_v47 = vmul.f32 %v3710_v5, %v3702_v30 }
 0x6fb   : > { %v3666_v46 = vmul.f32 0.5, %v3665_v29  ;;  %v3678_v6 = vmul.f32 %v6293_v28, %v3677_v34 }
 0x6fc   : > { %6296 = vpow2.f32 %v5578_v20  ;;  %v3722_v62 = vpop.permute.xlu0 %3721 }
 0x6fd   : > { %v3667_v9 = vsub.f32 1.5, %v3666_v46  ;;  %6298 = vpow2.f32 %v5579_v0  ;;  %v3682_v45 = vsel %vm3681_vm5, %v6293_v28, %v3678_v6 }
 0x6fe   : > { %v3713_v28 = vmul.f32 %v3705_v11, %v3682_v45  ;;  %v3714_v63 = vmul.f32 %v3706_v3, %v3682_v45 }
 0x6ff   : > { %v3668_v15 = vmul.f32 %v6295_v51, %v3667_v9  ;;  %v3737_v59 = vpop.permute.xlu1 %3736 }
 0x700   : > { %v3745_v57 = vmul.f32 %v3737_v59, %v3717_v19  ;;  %v3746_v17 = vmul.f32 %v3737_v59, %v3718_v47 }
 0x701   : > { %v3672_v44 = vsel %vm3671_vm6, %v6295_v51, %v3668_v15  ;;  %v8631_v2 = vpop.permute.xlu2 %3432 }
 0x702   : > { %v6297_v4 = vpop.eup %6296  ;;  %v3711_v1 = vmul.f32 %v3703_v26, %v3672_v44  ;;  %v3712_v40 = vmul.f32 %v3704_v21, %v3672_v44  ;;  %v8634_v41 = vadd.f32 %v3765_v24, %v3745_v57  ;;  %v8638_v32 = vadd.f32 %v3765_v24, %v3746_v17 }
 0x703   : > { %v6299_v27 = vpop.eup %6298  ;;  %v8636_v37 = vadd.f32 1.0, %v6297_v4 }
 0x704   : > { %v8640_v55 = vadd.f32 1.0, %v6299_v27  ;;  %v3739_v36 = vmul.f32 %v3722_v62, %v3711_v1  ;;  %v3740_v31 = vmul.f32 %v3722_v62, %v3712_v40  ;;  %v5580_v12 = vmul.f32 -1.442695, %v8634_v41  ;;  %v3755_v54 = vpop.permute.xlu0 %3754 }
 0x705   : > { %6300 = vrcp.f32 %v8636_v37  ;;  %v5581_v49 = vmul.f32 -1.442695, %v8638_v32  ;;  %v3876_v51 = vand.u32 2147483647, %v8636_v37  ;;  %vm3872_vm7 = vweird.f32 %v8636_v37 }
 0x706   : > { %6302 = vrcp.f32 %v8640_v55  ;;  %v8649_v58 = vadd.f32 %v3750_v25, %v3739_v36  ;;  %v8651_v14 = vadd.f32 %v3750_v25, %v3740_v31  ;;  %v3878_v20 = vand.u32 2147483648, %v8636_v37 }
 0x707   : > { %v3727_v24 = vpop.permute.xlu1 %3726  ;;  %6304 = vpow2.f32 %v5580_v12  ;;  %vm3887_vm8 = vweird.f32 %v8640_v55  ;;  %v3891_v46 = vand.u32 2147483647, %v8640_v55  ;;  %v3893_v30 = vand.u32 2147483648, %v8640_v55 }
 0x708   : > { %v5574_v22 = vmul.f32 -1.442695, %v8649_v58  ;;  %v5575_v16 = vmul.f32 -1.442695, %v8651_v14  ;;  %v3741_v56 = vmul.f32 %v3727_v24, %v3713_v28  ;;  %v3742_v48 = vmul.f32 %v3727_v24, %v3714_v63 }
 0x709   : > { %v8656_v39 = vpop.permute.xlu2 %3426  ;;  %6306 = vpow2.f32 %v5581_v49  ;;  %vm8681_vm0 = vcmp.eq.f32.partialorder %v3876_v51, 8.507059e+37  ;;  %v3879_v57 = vor.u32 1.1754944e-38, %v3878_v20  ;;  %vm3892_vm11 = vcmp.eq.f32.partialorder %v3891_v46, 8.507059e+37 }
 0x70a   : > { %6308 = vpow2.f32 %v5574_v22  ;;  %v8661_v50 = vadd.f32 %v3755_v54, %v3741_v56  ;;  %v8663_v18 = vadd.f32 %v3755_v54, %v3742_v48  ;;  %v3894_v40 = vor.u32 1.1754944e-38, %v3893_v30 }
 0x70b   : > { %v6301_v43 = vpop.eup %6300  ;;  %6310 = vpow2.f32 %v5575_v16 }
 0x70c   : > { %v6303_v35 = vpop.eup %6302  ;;  %v3868_v10 = vmul.f32 %v6301_v43, %v8636_v37  ;;  %v3439_v53 = vpop.permute.xlu0 %3438  ;;  %v5576_v42 = vmul.f32 -1.442695, %v8661_v50  ;;  %v5577_v0 = vmul.f32 -1.442695, %v8663_v18  ;;  %vm3873_vm1 = vweird.f32 %v6301_v43 }
 0x70d   : > { %v3883_v13 = vmul.f32 %v6303_v35, %v8640_v55  ;;  %v6305_v29 = vpop.eup %6304  ;;  %vm3888_vm9 = vweird.f32 %v6303_v35  ;;  %vm3874_vm2 = vmor %vm3872_vm7, %vm3873_vm1 }
 0x70e   : > { %v3869_v25 = vsub.f32 1.0, %v3868_v10  ;;  %v8679_v61 = vadd.f32 1.0, %v6305_v29  ;;  %6312 = vpow2.f32 %v5576_v42  ;;  %vm3889_vm4 = vmor %vm3887_vm8, %vm3888_vm9 }
 0x70f   : > { %v3884_v34 = vsub.f32 1.0, %v3883_v13  ;;  %v3431_v5 = vpop.permute.xlu1 %3430  ;;  %v6307_v62 = vpop.eup %6306 }
 0x710   : > { %v3870_v9 = vmul.f32 %v6301_v43, %v3869_v25  ;;  %v6309_v47 = vpop.eup %6308  ;;  %v8685_v59 = vadd.f32 1.0, %v6307_v62  ;;  %6314 = vrcp.f32 %v8679_v61  ;;  %v8703_v27 = vsel %vm9753_vm15, %v3431_v5, %v3439_v53 }
 0x711   : > { %v3885_v15 = vmul.f32 %v6303_v35, %v3884_v34  ;;  %v8688_v6 = vpop.permute.xlu2 %3436  ;;  %v6311_v26 = vpop.eup %6310  ;;  %v8690_v17 = vadd.f32 1.0, %v6309_v47  ;;  %6316 = vpow2.f32 %v5577_v0  ;;  %v3906_v11 = vand.u32 2147483647, %v8679_v61 }
 0x712   : > { %v3871_v21 = vadd.f32 %v6301_v43, %v3870_v9  ;;  %v8694_v4 = vadd.f32 1.0, %v6311_v26  ;;  %6318 = vrcp.f32 %v8685_v59  ;;  %v3908_v3 = vand.u32 2147483648, %v8679_v61 }
 0x713   : > { %v3886_v44 = vadd.f32 %v6303_v35, %v3885_v15  ;;  %6320 = vrcp.f32 %v8690_v17  ;;  %v3818_v31 = vand.u32 2147483648, %v8690_v17  ;;  %v3816_v63 = vand.u32 2147483647, %v8690_v17 }
 0x714   : > { %v3875_v1 = vsel %vm3874_vm2, %v6301_v43, %v3871_v21  ;;  %v8705_v37 = vpop.permute.xlu0 %3428  ;;  %6322 = vrcp.f32 %v8694_v4  ;;  %v6313_v12 = vpop.eup %6312  ;;  %v3833_v49 = vand.u32 2147483648, %v8694_v4  ;;  %v8723_v22 = vsel %vm9754_vm3, %v3439_v53, %v3431_v5 }
 0x715   : > { %v3880_v45 = vsel %vm8681_vm0, %v3879_v57, %v3875_v1  ;;  %v3890_v36 = vsel %vm3889_vm4, %v6303_v35, %v3886_v44  ;;  %v3831_v56 = vand.u32 2147483647, %v8694_v4  ;;  %vm3902_vm6 = vweird.f32 %v8679_v61 }
 0x716   : > { %v3895_v55 = vsel %vm3892_vm11, %v3894_v40, %v3890_v36  ;;  %v8712_v54 = vmul.f32 %v3880_v45, %v8617_v38  ;;  %v6315_v24 = vpop.eup %6314  ;;  %vm3917_vm10 = vweird.f32 %v8685_v59  ;;  %vm3812_vm5 = vweird.f32 %v8690_v17 }
 0x717   : > { %v8717_v28 = vmul.f32 %v3895_v55, %v8619_v60  ;;  %v8725_v16 = vpop.permute.xlu1 %3440  ;;  %v6317_v38 = vpop.eup %6316  ;;  %v3898_v48 = vmul.f32 %v6315_v24, %v8679_v61  ;;  %v3819_v43 = vor.u32 1.1754944e-38, %v3818_v31  ;;  %vm3903_vm7 = vweird.f32 %v6315_v24 }
 0x718   : > { %4223 = vrot.lane.b32.xlu0 %v8712_v54, %s9750_s0  ;;  %v6319_v60 = vpop.eup %6318  ;;  %vm3827_vm8 = vweird.f32 %v8694_v4  ;;  %vm8741_vm1 = vcmp.eq.f32.partialorder %v3906_v11, 8.507059e+37  ;;  %v3909_v13 = vor.u32 1.1754944e-38, %v3908_v3  ;;  %vm8747_vm0 = vcmp.eq.f32.partialorder %v3816_v63, 8.507059e+37  ;;  %vm3904_vm15 = vmor %vm3902_vm6, %vm3903_vm7 }
 0x719   : > { %v4121_v7 = vpack.c.bf16 %v8717_v28, %v8712_v54  ;;  %4231 = vrot.lane.b32.xlu2 %v8717_v28, %s9750_s0  ;;  %v8738_v35 = vpop.permute.xlu2 %3392  ;;  %v6321_v10 = vpop.eup %6320  ;;  %v3899_v51 = vsub.f32 1.0, %v3898_v48  ;;  %v3913_v42 = vmul.f32 %v6319_v60, %v8685_v59  ;;  %v3834_v0 = vor.u32 1.1754944e-38, %v3833_v49 }
 0x71a   : > { %v6323_v29 = vpop.eup %6322  ;;  %v3808_v25 = vmul.f32 %v6321_v10, %v8690_v17  ;;  %v3921_v34 = vand.u32 2147483647, %v8685_v59  ;;  %v8752_v46 = vadd.f32 1.0, %v6313_v12  ;;  %vm8755_vm9 = vcmp.eq.f32.partialorder %v3831_v56, 8.507059e+37 }
 0x71b   : > { %4125 = vst [vmem:[#allocation2 + $0x128] sm:$0xff] %v4121_v7  ;;  %v3823_v30 = vmul.f32 %v6323_v29, %v8694_v4  ;;  %v3900_v62 = vmul.f32 %v6315_v24, %v3899_v51  ;;  %v3914_v9 = vsub.f32 1.0, %v3913_v42  ;;  %vm3918_vm2 = vweird.f32 %v6319_v60 }
 0x71c   : > { %v8759_v19 = vpop.permute.xlu0 %3384  ;;  %v3809_v47 = vsub.f32 1.0, %v3808_v25  ;;  %v3923_v15 = vand.u32 2147483648, %v8685_v59  ;;  %v8762_v26 = vadd.f32 1.0, %v6317_v38  ;;  %6324 = vrcp.f32 %v8752_v46  ;;  %vm3919_vm3 = vmor %vm3917_vm10, %vm3918_vm2 }
 0x71d   : > { %vm3813_vm11 = vweird.f32 %v6321_v10  ;;  %v3824_v21 = vsub.f32 1.0, %v3823_v30  ;;  %v3901_v57 = vadd.f32 %v6315_v24, %v3900_v62  ;;  %v3915_v44 = vmul.f32 %v6319_v60, %v3914_v9 }
 0x71e   : > { %v3810_v1 = vmul.f32 %v6321_v10, %v3809_v47  ;;  %vm3828_vm4 = vweird.f32 %v6323_v29  ;;  %v3848_v40 = vand.u32 2147483648, %v8752_v46  ;;  %6326 = vrcp.f32 %v8762_v26  ;;  %vm3814_vm7 = vmor %vm3812_vm5, %vm3813_vm11 }
 0x71f   : > { %v8770_v45 = vpop.permute.xlu1 %3434  ;;  %v3825_v36 = vmul.f32 %v6323_v29, %v3824_v21  ;;  %v3905_v31 = vsel %vm3904_vm15, %v6315_v24, %v3901_v57  ;;  %v3916_v12 = vadd.f32 %v6319_v60, %v3915_v44  ;;  %v3846_v55 = vand.u32 2147483647, %v8752_v46  ;;  %vm3829_vm10 = vmor %vm3827_vm8, %vm3828_vm4 }
 0x720   : > { %v3811_v11 = vadd.f32 %v6321_v10, %v3810_v1  ;;  %v3910_v3 = vsel %vm8741_vm1, %v3909_v13, %v3905_v31  ;;  %vm3922_vm6 = vcmp.eq.f32.partialorder %v3921_v34, 8.507059e+37  ;;  %v3924_v61 = vor.u32 1.1754944e-38, %v3923_v15 }
 0x721   : > { %v8778_v63 = vpop.permute.xlu2 %3388  ;;  %v3826_v24 = vadd.f32 %v6323_v29, %v3825_v36  ;;  %v3920_v49 = vsel %vm3919_vm3, %v6319_v60, %v3916_v12  ;;  %v8784_v38 = vmul.f32 %v3910_v3, %v8634_v41  ;;  %vm3842_vm15 = vweird.f32 %v8752_v46 }
 0x722   : > { %v3861_v56 = vand.u32 2147483647, %v8762_v26  ;;  %v6325_v48 = vpop.eup %6324  ;;  %v3815_v59 = vsel %vm3814_vm7, %v6321_v10, %v3811_v11  ;;  %v3925_v7 = vsel %vm3922_vm6, %v3924_v61, %v3920_v49  ;;  %v3849_v51 = vor.u32 1.1754944e-38, %v3848_v40 }
 0x723   : > { %v3863_v17 = vand.u32 2147483648, %v8762_v26  ;;  %v3820_v60 = vsel %vm8747_vm0, %v3819_v43, %v3815_v59  ;;  %v3830_v53 = vsel %vm3829_vm10, %v6323_v29, %v3826_v24  ;;  %v8795_v41 = vmul.f32 %v3925_v7, %v8638_v32  ;;  %4225 = vrot.lane.b32.xlu1 %v8784_v38, %s9750_s0  ;;  %4079 = vrot.lane.b32.xlu2 %v8784_v38, %s9731_s15 }
 0x724   : > { %v3838_v13 = vmul.f32 %v6325_v48, %v8752_v46  ;;  %vm8798_vm5 = vcmp.eq.f32.partialorder %v3846_v55, 8.507059e+37  ;;  %vm3857_vm1 = vweird.f32 %v8762_v26  ;;  %v8805_v4 = vpop.permute.xlu0 %3394  ;;  %v6327_v10 = vpop.eup %6326  ;;  %v3835_v43 = vsel %vm8755_vm9, %v3834_v0, %v3830_v53 }
 0x725   : > { %v8810_v32 = vmul.f32 %v3820_v60, %v8649_v58  ;;  %vm3843_vm8 = vweird.f32 %v6325_v48  ;;  %v3460_v29 = vmul.f32 %v8667_v33, %v8703_v27  ;;  %v8817_v25 = vmul.f32 %v3835_v43, %v8651_v14  ;;  %4233 = vrot.lane.b32.xlu0 %v8795_v41, %s9750_s0 }
 0x726   : > { %v4122_v20 = vpack.c.bf16 %v8795_v41, %v8784_v38  ;;  %v3839_v34 = vsub.f32 1.0, %v3838_v13  ;;  %v3853_v30 = vmul.f32 %v6327_v10, %v8762_v26  ;;  %vm8822_vm0 = vcmp.eq.f32.partialorder %v3861_v56, 8.507059e+37  ;;  %vm3844_vm6 = vmor %vm3842_vm15, %vm3843_vm8 }
 0x727   : > { %vm3858_vm9 = vweird.f32 %v6327_v10  ;;  %v3864_v58 = vor.u32 1.1754944e-38, %v3863_v17  ;;  %v3461_v27 = vmul.f32 %v8672_v23, %v8723_v22  ;;  %vm9765_vm2 = vcmp.lt.s32.totalorder %v6932_v8, 112  ;;  %v3387_v5 = vpop.permute.xlu1 %3386  ;;  %v5569_v22 = vld [vmem:[%s9611_s2 + $0xc] sm:$0x3] }
 0x728   : > { %v3443_v14 = vsel %vm9765_vm2, %v8705_v37, %v8688_v6  ;;  %v4119_v62 = vpack.c.bf16 %v8817_v25, %v8810_v32  ;;  %4126 = vst [vmem:[#allocation2 + $0x138] sm:$0xff] %v4122_v20  ;;  %v3840_v9 = vmul.f32 %v6325_v48, %v3839_v34  ;;  %v3854_v47 = vsub.f32 1.0, %v3853_v30  ;;  %vm9766_vm11 = vmmov %vm9765_vm2  ;;  %v5571_v34 = vld [vmem:[%s9611_s2 + $0x10] sm:$0x3] }
 0x729   : > { %v3447_v15 = vsel %vm9766_vm11, %v8688_v6, %v8705_v37  ;;  %v3466_v21 = vpack.c.bf16 %v3461_v27, %v3460_v29  ;;  %v3458_v57 = vmul.f32 %v8667_v33, %v3443_v14  ;;  %vm9767_vm4 = vmmov %vm9765_vm2  ;;  %v8849_v40 = vpop.permute.xlu2 %3478  ;;  %v3406_v11 = vperm.slane %v5569_v22, 0 }
 0x72a   : > { %v3459_v44 = vmul.f32 %v8672_v23, %v3447_v15  ;;  %v3445_v1 = vsel %vm9767_vm4, %v8631_v2, %v8725_v16  ;;  %4123 = vst [vmem:[#allocation2 + $0x108] sm:$0xff] %v4119_v62  ;;  %v3841_v36 = vadd.f32 %v6325_v48, %v3840_v9  ;;  %v3855_v31 = vmul.f32 %v6327_v10, %v3854_v47  ;;  %vm9768_vm3 = vmmov %vm9765_vm2 }
 0x72b   : > { %v3449_v6 = vsel %vm9768_vm3, %v8725_v16, %v8631_v2  ;;  %v3462_v37 = vmul.f32 %v8667_v33, %v3445_v1  ;;  %3470 = vst [vmem:[#allocation2 + $0x1e0] sm:$0xff] %v3466_v21  ;;  %v3407_v3 = vperm.slane %v5569_v22, 1  ;;  %vm9769_vm7 = vcmp.lt.s32.totalorder %v6932_v8, 113  ;;  %4077 = vrot.lane.b32.xlu1 %v8712_v54, %s9731_s15  ;;  %vm3859_vm15 = vmor %vm3857_vm1, %vm3858_vm9  ;;  %4219 = vrot.lane.b32.xlu2 %v8810_v32, %s9750_s0 }
 0x72c   : > { %v3465_v12 = vpack.c.bf16 %v3459_v44, %v3458_v57  ;;  %v3463_v55 = vmul.f32 %v8672_v23, %v3449_v6  ;;  %v3845_v61 = vsel %vm3844_vm6, %v6325_v48, %v3841_v36  ;;  %v3856_v24 = vadd.f32 %v6327_v10, %v3855_v31  ;;  %vm9770_vm10 = vmmov %vm9769_vm7  ;;  %v3391_v16 = vpop.permute.xlu0 %3390 }
 0x72d   : > { %v3398_v49 = vsel %vm9769_vm7, %v8759_v19, %v8738_v35  ;;  %v3402_v2 = vsel %vm9770_vm10, %v8738_v35, %v8759_v19  ;;  %v3850_v46 = vsel %vm8798_vm5, %v3849_v51, %v3845_v61  ;;  %vm9771_vm8 = vmmov %vm9765_vm2  ;;  %4085 = vrot.lane.b32.xlu0 %v8717_v28, %s9731_s15  ;;  %v8924_v9 = vperm.slane %v5571_v34, 0 }
 0x72e   : > { %3469 = vst [vmem:[#allocation2 + $0x1d0] sm:$0xff] %v3465_v12  ;;  %v3467_v56 = vpack.c.bf16 %v3463_v55, %v3462_v37  ;;  %v3414_v48 = vmul.f32 %v3406_v11, %v3398_v49  ;;  %v3415_v59 = vmul.f32 %v3407_v3, %v3402_v2  ;;  %v3860_v7 = vsel %vm3859_vm15, %v6327_v10, %v3856_v24  ;;  %vm9772_vm5 = vmmov %vm9765_vm2 }
 0x72f   : > { %v8876_v17 = vmul.f32 %v3850_v46, %v8661_v50  ;;  %v3442_v35 = vsel %vm9771_vm8, %v8656_v39, %v8770_v45  ;;  %v3446_v19 = vsel %vm9772_vm5, %v8770_v45, %v8656_v39  ;;  %v3865_v26 = vsel %vm8822_vm0, %v3864_v58, %v3860_v7  ;;  %v3383_v53 = vpop.permute.xlu1 %3382  ;;  %vm9773_vm1 = vmmov %vm9769_vm7 }
 0x730   : > { %3471 = vst [vmem:[#allocation2 + $0x1f0] sm:$0xff] %v3467_v56  ;;  %v3420_v51 = vpack.c.bf16 %v3415_v59, %v3414_v48  ;;  %v3456_v50 = vmul.f32 %v8667_v33, %v3442_v35  ;;  %v3457_v60 = vmul.f32 %v8672_v23, %v3446_v19  ;;  %v8893_v13 = vmul.f32 %v3865_v26, %v8663_v18  ;;  %vm9774_vm9 = vmmov %vm9773_vm1 }
 0x731   : > { %v3396_v39 = vsel %vm9773_vm1, %v8593_v52, %v8778_v63  ;;  %v3400_v45 = vsel %vm9774_vm9, %v8778_v63, %v8593_v52  ;;  %vm9775_vm0 = vmmov %vm9773_vm1  ;;  %v8915_v20 = vpop.permute.xlu2 %3472  ;;  %v8926_v47 = vperm.slane %v5571_v34, 1  ;;  %vm9779_vm3 = vcmp.lt.s32.totalorder %v6932_v8, 111  ;;  %v6063_v34 = vld [vmem:[#allocation2 + $0x16c] sm:$0xf0] }
 0x732   : > { %v3399_v33 = vsel %vm9775_vm0, %v3387_v5, %v8805_v4  ;;  %3424 = vst [vmem:[#allocation2 + $0x1a0] sm:$0xff] %v3420_v51  ;;  %v3464_v18 = vpack.c.bf16 %v3457_v60, %v3456_v50  ;;  %v3410_v23 = vmul.f32 %v3406_v11, %v3396_v39  ;;  %v3411_v42 = vmul.f32 %v3407_v3, %v3400_v45  ;;  %vm9776_vm2 = vmmov %vm9775_vm0  ;;  %v5855_v27 = vld [vmem:[#allocation2 + $0x1e0] sm:$0xf]  ;;  %v6077_v62 = vld [vmem:[#allocation2 + $0x1e4] sm:$0xf] }
 0x733   : > { %v3403_v10 = vsel %vm9776_vm2, %v8805_v4, %v3387_v5  ;;  %v4120_v43 = vpack.c.bf16 %v8893_v13, %v8876_v17  ;;  %v3416_v29 = vmul.f32 %v3406_v11, %v3399_v33  ;;  %vm9777_vm11 = vmmov %vm9775_vm0  ;;  %4087 = vrot.lane.b32.xlu1 %v8795_v41, %s9731_s15  ;;  %4229 = vrot.lane.b32.xlu2 %v8893_v13, %s9750_s0  ;;  %vm9788_vm9 = vcmask 261120  }
 0x734   : > { %v3417_v52 = vmul.f32 %v3407_v3, %v3403_v10  ;;  %v3397_v63 = vsel %vm9777_vm11, %v3383_v53, %v3391_v16  ;;  %3468 = vst [vmem:[#allocation2 + $0x1c0] sm:$0xff] %v3464_v18  ;;  %v3418_v30 = vpack.c.bf16 %v3411_v42, %v3410_v23  ;;  %vm9778_vm4 = vmmov %vm9775_vm0  ;;  %v3485_v5 = vpop.permute.xlu0 %3484  ;;  %vm9790_vm2 = vcmp.lt.s32.totalorder %v6932_v8, 112 }
 0x735   : > { %v3401_v0 = vsel %vm9778_vm4, %v3391_v16, %v3383_v53  ;;  %v3412_v4 = vmul.f32 %v3406_v11, %v3397_v63  ;;  %4124 = vst [vmem:[#allocation2 + $0x118] sm:$0xff] %v4120_v43  ;;  %4221 = vrot.lane.b32.xlu0 %v8876_v17, %s9750_s0  ;;  %vm9780_vm6 = vmmov %vm9779_vm3  ;;  %v6075_v6 = vld [vmem:[#allocation2 + $0x1cc] sm:$0xf0] }
 0x736   : > { %v3421_v58 = vpack.c.bf16 %v3417_v52, %v3416_v29  ;;  %v3413_v14 = vmul.f32 %v3407_v3, %v3401_v0  ;;  %3422 = vst [vmem:[#allocation2 + $0x180] sm:$0xff] %v3418_v30  ;;  %v5841_v3 = vld [vmem:[#allocation2 + $0x1d0] sm:$0xf0]  ;;  %vm9781_vm7 = vmmov %vm9779_vm3  ;;  %v6061_v0 = vld [vmem:[#allocation2 + $0x164] sm:$0xf] }
 0x737   : > { %v6079_v15 = vld [vmem:[#allocation2 + $0x1ec] sm:$0xf0]  ;;  %v5857_v22 = vld [vmem:[#allocation2 + $0x1f0] sm:$0xf0]  ;;  %v3477_v1 = vpop.permute.xlu1 %3476  ;;  %vm9782_vm10 = vmmov %vm9779_vm3 }
 0x738   : > { %3425 = vst [vmem:[#allocation2 + $0x1b0] sm:$0xff] %v3421_v58  ;;  %v3419_v21 = vpack.c.bf16 %v3413_v14, %v3412_v4  ;;  %v5856_v57 = vor.u32 %v6079_v15, %v5855_v27  ;;  %v5860_v44 = vor.u32 %v6077_v62, %v5857_v22  ;;  %v3490_v36 = vsel %vm9779_vm3, %v3477_v1, %v3485_v5  ;;  %vm9783_vm15 = vmmov %vm9779_vm3  ;;  %v5793_v30 = vld [vmem:[#allocation2 + $0x170] sm:$0xf0]  ;;  %v5775_v62 = vld [vmem:[#allocation2 + $0x140] sm:$0xf] }
 0x739   : > { %v3494_v31 = vsel %vm9780_vm6, %v3485_v5, %v3477_v1  ;;  %v3506_v37 = vmul.f32 %v8924_v9, %v3490_v36  ;;  %v5823_v2 = vld [vmem:[#allocation2 + $0x1a0] sm:$0xf]  ;;  %v6069_v16 = vld [vmem:[#allocation2 + $0x1a4] sm:$0xf]  ;;  %v3483_v46 = vpop.permute.xlu2 %3482  ;;  %vm9784_vm8 = vmmov %vm9779_vm3  ;;  %v5796_v58 = vor.u32 %v6061_v0, %v5793_v30  ;;  %vm9794_vm6 = vcmp.lt.s32.totalorder %v6932_v8, 1 }
 0x73a   : > { %3423 = vst [vmem:[#allocation2 + $0x190] sm:$0xff] %v3419_v21  ;;  %4830 = vmatpush.bf16.msrb.mxu0 %v5856_v57  ;;  %4887 = vmatpush.bf16.msra.mxu2 %v5860_v44  ;;  %v3507_v12 = vmul.f32 %v8926_v47, %v3494_v31  ;;  %vm9785_vm5 = vmmov %vm9779_vm3  ;;  %v6057_v15 = vld [vmem:[#allocation2 + $0x144] sm:$0xf]  ;;  %v6059_v57 = vld [vmem:[#allocation2 + $0x14c] sm:$0xf0] }
 0x73b   : > { %v5839_v55 = vld [vmem:[#allocation2 + $0x1c0] sm:$0xf]  ;;  %v6073_v11 = vld [vmem:[#allocation2 + $0x1c4] sm:$0xf]  ;;  %4227 = vrot.lane.b32.xlu1 %v8817_v25, %s9750_s0  ;;  %4081 = vrot.lane.b32.xlu2 %v8817_v25, %s9731_s15  ;;  %vm9786_vm1 = vmmov %vm9779_vm3  ;;  %v5776_v36 = vor.u32 %v6059_v57, %v5775_v62  ;;  %s9787_s0 = smov 16  }
 0x73c   : > { %v5840_v61 = vor.u32 %v6075_v6, %v5839_v55  ;;  %v5844_v24 = vor.u32 %v6073_v11, %v5841_v3  ;;  %v3512_v49 = vpack.c.bf16 %v3507_v12, %v3506_v37  ;;  %v3475_v56 = vpop.permute.xlu0 %3474  ;;  %v5777_v44 = vld [vmem:[#allocation2 + $0x150] sm:$0xf0]  ;;  %v5759_v6 = vld [vmem:[#allocation2 + $0x120] sm:$0xf]  ;;  %v6053_v37 = vld [vmem:[#allocation2 + $0x124] sm:$0xf] }
 0x73d   : > { %v3489_v7 = vsel %vm9781_vm7, %v3475_v56, %v3483_v46  ;;  %v3493_v35 = vsel %vm9782_vm10, %v3483_v46, %v3475_v56  ;;  %4073 = vrot.lane.b32.xlu0 %v8810_v32, %s9731_s15  ;;  %v5807_v53 = vld [vmem:[#allocation2 + $0x180] sm:$0xf]  ;;  %v6065_v10 = vld [vmem:[#allocation2 + $0x184] sm:$0xf]  ;;  %v5780_v31 = vor.u32 %v6057_v15, %v5777_v44  ;;  %v5599_v30 = vld [vmem:[%s9620_s11 + $0x8] sm:$0xf] }
 0x73e   : > { %4831 = vmatpush.bf16.msrb.mxu0 %v5840_v61  ;;  %4888 = vmatpush.bf16.msra.mxu2 %v5844_v24  ;;  %3516 = vst [vmem:[#allocation2 + $0x220] sm:$0xff] %v3512_v49  ;;  %v3504_v51 = vmul.f32 %v8924_v9, %v3489_v7  ;;  %v3505_v50 = vmul.f32 %v8926_v47, %v3493_v35  ;;  %v6051_v24 = vld [vmem:[#allocation2 + $0x10c] sm:$0xf0]  ;;  %v5745_v49 = vld [vmem:[#allocation2 + $0x110] sm:$0xf0]  ;;  %vm9789_vm0 = vmmov %vm9788_vm9 }
 0x73f   : > { %v6071_v48 = vld [vmem:[#allocation2 + $0x1ac] sm:$0xf0]  ;;  %v5825_v59 = vld [vmem:[#allocation2 + $0x1b0] sm:$0xf0]  ;;  %v3487_v60 = vpop.permute.xlu1 %3486  ;;  %v6049_v46 = vld [vmem:[#allocation2 + $0x104] sm:$0xf] }
 0x740   : > { %v5824_v19 = vor.u32 %v6071_v48, %v5823_v2  ;;  %v5828_v26 = vor.u32 %v6069_v16, %v5825_v59  ;;  %v3511_v33 = vpack.c.bf16 %v3505_v50, %v3504_v51  ;;  %v3491_v18 = vsel %vm9783_vm15, %v8849_v40, %v3487_v60  ;;  %v5743_v16 = vld [vmem:[#allocation2 + $0x100] sm:$0xf]  ;;  %vm9791_vm11 = vmmov %vm9790_vm2 }
 0x741   : > { %v6067_v39 = vld [vmem:[#allocation2 + $0x18c] sm:$0xf0]  ;;  %v5809_v45 = vld [vmem:[#allocation2 + $0x190] sm:$0xf0]  ;;  %v3495_v23 = vsel %vm9784_vm8, %v3487_v60, %v8849_v40  ;;  %v3508_v43 = vmul.f32 %v8924_v9, %v3491_v18  ;;  %v5791_v40 = vld [vmem:[#allocation2 + $0x160] sm:$0xf]  ;;  %v5744_v48 = vor.u32 %v6051_v24, %v5743_v16  ;;  %v5748_v59 = vor.u32 %v6049_v46, %v5745_v49 }
 0x742   : > { %v5808_v42 = vor.u32 %v6067_v39, %v5807_v53  ;;  %4832 = vmatpush.bf16.msrb.mxu0 %v5824_v19  ;;  %4889 = vmatpush.bf16.msra.mxu2 %v5828_v26  ;;  %v3509_v29 = vmul.f32 %v8926_v47, %v3495_v23  ;;  %v5812_v52 = vor.u32 %v6065_v10, %v5809_v45  ;;  %v5591_v60 = vld [vmem:[%s9620_s11] sm:$0xf]  ;;  %v6012_v53 = vld [vmem:[%s9620_s11 + $0x8] sm:$0xf0]  ;;  %v6011_v45 = vld [vmem:[%s9620_s11 + $0x4] sm:$0xf] }
 0x743   : > { %3515 = vst [vmem:[#allocation2 + $0x210] sm:$0xff] %v3511_v33  ;;  %4075 = vrot.lane.b32.xlu1 %v8876_v17, %s9731_s15  ;;  %v5792_v4 = vor.u32 %v6063_v34, %v5791_v40  ;;  %4179 = vrot.lane.b32.xlu2 %v8784_v38, %s9739_s22  ;;  %v8990_v39 = vor.u32 %v6012_v53, %v5591_v60  ;;  %v5593_v33 = vld [vmem:[%s9620_s11 + $0xc] sm:$0xf0]  ;;  %v5603_v23 = vld [vmem:[%s9620_s11 + $0x18] sm:$0xf]  ;;  %vm9792_vm4 = vmmov %vm9790_vm2 }
 0x744   : > { %v3513_v63 = vpack.c.bf16 %v3509_v29, %v3508_v43  ;;  %v9006_v18 = vor.u32 %v6011_v45, %v5593_v33  ;;  %v6014_v43 = vld [vmem:[%s9620_s11 + $0x1c] sm:$0xf]  ;;  %v5605_v29 = vld [vmem:[%s9620_s11 + $0x24] sm:$0xf0]  ;;  %v6013_v40 = vld [vmem:[%s9620_s11 + $0x10] sm:$0xf0] }
 0x745   : > { %4083 = vrot.lane.b32.xlu0 %v8893_v13, %s9731_s15  ;;  %v5887_v12 = vld [vmem:[#allocation2 + $0x220] sm:$0xf]  ;;  %v6085_v2 = vld [vmem:[#allocation2 + $0x224] sm:$0xf]  ;;  %4819 = vmatmul.bf16.vlgmr.msrb.gmra.mxu2 %v8990_v39  ;;  %v9059_v0 = vor.u32 %v6013_v40, %v5599_v30  ;;  %vm9793_vm3 = vmmov %vm9790_vm2  ;;  %s5101_s15 = scalar_lea.hbm %s9837_s23, %s6090_s30 }
 0x746   : > { %3517 = vst [vmem:[#allocation2 + $0x230] sm:$0xff] %v3513_v63  ;;  %4833 = vmatpush.bf16.msrb.mxu0 %v5808_v42  ;;  %4890 = vmatpush.bf16.msra.mxu2 %v5812_v52  ;;  %v6015_v42 = vld [vmem:[%s9620_s11 + $0x20] sm:$0xf0]  ;;  %v9037_v52 = vor.u32 %v6014_v43, %v5605_v29  ;;  %vm9795_vm7 = vmmov %vm9794_vm6  ;;  %v5611_v53 = vld [vmem:[%s9620_s11 + $0x20] sm:$0xf]  ;;  %s5104_s20 = sshll.u32 %s5101_s15, 4  ;;  %s5105_s20 = int_to_ptr.hbm [resolvable:$true] %s5104_s20 }
 0x747   : > { %v3481_v27 = vpop.permute.xlu1 %3480  ;;  %4876 = vmatmul.bf16.vlgmr.msrb.gmra.mxu3 %v8990_v39  ;;  %v9021_v10 = vor.u32 %v6015_v42, %v5603_v23  ;;  %vm9796_vm10 = vmmov %vm9794_vm6  ;;  %v6016_v45 = vld [vmem:[%s9620_s11 + $0x28] sm:$0xf0] }
 0x748   : > { %v3488_v14 = vsel %vm9785_vm5, %v8915_v20, %v3481_v27  ;;  %v3492_v5 = vsel %vm9786_vm1, %v3481_v27, %v8915_v20  ;;  %vm9797_vm15 = vmmov %vm9794_vm6  ;;  %v9148_v42 = vor.u32 %v6016_v45, %v5611_v53 }
 0x749   : > { %v3502_v22 = vmul.f32 %v8924_v9, %v3488_v14  ;;  %v3503_v21 = vmul.f32 %v8926_v47, %v3492_v5  ;;  %v6055_v9 = vld [vmem:[#allocation2 + $0x12c] sm:$0xf0]  ;;  %v5761_v47 = vld [vmem:[#allocation2 + $0x130] sm:$0xf0]  ;;  %vm9798_vm8 = vmmov %vm9790_vm2 }
 0x74a   : > { %4834 = vmatpush.bf16.msrb.mxu0 %v5792_v4  ;;  %4891 = vmatpush.bf16.msra.mxu2 %v5796_v58  ;;  %v5760_v11 = vor.u32 %v6055_v9, %v5759_v6  ;;  %v5764_v3 = vor.u32 %v6053_v37, %v5761_v47  ;;  %v6083_v35 = vld [vmem:[#allocation2 + $0x20c] sm:$0xf0]  ;;  %v5873_v51 = vld [vmem:[#allocation2 + $0x210] sm:$0xf0]  ;;  %v5587_v4 = vld [vmem:[%s9611_s2 + $0xe] sm:$0x3] }
 0x74b   : > { %v3510_v1 = vpack.c.bf16 %v3503_v21, %v3502_v22  ;;  %4177 = vrot.lane.b32.xlu1 %v8712_v54, %s9739_s22  ;;  %4031 = vrot.lane.b32.xlu2 %v8712_v54, %s9730_s26  ;;  %v9074_v58 = vperm.slane %v5587_v4, 0  ;;  %v9076_v27 = vperm.slane %v5587_v4, 1  ;;  %vm9799_vm5 = vmmov %vm9790_vm2 }
 0x74c   : > { %vm9800_vm1 = vmmov %vm9789_vm0 }
 0x74d   : > { %v6087_v20 = vld [vmem:[#allocation2 + $0x22c] sm:$0xf0]  ;;  %3514 = vst [vmem:[#allocation2 + $0x200] sm:$0xff] %v3510_v1  ;;  %4185 = vrot.lane.b32.xlu0 %v8717_v28, %s9739_s22  ;;  %v5889_v61 = vld [vmem:[#allocation2 + $0x230] sm:$0xf0] }
 0x74e   : > { %4835 = vmatpush.bf16.msrb.mxu0 %v5776_v36  ;;  %4892 = vmatpush.bf16.msra.mxu2 %v5780_v31  ;;  %v5888_v55 = vor.u32 %v6087_v20, %v5887_v12  ;;  %v5892_v56 = vor.u32 %v6085_v2, %v5889_v61 }
 0x750   : > { %4855 = vmatpush.bf16.msrb.mxu1 %v5888_v55  ;;  %v5584_v55 = vld [vmem:[%s9611_s2 + $0x6] sm:$0x3] }
 0x752   : > { %4836 = vmatpush.bf16.msrb.mxu0 %v5760_v11  ;;  %4893 = vmatpush.bf16.msra.mxu2 %v5764_v3  ;;  %v9112_v11 = vperm.slane %v5584_v55, 0  ;;  %v9114_v3 = vperm.slane %v5584_v55, 1 }
 0x753   : > { %4187 = vrot.lane.b32.xlu1 %v8795_v41, %s9739_s22  ;;  %4041 = vrot.lane.b32.xlu2 %v8795_v41, %s9730_s26 }
 0x754   : > { %v5871_v7 = vld [vmem:[#allocation2 + $0x200] sm:$0xf]  ;;  %v6081_v19 = vld [vmem:[#allocation2 + $0x204] sm:$0xf] }
 0x755   : > { %v5872_v26 = vor.u32 %v6083_v35, %v5871_v7  ;;  %4033 = vrot.lane.b32.xlu0 %v8784_v38, %s9730_s26  ;;  %v5876_v50 = vor.u32 %v6081_v19, %v5873_v51  ;;  %4824 = vmatmul.bf16.gmra.mxu2 %v9021_v10 }
 0x756   : > { %4837 = vmatpush.bf16.msrb.mxu0 %v5744_v48  ;;  %4894 = vmatpush.bf16.msra.mxu2 %v5748_v59 }
 0x757   : > { %4856 = vmatpush.bf16.msrb.mxu1 %v5872_v26  ;;  %4881 = vmatmul.bf16.gmra.mxu3 %v9021_v10 }
 0x759   : > { %4838 = vmatmul.bf16.vlgmr.msrb.gmra.mxu0 %v9006_v18 }
 0x75a   : > { %4912 = vmatpush.bf16.msra.mxu0 %v5892_v56  ;;  %5901 = vmatmul.msk.bf16.vlgmr.msrb.gmra.mxu1 %vm9788_vm9, %v9059_v0  ;;  %vm9801_vm9 = vmmov %vm9789_vm0 }
 0x75b   : > { %4039 = vrot.lane.b32.xlu1 %v8717_v28, %s9730_s26  ;;  %4181 = vrot.lane.b32.xlu2 %v8817_v25, %s9739_s22 }
 0x75d   : > { %4173 = vrot.lane.b32.xlu0 %v8810_v32, %s9739_s22 }
 0x75e   : > { %4913 = vmatpush.bf16.msra.mxu0 %v5876_v50 }
 0x763   : > { %4175 = vrot.lane.b32.xlu1 %v8876_v17, %s9739_s22  ;;  %4029 = vrot.lane.b32.xlu2 %v8876_v17, %s9730_s26 }
 0x765   : > { %4183 = vrot.lane.b32.xlu0 %v8893_v13, %s9739_s22  ;;  %4895 = vmatmul.bf16.vlgmr.msra.gmra.mxu2 %v9006_v18 }
 0x769   : > { %4843 = vmatmul.bf16.gmra.mxu0 %v9037_v52 }
 0x76a   : > { %5902 = vmatmul.msk.bf16.gmra.mxu1 %vm9800_vm1, %v9148_v42 }
 0x76b   : > { %4027 = vrot.lane.b32.xlu1 %v8810_v32, %s9730_s26  ;;  %4131 = vrot.lane.b32.xlu2 %v8712_v54, %s9732_s24 }
 0x76d   : > { %4035 = vrot.lane.b32.xlu0 %v8817_v25, %s9730_s26 }
 0x773   : > { %4037 = vrot.lane.b32.xlu1 %v8893_v13, %s9730_s26  ;;  %v4232_v63 = vpop.permute.xlu2 %4231  ;;  %4141 = vrot.lane.b32.xlu2 %v8795_v41, %s9732_s24 }
 0x775   : > { %4133 = vrot.lane.b32.xlu0 %v8784_v38, %s9732_s24  ;;  %4900 = vmatmul.bf16.gmra.mxu2 %v9037_v52 }
 0x779   : > { %5903 = vmatmul.msk.bf16.vlgmr.msra.gmra.mxu0 %vm9789_vm0, %v9059_v0  ;;  %vm9802_vm0 = vmmov %vm9790_vm2 }
 0x77b   : > { %4139 = vrot.lane.b32.xlu1 %v8717_v28, %s9732_s24  ;;  %3993 = vrot.lane.b32.xlu2 %v8717_v28, %s9787_s0 }
 0x77d   : > { %3985 = vrot.lane.b32.xlu0 %v8712_v54, %s9787_s0  ;;  %v4080_v34 = vpop.permute.xlu2 %4079 }
 0x783   : > { %3987 = vrot.lane.b32.xlu1 %v8784_v38, %s9787_s0  ;;  %4129 = vrot.lane.b32.xlu2 %v8876_v17, %s9732_s24 }
 0x785   : > { %3995 = vrot.lane.b32.xlu0 %v8795_v41, %s9787_s0  ;;  %v9078_v14 = vpop.permute.xlu2 %4219 }
 0x789   : > { %5904 = vmatmul.msk.bf16.gmra.mxu0 %vm9801_vm9, %v9148_v42 }
 0x78a   : > { %v4224_v5 = vpop.permute.xlu0 %4223 }
 0x78b   : > { %v4237_v62 = vsel %vm9790_vm2, %v4224_v5, %v4232_v63  ;;  %v4241_v15 = vsel %vm9791_vm11, %v4232_v63, %v4224_v5  ;;  %4127 = vrot.lane.b32.xlu1 %v8810_v32, %s9732_s24  ;;  %3981 = vrot.lane.b32.xlu2 %v8810_v32, %s9787_s0  ;;  %vm9803_vm2 = vmmov %vm9802_vm0 }
 0x78c   : > { %v4253_v22 = vmul.f32 %v9074_v58, %v4237_v62  ;;  %v4254_v21 = vmul.f32 %v9076_v27, %v4241_v15  ;;  %vm9804_vm11 = vmmov %vm9794_vm6 }
 0x78d   : > { %4135 = vrot.lane.b32.xlu0 %v8817_v25, %s9732_s24  ;;  %v4230_v44 = vpop.permute.xlu2 %4229 }
 0x78e   : > { %v4259_v57 = vpack.c.bf16 %v4254_v21, %v4253_v22 }
 0x790   : > { %4263 = vst [vmem:[#allocation2 + $0x1e8] sm:$0xff] %v4259_v57 }
 0x793   : > { %4137 = vrot.lane.b32.xlu1 %v8893_v13, %s9732_s24  ;;  %3991 = vrot.lane.b32.xlu2 %v8893_v13, %s9787_s0 }
 0x795   : > { %3983 = vrot.lane.b32.xlu0 %v8876_v17, %s9787_s0  ;;  %v4226_v1 = vpop.permute.xlu1 %4225  ;;  %v4082_v37 = vpop.permute.xlu2 %4081 }
 0x797   : > { %v4234_v36 = vpop.permute.xlu0 %4233  ;;  %v5863_v48 = vld [vmem:[#allocation2 + $0x1e8] sm:$0xf] }
 0x798   : > { %v4238_v31 = vsel %vm9792_vm4, %v4226_v1, %v4234_v36  ;;  %v4242_v6 = vsel %vm9793_vm3, %v4234_v36, %v4226_v1  ;;  %vm9805_vm4 = vmmov %vm9794_vm6 }
 0x799   : > { %v4255_v12 = vmul.f32 %v9074_v58, %v4238_v31  ;;  %v4256_v20 = vmul.f32 %v9076_v27, %v4242_v6  ;;  %vm9806_vm3 = vmmov %vm9805_vm4 }
 0x79b   : > { %v4260_v9 = vpack.c.bf16 %v4256_v20, %v4255_v12  ;;  %3989 = vrot.lane.b32.xlu1 %v8817_v25, %s9787_s0  ;;  %3947 = vrot.lane.b32.xlu2 %v8717_v28, %s9725_s27 }
 0x79d   : > { %4264 = vst [vmem:[#allocation2 + $0x1f8] sm:$0xff] %v4260_v9  ;;  %3939 = vrot.lane.b32.xlu0 %v8712_v54, %s9725_s27  ;;  %v4078_v47 = vpop.permute.xlu1 %4077  ;;  %v9122_v2 = vpop.permute.xlu2 %4179 }
 0x79f   : > { %v4086_v61 = vpop.permute.xlu0 %4085 }
 0x7a0   : > { %v4091_v24 = vsel %vm9794_vm6, %v4078_v47, %v4086_v61  ;;  %v4095_v49 = vsel %vm9795_vm7, %v4086_v61, %v4078_v47  ;;  %vm9807_vm6 = vmmov %vm9806_vm3  ;;  %vm9808_vm7 = vcmp.lt.s32.totalorder %v6932_v8, 113 }
 0x7a1   : > { %v4107_v16 = vmul.f32 %v9112_v11, %v4095_v49  ;;  %v4108_v46 = vmul.f32 %v9114_v3, %v4091_v24 }
 0x7a3   : > { %v4113_v56 = vpack.c.bf16 %v4108_v46, %v4107_v16  ;;  %3941 = vrot.lane.b32.xlu1 %v8784_v38, %s9725_s27  ;;  %3937 = vrot.lane.b32.xlu2 %v8876_v17, %s9725_s27  ;;  %v5586_v46 = vld [vmem:[%s9611_s2 + $0xc] sm:$0x3] }
 0x7a4   : > { %v6080_v59 = vld [vmem:[#allocation2 + $0x1f4] sm:$0xf0] }
 0x7a5   : > { %4117 = vst [vmem:[#allocation2 + $0xe8] sm:$0xff] %v4113_v56  ;;  %3949 = vrot.lane.b32.xlu0 %v8795_v41, %s9725_s27  ;;  %v4088_v7 = vpop.permute.xlu1 %4087  ;;  %v5864_v35 = vor.u32 %v6080_v59, %v5863_v48  ;;  %v9150_v29 = vpop.permute.xlu2 %4031 }
 0x7a6   : > { %v4092_v19 = vsel %vm9796_vm10, %v4080_v34, %v4088_v7  ;;  %v4096_v26 = vsel %vm9797_vm15, %v4088_v7, %v4080_v34  ;;  %vm9809_vm10 = vmmov %vm9808_vm7 }
 0x7a7   : > { %v4109_v51 = vmul.f32 %v9112_v11, %v4096_v26  ;;  %v4110_v50 = vmul.f32 %v9114_v3, %v4092_v19  ;;  %4944 = vmatpush.bf16.msra.mxu3 %v5864_v35  ;;  %v4222_v60 = vpop.permute.xlu0 %4221  ;;  %v5583_v26 = vld [vmem:[%s9611_s2 + $0x4] sm:$0x3]  ;;  %vm9810_vm15 = vmmov %vm9808_vm7 }
 0x7a8   : > { %v4236_v33 = vsel %vm9798_vm8, %v4222_v60, %v4230_v44  ;;  %v4240_v23 = vsel %vm9799_vm5, %v4230_v44, %v4222_v60  ;;  %vm9811_vm8 = vmmov %vm9808_vm7 }
 0x7a9   : > { %v4114_v43 = vpack.c.bf16 %v4110_v50, %v4109_v51  ;;  %v4251_v63 = vmul.f32 %v9074_v58, %v4236_v33  ;;  %v4252_v34 = vmul.f32 %v9076_v27, %v4240_v23  ;;  %vm9812_vm5 = vmmov %vm9808_vm7 }
 0x7aa   : > { %vm9813_vm1 = vmmov %vm9812_vm5 }
 0x7ab   : > { %4118 = vst [vmem:[#allocation2 + $0xf8] sm:$0xff] %v4114_v43  ;;  %v4258_v30 = vpack.c.bf16 %v4252_v34, %v4251_v63  ;;  %3935 = vrot.lane.b32.xlu1 %v8810_v32, %s9725_s27  ;;  %4269 = vrot.lane.b32.xlu2 %v8712_v54, %s9688_s29  ;;  %v9230_v63 = vperm.slane %v5583_v26, 0  ;;  %v9232_v34 = vperm.slane %v5583_v26, 1  ;;  %vm9814_vm9 = vmmov %vm9813_vm1 }
 0x7ac   : > { %v5735_v31 = vld [vmem:[#allocation2 + $0xe8] sm:$0xf]  ;;  %v6046_v6 = vld [vmem:[#allocation2 + $0xec] sm:$0xf] }
 0x7ad   : > { %4262 = vst [vmem:[#allocation2 + $0x1d8] sm:$0xff] %v4258_v30  ;;  %3943 = vrot.lane.b32.xlu0 %v8817_v25, %s9725_s27  ;;  %v4228_v40 = vpop.permute.xlu1 %4227  ;;  %v9176_v1 = vpop.permute.xlu2 %4041 }
 0x7ae   : > { %v4235_v4 = vsel %vm9802_vm0, %v9078_v14, %v4228_v40  ;;  %v4239_v5 = vsel %vm9803_vm2, %v4228_v40, %v9078_v14  ;;  %vm9815_vm0 = vmmov %vm9813_vm1  ;;  %vm9816_vm2 = vcmp.lt.s32.totalorder %v6932_v8, 127 }
 0x7af   : > { %v4249_v62 = vmul.f32 %v9074_v58, %v4235_v4  ;;  %v4250_v15 = vmul.f32 %v9076_v27, %v4239_v5  ;;  %v4074_v22 = vpop.permute.xlu0 %4073 }
 0x7b0   : > { %v4089_v21 = vsel %vm9804_vm11, %v4074_v22, %v4082_v37  ;;  %v4093_v57 = vsel %vm9805_vm4, %v4082_v37, %v4074_v22  ;;  %vm9817_vm11 = vmmov %vm9816_vm2 }
 0x7b1   : > { %v4257_v44 = vpack.c.bf16 %v4250_v15, %v4249_v62  ;;  %v4103_v36 = vmul.f32 %v9112_v11, %v4093_v57  ;;  %v4104_v14 = vmul.f32 %v9114_v3, %v4089_v21  ;;  %vm9819_vm4 = vmmov %vm9816_vm2 }
 0x7b2   : > { %v6048_v54 = vld [vmem:[#allocation2 + $0xf4] sm:$0xf0]  ;;  %v5737_v58 = vld [vmem:[#allocation2 + $0xf8] sm:$0xf0] }
 0x7b3   : > { %4261 = vst [vmem:[#allocation2 + $0x1c8] sm:$0xff] %v4257_v44  ;;  %v4111_v27 = vpack.c.bf16 %v4104_v14, %v4103_v36  ;;  %3945 = vrot.lane.b32.xlu1 %v8893_v13, %s9725_s27  ;;  %v5736_v12 = vor.u32 %v6048_v54, %v5735_v31  ;;  %v9182_v20 = vor.u32 %v6046_v6, %v5737_v58  ;;  %v4393_v44 = vld [vmem:[%s9621_s12 + $0x10] sm:$0xff]  ;;  %s6372_s27 = sshra.s32 %s5105_s20, 4  ;;  %s6373_s27 = int_to_ptr.hbm [resolvable:$true] %s6372_s27 }
 0x7b4   : > { %4279 = vrot.lane.b32.xlu2 %v8795_v41, %s9688_s29  ;;  %v6076_v16 = vld [vmem:[#allocation2 + $0x1d4] sm:$0xf0]  ;;  %s6374_s18 = scalar_lea.hbm %s6373_s27, 128  ;;  %p6379_p1 = scmp.lt.s32.totalorder %s6373_s27, %s9837_s23 }
 0x7b5   : > { %4115 = vst [vmem:[#allocation2 + $0xc8] sm:$0xff] %v4111_v27  ;;  %4271 = vrot.lane.b32.xlu0 %v8784_v38, %s9688_s29  ;;  %v4076_v37 = vpop.permute.xlu1 %4075  ;;  %4925 = vmatpush.bf16.msra.mxu1 %v5736_v12  ;;  %v9193_v61 = vpop.permute.xlu2 %4181  ;;  %p6375_p9 = scmp.ne.s32.totalorder %s6373_s27, %s6374_s18  ;;  %p6380_p3 = scmp.lt.s32.totalorder %s6378_s3, %s6374_s18 }
 0x7b6   : > { %4982 = vmatpush.bf16.msrb.mxu0 %v9182_v20 }
 0x7b7   : > { %v4084_v55 = vpop.permute.xlu0 %4083  ;;  %p6376_p13 = pnand %p6375_p9, %p6568_p11  ;;  %p6381_p4 = por %p6380_p3, %p6379_p1 }
 0x7b8   : > { %v4090_v9 = vsel %vm9806_vm3, %v4076_v37, %v4084_v55  ;;  %v4094_v47 = vsel %vm9807_vm6, %v4084_v55, %v4076_v37  ;;  %v4394_v37 = vld [vmem:[%s9621_s12 + $0x18] sm:$0xff]  ;;  %vm9820_vm3 = vmmov %vm9816_vm2 }
 0x7b9   : > { %v4105_v24 = vmul.f32 %v9112_v11, %v4094_v47  ;;  %v4106_v38 = vmul.f32 %v9114_v3, %v4090_v9  ;;  %v9204_v11 = vperm.slane %v5586_v46, 0  ;;  %v9206_v3 = vperm.slane %v5586_v46, 1  ;;  %vm9821_vm6 = vmmov %vm9816_vm2  ;;  %p6377_p0 = pneg %p6376_p13 }
 0x7ba   : > { %v5847_v49 = vld [vmem:[#allocation2 + $0x1c8] sm:$0xf] }
 0x7bb   : > { %v4112_v41 = vpack.c.bf16 %v4106_v38, %v4105_v24  ;;  %4277 = vrot.lane.b32.xlu1 %v8717_v28, %s9688_s29  ;;  %v5848_v56 = vor.u32 %v6076_v16, %v5847_v49  ;;  %p6382_p7 = pnand %p6381_p4, %p6377_p0 }
 0x7bc   : > { %4273 = vrot.lane.b32.xlu2 %v8817_v25, %s9688_s29  ;;  %v4392_v25 = vld [vmem:[%s9621_s12 + $0x8] sm:$0xff] }
 0x7bd   : > { %4116 = vst [vmem:[#allocation2 + $0xd8] sm:$0xff] %v4112_v41  ;;  %4265 = vrot.lane.b32.xlu0 %v8810_v32, %s9688_s29  ;;  %v4178_v48 = vpop.permute.xlu1 %4177  ;;  %4945 = vmatpush.bf16.msra.mxu3 %v5848_v56  ;;  %v9214_v35 = vpop.permute.xlu2 %4029  ;;  %v5719_v50 = vld [vmem:[#allocation2 + $0xc8] sm:$0xf]  ;;  %v6042_v53 = vld [vmem:[#allocation2 + $0xcc] sm:$0xf] }
 0x7bf   : > { %v4186_v59 = vpop.permute.xlu0 %4185 }
 0x7c0   : > { %v4191_v7 = vsel %vm9808_vm7, %v4178_v48, %v4186_v59  ;;  %v4195_v28 = vsel %vm9809_vm10, %v4186_v59, %v4178_v48  ;;  %vm9822_vm7 = vmmov %vm9816_vm2 }
 0x7c1   : > { %v4207_v32 = vmul.f32 %v9204_v11, %v4191_v7  ;;  %v4208_v19 = vmul.f32 %v9206_v3, %v4195_v28  ;;  %vm9823_vm10 = vmmov %vm9816_vm2 }
 0x7c3   : > { %v4213_v51 = vpack.c.bf16 %v4208_v19, %v4207_v32  ;;  %4267 = vrot.lane.b32.xlu1 %v8876_v17, %s9688_s29 }
 0x7c4   : > { %v6044_v60 = vld [vmem:[#allocation2 + $0xd4] sm:$0xf0]  ;;  %v5721_v45 = vld [vmem:[#allocation2 + $0xd8] sm:$0xf0]  ;;  %4402 = vperm.xlu2 %6157, %v4392_v25  }
 0x7c5   : > { %4217 = vst [vmem:[#allocation2 + $0x1a8] sm:$0xff] %v4213_v51  ;;  %4275 = vrot.lane.b32.xlu0 %v8893_v13, %s9688_s29  ;;  %v4188_v33 = vpop.permute.xlu1 %4187  ;;  %v5720_v23 = vor.u32 %v6044_v60, %v5719_v50  ;;  %v9228_v43 = vor.u32 %v6042_v53, %v5721_v45  ;;  %v9252_v15 = vpop.permute.xlu2 %4131  ;;  %s9470_s29 = scalar_lea.vmem [#allocation6], %s9826_s16 }
 0x7c6   : > { %v4192_v17 = vsel %vm9810_vm15, %v9122_v2, %v4188_v33  ;;  %v4196_v30 = vsel %vm9811_vm8, %v4188_v33, %v9122_v2  ;;  %v4391_v2 = vld [vmem:[%s9621_s12] sm:$0xff]  ;;  %s5102_s28 = sshll.u32 %s9470_s29, 4  ;;  %s5103_s28 = int_to_ptr.vmem [resolvable:$true] %s5102_s28 }
 0x7c7   : > { %v4209_v40 = vmul.f32 %v9204_v11, %v4192_v17  ;;  %v4210_v13 = vmul.f32 %v9206_v3, %v4196_v30  ;;  %4926 = vmatpush.bf16.msra.mxu1 %v5720_v23  ;;  %v4034_v4 = vpop.permute.xlu0 %4033  ;;  %4983 = vmatpush.bf16.msrb.mxu0 %v9228_v43  ;;  %v5585_v17 = vld [vmem:[%s9611_s2 + $0xa] sm:$0x3] }
 0x7c8   : > { %v4046_v5 = vsel %vm995_vm14, %v4034_v4, %v9176_v1  ;;  %v4050_v62 = vsel %vm995_vm14, %v9176_v1, %v4034_v4 }
 0x7c9   : > { %v4214_v22 = vpack.c.bf16 %v4210_v13, %v4209_v40  ;;  %v4063_v21 = vmul.f32 %v9230_v63, %v4050_v62  ;;  %v4064_v57 = vmul.f32 %v9232_v34, %v4046_v5  ;;  %v9298_v62 = vperm.slane %v5585_v17, 0 }
 0x7cb   : > { %4218 = vst [vmem:[#allocation2 + $0x1b8] sm:$0xff] %v4214_v22  ;;  %v4068_v36 = vpack.c.bf16 %v4064_v57, %v4063_v21  ;;  %4397 = vperm.xlu1 %6159, %v4391_v2   ;;  %v9300_v2 = vperm.slane %v5585_v17, 1 }
 0x7cc   : > { %v5831_v24 = vld [vmem:[#allocation2 + $0x1a8] sm:$0xf] }
 0x7cd   : > { %4072 = vst [vmem:[#allocation2 + $0xb8] sm:$0xff] %v4068_v36  ;;  %4407 = vperm.xlu0 %6158, %v4393_v44   ;;  %v4040_v1 = vpop.permute.xlu1 %4039  ;;  %v4142_v55 = vpop.permute.xlu2 %4141 }
 0x7ce   : > { %v4045_v14 = vsel %vm995_vm14, %v9150_v29, %v4040_v1  ;;  %v4049_v31 = vsel %vm995_vm14, %v4040_v1, %v9150_v29 }
 0x7cf   : > { %v4061_v54 = vmul.f32 %v9230_v63, %v4049_v31  ;;  %v4062_v6 = vmul.f32 %v9232_v34, %v4045_v14  ;;  %v4174_v58 = vpop.permute.xlu0 %4173 }
 0x7d0   : > { %v4189_v27 = vsel %vm9812_vm5, %v4174_v58, %v9193_v61  ;;  %v4193_v12 = vsel %vm9813_vm1, %v9193_v61, %v4174_v58 }
 0x7d1   : > { %v4067_v9 = vpack.c.bf16 %v4062_v6, %v4061_v54  ;;  %v4203_v29 = vmul.f32 %v9204_v11, %v4189_v27  ;;  %v4204_v47 = vmul.f32 %v9206_v3, %v4193_v12 }
 0x7d2   : > { %v6072_v38 = vld [vmem:[#allocation2 + $0x1b4] sm:$0xf0] }
 0x7d3   : > { %4071 = vst [vmem:[#allocation2 + $0xa8] sm:$0xff] %v4067_v9  ;;  %v4211_v49 = vpack.c.bf16 %v4204_v47, %v4203_v29  ;;  %4412 = vperm.xlu1 %6159, %v4394_v37   ;;  %v5832_v16 = vor.u32 %v6072_v38, %v5831_v24  ;;  %v9333_v24 = vpop.f32.mrf.mxu2 }
 0x7d4   : > { %v6040_v28 = vld [vmem:[#allocation2 + $0xb4] sm:$0xf0]  ;;  %v5705_v26 = vld [vmem:[#allocation2 + $0xb8] sm:$0xf0] }
 0x7d5   : > { %4215 = vst [vmem:[#allocation2 + $0x188] sm:$0xff] %v4211_v49  ;;  %v4176_v46 = vpop.permute.xlu1 %4175  ;;  %4946 = vmatpush.bf16.msra.mxu3 %v5832_v16  ;;  %v3994_v48 = vpop.permute.xlu2 %3993 }
 0x7d7   : > { %v4184_v61 = vpop.permute.xlu0 %4183 }
 0x7d8   : > { %v4190_v41 = vsel %vm9814_vm9, %v4176_v46, %v4184_v61  ;;  %v4194_v56 = vsel %vm9815_vm0, %v4184_v61, %v4176_v46 }
 0x7d9   : > { %v4205_v59 = vmul.f32 %v9204_v11, %v4190_v41  ;;  %v4206_v7 = vmul.f32 %v9206_v3, %v4194_v56  ;;  %v9341_v56 = vpop.f32.mrf.mxu0 }
 0x7da   : > { %v5703_v32 = vld [vmem:[#allocation2 + $0xa8] sm:$0xf]  ;;  %v6038_v19 = vld [vmem:[#allocation2 + $0xac] sm:$0xf] }
 0x7db   : > { %v4212_v51 = vpack.c.bf16 %v4206_v7, %v4205_v59  ;;  %v5704_v25 = vor.u32 %v6040_v28, %v5703_v32  ;;  %v9284_v50 = vor.u32 %v6038_v19, %v5705_v26 }
 0x7dc   : > { %v5815_v40 = vld [vmem:[#allocation2 + $0x188] sm:$0xf] }
 0x7dd   : > { %4216 = vst [vmem:[#allocation2 + $0x198] sm:$0xff] %v4212_v51  ;;  %v4028_v60 = vpop.permute.xlu1 %4027  ;;  %4927 = vmatpush.bf16.msra.mxu1 %v5704_v25  ;;  %4984 = vmatpush.bf16.msrb.mxu0 %v9284_v50  ;;  %v9291_v3 = vpop.permute.xlu2 %4129 }
 0x7df   : > { %v4036_v53 = vpop.permute.xlu0 %4035 }
 0x7e0   : > { %v4043_v45 = vsel %vm995_vm14, %v4028_v60, %v4036_v53  ;;  %v4047_v11 = vsel %vm995_vm14, %v4036_v53, %v4028_v60 }
 0x7e1   : > { %v4057_v33 = vmul.f32 %v9230_v63, %v4047_v11  ;;  %v4058_v23 = vmul.f32 %v9232_v34, %v4043_v45 }
 0x7e3   : > { %v4065_v30 = vpack.c.bf16 %v4058_v23, %v4057_v33  ;;  %v9352_v33 = vpop.f32.mrf.mxu2 }
 0x7e4   : > { %v6068_v13 = vld [vmem:[#allocation2 + $0x194] sm:$0xf0] }
 0x7e5   : > { %4069 = vst [vmem:[#allocation2 + $0x88] sm:$0xff] %v4065_v30  ;;  %v4038_v4 = vpop.permute.xlu1 %4037  ;;  %v5816_v5 = vor.u32 %v6068_v13, %v5815_v40  ;;  %v9314_v31 = vpop.permute.xlu2 %3981 }
 0x7e6   : > { %v4044_v22 = vsel %vm995_vm14, %v9214_v35, %v4038_v4  ;;  %v4048_v21 = vsel %vm995_vm14, %v4038_v4, %v9214_v35  ;;  %v5582_v35 = vld [vmem:[%s9611_s2 + $0x2] sm:$0x3]  ;;  %vm9818_vm14 = vmmov %vm9816_vm2  ;;  %v9354_v13 = vpop.f32.mrf.mxu0 }
 0x7e7   : > { %v4059_v57 = vmul.f32 %v9230_v63, %v4048_v21  ;;  %v4060_v44 = vmul.f32 %v9232_v34, %v4044_v22  ;;  %4947 = vmatpush.bf16.msra.mxu3 %v5816_v5  ;;  %v4134_v36 = vpop.permute.xlu0 %4133  ;;  %v9321_v27 = vperm.slane %v5582_v35, 0  ;;  %v9323_v12 = vperm.slane %v5582_v35, 1 }
 0x7e8   : > { %v4146_v1 = vsel %vm9816_vm2, %v4134_v36, %v4142_v55  ;;  %v4150_v14 = vsel %vm9817_vm11, %v4142_v55, %v4134_v36  ;;  %vm9833_vm2 = vcmask 261120  }
 0x7e9   : > { %v4066_v54 = vpack.c.bf16 %v4060_v44, %v4059_v57  ;;  %v4163_v6 = vmul.f32 %v9298_v62, %v4146_v1  ;;  %v4164_v58 = vmul.f32 %v9300_v2, %v4150_v14  ;;  %vm9834_vm11 = vmmov %vm9833_vm2 }
 0x7eb   : > { %4070 = vst [vmem:[#allocation2 + $0x98] sm:$0xff] %v4066_v54  ;;  %v4168_v63 = vpack.c.bf16 %v4164_v58, %v4163_v6  ;;  %v9364_v54 = vpop.f32.mrf.mxu2 }
 0x7ec   : > { %v6034_v7 = vld [vmem:[#allocation2 + $0x8c] sm:$0xf] }
 0x7ed   : > { %4172 = vst [vmem:[#allocation2 + $0x178] sm:$0xff] %v4168_v63  ;;  %v4140_v34 = vpop.permute.xlu1 %4139  ;;  %v3992_v16 = vpop.permute.xlu2 %3991 }
 0x7ee   : > { %v4145_v37 = vsel %vm9818_vm14, %v9252_v15, %v4140_v34  ;;  %v4149_v55 = vsel %vm9819_vm4, %v4140_v34, %v9252_v15  ;;  %v5687_v15 = vld [vmem:[#allocation2 + $0x88] sm:$0xf]  ;;  %vm9835_vm14 = vmmov %vm9833_vm2 }
 0x7ef   : > { %v4161_v9 = vmul.f32 %v9298_v62, %v4145_v37  ;;  %v4162_v29 = vmul.f32 %v9300_v2, %v4149_v55  ;;  %v3986_v47 = vpop.permute.xlu0 %3985  ;;  %v9368_v55 = vpop.f32.mrf.mxu0  ;;  %vm9836_vm4 = vmmov %vm9833_vm2 }
 0x7f0   : > { %v3999_v38 = vsel %vm947_vm13, %v3986_v47, %v3994_v48  ;;  %v4003_v49 = vsel %vm947_vm13, %v3994_v48, %v3986_v47 }
 0x7f1   : > { %v4167_v46 = vpack.c.bf16 %v4162_v29, %v4161_v9  ;;  %v4015_v61 = vmul.f32 %v9321_v27, %v4003_v49  ;;  %v4016_v41 = vmul.f32 %v9323_v12, %v3999_v38 }
 0x7f2   : > { %v6036_v59 = vld [vmem:[#allocation2 + $0x94] sm:$0xf0]  ;;  %v5689_v28 = vld [vmem:[#allocation2 + $0x98] sm:$0xf0] }
 0x7f3   : > { %4171 = vst [vmem:[#allocation2 + $0x168] sm:$0xff] %v4167_v46  ;;  %v4021_v32 = vpack.c.bf16 %v4016_v41, %v4015_v61  ;;  %v5688_v19 = vor.u32 %v6036_v59, %v5687_v15  ;;  %v9343_v26 = vor.u32 %v6034_v7, %v5689_v28 }
 0x7f4   : > { %v6064_v17 = vld [vmem:[#allocation2 + $0x174] sm:$0xf0] }
 0x7f5   : > { %4025 = vst [vmem:[#allocation2 + $0x68] sm:$0xff] %v4021_v32  ;;  %v3988_v51 = vpop.permute.xlu1 %3987  ;;  %4928 = vmatpush.bf16.msra.mxu1 %v5688_v19  ;;  %4985 = vmatpush.bf16.msrb.mxu0 %v9343_v26  ;;  %v3948_v53 = vpop.permute.xlu2 %3947 }
 0x7f7   : > { %v3996_v48 = vpop.permute.xlu0 %3995 }
 0x7f8   : > { %v4000_v25 = vsel %vm947_vm13, %v3988_v51, %v3996_v48  ;;  %v4004_v60 = vsel %vm947_vm13, %v3996_v48, %v3988_v51 }
 0x7f9   : > { %v4017_v45 = vmul.f32 %v9321_v27, %v4004_v60  ;;  %v4018_v11 = vmul.f32 %v9323_v12, %v4000_v25 }
 0x7fa   : > { %v5799_v23 = vld [vmem:[#allocation2 + $0x168] sm:$0xf] }
 0x7fb   : > { %v4022_v30 = vpack.c.bf16 %v4018_v11, %v4017_v45  ;;  %v5800_v40 = vor.u32 %v6064_v17, %v5799_v23  ;;  %v9404_v45 = vpop.f32.mrf.mxu0 }
 0x7fc   : > { %v5671_v14 = vld [vmem:[#allocation2 + $0x68] sm:$0xf]  ;;  %v6030_v58 = vld [vmem:[#allocation2 + $0x6c] sm:$0xf] }
 0x7fd   : > { %4026 = vst [vmem:[#allocation2 + $0x78] sm:$0xff] %v4022_v30  ;;  %v4128_v4 = vpop.permute.xlu1 %4127  ;;  %4948 = vmatpush.bf16.msra.mxu3 %v5800_v40  ;;  %v9360_v57 = vpop.permute.xlu2 %3937 }
 0x7ff   : > { %v4136_v5 = vpop.permute.xlu0 %4135 }
 0x800   : > { %v4143_v22 = vsel %vm9820_vm3, %v4128_v4, %v4136_v5  ;;  %v4147_v21 = vsel %vm9821_vm6, %v4136_v5, %v4128_v4 }
 0x801   : > { %v4157_v44 = vmul.f32 %v9298_v62, %v4143_v22  ;;  %v4158_v36 = vmul.f32 %v9300_v2, %v4147_v21  ;;  %v6056_v22 = vld [vmem:[#allocation2 + $0x134] sm:$0xf0]  ;;  %v9414_v21 = vpop.f32.mrf.mxu3 }
 0x803   : > { %v4165_v1 = vpack.c.bf16 %v4158_v36, %v4157_v44  ;;  %v5767_v36 = vld [vmem:[#allocation2 + $0x128] sm:$0xf] }
 0x804   : > { %v6032_v6 = vld [vmem:[#allocation2 + $0x74] sm:$0xf0]  ;;  %v5673_v35 = vld [vmem:[#allocation2 + $0x78] sm:$0xf0] }
 0x805   : > { %4169 = vst [vmem:[#allocation2 + $0x148] sm:$0xff] %v4165_v1  ;;  %v4138_v63 = vpop.permute.xlu1 %4137  ;;  %v5672_v34 = vor.u32 %v6032_v6, %v5671_v14  ;;  %v9366_v37 = vor.u32 %v6030_v58, %v5673_v35  ;;  %v9383_v41 = vpop.permute.xlu2 %4269  ;;  %v5768_v14 = vor.u32 %v6056_v22, %v5767_v36 }
 0x806   : > { %v4144_v9 = vsel %vm9822_vm7, %v9291_v3, %v4138_v63  ;;  %v4148_v29 = vsel %vm9823_vm10, %v4138_v63, %v9291_v3  ;;  %v9422_v35 = vpop.f32.mrf.mxu1  ;;  %v6052_v63 = vld [vmem:[#allocation2 + $0x114] sm:$0xf0] }
 0x807   : > { %v4159_v47 = vmul.f32 %v9298_v62, %v4144_v9  ;;  %v4160_v38 = vmul.f32 %v9300_v2, %v4148_v29  ;;  %4929 = vmatpush.bf16.msra.mxu1 %v5672_v34  ;;  %4986 = vmatpush.bf16.msrb.mxu0 %v9366_v37  ;;  %v3984_v49 = vpop.permute.xlu0 %3983  ;;  %v3959_v62 = vld [vmem:[%s9611_s2] sm:$0x3] }
 0x808   : > { %v3998_v46 = vsel %vm947_vm13, %v3984_v49, %v3992_v16  ;;  %v4002_v61 = vsel %vm947_vm13, %v3992_v16, %v3984_v49  ;;  %v9390_v28 = vperm.slane %v3959_v62, 0  ;;  %v9392_v32 = vperm.slane %v3959_v62, 1  ;;  %v9394_v16 = vpop.f32.mrf.mxu2  ;;  %v5751_v49 = vld [vmem:[#allocation2 + $0x108] sm:$0xf] }
 0x809   : > { %v4166_v15 = vpack.c.bf16 %v4160_v38, %v4159_v47  ;;  %v4013_v59 = vmul.f32 %v9321_v27, %v4002_v61  ;;  %v4014_v3 = vmul.f32 %v9323_v12, %v3998_v46  ;;  %v9428_v47 = vpop.f32.mrf.mxu0  ;;  %v5752_v62 = vor.u32 %v6052_v63, %v5751_v49  ;;  %v5042_v63 = vld [vmem:[%s6610_s25 + $0x18] sm:$0xff] }
 0x80b   : > { %4170 = vst [vmem:[#allocation2 + $0x158] sm:$0xff] %v4166_v15  ;;  %v4020_v2 = vpack.c.bf16 %v4014_v3, %v4013_v59 }
 0x80c   : > { %v5783_v4 = vld [vmem:[#allocation2 + $0x148] sm:$0xf] }
 0x80d   : > { %4024 = vst [vmem:[#allocation2 + $0x58] sm:$0xff] %v4020_v2  ;;  %v3990_v7 = vpop.permute.xlu1 %3989 }
 0x80e   : > { %v3997_v19 = vsel %vm947_vm13, %v9314_v31, %v3990_v7  ;;  %v4001_v51 = vsel %vm947_vm13, %v3990_v7, %v9314_v31  ;;  %v9410_v17 = vpop.permute.xlu2 %4279  ;;  %vm9824_vm13 = vcmp.lt.s32.totalorder %v6932_v8, 111 }
 0x80f   : > { %v4011_v48 = vmul.f32 %v9321_v27, %v4001_v51  ;;  %v4012_v25 = vmul.f32 %v9323_v12, %v3997_v19  ;;  %v3940_v60 = vpop.permute.xlu0 %3939  ;;  %v4879_v19 = vpop.f32.mrf.mxu3  ;;  %vm9825_vm15 = vmmov %vm9824_vm13 }
 0x810   : > { %v3953_v11 = vsel %vm900_vm12, %v3940_v60, %v3948_v53  ;;  %v3957_v23 = vsel %vm900_vm12, %v3948_v53, %v3940_v60  ;;  %v9416_v1 = vpop.f32.mrf.mxu2 }
 0x811   : > { %v4019_v30 = vpack.c.bf16 %v4012_v25, %v4011_v48  ;;  %v3969_v40 = vmul.f32 %v9390_v28, %v3957_v23  ;;  %v3970_v31 = vmul.f32 %v9392_v32, %v3953_v11 }
 0x812   : > { %v6060_v27 = vld [vmem:[#allocation2 + $0x154] sm:$0xf0] }
 0x813   : > { %4023 = vst [vmem:[#allocation2 + $0x48] sm:$0xff] %v4019_v30  ;;  %v3975_v12 = vpack.c.bf16 %v3970_v31, %v3969_v40  ;;  %v5784_v5 = vor.u32 %v6060_v27, %v5783_v4  ;;  %v5588_v4 = vld [vmem:[%s9611_s2 + $0x10] sm:$0x3] }
 0x814   : > { %v6028_v38 = vld [vmem:[#allocation2 + $0x54] sm:$0xf0]  ;;  %v5657_v15 = vld [vmem:[#allocation2 + $0x58] sm:$0xf0]  ;;  %v4292_v49 = vperm.slane %v5588_v4, 1 }
 0x815   : > { %3979 = vst [vmem:[#allocation2 + $0x28] sm:$0xff] %v3975_v12  ;;  %v3942_v44 = vpop.permute.xlu1 %3941  ;;  %4949 = vmatpush.bf16.msra.mxu3 %v5784_v5  ;;  %v4860_v12 = vpop.f32.mrf.mxu1 }
 0x816   : > { %v9424_v34 = vpop.permute.xlu2 %4273  ;;  %v4917_v5 = vpop.f32.mrf.mxu0 }
 0x817   : > { %v3950_v53 = vpop.permute.xlu0 %3949 }
 0x818   : > { %v3954_v6 = vsel %vm900_vm12, %v3942_v44, %v3950_v53  ;;  %v3958_v58 = vsel %vm900_vm12, %v3950_v53, %v3942_v44  ;;  %v4898_v30 = vpop.f32.mrf.mxu2 }
 0x819   : > { %v3971_v9 = vmul.f32 %v9390_v28, %v3958_v58  ;;  %v3972_v29 = vmul.f32 %v9392_v32, %v3954_v6  ;;  %4950 = vmatpush.bf16.msra.mxu3 %v5768_v14  ;;  %v5041_v58 = vld [vmem:[%s6610_s25 + $0x10] sm:$0xff] }
 0x81a   : > { %v5655_v46 = vld [vmem:[#allocation2 + $0x48] sm:$0xf]  ;;  %v6026_v61 = vld [vmem:[#allocation2 + $0x4c] sm:$0xf] }
 0x81b   : > { %v3976_v59 = vpack.c.bf16 %v3972_v29, %v3971_v9  ;;  %v5656_v3 = vor.u32 %v6028_v38, %v5655_v46  ;;  %v9430_v2 = vor.u32 %v6026_v61, %v5657_v15  ;;  %v4291_v38 = vperm.slane %v5588_v4, 0 }
 0x81c   : > { %v5639_v22 = vld [vmem:[#allocation2 + $0x28] sm:$0xf]  ;;  %v6022_v14 = vld [vmem:[#allocation2 + $0x2c] sm:$0xf] }
 0x81d   : > { %3980 = vst [vmem:[#allocation2 + $0x38] sm:$0xff] %v3976_v59  ;;  %v3936_v7 = vpop.permute.xlu1 %3935  ;;  %4930 = vmatpush.bf16.msra.mxu1 %v5656_v3  ;;  %4951 = vmatpush.bf16.msra.mxu3 %v5752_v62 }
 0x81e   : > { %4987 = vmatpush.bf16.msrb.mxu0 %v9430_v2  ;;  %v9438_v60 = vpop.permute.xlu2 %4402 }
 0x81f   : > { %v3944_v51 = vpop.permute.xlu0 %3943  ;;  %v4823_v40 = vadd.f32 %v9352_v33, %v9438_v60  ;;  %v4880_v31 = vadd.f32 %v4879_v19, %v9438_v60 }
 0x820   : > { %v3951_v48 = vsel %vm900_vm12, %v3936_v7, %v3944_v51  ;;  %v3955_v25 = vsel %vm900_vm12, %v3944_v51, %v3936_v7  ;;  %4952 = vmatmul.bf16.vlgmr.msra.gmra.mxu3 %v9006_v18  ;;  %v4901_v8 = vpop.f32.mrf.mxu2 }
 0x821   : > { %v3965_v11 = vmul.f32 %v9390_v28, %v3955_v25  ;;  %v3966_v23 = vmul.f32 %v9392_v32, %v3951_v48  ;;  %v4899_v44 = vadd.f32 %v4898_v30, %v4880_v31  ;;  %v4842_v36 = vadd.f32 %v9354_v13, %v4823_v40 }
 0x823   : > { %v3973_v27 = vpack.c.bf16 %v3966_v23, %v3965_v11  ;;  %v4861_v46 = vadd.f32 %v4860_v12, %v4842_v36  ;;  %v4918_v61 = vadd.f32 %v4917_v5, %v4899_v44 }
 0x824   : > { %v6024_v53 = vld [vmem:[#allocation2 + $0x34] sm:$0xf0]  ;;  %v5641_v6 = vld [vmem:[#allocation2 + $0x38] sm:$0xf0] }
 0x825   : > { %3977 = vst [vmem:[#allocation2 + $0x8] sm:$0xff] %v3973_v27  ;;  %v3946_v33 = vpop.permute.xlu1 %3945  ;;  %v5640_v9 = vor.u32 %v6024_v53, %v5639_v22  ;;  %v9451_v29 = vor.u32 %v6022_v14, %v5641_v6  ;;  %v5049_v7 = vadd.f32 %v5041_v58, %v4861_v46  ;;  %v5050_v19 = vadd.f32 %v5042_v63, %v4918_v61  ;;  %v5865_v53 = vld [vmem:[#allocation2 + $0x1f8] sm:$0xf0] }
 0x826   : > { %v3952_v15 = vsel %vm900_vm12, %v9360_v57, %v3946_v33  ;;  %v3956_v13 = vsel %vm900_vm12, %v3946_v33, %v9360_v57  ;;  %vm9827_vm12 = vmmov %vm9824_vm13  ;;  %v6078_v33 = vld [vmem:[#allocation2 + $0x1ec] sm:$0xf] }
 0x827   : > { %v3967_v59 = vmul.f32 %v9390_v28, %v3956_v13  ;;  %v3968_v3 = vmul.f32 %v9392_v32, %v3952_v15  ;;  %4931 = vmatpush.bf16.msra.mxu1 %v5640_v9  ;;  %4988 = vmatpush.bf16.msrb.mxu0 %v9451_v29  ;;  %v4272_v62 = vpop.permute.xlu0 %4271  ;;  %5057 = vst [vmem:[%s9470_s29 + $0x10] sm:$0xff] %v5049_v7  ;;  %vm9828_vm8 = vmmov %vm9827_vm12 }
 0x828   : > { %v4284_v51 = vsel %vm9824_vm13, %v4272_v62, %v9410_v17  ;;  %v4288_v48 = vsel %vm9825_vm15, %v9410_v17, %v4272_v62  ;;  %5058 = vst [vmem:[%s9470_s29 + $0x18] sm:$0xff] %v5050_v19  ;;  %vm9829_vm5 = vmmov %vm9828_vm8  ;;  %v5868_v46 = vor.u32 %v6078_v33, %v5865_v53  ;;  %v4882_v19 = vpop.f32.mrf.mxu3  ;;  %v5040_v53 = vld [vmem:[%s6610_s25 + $0x8] sm:$0xff] }
 0x829   : > { %v3974_v25 = vpack.c.bf16 %v3968_v3, %v3967_v59  ;;  %v4301_v57 = vmul.f32 %v4291_v38, %v4284_v51  ;;  %v4302_v11 = vmul.f32 %v4292_v49, %v4288_v48  ;;  %vm9830_vm1 = vmmov %vm9829_vm5  ;;  %v5849_v59 = vld [vmem:[#allocation2 + $0x1d8] sm:$0xf0]  ;;  %v6062_v33 = vld [vmem:[#allocation2 + $0x16c] sm:$0xf] }
 0x82a   : > { %vm9831_vm9 = vmmov %vm9830_vm1  ;;  %v5833_v48 = vld [vmem:[#allocation2 + $0x1b8] sm:$0xf0] }
 0x82b   : > { %v4306_v28 = vpack.c.bf16 %v4302_v11, %v4301_v57  ;;  %3978 = vst [vmem:[#allocation2 + $0x18] sm:$0xff] %v3974_v25  ;;  %vm9832_vm0 = vmmov %vm9830_vm1 }
 0x82c   : > { %v5623_v44 = vld [vmem:[#allocation2 + $0x8] sm:$0xf]  ;;  %v6018_v36 = vld [vmem:[#allocation2 + $0xc] sm:$0xf] }
 0x82d   : > { %4310 = vst [vmem:[#allocation2 + $0x238] sm:$0xff] %v4306_v28  ;;  %v4278_v32 = vpop.permute.xlu1 %4277 }
 0x82e   : > { %v4283_v23 = vsel %vm9827_vm12, %v9383_v41, %v4278_v32  ;;  %v4287_v17 = vsel %vm9828_vm8, %v4278_v32, %v9383_v41 }
 0x82f   : > { %v4299_v30 = vmul.f32 %v4291_v38, %v4283_v23  ;;  %v4300_v40 = vmul.f32 %v4292_v49, %v4287_v17  ;;  %v4266_v31 = vpop.permute.xlu0 %4265  ;;  %v6070_v17 = vld [vmem:[#allocation2 + $0x1ac] sm:$0xf] }
 0x830   : > { %v4281_v4 = vsel %vm9829_vm5, %v4266_v31, %v9424_v34  ;;  %v4285_v27 = vsel %vm9830_vm1, %v9424_v34, %v4266_v31  ;;  %4957 = vmatmul.bf16.gmra.mxu3 %v9037_v52  ;;  %v6074_v34 = vld [vmem:[#allocation2 + $0x1cc] sm:$0xf] }
 0x831   : > { %v4305_v12 = vpack.c.bf16 %v4300_v40, %v4299_v30  ;;  %v4295_v5 = vmul.f32 %v4291_v38, %v4281_v4  ;;  %v4296_v22 = vmul.f32 %v4292_v49, %v4285_v27  ;;  %v5852_v7 = vor.u32 %v6074_v34, %v5849_v59  ;;  %v4863_v30 = vpop.f32.mrf.mxu1  ;;  %v5817_v4 = vld [vmem:[#allocation2 + $0x198] sm:$0xf0] }
 0x832   : > { %v6020_v14 = vld [vmem:[#allocation2 + $0x14] sm:$0xf0]  ;;  %v5625_v6 = vld [vmem:[#allocation2 + $0x18] sm:$0xf0] }
 0x833   : > { %4309 = vst [vmem:[#allocation2 + $0x228] sm:$0xff] %v4305_v12  ;;  %v4303_v41 = vpack.c.bf16 %v4296_v22, %v4295_v5  ;;  %v5624_v58 = vor.u32 %v6020_v14, %v5623_v44  ;;  %v9487_v63 = vor.u32 %v6018_v36, %v5625_v6  ;;  %v6066_v36 = vld [vmem:[#allocation2 + $0x18c] sm:$0xf] }
 0x834   : > { %v6088_v51 = vld [vmem:[#allocation2 + $0x234] sm:$0xf0]  ;;  %v5897_v11 = vld [vmem:[#allocation2 + $0x238] sm:$0xf0] }
 0x835   : > { %4307 = vst [vmem:[#allocation2 + $0x208] sm:$0xff] %v4303_v41  ;;  %v4268_v9 = vpop.permute.xlu1 %4267  ;;  %4932 = vmatpush.bf16.msra.mxu1 %v5624_v58  ;;  %4989 = vmatpush.bf16.msrb.mxu0 %v9487_v63  ;;  %v5820_v41 = vor.u32 %v6066_v36, %v5817_v4  ;;  %v6054_v4 = vld [vmem:[#allocation2 + $0x12c] sm:$0xf] }
 0x837   : > { %v4276_v61 = vpop.permute.xlu0 %4275 }
 0x838   : > { %v4282_v15 = vsel %vm9831_vm9, %v4268_v9, %v4276_v61  ;;  %v4286_v13 = vsel %vm9832_vm0, %v4276_v61, %v4268_v9  ;;  %4933 = vmatmul.bf16.vlgmr.msra.gmra.mxu1 %v8990_v39  ;;  %4990 = vmatmul.bf16.vlgmr.msrb.gmra.mxu0 %v8990_v39  ;;  %v5836_v39 = vor.u32 %v6070_v17, %v5833_v48  ;;  %v5043_v9 = vld [vmem:[%s6610_s25 + $0x20] sm:$0xff]  ;;  %v5046_v17 = vld [vmem:[%s6610_s25 + $0x38] sm:$0xff] }
 0x839   : > { %5001 = vmatpush.bf16.msrb.mxu1 %v5868_v46  ;;  %v4297_v3 = vmul.f32 %v4291_v38, %v4282_v15  ;;  %v4298_v62 = vmul.f32 %v4292_v49, %v4286_v13  ;;  %v4920_v49 = vpop.f32.mrf.mxu0 }
 0x83a   : > { %v5895_v25 = vld [vmem:[#allocation2 + $0x228] sm:$0xf]  ;;  %v6086_v57 = vld [vmem:[#allocation2 + $0x22c] sm:$0xf] }
 0x83b   : > { %v4304_v28 = vpack.c.bf16 %v4298_v62, %v4297_v3  ;;  %v5896_v32 = vor.u32 %v6088_v51, %v5895_v25  ;;  %v5900_v23 = vor.u32 %v6086_v57, %v5897_v11  ;;  %v4865_v11 = vpop.f32.mrf.mxu1 }
 0x83c   : > { %v5879_v46 = vld [vmem:[#allocation2 + $0x208] sm:$0xf] }
 0x83d   : > { %5002 = vmatpush.bf16.msrb.mxu1 %v5852_v7  ;;  %4308 = vst [vmem:[#allocation2 + $0x218] sm:$0xff] %v4304_v28  ;;  %v9496_v38 = vpop.permute.xlu1 %4397  ;;  %4969 = vmatpush.bf16.msrb.mxu2 %v5896_v32  ;;  %v5785_v32 = vld [vmem:[#allocation2 + $0x158] sm:$0xf0] }
 0x83e   : > { %5026 = vmatpush.bf16.msrb.mxu3 %v5900_v23  ;;  %v4821_v40 = vadd.f32 %v9333_v24, %v9496_v38  ;;  %v4878_v31 = vadd.f32 %v9414_v21, %v9496_v38  ;;  %v5039_v24 = vld [vmem:[%s6610_s25] sm:$0xff] }
 0x83f   : > { %v9502_v27 = vpop.permute.xlu0 %4407 }
 0x840   : > { %v4840_v12 = vadd.f32 %v9341_v56, %v4821_v40  ;;  %v4897_v5 = vadd.f32 %v9416_v1, %v4878_v31  ;;  %v4826_v22 = vadd.f32 %v9364_v54, %v9502_v27  ;;  %v4883_v44 = vadd.f32 %v4882_v19, %v9502_v27  ;;  %v5801_v56 = vld [vmem:[#allocation2 + $0x178] sm:$0xf0]  ;;  %v5044_v1 = vld [vmem:[%s6610_s25 + $0x28] sm:$0xff]  ;;  %v4884_v54 = vpop.f32.mrf.mxu3  ;;  %v4903_v19 = vpop.f32.mrf.mxu2 }
 0x841   : > { %5003 = vmatpush.bf16.msrb.mxu1 %v5836_v39  ;;  %v5804_v7 = vor.u32 %v6062_v33, %v5801_v56  ;;  %v4922_v28 = vpop.f32.mrf.mxu0  ;;  %v5911_v33 = vld [vmem:[%s6610_s25 + $0x50] sm:$0xff] }
 0x842   : > { %v4859_v21 = vadd.f32 %v9422_v35, %v4840_v12  ;;  %v4916_v14 = vadd.f32 %v9428_v47, %v4897_v5  ;;  %v4902_v6 = vadd.f32 %v4901_v8, %v4883_v44  ;;  %v4845_v58 = vadd.f32 %v9368_v55, %v4826_v22  ;;  %v6082_v35 = vld [vmem:[#allocation2 + $0x20c] sm:$0xf]  ;;  %v5753_v5 = vld [vmem:[#allocation2 + $0x118] sm:$0xf0] }
 0x843   : > { %v6050_v22 = vld [vmem:[#allocation2 + $0x10c] sm:$0xf] }
 0x844   : > { %v5047_v34 = vadd.f32 %v5039_v24, %v4859_v21  ;;  %v5048_v61 = vadd.f32 %v5040_v53, %v4916_v14  ;;  %v4864_v15 = vadd.f32 %v4863_v30, %v4845_v58  ;;  %v4921_v13 = vadd.f32 %v4920_v49, %v4902_v6  ;;  %v6084_v59 = vld [vmem:[#allocation2 + $0x214] sm:$0xf0]  ;;  %v5881_v3 = vld [vmem:[#allocation2 + $0x218] sm:$0xf0]  ;;  %v6058_v30 = vld [vmem:[#allocation2 + $0x14c] sm:$0xf] }
 0x845   : > { %5004 = vmatpush.bf16.msrb.mxu1 %v5820_v41  ;;  %v9516_v47 = vpop.permute.xlu1 %4412  ;;  %v5880_v55 = vor.u32 %v6084_v59, %v5879_v46  ;;  %v5884_v62 = vor.u32 %v6082_v35, %v5881_v3  ;;  %v5788_v40 = vor.u32 %v6058_v30, %v5785_v32  ;;  %v5756_v44 = vor.u32 %v6050_v22, %v5753_v5  ;;  %v5913_v3 = vld [vmem:[%s6610_s25 + $0x60] sm:$0xff]  ;;  %v5915_v32 = vld [vmem:[%s6610_s25 + $0x70] sm:$0xff]  ;;  %v5916_v22 = vld [vmem:[%s6610_s25 + $0x78] sm:$0xff] }
 0x846   : > { %5055 = vst [vmem:[%s9470_s29] sm:$0xff] %v5047_v34  ;;  %v5051_v51 = vadd.f32 %v5043_v9, %v4864_v15  ;;  %v5052_v48 = vadd.f32 %v5044_v1, %v4921_v13  ;;  %v4828_v25 = vadd.f32 %v9394_v16, %v9516_v47  ;;  %v4885_v57 = vadd.f32 %v4884_v54, %v9516_v47  ;;  %v5045_v16 = vld [vmem:[%s6610_s25 + $0x30] sm:$0xff]  ;;  %v5910_v34 = vld [vmem:[%s6610_s25 + $0x48] sm:$0xff] }
 0x847   : > { %5056 = vst [vmem:[%s9470_s29 + $0x8] sm:$0xff] %v5048_v61  ;;  %4970 = vmatpush.bf16.msrb.mxu2 %v5880_v55  ;;  %5027 = vmatpush.bf16.msrb.mxu3 %v5884_v62 }
 0x848   : > { %5059 = vst [vmem:[%s9470_s29 + $0x20] sm:$0xff] %v5051_v51  ;;  %v4904_v23 = vadd.f32 %v4903_v19, %v4885_v57  ;;  %v4847_v8 = vadd.f32 %v9404_v45, %v4828_v25  ;;  %4938 = vmatmul.bf16.gmra.mxu1 %v9021_v10  ;;  %v5912_v25 = vld [vmem:[%s6610_s25 + $0x58] sm:$0xff] }
 0x849   : > { %5005 = vmatpush.bf16.msrb.mxu1 %v5804_v7  ;;  %5060 = vst [vmem:[%s9470_s29 + $0x28] sm:$0xff] %v5052_v48 }
 0x84a   : > { %5905 = vmatmul.msk.bf16.vlgmr.msrb.gmra.mxu2 %vm9833_vm2, %v9059_v0  ;;  %v4866_v39 = vadd.f32 %v4865_v11, %v4847_v8  ;;  %v4923_v49 = vadd.f32 %v4922_v28, %v4904_v23  ;;  %5907 = vmatmul.msk.bf16.vlgmr.msrb.gmra.mxu3 %vm9834_vm11, %v9059_v0 }
 0x84b   : > { %6091 = vmatpush.bf16.msra.mxu2 %v9182_v20  ;;  %v5769_v20 = vld [vmem:[#allocation2 + $0x138] sm:$0xf0] }
 0x84c   : > { %v5053_v31 = vadd.f32 %v5045_v16, %v4866_v39  ;;  %v5054_v45 = vadd.f32 %v5046_v17, %v4923_v49  ;;  %v5772_v12 = vor.u32 %v6054_v4, %v5769_v20 }
 0x84d   : > { %5006 = vmatpush.bf16.msrb.mxu1 %v5788_v40  ;;  %v5914_v40 = vld [vmem:[%s6610_s25 + $0x68] sm:$0xff] }
 0x84e   : > { %5061 = vst [vmem:[%s9470_s29 + $0x30] sm:$0xff] %v5053_v31 }
 0x84f   : > { %6092 = vmatpush.bf16.msra.mxu2 %v9228_v43  ;;  %5062 = vst [vmem:[%s9470_s29 + $0x38] sm:$0xff] %v5054_v45 }
 0x851   : > { %5007 = vmatpush.bf16.msrb.mxu1 %v5772_v12 }
 0x853   : > { %6093 = vmatpush.bf16.msra.mxu2 %v9284_v50 }
 0x855   : > { %5008 = vmatpush.bf16.msrb.mxu1 %v5756_v44 }
 0x857   : > { %6094 = vmatpush.bf16.msra.mxu2 %v9343_v26 }
 0x858   : > { %5009 = vmatmul.bf16.vlgmr.msrb.gmra.mxu1 %v9006_v18 }
 0x85a   : > { %5906 = vmatmul.msk.bf16.gmra.mxu2 %vm9835_vm14, %v9148_v42  ;;  %5908 = vmatmul.msk.bf16.gmra.mxu3 %vm9836_vm4, %v9148_v42 }
 0x85b   : > { %6095 = vmatpush.bf16.msra.mxu2 %v9366_v37 }
 0x85f   : > { %6096 = vmatpush.bf16.msra.mxu2 %v9430_v2 }
 0x863   : > { %6097 = vmatpush.bf16.msra.mxu2 %v9451_v29  ;;  %v5909_v29 = vld [vmem:[%s6610_s25 + $0x40] sm:$0xff] }
 0x867   : > { %6098 = vmatpush.bf16.msra.mxu2 %v9487_v63 }
 0x868   : > { %5014 = vmatmul.bf16.gmra.mxu1 %v9037_v52 }
 0x86a   : > { %4995 = vmatmul.bf16.vlgmr.msra.gmra.mxu2 %v9021_v10 }
 0x8a3   : > { %v4953_v0 = vpop.f32.mrf.mxu3 }
 0x8ab   : > { %v4955_v43 = vpop.f32.mrf.mxu3 }
 0x8b3   : > { %v4958_v26 = vpop.f32.mrf.mxu3 }
 0x8b5   : > { %v4934_v18 = vpop.f32.mrf.mxu1  ;;  %v4991_v52 = vpop.f32.mrf.mxu0 }
 0x8b6   : > { %v4935_v42 = vadd.f32 %v4934_v18, %v9496_v38  ;;  %v4992_v6 = vadd.f32 %v4991_v52, %v9496_v38 }
 0x8b8   : > { %v4954_v2 = vadd.f32 %v4953_v0, %v4935_v42 }
 0x8bb   : > { %v4960_v36 = vpop.f32.mrf.mxu3 }
 0x8bd   : > { %v4936_v50 = vpop.f32.mrf.mxu1  ;;  %v4993_v15 = vpop.f32.mrf.mxu0 }
 0x8be   : > { %v4937_v10 = vadd.f32 %v4936_v50, %v9438_v60  ;;  %v4994_v38 = vadd.f32 %v4993_v15, %v9438_v60 }
 0x8c0   : > { %v4956_v21 = vadd.f32 %v4955_v43, %v4937_v10 }
 0x8c5   : > { %v4939_v37 = vpop.f32.mrf.mxu1 }
 0x8c6   : > { %v4940_v54 = vadd.f32 %v4939_v37, %v9502_v27 }
 0x8c8   : > { %v4959_v59 = vadd.f32 %v4958_v26, %v4940_v54 }
 0x8cd   : > { %v4972_v24 = vpop.f32.mrf.mxu2  ;;  %v4941_v63 = vpop.f32.mrf.mxu1 }
 0x8ce   : > { %v4973_v53 = vadd.f32 %v4972_v24, %v4954_v2  ;;  %v5029_v14 = vpop.f32.mrf.mxu3  ;;  %v4942_v51 = vadd.f32 %v4941_v63, %v9516_v47 }
 0x8d0   : > { %v5071_v41 = vadd.f32 %v5909_v29, %v4973_v53  ;;  %v4961_v28 = vadd.f32 %v4960_v36, %v4942_v51 }
 0x8d2   : > { %5917 = vst [vmem:[%s9470_s29 + $0x40] sm:$0xff] %v5071_v41 }
 0x8d5   : > { %v4974_v58 = vpop.f32.mrf.mxu2  ;;  %v5010_v9 = vpop.f32.mrf.mxu1 }
 0x8d6   : > { %v4975_v56 = vadd.f32 %v4974_v58, %v4956_v21  ;;  %v5011_v1 = vadd.f32 %v5010_v9, %v4992_v6  ;;  %v5031_v7 = vpop.f32.mrf.mxu3 }
 0x8d8   : > { %v5073_v46 = vadd.f32 %v5911_v33, %v4975_v56  ;;  %v5030_v61 = vadd.f32 %v5029_v14, %v5011_v1 }
 0x8da   : > { %5919 = vst [vmem:[%s9470_s29 + $0x50] sm:$0xff] %v5073_v46  ;;  %v5072_v13 = vadd.f32 %v5910_v34, %v5030_v61 }
 0x8dc   : > { %5918 = vst [vmem:[%s9470_s29 + $0x48] sm:$0xff] %v5072_v13 }
 0x8dd   : > { %v4977_v35 = vpop.f32.mrf.mxu2  ;;  %v5012_v62 = vpop.f32.mrf.mxu1 }
 0x8de   : > { %v4978_v55 = vadd.f32 %v4977_v35, %v4959_v59  ;;  %v5013_v19 = vadd.f32 %v5012_v62, %v4994_v38  ;;  %v5034_v39 = vpop.f32.mrf.mxu3 }
 0x8e0   : > { %v5075_v48 = vadd.f32 %v5913_v3, %v4978_v55  ;;  %v5032_v57 = vadd.f32 %v5031_v7, %v5013_v19 }
 0x8e2   : > { %5921 = vst [vmem:[%s9470_s29 + $0x60] sm:$0xff] %v5075_v48  ;;  %v5074_v11 = vadd.f32 %v5912_v25, %v5032_v57 }
 0x8e4   : > { %5920 = vst [vmem:[%s9470_s29 + $0x58] sm:$0xff] %v5074_v11 }
 0x8e5   : > { %v4979_v60 = vpop.f32.mrf.mxu2  ;;  %v5015_v17 = vpop.f32.mrf.mxu1 }
 0x8e6   : > { %v4980_v23 = vadd.f32 %v4979_v60, %v4961_v28 }
 0x8e8   : > { %v5077_v8 = vadd.f32 %v5915_v32, %v4980_v23 }
 0x8ea   : > { %5923 = vst [vmem:[%s9470_s29 + $0x70] sm:$0xff] %v5077_v8 }
 0x8ed   : > { %v4996_v16 = vpop.f32.mrf.mxu2  ;;  %v5017_v12 = vpop.f32.mrf.mxu1 }
 0x8ee   : > { %v4997_v30 = vadd.f32 %v4996_v16, %v9502_v27  ;;  %v5036_v27 = vpop.f32.mrf.mxu3 }
 0x8f0   : > { %v5016_v49 = vadd.f32 %v5015_v17, %v4997_v30 }
 0x8f2   : > { %v5035_v20 = vadd.f32 %v5034_v39, %v5016_v49 }
 0x8f4   : > { %v5076_v31 = vadd.f32 %v5914_v40, %v5035_v20 }
 0x8f5   : > { %v4998_v45 = vpop.f32.mrf.mxu2 }
 0x8f6   : > { %5922 = vst [vmem:[%s9470_s29 + $0x68] sm:$0xff] %v5076_v31  ;;  %v4999_v4 = vadd.f32 %v4998_v45, %v9516_v47 }
 0x8f8   : > { %v5018_v5 = vadd.f32 %v5017_v12, %v4999_v4 }
 0x8fa   : > { %v5037_v44 = vadd.f32 %v5036_v27, %v5018_v5 }
 0x8fc   : > { %v5078_v0 = vadd.f32 %v5916_v22, %v5037_v44 }
 0x8fe   : > { %5924 = vst [vmem:[%s9470_s29 + $0x78] sm:$0xff] %v5078_v0 }
 0x8ff   : > { %6385 = shalt.err (!%p6382_p7)
}
 0x900   : > { %s6437_s14 = smov 256  }
 0x901   : > { %6101 = dma.vmem_to_hbm [thread:$0]  (%p6568_p11), %s5103_s28, 2048, %s5105_s20, %s5089_s13, %s6437_s14, %s6437_s14, %s9787_s0  }
 0x902 PF: > { %s9839_s29 = sld [smem:[#allocation9_spill]]  ;;  %p9841_p5 = scmp.ge.s32.totalorder %s6424_s21, 2 }
 0x904   : > { %p6108_p8 = pnand %p9841_p5, %p6572_p12 }
 0x906   : > { %p6109_p10 = pneg %p6108_p8 }
 0x908   : > { %s5119_s17 = sand.u32 1, %s9839_s29  }
 0x909   : > { %s5120_s24 = scalar_lea.sflag [#allocation5], %s5119_s17 }
 0x90a   : > { %6407 = dma.done.wait (%p6109_p10), %s5120_s24, 2048  }
 0x90b   : > { %6409 = vsyncadd (%p6109_p10), %s5120_s24, 4294965248  ;;  %s9842_s21 = sld [smem:[#allocation11_spill]]  ;;  %s9845_s18 = smov %s6416_s19 }
 0x90c   : > { %s9843_s15 = sld [smem:[#allocation10_spill]] }
 0x90d   : > { %s9844_s20 = sld [smem:[#allocation12_spill]] }
 0x911   : > { %p28_p2 = scmp.ge.s32.totalorder %s9842_s21, 4  }
 0x912   : > { %s9846_s19 = smov %s9843_s15 }
 0x913   :  { %30 = sbr.rel (!%p28_p2) target bundleno = 10 (0xa), region = 138 }
 0x918   :  { %5126 = vsyncpa [#allocation4], 1 }
 0x919   :  { %5128 = vsyncpa [#allocation4 + $0x1], 1 }
 0x91a   :  { %5129 = vsyncpa [#allocation5], 1 }
 0x91b   :  { %5131 = vsyncpa [#allocation5 + $0x1], 1 }

</bundles_post_ra>
